<compile_context>
chip_gen: v7x
topology: tpu7x:2x2x1
jax: 0.10.0
libtpu: 0.0.40
codegen_flags: <defaults>
</compile_context>

<pallas_src>
import functools
import math

import jax
import jax.numpy as jnp
from jax import lax
from jax.experimental import pallas as pl
from jax.experimental.pallas import tpu as pltpu


# ----------------------------------------------------------------------------
# Fused kernel: conv3x3+ReLU -> conv3x3+ReLU -> fused {mu, softplus(sigma)}
#               1x1 heads -> z = mu + sigma * noise   (one row tile per step)
# ----------------------------------------------------------------------------
def _sample_z_kernel(xp_ref, noise_ref, w1_ref, b1_ref, w2_ref, b2_ref,
                     wh_ref, bh_ref, out_ref, h1_ref, col_ref,
                     *, H, W, TH, Cin, z_dim):
    f32 = jnp.float32
    bf16 = jnp.bfloat16
    t = pl.program_id(1)
    r0 = pl.multiple_of(t * TH, TH)          # first output row of this tile
    m1 = (TH + 2) * W                        # conv1 rows (one halo row each side)
    m2 = TH * W                              # conv2 / output rows

    # ---- conv1 (3x3 'same' + ReLU): im2col -> ONE K=9*Cin MXU matmul ----------
    # xp is the bf16 input zero-padded by (2 rows, 1 col); the 9 taps are staged
    # into the bf16 im2col scratch so the tap reduction is a single matmul.
    for ky in range(3):
        for kx in range(3):
            k = 3 * ky + kx
            tap = xp_ref[pl.ds(r0 + ky, TH + 2), kx:kx + W, :]
            col_ref[:, k * Cin:(k + 1) * Cin] = tap.reshape(m1, Cin)
    acc1 = jnp.dot(col_ref[...], w1_ref[...], preferred_element_type=f32)
    h1 = jnp.maximum(acc1 + b1_ref[...], 0.0).astype(bf16)
    h1 = h1.reshape(TH + 2, W, Cin)

    # Stage h1 (bf16) with zero halo columns = conv2's 'same' W padding.
    h1_ref[:, 1:W + 1, :] = h1
    zcol = jnp.zeros((TH + 2, 1, Cin), bf16)
    h1_ref[:, 0:1, :] = zcol
    h1_ref[:, W + 1:W + 2, :] = zcol

    # Halo rows lying outside [0, H) are conv2's zero 'same' padding.  Only the
    # first row of the first tile / last row of the last tile are affected, so
    # zero-write just those two rows under pl.when (no full-tile select).
    zrow = jnp.zeros((1, W + 2, Cin), bf16)

    @pl.when(t == 0)
    def _():
        h1_ref[0:1, :, :] = zrow

    @pl.when(t == pl.num_programs(1) - 1)
    def _():
        h1_ref[TH + 1:TH + 2, :, :] = zrow

    # ---- conv2 (3x3 'same' + ReLU): im2col -> ONE K=9*Cin MXU matmul ----------
    for ky in range(3):
        for kx in range(3):
            k = 3 * ky + kx
            tap = h1_ref[ky:ky + TH, kx:kx + W, :]
            col_ref[0:m2, k * Cin:(k + 1) * Cin] = tap.reshape(m2, Cin)
    acc2 = jnp.dot(col_ref[0:m2, :], w2_ref[...], preferred_element_type=f32)
    h2 = jnp.maximum(acc2 + b2_ref[...], 0.0).astype(bf16)       # (m2, Cin) bf16

    # ---- fused 1x1 heads (mu ++ sigma_pre) --------------------------------------
    # (2*z_dim, Cin) . (m2, Cin)^T via dot_general contracting the channel axis:
    # no explicit transpose of h2, result is lane-dense (spatial on lanes).
    heads = lax.dot_general(wh_ref[...], h2,
                            dimension_numbers=(((1,), (1,)), ((), ())),
                            preferred_element_type=f32) + bh_ref[...]
    mu = heads[0:z_dim, :]
    sp = heads[z_dim:2 * z_dim, :]
    # numerically-stable softplus (matches nn.Softplus at these magnitudes)
    sigma = jnp.maximum(sp, 0.0) + jnp.log(1.0 + jnp.exp(-jnp.abs(sp)))

    # ---- reparameterised sample; mu/sigma/z packed into ONE output tile --------
    out_ref[0:z_dim, :] = mu
    out_ref[z_dim:2 * z_dim, :] = sigma
    out_ref[2 * z_dim:3 * z_dim, :] = mu + sigma * noise_ref[...]


# ----------------------------------------------------------------------------
# Wrapper
# ----------------------------------------------------------------------------
def _pick_row_block(H, W, target_m=4096, min_tiles=1):
    """Largest row tile TH such that TH divides H, the flattened tile TH*W is a
    multiple of 128 lanes, TH*W <= target_m, and (if possible) there are at
    least `min_tiles` row tiles (so a batch-1 call still has >=2 parallel grid
    steps for v7x megacore)."""
    legal = [th for th in range(1, H + 1) if H % th == 0 and (th * W) % 128 == 0]
    if not legal:
        return H                       # whole image (lane-masked stores; rare)
    pref = [th for th in legal if th * W <= target_m and H // th >= min_tiles]
    if pref:
        return max(pref)
    small = [th for th in legal if th * W <= target_m]
    return max(small) if small else min(legal)


def init_sample_z_params(key, input_dim, z_dim=2):
    """Deterministic parameters matching SampleZBlock(input_dim, z_dim0=2, depth=2)."""
    def conv(k, kh, kw, cin, cout):
        kw_, kb_ = jax.random.split(k)
        w = jax.random.normal(kw_, (kh, kw, cin, cout), jnp.float32)
        w = w / math.sqrt(kh * kw * cin)
        b = 0.01 * jax.random.normal(kb_, (cout,), jnp.float32)
        return w, b

    k1, k2, k3, k4 = jax.random.split(key, 4)
    w1, b1 = conv(k1, 3, 3, input_dim, input_dim)
    w2, b2 = conv(k2, 3, 3, input_dim, input_dim)
    wmu, bmu = conv(k3, 1, 1, input_dim, z_dim)
    wsg, bsg = conv(k4, 1, 1, input_dim, z_dim)
    return {"w1": w1, "b1": b1, "w2": w2, "b2": b2,
            "w_mu": wmu.reshape(input_dim, z_dim), "b_mu": bmu,
            "w_sigma": wsg.reshape(input_dim, z_dim), "b_sigma": bsg}


def sample_z_block_forward(params, x_nchw, noise_nchw, *, row_block=None):
    """Fused Pallas forward of SampleZBlock.  Returns (mu, sigma, z) in NCHW."""
    N, Cin, H, W = x_nchw.shape
    z_dim = params["b_mu"].shape[0]
    if row_block is None:
        TH = _pick_row_block(H, W, min_tiles=(2 if N == 1 else 1))
    else:
        TH = row_block
    assert H % TH == 0
    GH = H // TH

    f32 = jnp.float32
    bf16 = jnp.bfloat16

    # NCHW -> NHWC + halo zero-padding (2 rows / 1 col) for the two fused 3x3
    # convs; cast the MXU operand to bf16 (f32 accumulation in-kernel).
    # TODO(synk): at production image sizes this transpose+pad should be fused
    # upstream (or the kernel fed NHWC directly) to avoid an extra HBM pass.
    x = jnp.transpose(x_nchw, (0, 2, 3, 1)).astype(bf16)
    xp = jnp.pad(x, ((0, 0), (2, 2), (1, 1), (0, 0)))

    w1 = params["w1"].reshape(9 * Cin, Cin).astype(bf16)      # im2col weights (K=9*Cin)
    w2 = params["w2"].reshape(9 * Cin, Cin).astype(bf16)
    b1 = params["b1"].reshape(1, Cin).astype(f32)
    b2 = params["b2"].reshape(1, Cin).astype(f32)
    wh = jnp.concatenate([params["w_mu"].T, params["w_sigma"].T], 0).astype(bf16)
    bh = jnp.concatenate([params["b_mu"], params["b_sigma"]],
                         0).reshape(2 * z_dim, 1).astype(f32)
    noise = noise_nchw.reshape(N, z_dim, H * W).astype(f32)

    kernel = functools.partial(_sample_z_kernel, H=H, W=W, TH=TH, Cin=Cin,
                               z_dim=z_dim)

    def tile_spec(rows):
        return pl.BlockSpec((None, rows, TH * W), lambda n, t: (n, 0, t))

    def const_spec(shape):
        return pl.BlockSpec(shape, lambda n, t, _r=len(shape): (0,) * _r)

    out = pl.pallas_call(
        kernel,
        out_shape=jax.ShapeDtypeStruct((N, 3 * z_dim, H * W), f32),
        grid=(N, GH),
        in_specs=[
            # full padded image per batch element (resident across row tiles)
            pl.BlockSpec((None, H + 4, W + 2, Cin), lambda n, t: (n, 0, 0, 0)),
            tile_spec(z_dim),                                       # noise tile
            const_spec((9 * Cin, Cin)), const_spec((1, Cin)),       # conv1 w, b
            const_spec((9 * Cin, Cin)), const_spec((1, Cin)),       # conv2 w, b
            const_spec((2 * z_dim, Cin)), const_spec((2 * z_dim, 1)),  # fused heads
        ],
        out_specs=tile_spec(3 * z_dim),
        scratch_shapes=[
            pltpu.VMEM((TH + 2, W + 2, Cin), bf16),        # staged conv1 output (bf16)
            pltpu.VMEM(((TH + 2) * W, 9 * Cin), bf16),     # shared im2col buffer
        ],
        compiler_params=pltpu.CompilerParams(
            dimension_semantics=("parallel", "parallel"),
            vmem_limit_bytes=32 * 1024 * 1024),
    )(xp, noise, w1, b1, w2, b2, wh, bh)

    shp = (N, z_dim, H, W)
    mu = out[:, 0:z_dim].reshape(shp)
    sigma = out[:, z_dim:2 * z_dim].reshape(shp)
    z = out[:, 2 * z_dim:3 * z_dim].reshape(shp)
    return mu, sigma, z


# ----------------------------------------------------------------------------
# Pure-JAX reference (inputs rounded to bf16 like the kernel's MXU operands,
# all accumulation in f32) -- used only for the correctness check.
# ----------------------------------------------------------------------------
def sample_z_block_reference(params, x_nchw, noise_nchw):
    f32 = jnp.float32
    rb = lambda a: a.astype(jnp.bfloat16).astype(f32)
    dn = ("NHWC", "HWIO", "NHWC")
    hp = lax.Precision.HIGHEST

    x = rb(jnp.transpose(x_nchw, (0, 2, 3, 1)))
    h = lax.conv_general_dilated(x, rb(params["w1"]), (1, 1), "SAME",
                                 dimension_numbers=dn, precision=hp)
    h = rb(jnp.maximum(h + params["b1"], 0.0))
    h = lax.conv_general_dilated(h, rb(params["w2"]), (1, 1), "SAME",
                                 dimension_numbers=dn, precision=hp)
    h = rb(jnp.maximum(h + params["b2"], 0.0))
    mu = jnp.einsum("nhwc,cz->nhwz", h, rb(params["w_mu"]),
                    precision=hp) + params["b_mu"]
    sp = jnp.einsum("nhwc,cz->nhwz", h, rb(params["w_sigma"]),
                    precision=hp) + params["b_sigma"]
    sigma = jax.nn.softplus(sp)
    mu = jnp.transpose(mu, (0, 3, 1, 2))
    sigma = jnp.transpose(sigma, (0, 3, 1, 2))
    z = mu + sigma * noise_nchw
    return mu, sigma, z


# ----------------------------------------------------------------------------
# Main
# ----------------------------------------------------------------------------
if __name__ == "__main__":
    key = jax.random.PRNGKey(0)
    input_dim, z_dim = 32, 2          # SampleZBlock(input_dim=32, z_dim0=2, depth=2)
    batch, H, W = 2, 16, 16

    kp, kx, kn = jax.random.split(key, 3)
    params = init_sample_z_params(kp, input_dim, z_dim)
    x = jax.random.normal(kx, (batch, input_dim, H, W), jnp.float32)
    noise = jax.random.normal(kn, (batch, z_dim, H, W), jnp.float32)  # ~ randn_like

    # Default (whole-image) row tile, plus an explicit smaller row tile to
    # exercise the multi-tile halo / pl.when edge-row path.
    outs = sample_z_block_forward(params, x, noise)
    outs_tiled = sample_z_block_forward(params, x, noise, row_block=8)
    jax.block_until_ready((outs, outs_tiled))

    ref = sample_z_block_reference(params, x, noise)
    for got, got_t, want, name in zip(outs, outs_tiled, ref, ("mu", "sigma", "z")):
        assert got.shape == (batch, z_dim, H, W), name
        assert bool(jnp.all(jnp.isfinite(got))), name
        assert bool(jnp.allclose(got, want, rtol=2e-2, atol=2e-2)), name
        assert bool(jnp.allclose(got_t, want, rtol=2e-2, atol=2e-2)), name
    assert bool(jnp.all(outs[1] > 0.0))           # softplus -> sigma > 0

    print("KERNEL_OK")
</pallas_src>

<mosaic_0001>
module attributes {stable_mosaic.version = 11 : i64} {
  func.func @_sample_z_kernel(%arg0: i32, %arg1: i32, %arg2: memref<1x20x18x32xbf16, #tpu.memory_space<vmem>>, %arg3: memref<1x2x256xf32, #tpu.memory_space<vmem>>, %arg4: memref<288x32xbf16, #tpu.memory_space<vmem>>, %arg5: memref<1x32xf32, #tpu.memory_space<vmem>>, %arg6: memref<288x32xbf16, #tpu.memory_space<vmem>>, %arg7: memref<1x32xf32, #tpu.memory_space<vmem>>, %arg8: memref<4x32xbf16, #tpu.memory_space<vmem>>, %arg9: memref<4x1xf32, #tpu.memory_space<vmem>>, %arg10: memref<1x6x256xf32, #tpu.memory_space<vmem>>, %arg11: memref<18x18x32xbf16, #tpu.memory_space<vmem>>, %arg12: memref<288x288xbf16, #tpu.memory_space<vmem>>) attributes {dimension_semantics = [#tpu.dimension_semantics<parallel>, #tpu.dimension_semantics<parallel>], iteration_bounds = array<i64: 2, 1>, scalar_prefetch = 0 : i64, scratch_operands = 2 : i64, tpu.core_type = #tpu.core_type<tc>, window_params = [{transform_indices = @transform_0, window_bounds = array<i64: 1, 20, 18, 32>}, {transform_indices = @transform_1, window_bounds = array<i64: 1, 2, 256>}, {pipeline_mode = #tpu.pipeline_mode<synchronous>, transform_indices = @transform_2, window_bounds = array<i64: 288, 32>}, {pipeline_mode = #tpu.pipeline_mode<synchronous>, transform_indices = @transform_3, window_bounds = array<i64: 1, 32>}, {pipeline_mode = #tpu.pipeline_mode<synchronous>, transform_indices = @transform_4, window_bounds = array<i64: 288, 32>}, {pipeline_mode = #tpu.pipeline_mode<synchronous>, transform_indices = @transform_5, window_bounds = array<i64: 1, 32>}, {pipeline_mode = #tpu.pipeline_mode<synchronous>, transform_indices = @transform_6, window_bounds = array<i64: 4, 32>}, {pipeline_mode = #tpu.pipeline_mode<synchronous>, transform_indices = @transform_7, window_bounds = array<i64: 4, 1>}, {transform_indices = @transform_8, window_bounds = array<i64: 1, 6, 256>}]} {
    %c16_i32 = arith.constant 16 : i32
    %0 = arith.muli %arg1, %c16_i32 : i32
    %1 = tpu.assume_multiple %0, 16 : i32
    %c0_i32 = arith.constant 0 : i32
    %2 = arith.addi %1, %c0_i32 : i32
    %c0 = arith.constant 0 : index
    %3 = arith.index_cast %2 : i32 to index
    %c0_0 = arith.constant 0 : index
    %c0_1 = arith.constant 0 : index
    %4 = vector.load %arg2[%c0, %3, %c0_0, %c0_1] : memref<1x20x18x32xbf16, #tpu.memory_space<vmem>>, vector<1x18x16x32xbf16>
    %5 = vector.shape_cast %4 : vector<1x18x16x32xbf16> to vector<18x16x32xbf16>
    %6 = vector.shape_cast %5 : vector<18x16x32xbf16> to vector<288x32xbf16>
    %c0_2 = arith.constant 0 : index
    %c0_3 = arith.constant 0 : index
    %7 = vector.load %arg12[%c0_2, %c0_3] : memref<288x288xbf16, #tpu.memory_space<vmem>>, vector<288x32xbf16>
    tpu.vector_store %arg12[%c0_2, %c0_3], %6 {strides = array<i32>} : memref<288x288xbf16, #tpu.memory_space<vmem>>, vector<288x32xbf16>,
    %c0_i32_4 = arith.constant 0 : i32
    %8 = arith.addi %1, %c0_i32_4 : i32
    %c0_5 = arith.constant 0 : index
    %9 = arith.index_cast %8 : i32 to index
    %c1 = arith.constant 1 : index
    %c0_6 = arith.constant 0 : index
    %10 = vector.load %arg2[%c0_5, %9, %c1, %c0_6] : memref<1x20x18x32xbf16, #tpu.memory_space<vmem>>, vector<1x18x16x32xbf16>
    %11 = vector.shape_cast %10 : vector<1x18x16x32xbf16> to vector<18x16x32xbf16>
    %12 = vector.shape_cast %11 : vector<18x16x32xbf16> to vector<288x32xbf16>
    %c0_7 = arith.constant 0 : index
    %c32 = arith.constant 32 : index
    %13 = vector.load %arg12[%c0_7, %c32] : memref<288x288xbf16, #tpu.memory_space<vmem>>, vector<288x32xbf16>
    tpu.vector_store %arg12[%c0_7, %c32], %12 {strides = array<i32>} : memref<288x288xbf16, #tpu.memory_space<vmem>>, vector<288x32xbf16>,
    %c0_i32_8 = arith.constant 0 : i32
    %14 = arith.addi %1, %c0_i32_8 : i32
    %c0_9 = arith.constant 0 : index
    %15 = arith.index_cast %14 : i32 to index
    %c2 = arith.constant 2 : index
    %c0_10 = arith.constant 0 : index
    %16 = vector.load %arg2[%c0_9, %15, %c2, %c0_10] : memref<1x20x18x32xbf16, #tpu.memory_space<vmem>>, vector<1x18x16x32xbf16>
    %17 = vector.shape_cast %16 : vector<1x18x16x32xbf16> to vector<18x16x32xbf16>
    %18 = vector.shape_cast %17 : vector<18x16x32xbf16> to vector<288x32xbf16>
    %c0_11 = arith.constant 0 : index
    %c64 = arith.constant 64 : index
    %19 = vector.load %arg12[%c0_11, %c64] : memref<288x288xbf16, #tpu.memory_space<vmem>>, vector<288x32xbf16>
    tpu.vector_store %arg12[%c0_11, %c64], %18 {strides = array<i32>} : memref<288x288xbf16, #tpu.memory_space<vmem>>, vector<288x32xbf16>,
    %c1_i32 = arith.constant 1 : i32
    %20 = arith.addi %1, %c1_i32 : i32
    %c0_12 = arith.constant 0 : index
    %21 = arith.index_cast %20 : i32 to index
    %c0_13 = arith.constant 0 : index
    %c0_14 = arith.constant 0 : index
    %22 = vector.load %arg2[%c0_12, %21, %c0_13, %c0_14] : memref<1x20x18x32xbf16, #tpu.memory_space<vmem>>, vector<1x18x16x32xbf16>
    %23 = vector.shape_cast %22 : vector<1x18x16x32xbf16> to vector<18x16x32xbf16>
    %24 = vector.shape_cast %23 : vector<18x16x32xbf16> to vector<288x32xbf16>
    %c0_15 = arith.constant 0 : index
    %c96 = arith.constant 96 : index
    %25 = vector.load %arg12[%c0_15, %c96] : memref<288x288xbf16, #tpu.memory_space<vmem>>, vector<288x32xbf16>
    tpu.vector_store %arg12[%c0_15, %c96], %24 {strides = array<i32>} : memref<288x288xbf16, #tpu.memory_space<vmem>>, vector<288x32xbf16>,
    %c1_i32_16 = arith.constant 1 : i32
    %26 = arith.addi %1, %c1_i32_16 : i32
    %c0_17 = arith.constant 0 : index
    %27 = arith.index_cast %26 : i32 to index
    %c1_18 = arith.constant 1 : index
    %c0_19 = arith.constant 0 : index
    %28 = vector.load %arg2[%c0_17, %27, %c1_18, %c0_19] : memref<1x20x18x32xbf16, #tpu.memory_space<vmem>>, vector<1x18x16x32xbf16>
    %29 = vector.shape_cast %28 : vector<1x18x16x32xbf16> to vector<18x16x32xbf16>
    %30 = vector.shape_cast %29 : vector<18x16x32xbf16> to vector<288x32xbf16>
    %c0_20 = arith.constant 0 : index
    %c128 = arith.constant 128 : index
    %31 = vector.load %arg12[%c0_20, %c128] : memref<288x288xbf16, #tpu.memory_space<vmem>>, vector<288x32xbf16>
    tpu.vector_store %arg12[%c0_20, %c128], %30 {strides = array<i32>} : memref<288x288xbf16, #tpu.memory_space<vmem>>, vector<288x32xbf16>,
    %c1_i32_21 = arith.constant 1 : i32
    %32 = arith.addi %1, %c1_i32_21 : i32
    %c0_22 = arith.constant 0 : index
    %33 = arith.index_cast %32 : i32 to index
    %c2_23 = arith.constant 2 : index
    %c0_24 = arith.constant 0 : index
    %34 = vector.load %arg2[%c0_22, %33, %c2_23, %c0_24] : memref<1x20x18x32xbf16, #tpu.memory_space<vmem>>, vector<1x18x16x32xbf16>
    %35 = vector.shape_cast %34 : vector<1x18x16x32xbf16> to vector<18x16x32xbf16>
    %36 = vector.shape_cast %35 : vector<18x16x32xbf16> to vector<288x32xbf16>
    %c0_25 = arith.constant 0 : index
    %c160 = arith.constant 160 : index
    %37 = vector.load %arg12[%c0_25, %c160] : memref<288x288xbf16, #tpu.memory_space<vmem>>, vector<288x32xbf16>
    tpu.vector_store %arg12[%c0_25, %c160], %36 {strides = array<i32>} : memref<288x288xbf16, #tpu.memory_space<vmem>>, vector<288x32xbf16>,
    %c2_i32 = arith.constant 2 : i32
    %38 = arith.addi %1, %c2_i32 : i32
    %c0_26 = arith.constant 0 : index
    %39 = arith.index_cast %38 : i32 to index
    %c0_27 = arith.constant 0 : index
    %c0_28 = arith.constant 0 : index
    %40 = vector.load %arg2[%c0_26, %39, %c0_27, %c0_28] : memref<1x20x18x32xbf16, #tpu.memory_space<vmem>>, vector<1x18x16x32xbf16>
    %41 = vector.shape_cast %40 : vector<1x18x16x32xbf16> to vector<18x16x32xbf16>
    %42 = vector.shape_cast %41 : vector<18x16x32xbf16> to vector<288x32xbf16>
    %c0_29 = arith.constant 0 : index
    %c192 = arith.constant 192 : index
    %43 = vector.load %arg12[%c0_29, %c192] : memref<288x288xbf16, #tpu.memory_space<vmem>>, vector<288x32xbf16>
    tpu.vector_store %arg12[%c0_29, %c192], %42 {strides = array<i32>} : memref<288x288xbf16, #tpu.memory_space<vmem>>, vector<288x32xbf16>,
    %c2_i32_30 = arith.constant 2 : i32
    %44 = arith.addi %1, %c2_i32_30 : i32
    %c0_31 = arith.constant 0 : index
    %45 = arith.index_cast %44 : i32 to index
    %c1_32 = arith.constant 1 : index
    %c0_33 = arith.constant 0 : index
    %46 = vector.load %arg2[%c0_31, %45, %c1_32, %c0_33] : memref<1x20x18x32xbf16, #tpu.memory_space<vmem>>, vector<1x18x16x32xbf16>
    %47 = vector.shape_cast %46 : vector<1x18x16x32xbf16> to vector<18x16x32xbf16>
    %48 = vector.shape_cast %47 : vector<18x16x32xbf16> to vector<288x32xbf16>
    %c0_34 = arith.constant 0 : index
    %c224 = arith.constant 224 : index
    %49 = vector.load %arg12[%c0_34, %c224] : memref<288x288xbf16, #tpu.memory_space<vmem>>, vector<288x32xbf16>
    tpu.vector_store %arg12[%c0_34, %c224], %48 {strides = array<i32>} : memref<288x288xbf16, #tpu.memory_space<vmem>>, vector<288x32xbf16>,
    %c2_i32_35 = arith.constant 2 : i32
    %50 = arith.addi %1, %c2_i32_35 : i32
    %c0_36 = arith.constant 0 : index
    %51 = arith.index_cast %50 : i32 to index
    %c2_37 = arith.constant 2 : index
    %c0_38 = arith.constant 0 : index
    %52 = vector.load %arg2[%c0_36, %51, %c2_37, %c0_38] : memref<1x20x18x32xbf16, #tpu.memory_space<vmem>>, vector<1x18x16x32xbf16>
    %53 = vector.shape_cast %52 : vector<1x18x16x32xbf16> to vector<18x16x32xbf16>
    %54 = vector.shape_cast %53 : vector<18x16x32xbf16> to vector<288x32xbf16>
    %c0_39 = arith.constant 0 : index
    %c256 = arith.constant 256 : index
    %55 = vector.load %arg12[%c0_39, %c256] : memref<288x288xbf16, #tpu.memory_space<vmem>>, vector<288x32xbf16>
    tpu.vector_store %arg12[%c0_39, %c256], %54 {strides = array<i32>} : memref<288x288xbf16, #tpu.memory_space<vmem>>, vector<288x32xbf16>,
    %c0_40 = arith.constant 0 : index
    %c0_41 = arith.constant 0 : index
    %56 = vector.load %arg12[%c0_40, %c0_41] : memref<288x288xbf16, #tpu.memory_space<vmem>>, vector<288x288xbf16>
    %c0_42 = arith.constant 0 : index
    %c0_43 = arith.constant 0 : index
    %57 = vector.load %arg4[%c0_42, %c0_43] : memref<288x32xbf16, #tpu.memory_space<vmem>>, vector<288x32xbf16>
    %cst = arith.constant dense<0.000000e+00> : vector<288x32xf32>
    %58 = tpu.matmul %56, %57, %cst {dimension_numbers = #tpu.dot_dimension_numbers<[1], [0], [0], [1], [0, 0, 1, 1], [], []>} : vector<288x288xbf16>, vector<288x32xbf16>, vector<288x32xf32> -> vector<288x32xf32>
    %c0_44 = arith.constant 0 : index
    %c0_45 = arith.constant 0 : index
    %59 = vector.load %arg5[%c0_44, %c0_45] : memref<1x32xf32, #tpu.memory_space<vmem>>, vector<1x32xf32>
    %60 = vector.broadcast %59 : vector<1x32xf32> to vector<288x32xf32>
    %61 = arith.addf %58, %60 : vector<288x32xf32>
    %cst_46 = arith.constant 0.000000e+00 : f32
    %62 = vector.broadcast %cst_46 : f32 to vector<288x32xf32>
    %63 = arith.maximumf %61, %62 : vector<288x32xf32>
    %64 = arith.truncf %63 : vector<288x32xf32> to vector<288x32xbf16>
    %65 = vector.shape_cast %64 : vector<288x32xbf16> to vector<18x16x32xbf16>
    %c0_47 = arith.constant 0 : index
    %c1_48 = arith.constant 1 : index
    %c0_49 = arith.constant 0 : index
    %66 = vector.load %arg11[%c0_47, %c1_48, %c0_49] : memref<18x18x32xbf16, #tpu.memory_space<vmem>>, vector<18x16x32xbf16>
    tpu.vector_store %arg11[%c0_47, %c1_48, %c0_49], %65 {strides = array<i32>} : memref<18x18x32xbf16, #tpu.memory_space<vmem>>, vector<18x16x32xbf16>,
    %cst_50 = arith.constant 0.000000e+00 : bf16
    %67 = vector.broadcast %cst_50 : bf16 to vector<18x1x32xbf16>
    %c0_51 = arith.constant 0 : index
    %c0_52 = arith.constant 0 : index
    %c0_53 = arith.constant 0 : index
    %68 = vector.load %arg11[%c0_51, %c0_52, %c0_53] : memref<18x18x32xbf16, #tpu.memory_space<vmem>>, vector<18x1x32xbf16>
    tpu.vector_store %arg11[%c0_51, %c0_52, %c0_53], %67 {strides = array<i32>} : memref<18x18x32xbf16, #tpu.memory_space<vmem>>, vector<18x1x32xbf16>,
    %c0_54 = arith.constant 0 : index
    %c17 = arith.constant 17 : index
    %c0_55 = arith.constant 0 : index
    %69 = vector.load %arg11[%c0_54, %c17, %c0_55] : memref<18x18x32xbf16, #tpu.memory_space<vmem>>, vector<18x1x32xbf16>
    tpu.vector_store %arg11[%c0_54, %c17, %c0_55], %67 {strides = array<i32>} : memref<18x18x32xbf16, #tpu.memory_space<vmem>>, vector<18x1x32xbf16>,
    %cst_56 = arith.constant 0.000000e+00 : bf16
    %70 = vector.broadcast %cst_56 : bf16 to vector<1x18x32xbf16>
    %c0_i32_57 = arith.constant 0 : i32
    %71 = arith.cmpi eq, %arg1, %c0_i32_57 : i32
    %72 = arith.extui %71 : i1 to i32
    %c0_i32_58 = arith.constant 0 : i32
    %73 = arith.cmpi ne, %72, %c0_i32_58 : i32
    scf.if %73 {
      %c0_133 = arith.constant 0 : index
      %c0_134 = arith.constant 0 : index
      %c0_135 = arith.constant 0 : index
      %143 = vector.load %arg11[%c0_133, %c0_134, %c0_135] : memref<18x18x32xbf16, #tpu.memory_space<vmem>>, vector<1x18x32xbf16>
      tpu.vector_store %arg11[%c0_133, %c0_134, %c0_135], %70 {strides = array<i32>} : memref<18x18x32xbf16, #tpu.memory_space<vmem>>, vector<1x18x32xbf16>,
    } else {
    }
    %c0_i32_59 = arith.constant 0 : i32
    %74 = arith.cmpi eq, %arg1, %c0_i32_59 : i32
    %75 = arith.extui %74 : i1 to i32
    %c0_i32_60 = arith.constant 0 : i32
    %76 = arith.cmpi ne, %75, %c0_i32_60 : i32
    scf.if %76 {
      %c17_133 = arith.constant 17 : index
      %c0_134 = arith.constant 0 : index
      %c0_135 = arith.constant 0 : index
      %143 = vector.load %arg11[%c17_133, %c0_134, %c0_135] : memref<18x18x32xbf16, #tpu.memory_space<vmem>>, vector<1x18x32xbf16>
      tpu.vector_store %arg11[%c17_133, %c0_134, %c0_135], %70 {strides = array<i32>} : memref<18x18x32xbf16, #tpu.memory_space<vmem>>, vector<1x18x32xbf16>,
    } else {
    }
    %c0_61 = arith.constant 0 : index
    %c0_62 = arith.constant 0 : index
    %c0_63 = arith.constant 0 : index
    %77 = vector.load %arg11[%c0_61, %c0_62, %c0_63] : memref<18x18x32xbf16, #tpu.memory_space<vmem>>, vector<16x16x32xbf16>
    %78 = vector.shape_cast %77 : vector<16x16x32xbf16> to vector<256x32xbf16>
    %c0_64 = arith.constant 0 : index
    %c0_65 = arith.constant 0 : index
    %79 = vector.load %arg12[%c0_64, %c0_65] : memref<288x288xbf16, #tpu.memory_space<vmem>>, vector<256x32xbf16>
    tpu.vector_store %arg12[%c0_64, %c0_65], %78 {strides = array<i32>} : memref<288x288xbf16, #tpu.memory_space<vmem>>, vector<256x32xbf16>,
    %c0_66 = arith.constant 0 : index
    %c1_67 = arith.constant 1 : index
    %c0_68 = arith.constant 0 : index
    %80 = vector.load %arg11[%c0_66, %c1_67, %c0_68] : memref<18x18x32xbf16, #tpu.memory_space<vmem>>, vector<16x16x32xbf16>
    %81 = vector.shape_cast %80 : vector<16x16x32xbf16> to vector<256x32xbf16>
    %c0_69 = arith.constant 0 : index
    %c32_70 = arith.constant 32 : index
    %82 = vector.load %arg12[%c0_69, %c32_70] : memref<288x288xbf16, #tpu.memory_space<vmem>>, vector<256x32xbf16>
    tpu.vector_store %arg12[%c0_69, %c32_70], %81 {strides = array<i32>} : memref<288x288xbf16, #tpu.memory_space<vmem>>, vector<256x32xbf16>,
    %c0_71 = arith.constant 0 : index
    %c2_72 = arith.constant 2 : index
    %c0_73 = arith.constant 0 : index
    %83 = vector.load %arg11[%c0_71, %c2_72, %c0_73] : memref<18x18x32xbf16, #tpu.memory_space<vmem>>, vector<16x16x32xbf16>
    %84 = vector.shape_cast %83 : vector<16x16x32xbf16> to vector<256x32xbf16>
    %c0_74 = arith.constant 0 : index
    %c64_75 = arith.constant 64 : index
    %85 = vector.load %arg12[%c0_74, %c64_75] : memref<288x288xbf16, #tpu.memory_space<vmem>>, vector<256x32xbf16>
    tpu.vector_store %arg12[%c0_74, %c64_75], %84 {strides = array<i32>} : memref<288x288xbf16, #tpu.memory_space<vmem>>, vector<256x32xbf16>,
    %c1_76 = arith.constant 1 : index
    %c0_77 = arith.constant 0 : index
    %c0_78 = arith.constant 0 : index
    %86 = vector.load %arg11[%c1_76, %c0_77, %c0_78] : memref<18x18x32xbf16, #tpu.memory_space<vmem>>, vector<16x16x32xbf16>
    %87 = vector.shape_cast %86 : vector<16x16x32xbf16> to vector<256x32xbf16>
    %c0_79 = arith.constant 0 : index
    %c96_80 = arith.constant 96 : index
    %88 = vector.load %arg12[%c0_79, %c96_80] : memref<288x288xbf16, #tpu.memory_space<vmem>>, vector<256x32xbf16>
    tpu.vector_store %arg12[%c0_79, %c96_80], %87 {strides = array<i32>} : memref<288x288xbf16, #tpu.memory_space<vmem>>, vector<256x32xbf16>,
    %c1_81 = arith.constant 1 : index
    %c1_82 = arith.constant 1 : index
    %c0_83 = arith.constant 0 : index
    %89 = vector.load %arg11[%c1_81, %c1_82, %c0_83] : memref<18x18x32xbf16, #tpu.memory_space<vmem>>, vector<16x16x32xbf16>
    %90 = vector.shape_cast %89 : vector<16x16x32xbf16> to vector<256x32xbf16>
    %c0_84 = arith.constant 0 : index
    %c128_85 = arith.constant 128 : index
    %91 = vector.load %arg12[%c0_84, %c128_85] : memref<288x288xbf16, #tpu.memory_space<vmem>>, vector<256x32xbf16>
    tpu.vector_store %arg12[%c0_84, %c128_85], %90 {strides = array<i32>} : memref<288x288xbf16, #tpu.memory_space<vmem>>, vector<256x32xbf16>,
    %c1_86 = arith.constant 1 : index
    %c2_87 = arith.constant 2 : index
    %c0_88 = arith.constant 0 : index
    %92 = vector.load %arg11[%c1_86, %c2_87, %c0_88] : memref<18x18x32xbf16, #tpu.memory_space<vmem>>, vector<16x16x32xbf16>
    %93 = vector.shape_cast %92 : vector<16x16x32xbf16> to vector<256x32xbf16>
    %c0_89 = arith.constant 0 : index
    %c160_90 = arith.constant 160 : index
    %94 = vector.load %arg12[%c0_89, %c160_90] : memref<288x288xbf16, #tpu.memory_space<vmem>>, vector<256x32xbf16>
    tpu.vector_store %arg12[%c0_89, %c160_90], %93 {strides = array<i32>} : memref<288x288xbf16, #tpu.memory_space<vmem>>, vector<256x32xbf16>,
    %c2_91 = arith.constant 2 : index
    %c0_92 = arith.constant 0 : index
    %c0_93 = arith.constant 0 : index
    %95 = vector.load %arg11[%c2_91, %c0_92, %c0_93] : memref<18x18x32xbf16, #tpu.memory_space<vmem>>, vector<16x16x32xbf16>
    %96 = vector.shape_cast %95 : vector<16x16x32xbf16> to vector<256x32xbf16>
    %c0_94 = arith.constant 0 : index
    %c192_95 = arith.constant 192 : index
    %97 = vector.load %arg12[%c0_94, %c192_95] : memref<288x288xbf16, #tpu.memory_space<vmem>>, vector<256x32xbf16>
    tpu.vector_store %arg12[%c0_94, %c192_95], %96 {strides = array<i32>} : memref<288x288xbf16, #tpu.memory_space<vmem>>, vector<256x32xbf16>,
    %c2_96 = arith.constant 2 : index
    %c1_97 = arith.constant 1 : index
    %c0_98 = arith.constant 0 : index
    %98 = vector.load %arg11[%c2_96, %c1_97, %c0_98] : memref<18x18x32xbf16, #tpu.memory_space<vmem>>, vector<16x16x32xbf16>
    %99 = vector.shape_cast %98 : vector<16x16x32xbf16> to vector<256x32xbf16>
    %c0_99 = arith.constant 0 : index
    %c224_100 = arith.constant 224 : index
    %100 = vector.load %arg12[%c0_99, %c224_100] : memref<288x288xbf16, #tpu.memory_space<vmem>>, vector<256x32xbf16>
    tpu.vector_store %arg12[%c0_99, %c224_100], %99 {strides = array<i32>} : memref<288x288xbf16, #tpu.memory_space<vmem>>, vector<256x32xbf16>,
    %c2_101 = arith.constant 2 : index
    %c2_102 = arith.constant 2 : index
    %c0_103 = arith.constant 0 : index
    %101 = vector.load %arg11[%c2_101, %c2_102, %c0_103] : memref<18x18x32xbf16, #tpu.memory_space<vmem>>, vector<16x16x32xbf16>
    %102 = vector.shape_cast %101 : vector<16x16x32xbf16> to vector<256x32xbf16>
    %c0_104 = arith.constant 0 : index
    %c256_105 = arith.constant 256 : index
    %103 = vector.load %arg12[%c0_104, %c256_105] : memref<288x288xbf16, #tpu.memory_space<vmem>>, vector<256x32xbf16>
    tpu.vector_store %arg12[%c0_104, %c256_105], %102 {strides = array<i32>} : memref<288x288xbf16, #tpu.memory_space<vmem>>, vector<256x32xbf16>,
    %c0_106 = arith.constant 0 : index
    %c0_107 = arith.constant 0 : index
    %104 = vector.load %arg12[%c0_106, %c0_107] : memref<288x288xbf16, #tpu.memory_space<vmem>>, vector<256x288xbf16>
    %c0_108 = arith.constant 0 : index
    %c0_109 = arith.constant 0 : index
    %105 = vector.load %arg6[%c0_108, %c0_109] : memref<288x32xbf16, #tpu.memory_space<vmem>>, vector<288x32xbf16>
    %cst_110 = arith.constant dense<0.000000e+00> : vector<256x32xf32>
    %106 = tpu.matmul %104, %105, %cst_110 {dimension_numbers = #tpu.dot_dimension_numbers<[1], [0], [0], [1], [0, 0, 1, 1], [], []>} : vector<256x288xbf16>, vector<288x32xbf16>, vector<256x32xf32> -> vector<256x32xf32>
    %c0_111 = arith.constant 0 : index
    %c0_112 = arith.constant 0 : index
    %107 = vector.load %arg7[%c0_111, %c0_112] : memref<1x32xf32, #tpu.memory_space<vmem>>, vector<1x32xf32>
    %108 = vector.broadcast %107 : vector<1x32xf32> to vector<256x32xf32>
    %109 = arith.addf %106, %108 : vector<256x32xf32>
    %cst_113 = arith.constant 0.000000e+00 : f32
    %110 = vector.broadcast %cst_113 : f32 to vector<256x32xf32>
    %111 = arith.maximumf %109, %110 : vector<256x32xf32>
    %112 = arith.truncf %111 : vector<256x32xf32> to vector<256x32xbf16>
    %c0_114 = arith.constant 0 : index
    %c0_115 = arith.constant 0 : index
    %113 = vector.load %arg8[%c0_114, %c0_115] : memref<4x32xbf16, #tpu.memory_space<vmem>>, vector<4x32xbf16>
    %cst_116 = arith.constant dense<0.000000e+00> : vector<4x256xf32>
    %114 = tpu.matmul %113, %112, %cst_116 {dimension_numbers = #tpu.dot_dimension_numbers<[1], [1], [0], [0], [0, 0, 1, 0], [], []>} : vector<4x32xbf16>, vector<256x32xbf16>, vector<4x256xf32> -> vector<4x256xf32>
    %c0_117 = arith.constant 0 : index
    %c0_118 = arith.constant 0 : index
    %115 = vector.load %arg9[%c0_117, %c0_118] : memref<4x1xf32, #tpu.memory_space<vmem>>, vector<4x1xf32>
    %116 = vector.broadcast %115 : vector<4x1xf32> to vector<4x256xf32>
    %117 = arith.addf %114, %116 : vector<4x256xf32>
    %118 = vector.extract_strided_slice %117 {offsets = [0, 0], sizes = [2, 256], strides = [1, 1]} : vector<4x256xf32> to vector<2x256xf32>
    %119 = vector.extract_strided_slice %117 {offsets = [2, 0], sizes = [2, 256], strides = [1, 1]} : vector<4x256xf32> to vector<2x256xf32>
    %cst_119 = arith.constant 0.000000e+00 : f32
    %120 = vector.broadcast %cst_119 : f32 to vector<2x256xf32>
    %121 = arith.maximumf %119, %120 : vector<2x256xf32>
    %122 = math.absf %119 : vector<2x256xf32>
    %cst_120 = arith.constant 0.000000e+00 : f32
    %123 = vector.broadcast %cst_120 : f32 to vector<2x256xf32>
    %124 = arith.subf %123, %122 : vector<2x256xf32>
    %125 = math.exp %124 : vector<2x256xf32>
    %cst_121 = arith.constant 1.000000e+00 : f32
    %126 = vector.broadcast %cst_121 : f32 to vector<2x256xf32>
    %127 = arith.addf %126, %125 : vector<2x256xf32>
    %128 = math.log %127 : vector<2x256xf32>
    %129 = arith.addf %121, %128 : vector<2x256xf32>
    %c0_122 = arith.constant 0 : index
    %c0_123 = arith.constant 0 : index
    %c0_124 = arith.constant 0 : index
    %130 = vector.load %arg10[%c0_122, %c0_123, %c0_124] : memref<1x6x256xf32, #tpu.memory_space<vmem>>, vector<1x2x256xf32>
    %131 = vector.shape_cast %130 : vector<1x2x256xf32> to vector<2x256xf32>
    %132 = vector.shape_cast %118 : vector<2x256xf32> to vector<1x2x256xf32>
    tpu.vector_store %arg10[%c0_122, %c0_123, %c0_124], %132 {strides = array<i32>} : memref<1x6x256xf32, #tpu.memory_space<vmem>>, vector<1x2x256xf32>,
    %c0_125 = arith.constant 0 : index
    %c2_126 = arith.constant 2 : index
    %c0_127 = arith.constant 0 : index
    %133 = vector.load %arg10[%c0_125, %c2_126, %c0_127] : memref<1x6x256xf32, #tpu.memory_space<vmem>>, vector<1x2x256xf32>
    %134 = vector.shape_cast %133 : vector<1x2x256xf32> to vector<2x256xf32>
    %135 = vector.shape_cast %129 : vector<2x256xf32> to vector<1x2x256xf32>
    tpu.vector_store %arg10[%c0_125, %c2_126, %c0_127], %135 {strides = array<i32>} : memref<1x6x256xf32, #tpu.memory_space<vmem>>, vector<1x2x256xf32>,
    %c0_128 = arith.constant 0 : index
    %c0_129 = arith.constant 0 : index
    %c0_130 = arith.constant 0 : index
    %136 = vector.load %arg3[%c0_128, %c0_129, %c0_130] : memref<1x2x256xf32, #tpu.memory_space<vmem>>, vector<1x2x256xf32>
    %137 = vector.shape_cast %136 : vector<1x2x256xf32> to vector<2x256xf32>
    %138 = arith.mulf %129, %137 : vector<2x256xf32>
    %139 = arith.addf %118, %138 : vector<2x256xf32>
    %c0_131 = arith.constant 0 : index
    %c4 = arith.constant 4 : index
    %c0_132 = arith.constant 0 : index
    %140 = vector.load %arg10[%c0_131, %c4, %c0_132] : memref<1x6x256xf32, #tpu.memory_space<vmem>>, vector<1x2x256xf32>
    %141 = vector.shape_cast %140 : vector<1x2x256xf32> to vector<2x256xf32>
    %142 = vector.shape_cast %139 : vector<2x256xf32> to vector<1x2x256xf32>
    tpu.vector_store %arg10[%c0_131, %c4, %c0_132], %142 {strides = array<i32>} : memref<1x6x256xf32, #tpu.memory_space<vmem>>, vector<1x2x256xf32>,
    return
  }
  func.func @transform_0(%arg0: i32, %arg1: i32) -> (i32, i32, i32, i32) {
    %c0_i32 = arith.constant 0 : i32
    %c0_i32_0 = arith.constant 0 : i32
    %c0_i32_1 = arith.constant 0 : i32
    %c0_i32_2 = arith.constant 0 : i32
    return %arg0, %c0_i32, %c0_i32_0, %c0_i32_1 : i32, i32, i32, i32
  }
  func.func @transform_1(%arg0: i32, %arg1: i32) -> (i32, i32, i32) {
    %c0_i32 = arith.constant 0 : i32
    %c0_i32_0 = arith.constant 0 : i32
    return %arg0, %c0_i32, %arg1 : i32, i32, i32
  }
  func.func @transform_2(%arg0: i32, %arg1: i32) -> (i32, i32) {
    %c0_i32 = arith.constant 0 : i32
    %c0_i32_0 = arith.constant 0 : i32
    %c0_i32_1 = arith.constant 0 : i32
    return %c0_i32, %c0_i32_0 : i32, i32
  }
  func.func @transform_3(%arg0: i32, %arg1: i32) -> (i32, i32) {
    %c0_i32 = arith.constant 0 : i32
    %c0_i32_0 = arith.constant 0 : i32
    %c0_i32_1 = arith.constant 0 : i32
    return %c0_i32, %c0_i32_0 : i32, i32
  }
  func.func @transform_4(%arg0: i32, %arg1: i32) -> (i32, i32) {
    %c0_i32 = arith.constant 0 : i32
    %c0_i32_0 = arith.constant 0 : i32
    %c0_i32_1 = arith.constant 0 : i32
    return %c0_i32, %c0_i32_0 : i32, i32
  }
  func.func @transform_5(%arg0: i32, %arg1: i32) -> (i32, i32) {
    %c0_i32 = arith.constant 0 : i32
    %c0_i32_0 = arith.constant 0 : i32
    %c0_i32_1 = arith.constant 0 : i32
    return %c0_i32, %c0_i32_0 : i32, i32
  }
  func.func @transform_6(%arg0: i32, %arg1: i32) -> (i32, i32) {
    %c0_i32 = arith.constant 0 : i32
    %c0_i32_0 = arith.constant 0 : i32
    %c0_i32_1 = arith.constant 0 : i32
    return %c0_i32, %c0_i32_0 : i32, i32
  }
  func.func @transform_7(%arg0: i32, %arg1: i32) -> (i32, i32) {
    %c0_i32 = arith.constant 0 : i32
    %c0_i32_0 = arith.constant 0 : i32
    %c0_i32_1 = arith.constant 0 : i32
    return %c0_i32, %c0_i32_0 : i32, i32
  }
  func.func @transform_8(%arg0: i32, %arg1: i32) -> (i32, i32, i32) {
    %c0_i32 = arith.constant 0 : i32
    %c0_i32_0 = arith.constant 0 : i32
    return %arg0, %c0_i32, %arg1 : i32, i32, i32
  }
}

</mosaic_0001>

<bundles_post_ra>
// kernel: tpu_custom_call.1
= control target key start
LH: loop header
LB: loop body
LE: loop exit
PB: predicated region body
PF: predicated region fallthrough
CT: control target
= control target key end

     0   :  { %s10429_s27 = smov 0   ;;  %s10431_s28 = smov 0   ;;  %s13638_s0 = inlined_call_operand.vmem [shape: bf16[2,20,18,32], index: 0, kind: input, shape index: {}]   ;;  %s13639_s1 = inlined_call_operand.vmem [shape: f32[2,2,256], index: 1, kind: input, shape index: {}]   ;;  %s13640_s2 = inlined_call_operand.vmem [shape: bf16[288,32], index: 2, kind: input, shape index: {}]   ;;  %s13641_s3 = inlined_call_operand.vmem [shape: f32[1,32], index: 3, kind: input, shape index: {}]   ;;  %s13642_s4 = inlined_call_operand.vmem [shape: bf16[288,32], index: 4, kind: input, shape index: {}]   ;;  %s13643_s5 = inlined_call_operand.vmem [shape: f32[1,32], index: 5, kind: input, shape index: {}]   ;;  %s13644_s6 = inlined_call_operand.vmem [shape: bf16[4,32], index: 6, kind: input, shape index: {}]   ;;  %s13645_s7 = inlined_call_operand.vmem [shape: f32[4,1], index: 7, kind: input, shape index: {}]   ;;  %s13646_s8 = inlined_call_operand.vmem [shape: f32[2,6,256], index: 8, kind: output, shape index: {}]  }
   0x1   :  { %s10433_s29 = smov 0  }
   0x2 LB: > { %s30_s30 = sadd.s32 1, %s10373_s28  ;;  %p9071_p0 = scmp.ge.s32.totalorder %s10377_s29, 1  ;;  %s10377_s29 = sphi %s10433_s29, %s18_s29   ;;  %s10373_s28 = sphi %s10431_s28, %s13685_s28   ;;  %s10369_s27 = sphi %s10429_s27, %s13684_s27  }
   0x3   : > { %p32_p1 = scmp.ge.s32.totalorder %s30_s30, 2  ;;  %p293_p2 = scmp.lt.s32.totalorder %s10377_s29, 3 }
   0x5   : > { %s13687_s30 = smov (%p32_p1, %s30_s30), 0  ;;  %p294_p3 = pnand %p9071_p0, %p293_p2 }
   0x7   : > { %297 = sbr.rel (%p294_p3) target bundleno = 1409 (0x581), region = 52 }
   0xe   : > { %p340_p4 = scmp.lt.s32.totalorder %s10369_s27, 1  ;;  %vm1257_vm0 = vcmask 1042432   ;;  %v10218_v0 = vld [vmem:[%s13640_s2] sm:$0xff]   ;;  %vm1258_vm1 = vcmask 1046532   ;;  %v13647_v1 = vmov 0   ;;  %v10219_v2 = vld [vmem:[%s13640_s2 + $0x8] sm:$0xff]  }
   0xf   : > { %4049 = vmatprep.subr.bf16.mxu0 %v13647_v1  ;;  %10204 = vset.pattern.permute.xlu0 %v13647_v1  ;;  %vm10459_vm2 = vmor %vm1257_vm0, %vm1258_vm1  ;;  %v10221_v4 = vld [vmem:[%s13640_s2 + $0x10] sm:$0xff]   ;;  %s10380_s19 = smov 64   ;;  %v10223_v15 = vld [vmem:[%s13640_s2 + $0x18] sm:$0xff]   ;;  %s10381_s22 = smov 96   ;;  %vm587_vm3 = vsmask.f32 3328 }
  0x10   : > { %s13689_s27 = smov (!%p340_p4, %s10369_s27), 1  ;;  %4050 = vmatpush1.bf16.msra.mxu0 %v10218_v0  ;;  %vm588_vm4 = vsmask.f32 7440  ;;  %v10224_v27 = vld [vmem:[%s13640_s2 + $0x20] sm:$0xff]   ;;  %s10382_s25 = smov 32   ;;  %vm514_vm6 = vcmask 261120  }
  0x11   : > { %s10174_s13 = smul.u32 240, %s13689_s27  ;;  %4051 = vmatprep.subr.bf16.mxu0 %v13647_v1  ;;  %vm10529_vm5 = vmor %vm587_vm3, %vm588_vm4  ;;  %vm1130_vm7 = vcmask 523520   ;;  %vm1494_vm8 = vcmask 785920   ;;  %vm1697_vm9 = vcmask 1048320   ;;  %vm4547_vm10 = vsmask.f32 256 }
  0x12   : > { %vm4910_vm11 = vcmask 257024   ;;  %vm4911_vm12 = vsmask.f32 7938  ;;  %vm4918_vm13 = vcmask 253952   ;;  %vm4548_vm14 = vsmask.f32 4368 }
  0x13   : > { %s10466_s16 = scalar_lea.vmem %s13638_s0, %s10174_s13  ;;  %vm11834_vm15 = vmand %vm4910_vm11, %vm4911_vm12  ;;  %s9884_s24 = sshll.u32 %s13689_s27, 2 }
  0x14   : > { %v10205_v5 = vld [vmem:[%s10466_s16 + $0x18] sm:$0xff]   ;;  %4052 = vmatpush1.bf16.msra.mxu0 %v10219_v2  ;;  %v10206_v6 = vld [vmem:[%s10466_s16 + $0x24] sm:$0xff]   ;;  %v10207_v7 = vld [vmem:[%s10466_s16 + $0xc] sm:$0xff]   ;;  %s13614_s10 = scalar_lea.vmem %s13639_s1, %s9884_s24  ;;  %s9885_s11 = sshll.u32 %s13689_s27, 4 }
  0x15   : > { %4053 = vmatprep.subr.bf16.mxu0 %v13647_v1  ;;  %2782 = vrot.lane.b32.xlu1 %v10205_v5, %s10380_s19  ;;  %v9275_v8 = vld [vmem:[%s10466_s16 + $0xc] sm:$0xe]  ;;  %v9276_v9 = vld [vmem:[%s10466_s16 + $0x10] sm:$0xf]  ;;  %v9277_v10 = vld [vmem:[%s10466_s16 + $0x14] sm:$0x1]  ;;  %s13620_s14 = scalar_lea.vmem %s13646_s8, %s9885_s11 }
  0x16   : > { %2784 = vrot.lane.b32.xlu0 %v10206_v6, %s10380_s19  ;;  %v9329_v11 = vrot.slane %v9275_v8, 9  ;;  %v2402_v12 = vrot.slane %v9276_v9, 5  ;;  %v2405_v13 = vrot.slane %v9277_v10, 5  ;;  %v1149_v14 = vld [vmem:[%s10466_s16] sm:$0xe]  ;;  %vm11840_vm0 = vmand %vm4918_vm13, %vm4547_vm10 }
  0x17   : > { %v1150_v16 = vld [vmem:[%s10466_s16 + $0x4] sm:$0xf]  ;;  %v1151_v17 = vld [vmem:[%s10466_s16 + $0x8] sm:$0x1]  ;;  %v9113_v18 = vrot.slane %v1149_v14, 9  ;;  %vm11845_vm1 = vmor %vm4547_vm10, %vm4548_vm14 }
  0x18   : > { %4054 = vmatpush1.bf16.msra.mxu0 %v10221_v4  ;;  %v2403_v19 = vsel %vm10459_vm2, %v9329_v11, %v2402_v12  ;;  %v2404_v20 = vrot.slane %v2402_v12, 4  ;;  %v1262_v21 = vrot.slane %v1150_v16, 5  ;;  %v1265_v22 = vrot.slane %v1151_v17, 5  ;;  %v9278_v23 = vld [vmem:[%s10466_s16 + $0x18] sm:$0xe]  ;;  %vm11872_vm3 = vmand %vm4918_vm13, %vm4911_vm12 }
  0x19   : > { %4055 = vmatprep.subr.bf16.mxu0 %v13647_v1  ;;  %1643 = vrot.lane.b32.xlu1 %v10207_v7, %s10381_s22  ;;  %v9279_v24 = vld [vmem:[%s10466_s16 + $0x1c] sm:$0xf]  ;;  %v9280_v25 = vld [vmem:[%s10466_s16 + $0x20] sm:$0x1]  ;;  %v9330_v26 = vrot.slane %v9278_v23, 9 }
  0x1a   : > { %v2406_v28 = vsel %vm10459_vm2, %v2404_v20, %v2405_v13  ;;  %v1263_v29 = vsel %vm10459_vm2, %v9113_v18, %v1262_v21  ;;  %v1264_v30 = vrot.slane %v1262_v21, 4  ;;  %v2409_v31 = vrot.slane %v9279_v24, 5  ;;  %v1152_v32 = vld [vmem:[%s10466_s16 + $0xc] sm:$0xe]  ;;  %v1153_v33 = vld [vmem:[%s10466_s16 + $0x10] sm:$0xf] }
  0x1b   : > { %v9347_v34 = vcombine.low %v2403_v19, %v2406_v28  ;;  %v2412_v35 = vrot.slane %v9280_v25, 5  ;;  %v1154_v36 = vld [vmem:[%s10466_s16 + $0x14] sm:$0x1]  ;;  %v9114_v37 = vrot.slane %v1152_v32, 9  ;;  %v1269_v38 = vrot.slane %v1153_v33, 5 }
  0x1c   : > { %4056 = vmatpush1.bf16.msra.mxu0 %v10223_v15  ;;  %v1266_v39 = vsel %vm10459_vm2, %v1264_v30, %v1265_v22  ;;  %v2410_v40 = vsel %vm10459_vm2, %v9330_v26, %v2409_v31  ;;  %v2411_v41 = vrot.slane %v2409_v31, 4  ;;  %v1272_v42 = vrot.slane %v1154_v36, 5  ;;  %v533_v43 = vld [vmem:[%s10466_s16] sm:$0xf]  ;;  %v534_v44 = vld [vmem:[%s10466_s16 + $0x4] sm:$0xf] }
  0x1d   : > { %4057 = vmatprep.subr.bf16.mxu0 %v13647_v1  ;;  %2580 = vrot.lane.b32.xlu0 %v9347_v34, %s10382_s25  ;;  %v9131_v45 = vcombine.low %v1263_v29, %v1266_v39  ;;  %v1270_v46 = vsel %vm10459_vm2, %v9114_v37, %v1269_v38  ;;  %v1271_v47 = vrot.slane %v1269_v38, 4  ;;  %v535_v48 = vld [vmem:[%s10466_s16 + $0x8] sm:$0x1]  ;;  %v591_v49 = vshrl.u32 %v533_v43, 16  ;;  %v536_v50 = vld [vmem:[%s10466_s16 + $0xc] sm:$0xf] }
  0x1e   : > { %v2413_v51 = vsel %vm10459_vm2, %v2411_v41, %v2412_v35  ;;  %v594_v52 = vshll.u32 %v533_v43, 16  ;;  %v600_v53 = vshll.u32 %v534_v44, 16  ;;  %v604_v54 = vshrl.u32 %v534_v44, 16  ;;  %v537_v55 = vld [vmem:[%s10466_s16 + $0x10] sm:$0xf] }
  0x1f   : > { %1440 = vrot.lane.b32.xlu1 %v9131_v45, %s10380_s19  ;;  %v9348_v56 = vcombine.low %v2410_v40, %v2413_v51  ;;  %v1273_v57 = vsel %vm10459_vm2, %v1271_v47, %v1272_v42  ;;  %v593_v58 = vrot.slane %v591_v49, 4  ;;  %v610_v59 = vshll.u32 %v535_v48, 16  ;;  %v538_v60 = vld [vmem:[%s10466_s16 + $0x14] sm:$0x1]  ;;  %v9419_v2 = vld [vmem:[%s10466_s16 + $0x18] sm:$0xf] }
  0x20   : > { %4058 = vmatpush1.bf16.msra.mxu0 %v10224_v27  ;;  %v9132_v61 = vcombine.low %v1270_v46, %v1273_v57  ;;  %v596_v62 = vrot.slane %v594_v52, 5  ;;  %v602_v63 = vrot.slane %v600_v53, 5  ;;  %v606_v0 = vrot.slane %v604_v54, 4  ;;  %v9420_v12 = vld [vmem:[%s10466_s16 + $0x1c] sm:$0xf] }
  0x21   : > { %4059 = vmatprep.subr.bf16.mxu0 %v13647_v1  ;;  %2582 = vrot.lane.b32.xlu0 %v9348_v56, %s10382_s25  ;;  %v612_v4 = vrot.slane %v610_v59, 5  ;;  %v615_v5 = vshrl.u32 %v536_v50, 16  ;;  %v618_v6 = vshll.u32 %v536_v50, 16  ;;  %v624_v7 = vshll.u32 %v537_v55, 16  ;;  %v9421_v17 = vld [vmem:[%s10466_s16 + $0x20] sm:$0x1] }
  0x22   : > { %v597_v8 = vor.u32 %v596_v62, %v593_v58  ;;  %v607_v9 = vor.u32 %v606_v0, %v602_v63  ;;  %v628_v10 = vshrl.u32 %v537_v55, 16  ;;  %v634_v11 = vshll.u32 %v538_v60, 16  ;;  %v9422_v19 = vld [vmem:[%s10466_s16 + $0x24] sm:$0xf]  ;;  %v9423_v32 = vld [vmem:[%s10466_s16 + $0x28] sm:$0xf] }
  0x23   : > { %1442 = vrot.lane.b32.xlu1 %v9132_v61, %s10380_s19  ;;  %v617_v14 = vrot.slane %v615_v5, 4  ;;  %v620_v15 = vrot.slane %v618_v6, 5  ;;  %v626_v16 = vrot.slane %v624_v7, 5  ;;  %v2909_v18 = vshrl.u32 %v9419_v2, 16  ;;  %v9424_v37 = vld [vmem:[%s10466_s16 + $0x2c] sm:$0x1] }
  0x24   : > { %v598_v20 = vrot.slane %v597_v8, 4  ;;  %v608_v21 = vrot.slane %v607_v9, 4  ;;  %v630_v22 = vrot.slane %v628_v10, 4  ;;  %v636_v23 = vrot.slane %v634_v11, 5  ;;  %v9281_v42 = vld [vmem:[%s10466_s16 + $0x24] sm:$0xe] }
  0x25   : > { %v621_v24 = vor.u32 %v620_v15, %v617_v14  ;;  %v2911_v25 = vrot.slane %v2909_v18, 4  ;;  %v2912_v26 = vshll.u32 %v9419_v2, 16  ;;  %v2918_v27 = vshll.u32 %v9420_v12, 16  ;;  %v9282_v47 = vld [vmem:[%s10466_s16 + $0x28] sm:$0xf]  ;;  %v10208_v61 = vld [vmem:[%s10466_s16 + $0x18] sm:$0xff]  }
  0x26   : > { %v603_v28 = vsel %vm10529_vm5, %v598_v20, %v602_v63  ;;  %v613_v29 = vsel %vm10529_vm5, %v608_v21, %v612_v4  ;;  %v631_v30 = vor.u32 %v630_v22, %v626_v16  ;;  %v2922_v31 = vshrl.u32 %v9420_v12, 16  ;;  %v9283_v48 = vld [vmem:[%s10466_s16 + $0x2c] sm:$0x1]  ;;  %v539_v57 = vld [vmem:[%s10466_s16 + $0x18] sm:$0xf] }
  0x27   : > { %v9095_v33 = vcombine.low %v603_v28, %v613_v29  ;;  %v622_v34 = vrot.slane %v621_v24, 4  ;;  %v2914_v35 = vrot.slane %v2912_v26, 5  ;;  %v2920_v36 = vrot.slane %v2918_v27, 5  ;;  %v540_v5 = vld [vmem:[%s10466_s16 + $0x1c] sm:$0xf] }
  0x28   : > { %v632_v38 = vrot.slane %v631_v30, 4  ;;  %v2924_v39 = vrot.slane %v2922_v31, 4  ;;  %v2928_v40 = vshll.u32 %v9421_v17, 16  ;;  %v2933_v41 = vshrl.u32 %v9422_v19, 16  ;;  %v541_v6 = vld [vmem:[%s10466_s16 + $0x20] sm:$0x1] }
  0x29   : > { %1076 = vrot.lane.b32.xlu0 %v9095_v33, %s10382_s25  ;;  %v627_v43 = vsel %vm10529_vm5, %v622_v34, %v626_v16  ;;  %v2915_v44 = vor.u32 %v2914_v35, %v2911_v25  ;;  %v2936_v45 = vshll.u32 %v9422_v19, 16  ;;  %v2942_v46 = vshll.u32 %v9423_v32, 16  ;;  %v1155_v11 = vld [vmem:[%s10466_s16 + $0x18] sm:$0xe]  ;;  %v1156_v17 = vld [vmem:[%s10466_s16 + $0x1c] sm:$0xf] }
  0x2a   : > { %v637_v49 = vsel %vm10529_vm5, %v632_v38, %v636_v23  ;;  %v2925_v50 = vor.u32 %v2924_v39, %v2920_v36  ;;  %v2930_v51 = vrot.slane %v2928_v40, 5  ;;  %v2935_v52 = vrot.slane %v2933_v41, 4  ;;  %v1157_v26 = vld [vmem:[%s10466_s16 + $0x20] sm:$0x1]  ;;  %v9425_v27 = vld [vmem:[%s10466_s16 + $0x30] sm:$0xf] }
  0x2b   : > { %v9096_v53 = vcombine.low %v627_v43, %v637_v49  ;;  %v2916_v54 = vrot.slane %v2915_v44, 4  ;;  %v2938_v55 = vrot.slane %v2936_v45, 5  ;;  %v2944_v56 = vrot.slane %v2942_v46, 5  ;;  %v9427_v41 = vld [vmem:[%s10466_s16 + $0x38] sm:$0x1] }
  0x2c   : > { %v2926_v58 = vrot.slane %v2925_v50, 4  ;;  %v2946_v59 = vshrl.u32 %v9423_v32, 16  ;;  %v2952_v60 = vshll.u32 %v9424_v37, 16  ;;  %v9331_v62 = vrot.slane %v9281_v42, 9  ;;  %v10226_v32 = vld [vmem:[%s13640_s2 + $0x28] sm:$0xff]  }
  0x2d   : > { %1078 = vrot.lane.b32.xlu1 %v9096_v53, %s10382_s25  ;;  %v2921_v63 = vsel %vm10529_vm5, %v2916_v54, %v2920_v36  ;;  %v2939_v0 = vor.u32 %v2938_v55, %v2935_v52  ;;  %v2416_v2 = vrot.slane %v9282_v47, 5  ;;  %v2419_v4 = vrot.slane %v9283_v48, 5  ;;  %v9426_v37 = vld [vmem:[%s10466_s16 + $0x34] sm:$0xf]  ;;  %v9284_v43 = vld [vmem:[%s10466_s16 + $0x30] sm:$0xe]  ;;  %4060 = vmatpush1.bf16.msra.mxu0 %v10226_v32 }
  0x2e   : > { %v2931_v7 = vsel %vm10529_vm5, %v2926_v58, %v2930_v51  ;;  %v2948_v8 = vrot.slane %v2946_v59, 4  ;;  %v2954_v9 = vrot.slane %v2952_v60, 5  ;;  %v639_v10 = vshrl.u32 %v539_v57, 16  ;;  %4061 = vmatprep.subr.bf16.mxu0 %v13647_v1  ;;  %v9285_v52 = vld [vmem:[%s10466_s16 + $0x34] sm:$0xf] }
  0x2f   : > { %v9473_v12 = vcombine.low %v2921_v63, %v2931_v7  ;;  %v2940_v14 = vrot.slane %v2939_v0, 4  ;;  %v10561_v15 = vsel %vm10459_vm2, %v9331_v62, %v2416_v2  ;;  %v2418_v16 = vrot.slane %v2416_v2, 4  ;;  %v10228_v58 = vld [vmem:[%s13640_s2 + $0x30] sm:$0xff]   ;;  %v542_v63 = vld [vmem:[%s10466_s16 + $0x24] sm:$0xf] }
  0x30   : > { %v2949_v18 = vor.u32 %v2948_v8, %v2944_v56  ;;  %v641_v19 = vrot.slane %v639_v10, 4  ;;  %v642_v20 = vshll.u32 %v539_v57, 16  ;;  %v648_v21 = vshll.u32 %v540_v5, 16  ;;  %v9286_v57 = vld [vmem:[%s10466_s16 + $0x38] sm:$0x1] }
  0x31   : > { %3394 = vrot.lane.b32.xlu0 %v9473_v12, %s10381_s22  ;;  %v2945_v22 = vsel %vm10529_vm5, %v2940_v14, %v2944_v56  ;;  %1645 = vrot.lane.b32.xlu1 %v10208_v61, %s10381_s22  ;;  %v2420_v23 = vsel %vm10459_vm2, %v2418_v16, %v2419_v4  ;;  %v652_v24 = vshrl.u32 %v540_v5, 16  ;;  %v658_v25 = vshll.u32 %v541_v6, 16  ;;  %v543_v0 = vld [vmem:[%s10466_s16 + $0x28] sm:$0xf]  ;;  %v544_v7 = vld [vmem:[%s10466_s16 + $0x2c] sm:$0x1] }
  0x32   : > { %v2950_v28 = vrot.slane %v2949_v18, 4  ;;  %v9349_v29 = vcombine.low %v10561_v15, %v2420_v23  ;;  %v644_v30 = vrot.slane %v642_v20, 5  ;;  %v650_v31 = vrot.slane %v648_v21, 5  ;;  %4062 = vmatpush1.bf16.msra.mxu0 %v10228_v58  ;;  %v10229_v8 = vld [vmem:[%s13640_s2 + $0x38] sm:$0xff]   ;;  %v1158_v14 = vld [vmem:[%s10466_s16 + $0x24] sm:$0xe] }
  0x33   : > { %v654_v33 = vrot.slane %v652_v24, 4  ;;  %v660_v34 = vrot.slane %v658_v25, 5  ;;  %v9115_v35 = vrot.slane %v1155_v11, 9  ;;  %v1276_v36 = vrot.slane %v1156_v17, 5  ;;  %4063 = vmatprep.subr.bf16.mxu0 %v13647_v1  ;;  %v10209_v15 = vld [vmem:[%s10466_s16 + $0x30] sm:$0xff]  }
  0x34   : > { %v2955_v38 = vsel %vm10529_vm5, %v2950_v28, %v2954_v9  ;;  %v645_v39 = vor.u32 %v644_v30, %v641_v19  ;;  %v1279_v40 = vrot.slane %v1157_v26, 5  ;;  %v2957_v42 = vshrl.u32 %v9425_v27, 16  ;;  %v1159_v24 = vld [vmem:[%s10466_s16 + $0x28] sm:$0xf] }
  0x35   : > { %v9474_v44 = vcombine.low %v2945_v22, %v2955_v38  ;;  %v655_v45 = vor.u32 %v654_v33, %v650_v31  ;;  %v10583_v46 = vsel %vm10459_vm2, %v9115_v35, %v1276_v36  ;;  %v1278_v47 = vrot.slane %v1276_v36, 4  ;;  %v9428_v35 = vld [vmem:[%s10466_s16 + $0x3c] sm:$0xf] }
  0x36   : > { %v646_v48 = vrot.slane %v645_v39, 4  ;;  %v2959_v49 = vrot.slane %v2957_v42, 4  ;;  %v2960_v50 = vshll.u32 %v9425_v27, 16  ;;  %v2966_v51 = vshll.u32 %v9426_v37, 16  ;;  %4064 = vmatpush1.bf16.msra.mxu0 %v10229_v8  ;;  %v9430_v42 = vld [vmem:[%s10466_s16 + $0x44] sm:$0x1] }
  0x37   : > { %3396 = vrot.lane.b32.xlu0 %v9474_v44, %s10381_s22  ;;  %v656_v53 = vrot.slane %v655_v45, 4  ;;  %v1280_v54 = vsel %vm10459_vm2, %v1278_v47, %v1279_v40  ;;  %v2970_v55 = vshrl.u32 %v9426_v37, 16  ;;  %v2976_v56 = vshll.u32 %v9427_v41, 16  ;;  %4065 = vmatprep.subr.bf16.mxu0 %v13647_v1  ;;  %v10210_v37 = vld [vmem:[%s10466_s16 + $0x24] sm:$0xff]   ;;  %v9429_v41 = vld [vmem:[%s10466_s16 + $0x40] sm:$0xf] }
  0x38   : > { %v651_v59 = vsel %vm10529_vm5, %v646_v48, %v650_v31  ;;  %v9133_v60 = vcombine.low %v10583_v46, %v1280_v54  ;;  %v2962_v61 = vrot.slane %v2960_v50, 5  ;;  %v2968_v62 = vrot.slane %v2966_v51, 5  ;;  %v9287_v51 = vld [vmem:[%s10466_s16 + $0x3c] sm:$0xe] }
  0x39   : > { %v661_v2 = vsel %vm10529_vm5, %v656_v53, %v660_v34  ;;  %v2972_v4 = vrot.slane %v2970_v55, 4  ;;  %v2978_v5 = vrot.slane %v2976_v56, 5  ;;  %v9332_v6 = vrot.slane %v9284_v43, 9  ;;  %v1160_v34 = vld [vmem:[%s10466_s16 + $0x2c] sm:$0x1] }
  0x3a   : > { %v9097_v9 = vcombine.low %v651_v59, %v661_v2  ;;  %v2963_v10 = vor.u32 %v2962_v61, %v2959_v49  ;;  %v2423_v11 = vrot.slane %v9285_v52, 5  ;;  %v2426_v12 = vrot.slane %v9286_v57, 5  ;;  %v9288_v56 = vld [vmem:[%s10466_s16 + $0x40] sm:$0xf]  ;;  %v10233_v57 = vld [vmem:[%s13640_s2 + $0x48] sm:$0xff]  }
  0x3b   : > { %2584 = vrot.lane.b32.xlu0 %v9349_v29, %s10382_s25  ;;  %v2973_v16 = vor.u32 %v2972_v4, %v2968_v62  ;;  %v663_v17 = vshrl.u32 %v542_v63, 16  ;;  %v666_v18 = vshll.u32 %v542_v63, 16  ;;  %v672_v19 = vshll.u32 %v543_v0, 16  ;;  %v10231_v29 = vld [vmem:[%s13640_s2 + $0x40] sm:$0xff]  }
  0x3c   : > { %1080 = vrot.lane.b32.xlu1 %v9097_v9, %s10382_s25  ;;  %v2964_v20 = vrot.slane %v2963_v10, 4  ;;  %v10612_v21 = vsel %vm10459_vm2, %v9332_v6, %v2423_v11  ;;  %v2425_v22 = vrot.slane %v2423_v11, 4  ;;  %v676_v23 = vshrl.u32 %v543_v0, 16  ;;  %4066 = vmatpush1.bf16.msra.mxu0 %v10231_v29  ;;  %v546_v6 = vld [vmem:[%s10466_s16 + $0x34] sm:$0xf] }
  0x3d   : > { %v2974_v25 = vrot.slane %v2973_v16, 4  ;;  %v665_v26 = vrot.slane %v663_v17, 4  ;;  %v668_v27 = vrot.slane %v666_v18, 5  ;;  %v674_v28 = vrot.slane %v672_v19, 5  ;;  %4067 = vmatprep.subr.bf16.mxu0 %v13647_v1  ;;  %v547_v11 = vld [vmem:[%s10466_s16 + $0x38] sm:$0x1] }
  0x3e   : > { %v2969_v30 = vsel %vm10529_vm5, %v2964_v20, %v2968_v62  ;;  %v2427_v31 = vsel %vm10459_vm2, %v2425_v22, %v2426_v12  ;;  %v678_v32 = vrot.slane %v676_v23, 4  ;;  %v682_v33 = vshll.u32 %v544_v7, 16  ;;  %v9289_v62 = vld [vmem:[%s10466_s16 + $0x44] sm:$0x1]  ;;  %v10234_v12 = vld [vmem:[%s13640_s2 + $0x50] sm:$0xff]   ;;  %v10211_v18 = vld [vmem:[%s10466_s16 + $0x3c] sm:$0xff]  }
  0x3f   : > { %2786 = vrot.lane.b32.xlu0 %v10209_v15, %s10380_s19  ;;  %v2979_v36 = vsel %vm10529_vm5, %v2974_v25, %v2978_v5  ;;  %v9350_v38 = vcombine.low %v10612_v21, %v2427_v31  ;;  %v669_v39 = vor.u32 %v668_v27, %v665_v26  ;;  %v9116_v40 = vrot.slane %v1158_v14, 9  ;;  %v545_v5 = vld [vmem:[%s10466_s16 + $0x30] sm:$0xf] }
  0x40   : > { %1444 = vrot.lane.b32.xlu1 %v9133_v60, %s10380_s19  ;;  %v9475_v43 = vcombine.low %v2969_v30, %v2979_v36  ;;  %v679_v44 = vor.u32 %v678_v32, %v674_v28  ;;  %v684_v45 = vrot.slane %v682_v33, 5  ;;  %v1283_v46 = vrot.slane %v1159_v24, 5  ;;  %4068 = vmatpush1.bf16.msra.mxu0 %v10233_v57  ;;  %v1161_v23 = vld [vmem:[%s10466_s16 + $0x30] sm:$0xe]  ;;  %v1163_v33 = vld [vmem:[%s10466_s16 + $0x38] sm:$0x1] }
  0x41   : > { %v670_v47 = vrot.slane %v669_v39, 4  ;;  %v1286_v48 = vrot.slane %v1160_v34, 5  ;;  %v2981_v49 = vshrl.u32 %v9428_v35, 16  ;;  %v2984_v50 = vshll.u32 %v9428_v35, 16  ;;  %4069 = vmatprep.subr.bf16.mxu0 %v13647_v1  ;;  %v10236_v34 = vld [vmem:[%s13640_s2 + $0x58] sm:$0xff]  }
  0x42   : > { %v680_v52 = vrot.slane %v679_v44, 4  ;;  %v10636_v53 = vsel %vm10459_vm2, %v9116_v40, %v1283_v46  ;;  %v1285_v54 = vrot.slane %v1283_v46, 4  ;;  %v2990_v55 = vshll.u32 %v9429_v41, 16  ;;  %v9431_v39 = vld [vmem:[%s10466_s16 + $0x48] sm:$0xf] }
  0x43   : > { %3398 = vrot.lane.b32.xlu0 %v9475_v43, %s10381_s22  ;;  %v675_v58 = vsel %vm10529_vm5, %v670_v47, %v674_v28  ;;  %v2983_v59 = vrot.slane %v2981_v49, 4  ;;  %v2986_v60 = vrot.slane %v2984_v50, 5  ;;  %v2994_v61 = vshrl.u32 %v9429_v41, 16  ;;  %v1162_v28 = vld [vmem:[%s10466_s16 + $0x34] sm:$0xf] }
  0x44   : > { %1647 = vrot.lane.b32.xlu1 %v10210_v37, %s10381_s22  ;;  %v685_v63 = vsel %vm10529_vm5, %v680_v52, %v684_v45  ;;  %v1287_v0 = vsel %vm10459_vm2, %v1285_v54, %v1286_v48  ;;  %v2992_v2 = vrot.slane %v2990_v55, 5  ;;  %v3000_v4 = vshll.u32 %v9430_v42, 16  ;;  %4070 = vmatpush1.bf16.msra.mxu0 %v10234_v12  ;;  %v10212_v41 = vld [vmem:[%s10466_s16 + $0x30] sm:$0xff]   ;;  %v9432_v45 = vld [vmem:[%s10466_s16 + $0x4c] sm:$0xf] }
  0x45   : > { %v9098_v7 = vcombine.low %v675_v58, %v685_v63  ;;  %v9134_v8 = vcombine.low %v10636_v53, %v1287_v0  ;;  %v2987_v9 = vor.u32 %v2986_v60, %v2983_v59  ;;  %v2996_v10 = vrot.slane %v2994_v61, 4  ;;  %4071 = vmatprep.subr.bf16.mxu0 %v13647_v1  ;;  %v9433_v46 = vld [vmem:[%s10466_s16 + $0x50] sm:$0x1]  ;;  %v9290_v55 = vld [vmem:[%s10466_s16 + $0x48] sm:$0xe] }
  0x46   : > { %v3002_v14 = vrot.slane %v3000_v4, 5  ;;  %v9333_v15 = vrot.slane %v9287_v51, 9  ;;  %v2430_v16 = vrot.slane %v9288_v56, 5  ;;  %v2433_v17 = vrot.slane %v9289_v62, 5  ;;  %v10238_v56 = vld [vmem:[%s13640_s2 + $0x60] sm:$0xff]   ;;  %v10213_v12 = vld [vmem:[%s10466_s16 + $0x48] sm:$0xff]  }
  0x47   : > { %2586 = vrot.lane.b32.xlu0 %v9350_v38, %s10382_s25  ;;  %v2988_v19 = vrot.slane %v2987_v9, 4  ;;  %v2997_v20 = vor.u32 %v2996_v10, %v2992_v2  ;;  %v687_v21 = vshrl.u32 %v545_v5, 16  ;;  %v690_v22 = vshll.u32 %v545_v5, 16  ;;  %v9291_v61 = vld [vmem:[%s10466_s16 + $0x4c] sm:$0xf] }
  0x48   : > { %1082 = vrot.lane.b32.xlu1 %v9098_v7, %s10382_s25  ;;  %v10666_v24 = vsel %vm10459_vm2, %v9333_v15, %v2430_v16  ;;  %v2432_v25 = vrot.slane %v2430_v16, 4  ;;  %v696_v26 = vshll.u32 %v546_v6, 16  ;;  %v700_v27 = vshrl.u32 %v546_v6, 16  ;;  %4072 = vmatpush1.bf16.msra.mxu0 %v10236_v34  ;;  %v9292_v4 = vld [vmem:[%s10466_s16 + $0x50] sm:$0x1] }
  0x49   : > { %v2993_v29 = vsel %vm10529_vm5, %v2988_v19, %v2992_v2  ;;  %v2998_v30 = vrot.slane %v2997_v20, 4  ;;  %v689_v31 = vrot.slane %v687_v21, 4  ;;  %v692_v32 = vrot.slane %v690_v22, 5  ;;  %4073 = vmatprep.subr.bf16.mxu0 %v13647_v1  ;;  %v548_v9 = vld [vmem:[%s10466_s16 + $0x3c] sm:$0xf] }
  0x4a   : > { %v2434_v35 = vsel %vm10459_vm2, %v2432_v25, %v2433_v17  ;;  %v698_v36 = vrot.slane %v696_v26, 5  ;;  %v702_v37 = vrot.slane %v700_v27, 4  ;;  %v706_v38 = vshll.u32 %v547_v11, 16  ;;  %v549_v10 = vld [vmem:[%s10466_s16 + $0x40] sm:$0xf] }
  0x4b   : > { %2788 = vrot.lane.b32.xlu0 %v10211_v18, %s10380_s19  ;;  %v3003_v40 = vsel %vm10529_vm5, %v2998_v30, %v3002_v14  ;;  %v9351_v42 = vcombine.low %v10666_v24, %v2434_v35  ;;  %v693_v43 = vor.u32 %v692_v32, %v689_v31  ;;  %v9117_v44 = vrot.slane %v1161_v23, 9  ;;  %v550_v17 = vld [vmem:[%s10466_s16 + $0x44] sm:$0x1]  ;;  %v10240_v18 = vld [vmem:[%s13640_s2 + $0x68] sm:$0xff]   ;;  %v1164_v27 = vld [vmem:[%s10466_s16 + $0x3c] sm:$0xe] }
  0x4c   : > { %1446 = vrot.lane.b32.xlu1 %v9134_v8, %s10380_s19  ;;  %v9476_v47 = vcombine.low %v2993_v29, %v3003_v40  ;;  %v703_v48 = vor.u32 %v702_v37, %v698_v36  ;;  %v708_v49 = vrot.slane %v706_v38, 5  ;;  %v1290_v50 = vrot.slane %v1162_v28, 5  ;;  %4074 = vmatpush1.bf16.msra.mxu0 %v10238_v56  ;;  %v10244_v28 = vld [vmem:[%s13640_s2 + $0x80] sm:$0xff]  }
  0x4d   : > { %v694_v51 = vrot.slane %v693_v43, 4  ;;  %v1293_v52 = vrot.slane %v1163_v33, 5  ;;  %v3005_v53 = vshrl.u32 %v9431_v39, 16  ;;  %v3008_v54 = vshll.u32 %v9431_v39, 16  ;;  %4075 = vmatprep.subr.bf16.mxu0 %v13647_v1  ;;  %v1165_v33 = vld [vmem:[%s10466_s16 + $0x40] sm:$0xf]  ;;  %10090 = vmatprep.subr.bf16.mxu1 %v10244_v28 }
  0x4e   : > { %v704_v57 = vrot.slane %v703_v48, 4  ;;  %v10693_v58 = vsel %vm10459_vm2, %v9117_v44, %v1290_v50  ;;  %v1292_v59 = vrot.slane %v1290_v50, 4  ;;  %v3014_v60 = vshll.u32 %v9432_v45, 16  ;;  %v1166_v38 = vld [vmem:[%s10466_s16 + $0x44] sm:$0x1]  ;;  %v10243_v39 = vld [vmem:[%s13640_s2 + $0x70] sm:$0xff]   ;;  %10091 = vmatpush3.bf16.msra.mxu1 %v10244_v28 }
  0x4f   : > { %3400 = vrot.lane.b32.xlu0 %v9476_v47, %s10381_s22  ;;  %v699_v62 = vsel %vm10529_vm5, %v694_v51, %v698_v36  ;;  %v3007_v63 = vrot.slane %v3005_v53, 4  ;;  %v3010_v0 = vrot.slane %v3008_v54, 5  ;;  %v3018_v2 = vshrl.u32 %v9432_v45, 16  ;;  %v9434_v44 = vld [vmem:[%s10466_s16 + $0x54] sm:$0xf]  ;;  %v10247_v45 = vld [vmem:[%s13640_s2 + $0x88] sm:$0xff]  }
  0x50   : > { %1649 = vrot.lane.b32.xlu1 %v10212_v41, %s10381_s22  ;;  %v709_v5 = vsel %vm10529_vm5, %v704_v57, %v708_v49  ;;  %v1294_v6 = vsel %vm10459_vm2, %v1292_v59, %v1293_v52  ;;  %v3016_v7 = vrot.slane %v3014_v60, 5  ;;  %v3024_v8 = vshll.u32 %v9433_v46, 16  ;;  %4076 = vmatpush1.bf16.msra.mxu0 %v10240_v18  ;;  %v10214_v47 = vld [vmem:[%s10466_s16 + $0x3c] sm:$0xff]   ;;  %v9435_v51 = vld [vmem:[%s10466_s16 + $0x58] sm:$0xf] }
  0x51   : > { %v9099_v11 = vcombine.low %v699_v62, %v709_v5  ;;  %v9135_v14 = vcombine.low %v10693_v58, %v1294_v6  ;;  %v3011_v15 = vor.u32 %v3010_v0, %v3007_v63  ;;  %v3020_v16 = vrot.slane %v3018_v2, 4  ;;  %4077 = vmatprep.subr.bf16.mxu0 %v13647_v1  ;;  %v9436_v52 = vld [vmem:[%s10466_s16 + $0x5c] sm:$0x1]  ;;  %10092 = vmatprep.subr.bf16.mxu1 %v10247_v45  ;;  %v9294_v5 = vld [vmem:[%s10466_s16 + $0x58] sm:$0xf] }
  0x52   : > { %v3026_v19 = vrot.slane %v3024_v8, 5  ;;  %v9334_v20 = vrot.slane %v9290_v55, 9  ;;  %v2437_v21 = vrot.slane %v9291_v61, 5  ;;  %v2440_v22 = vrot.slane %v9292_v4, 5  ;;  %v9293_v61 = vld [vmem:[%s10466_s16 + $0x54] sm:$0xe]  ;;  %10093 = vmatpush3.bf16.msra.mxu1 %v10247_v45 }
  0x53   : > { %2588 = vrot.lane.b32.xlu0 %v9351_v42, %s10382_s25  ;;  %v3012_v23 = vrot.slane %v3011_v15, 4  ;;  %v3021_v24 = vor.u32 %v3020_v16, %v3016_v7  ;;  %v711_v25 = vshrl.u32 %v548_v9, 16  ;;  %v714_v26 = vshll.u32 %v548_v9, 16  ;;  %v10246_v62 = vld [vmem:[%s13640_s2 + $0x78] sm:$0xff]   ;;  %v551_v16 = vld [vmem:[%s10466_s16 + $0x48] sm:$0xf] }
  0x54   : > { %1084 = vrot.lane.b32.xlu1 %v9099_v11, %s10382_s25  ;;  %v10723_v29 = vsel %vm10459_vm2, %v9334_v20, %v2437_v21  ;;  %v2439_v30 = vrot.slane %v2437_v21, 4  ;;  %v720_v31 = vshll.u32 %v549_v10, 16  ;;  %v724_v32 = vshrl.u32 %v549_v10, 16  ;;  %4078 = vmatpush1.bf16.msra.mxu0 %v10243_v39  ;;  %v9295_v10 = vld [vmem:[%s10466_s16 + $0x5c] sm:$0x1] }
  0x55   : > { %v3017_v34 = vsel %vm10529_vm5, %v3012_v23, %v3016_v7  ;;  %v3022_v35 = vrot.slane %v3021_v24, 4  ;;  %v713_v36 = vrot.slane %v711_v25, 4  ;;  %v716_v37 = vrot.slane %v714_v26, 5  ;;  %4079 = vmatprep.subr.bf16.mxu0 %v13647_v1 }
  0x56   : > { %v2441_v40 = vsel %vm10459_vm2, %v2439_v30, %v2440_v22  ;;  %v722_v41 = vrot.slane %v720_v31, 5  ;;  %v726_v42 = vrot.slane %v724_v32, 4  ;;  %v730_v43 = vshll.u32 %v550_v17, 16  ;;  %v552_v17 = vld [vmem:[%s10466_s16 + $0x4c] sm:$0xf] }
  0x57   : > { %2790 = vrot.lane.b32.xlu0 %v10213_v12, %s10380_s19  ;;  %v3027_v46 = vsel %vm10529_vm5, %v3022_v35, %v3026_v19  ;;  %v9352_v48 = vcombine.low %v10723_v29, %v2441_v40  ;;  %v717_v49 = vor.u32 %v716_v37, %v713_v36  ;;  %v9118_v50 = vrot.slane %v1164_v27, 9  ;;  %v553_v22 = vld [vmem:[%s10466_s16 + $0x50] sm:$0x1]  ;;  %v10215_v27 = vld [vmem:[%s10466_s16 + $0x54] sm:$0xff]   ;;  %v1167_v32 = vld [vmem:[%s10466_s16 + $0x48] sm:$0xe] }
  0x58   : > { %1448 = vrot.lane.b32.xlu1 %v9135_v14, %s10380_s19  ;;  %v9477_v53 = vcombine.low %v3017_v34, %v3027_v46  ;;  %v727_v54 = vor.u32 %v726_v42, %v722_v41  ;;  %v732_v55 = vrot.slane %v730_v43, 5  ;;  %v1297_v56 = vrot.slane %v1165_v33, 5  ;;  %4080 = vmatpush1.bf16.msra.mxu0 %v10246_v62  ;;  %v1168_v37 = vld [vmem:[%s10466_s16 + $0x4c] sm:$0xf]  ;;  %v1169_v42 = vld [vmem:[%s10466_s16 + $0x50] sm:$0x1] }
  0x59   : > { %v718_v57 = vrot.slane %v717_v49, 4  ;;  %v1300_v58 = vrot.slane %v1166_v38, 5  ;;  %v3029_v59 = vshrl.u32 %v9434_v44, 16  ;;  %v3032_v60 = vshll.u32 %v9434_v44, 16  ;;  %v10216_v49 = vld [vmem:[%s10466_s16 + $0x48] sm:$0xff]  }
  0x5a   : > { %v728_v63 = vrot.slane %v727_v54, 4  ;;  %v1298_v0 = vsel %vm10459_vm2, %v9118_v50, %v1297_v56  ;;  %v1299_v2 = vrot.slane %v1297_v56, 4  ;;  %v3038_v4 = vshll.u32 %v9435_v51, 16  ;;  %v9439_v54 = vld [vmem:[%s10466_s16 + $0x68] sm:$0x1] }
  0x5b   : > { %3402 = vrot.lane.b32.xlu0 %v9477_v53, %s10381_s22  ;;  %v723_v6 = vsel %vm10529_vm5, %v718_v57, %v722_v41  ;;  %v3031_v7 = vrot.slane %v3029_v59, 4  ;;  %v3034_v8 = vrot.slane %v3032_v60, 5  ;;  %v3042_v9 = vshrl.u32 %v9435_v51, 16  ;;  %v9438_v53 = vld [vmem:[%s10466_s16 + $0x64] sm:$0xf] }
  0x5c   : > { %1651 = vrot.lane.b32.xlu1 %v10214_v47, %s10381_s22  ;;  %v733_v11 = vsel %vm10529_vm5, %v728_v63, %v732_v55  ;;  %v1301_v12 = vsel %vm10459_vm2, %v1299_v2, %v1300_v58  ;;  %v3040_v14 = vrot.slane %v3038_v4, 5  ;;  %v3048_v15 = vshll.u32 %v9436_v52, 16  ;;  %v9437_v47 = vld [vmem:[%s10466_s16 + $0x60] sm:$0xf] }
  0x5d   : > { %v9100_v18 = vcombine.low %v723_v6, %v733_v11  ;;  %v9136_v19 = vcombine.low %v1298_v0, %v1301_v12  ;;  %v3035_v20 = vor.u32 %v3034_v8, %v3031_v7  ;;  %v3044_v21 = vrot.slane %v3042_v9, 4  ;;  %v9296_v63 = vld [vmem:[%s10466_s16 + $0x60] sm:$0xe]  ;;  %v9297_v6 = vld [vmem:[%s10466_s16 + $0x64] sm:$0xf] }
  0x5e   : > { %v3050_v23 = vrot.slane %v3048_v15, 5  ;;  %v9335_v24 = vrot.slane %v9293_v61, 9  ;;  %v2444_v25 = vrot.slane %v9294_v5, 5  ;;  %v2447_v26 = vrot.slane %v9295_v10, 5  ;;  %v9298_v11 = vld [vmem:[%s10466_s16 + $0x68] sm:$0x1] }
  0x5f   : > { %2590 = vrot.lane.b32.xlu0 %v9352_v48, %s10382_s25  ;;  %v3036_v28 = vrot.slane %v3035_v20, 4  ;;  %v3045_v29 = vor.u32 %v3044_v21, %v3040_v14  ;;  %v735_v30 = vshrl.u32 %v551_v16, 16  ;;  %v738_v31 = vshll.u32 %v551_v16, 16 }
  0x60   : > { %1086 = vrot.lane.b32.xlu1 %v9100_v18, %s10382_s25  ;;  %v2445_v33 = vsel %vm10459_vm2, %v9335_v24, %v2444_v25  ;;  %v2446_v34 = vrot.slane %v2444_v25, 4  ;;  %v744_v35 = vshll.u32 %v552_v17, 16  ;;  %v748_v36 = vshrl.u32 %v552_v17, 16  ;;  %v554_v17 = vld [vmem:[%s10466_s16 + $0x54] sm:$0xf] }
  0x61   : > { %v3041_v38 = vsel %vm10529_vm5, %v3036_v28, %v3040_v14  ;;  %v3046_v39 = vrot.slane %v3045_v29, 4  ;;  %v737_v40 = vrot.slane %v735_v30, 4  ;;  %v740_v41 = vrot.slane %v738_v31, 5  ;;  %v555_v18 = vld [vmem:[%s10466_s16 + $0x58] sm:$0xf]  ;;  %v10217_v29 = vld [vmem:[%s10466_s16 + $0x60] sm:$0xff]  }
  0x62   : > { %v2448_v43 = vsel %vm10459_vm2, %v2446_v34, %v2447_v26  ;;  %v746_v44 = vrot.slane %v744_v35, 5  ;;  %v750_v45 = vrot.slane %v748_v36, 4  ;;  %v754_v46 = vshll.u32 %v553_v22, 16  ;;  %v1170_v28 = vld [vmem:[%s10466_s16 + $0x54] sm:$0xe] }
  0x63   : > { %2792 = vrot.lane.b32.xlu0 %v10215_v27, %s10380_s19  ;;  %v3051_v48 = vsel %vm10529_vm5, %v3046_v39, %v3050_v23  ;;  %v9353_v50 = vcombine.low %v2445_v33, %v2448_v43  ;;  %v741_v51 = vor.u32 %v740_v41, %v737_v40  ;;  %v9119_v52 = vrot.slane %v1167_v32, 9  ;;  %v556_v23 = vld [vmem:[%s10466_s16 + $0x5c] sm:$0x1]  ;;  %v1171_v34 = vld [vmem:[%s10466_s16 + $0x58] sm:$0xf] }
  0x64   : > { %1450 = vrot.lane.b32.xlu1 %v9136_v19, %s10380_s19  ;;  %v9478_v55 = vcombine.low %v3041_v38, %v3051_v48  ;;  %v751_v56 = vor.u32 %v750_v45, %v746_v44  ;;  %v756_v57 = vrot.slane %v754_v46, 5  ;;  %v1304_v58 = vrot.slane %v1168_v37, 5  ;;  %v1172_v39 = vld [vmem:[%s10466_s16 + $0x5c] sm:$0x1] }
  0x65   : > { %v742_v59 = vrot.slane %v741_v51, 4  ;;  %v1307_v60 = vrot.slane %v1169_v42, 5  ;;  %v3053_v61 = vshrl.u32 %v9437_v47, 16  ;;  %v3056_v62 = vshll.u32 %v9437_v47, 16 }
  0x66   : > { %v752_v0 = vrot.slane %v751_v56, 4  ;;  %v1305_v2 = vsel %vm10459_vm2, %v9119_v52, %v1304_v58  ;;  %v1306_v4 = vrot.slane %v1304_v58, 4  ;;  %v3062_v5 = vshll.u32 %v9438_v53, 16 }
  0x67   : > { %3404 = vrot.lane.b32.xlu0 %v9478_v55, %s10381_s22  ;;  %v747_v7 = vsel %vm10529_vm5, %v742_v59, %v746_v44  ;;  %v3055_v8 = vrot.slane %v3053_v61, 4  ;;  %v3058_v9 = vrot.slane %v3056_v62, 5  ;;  %v3066_v10 = vshrl.u32 %v9438_v53, 16  ;;  %v9440_v44 = vld [vmem:[%s10466_s16 + $0x6c] sm:$0xf]  ;;  %v10220_v55 = vld [vmem:[%s10466_s16 + $0x54] sm:$0xff]  }
  0x68   : > { %1653 = vrot.lane.b32.xlu1 %v10216_v49, %s10381_s22  ;;  %v757_v12 = vsel %vm10529_vm5, %v752_v0, %v756_v57  ;;  %v1308_v14 = vsel %vm10459_vm2, %v1306_v4, %v1307_v60  ;;  %v3064_v15 = vrot.slane %v3062_v5, 5  ;;  %v3072_v16 = vshll.u32 %v9439_v54, 16  ;;  %v9441_v53 = vld [vmem:[%s10466_s16 + $0x70] sm:$0xf]  ;;  %v9442_v59 = vld [vmem:[%s10466_s16 + $0x74] sm:$0x1] }
  0x69   : > { %v9101_v19 = vcombine.low %v747_v7, %v757_v12  ;;  %v9137_v20 = vcombine.low %v1305_v2, %v1308_v14  ;;  %v3059_v21 = vor.u32 %v3058_v9, %v3055_v8  ;;  %v3068_v22 = vrot.slane %v3066_v10, 4  ;;  %v9299_v0 = vld [vmem:[%s10466_s16 + $0x6c] sm:$0xe]  ;;  %v9300_v2 = vld [vmem:[%s10466_s16 + $0x70] sm:$0xf] }
  0x6a   : > { %v3074_v24 = vrot.slane %v3072_v16, 5  ;;  %v9336_v25 = vrot.slane %v9296_v63, 9  ;;  %v2451_v26 = vrot.slane %v9297_v6, 5  ;;  %v2454_v27 = vrot.slane %v9298_v11, 5  ;;  %v9301_v4 = vld [vmem:[%s10466_s16 + $0x74] sm:$0x1] }
  0x6b   : > { %2592 = vrot.lane.b32.xlu0 %v9353_v50, %s10382_s25  ;;  %v3060_v30 = vrot.slane %v3059_v21, 4  ;;  %v3069_v31 = vor.u32 %v3068_v22, %v3064_v15  ;;  %v759_v32 = vshrl.u32 %v554_v17, 16  ;;  %v762_v33 = vshll.u32 %v554_v17, 16 }
  0x6c   : > { %1088 = vrot.lane.b32.xlu1 %v9101_v19, %s10382_s25  ;;  %v2452_v35 = vsel %vm10459_vm2, %v9336_v25, %v2451_v26  ;;  %v2453_v36 = vrot.slane %v2451_v26, 4  ;;  %v768_v37 = vshll.u32 %v555_v18, 16  ;;  %v772_v38 = vshrl.u32 %v555_v18, 16  ;;  %v557_v18 = vld [vmem:[%s10466_s16 + $0x60] sm:$0xf] }
  0x6d   : > { %v3065_v40 = vsel %vm10529_vm5, %v3060_v30, %v3064_v15  ;;  %v3070_v41 = vrot.slane %v3069_v31, 4  ;;  %v761_v42 = vrot.slane %v759_v32, 4  ;;  %v764_v43 = vrot.slane %v762_v33, 5  ;;  %v10222_v30 = vld [vmem:[%s10466_s16 + $0x6c] sm:$0xff]  }
  0x6e   : > { %v2455_v45 = vsel %vm10459_vm2, %v2453_v36, %v2454_v27  ;;  %v770_v46 = vrot.slane %v768_v37, 5  ;;  %v774_v47 = vrot.slane %v772_v38, 4  ;;  %v778_v48 = vshll.u32 %v556_v23, 16  ;;  %v558_v23 = vld [vmem:[%s10466_s16 + $0x64] sm:$0xf] }
  0x6f   : > { %2794 = vrot.lane.b32.xlu0 %v10217_v29, %s10380_s19  ;;  %v3075_v49 = vsel %vm10529_vm5, %v3070_v41, %v3074_v24  ;;  %v9354_v50 = vcombine.low %v2452_v35, %v2455_v45  ;;  %v765_v51 = vor.u32 %v764_v43, %v761_v42  ;;  %v9120_v52 = vrot.slane %v1170_v28, 9  ;;  %v559_v24 = vld [vmem:[%s10466_s16 + $0x68] sm:$0x1]  ;;  %v1173_v29 = vld [vmem:[%s10466_s16 + $0x60] sm:$0xe] }
  0x70   : > { %1452 = vrot.lane.b32.xlu1 %v9137_v20, %s10380_s19  ;;  %v9479_v54 = vcombine.low %v3065_v40, %v3075_v49  ;;  %v775_v56 = vor.u32 %v774_v47, %v770_v46  ;;  %v780_v57 = vrot.slane %v778_v48, 5  ;;  %v1311_v58 = vrot.slane %v1171_v34, 5  ;;  %v1174_v35 = vld [vmem:[%s10466_s16 + $0x64] sm:$0xf]  ;;  %v1175_v40 = vld [vmem:[%s10466_s16 + $0x68] sm:$0x1] }
  0x71   : > { %v766_v60 = vrot.slane %v765_v51, 4  ;;  %v1314_v61 = vrot.slane %v1172_v39, 5  ;;  %v3077_v62 = vshrl.u32 %v9440_v44, 16  ;;  %v3080_v63 = vshll.u32 %v9440_v44, 16  ;;  %v9443_v41 = vld [vmem:[%s10466_s16 + $0x78] sm:$0xf] }
  0x72   : > { %v776_v5 = vrot.slane %v775_v56, 4  ;;  %v1312_v6 = vsel %vm10459_vm2, %v9120_v52, %v1311_v58  ;;  %v1313_v7 = vrot.slane %v1311_v58, 4  ;;  %v3086_v8 = vshll.u32 %v9441_v53, 16  ;;  %v10225_v56 = vld [vmem:[%s10466_s16 + $0x60] sm:$0xff]  }
  0x73   : > { %3406 = vrot.lane.b32.xlu0 %v9479_v54, %s10381_s22  ;;  %v771_v9 = vsel %vm10529_vm5, %v766_v60, %v770_v46  ;;  %v3079_v10 = vrot.slane %v3077_v62, 4  ;;  %v3082_v11 = vrot.slane %v3080_v63, 5  ;;  %v3090_v12 = vshrl.u32 %v9441_v53, 16  ;;  %v9444_v46 = vld [vmem:[%s10466_s16 + $0x7c] sm:$0xf] }
  0x74   : > { %1655 = vrot.lane.b32.xlu1 %v10220_v55, %s10381_s22  ;;  %v781_v14 = vsel %vm10529_vm5, %v776_v5, %v780_v57  ;;  %v1315_v15 = vsel %vm10459_vm2, %v1313_v7, %v1314_v61  ;;  %v3088_v16 = vrot.slane %v3086_v8, 5  ;;  %v3096_v17 = vshll.u32 %v9442_v59, 16  ;;  %v9445_v60 = vld [vmem:[%s10466_s16 + $0x80] sm:$0x1] }
  0x75   : > { %v9102_v19 = vcombine.low %v771_v9, %v781_v14  ;;  %v9138_v20 = vcombine.low %v1312_v6, %v1315_v15  ;;  %v3083_v21 = vor.u32 %v3082_v11, %v3079_v10  ;;  %v3092_v22 = vrot.slane %v3090_v12, 4  ;;  %v9304_v5 = vld [vmem:[%s10466_s16 + $0x80] sm:$0x1] }
  0x76   : > { %v3098_v25 = vrot.slane %v3096_v17, 5  ;;  %v9337_v26 = vrot.slane %v9299_v0, 9  ;;  %v2458_v27 = vrot.slane %v9300_v2, 5  ;;  %v2461_v28 = vrot.slane %v9301_v4, 5  ;;  %v9302_v2 = vld [vmem:[%s10466_s16 + $0x78] sm:$0xe] }
  0x77   : > { %2594 = vrot.lane.b32.xlu0 %v9354_v50, %s10382_s25  ;;  %v3084_v31 = vrot.slane %v3083_v21, 4  ;;  %v3093_v32 = vor.u32 %v3092_v22, %v3088_v16  ;;  %v783_v33 = vshrl.u32 %v557_v18, 16  ;;  %v786_v34 = vshll.u32 %v557_v18, 16  ;;  %v9303_v4 = vld [vmem:[%s10466_s16 + $0x7c] sm:$0xf] }
  0x78   : > { %1090 = vrot.lane.b32.xlu1 %v9102_v19, %s10382_s25  ;;  %v2459_v36 = vsel %vm10459_vm2, %v9337_v26, %v2458_v27  ;;  %v2460_v37 = vrot.slane %v2458_v27, 4  ;;  %v792_v38 = vshll.u32 %v558_v23, 16  ;;  %v796_v39 = vshrl.u32 %v558_v23, 16  ;;  %v560_v19 = vld [vmem:[%s10466_s16 + $0x6c] sm:$0xf] }
  0x79   : > { %v3089_v42 = vsel %vm10529_vm5, %v3084_v31, %v3088_v16  ;;  %v3094_v43 = vrot.slane %v3093_v32, 4  ;;  %v785_v44 = vrot.slane %v783_v33, 4  ;;  %v788_v45 = vrot.slane %v786_v34, 5 }
  0x7a   : > { %v2462_v47 = vsel %vm10459_vm2, %v2460_v37, %v2461_v28  ;;  %v794_v48 = vrot.slane %v792_v38, 5  ;;  %v798_v49 = vrot.slane %v796_v39, 4  ;;  %v802_v50 = vshll.u32 %v559_v24, 16 }
  0x7b   : > { %2796 = vrot.lane.b32.xlu0 %v10222_v30, %s10380_s19  ;;  %v3099_v51 = vsel %vm10529_vm5, %v3094_v43, %v3098_v25  ;;  %v9355_v52 = vcombine.low %v2459_v36, %v2462_v47  ;;  %v789_v53 = vor.u32 %v788_v45, %v785_v44  ;;  %v9121_v54 = vrot.slane %v1173_v29, 9  ;;  %v562_v25 = vld [vmem:[%s10466_s16 + $0x74] sm:$0x1]  ;;  %v10227_v30 = vld [vmem:[%s10466_s16 + $0x78] sm:$0xff]   ;;  %v1176_v43 = vld [vmem:[%s10466_s16 + $0x6c] sm:$0xe] }
  0x7c   : > { %1454 = vrot.lane.b32.xlu1 %v9138_v20, %s10380_s19  ;;  %v9480_v55 = vcombine.low %v3089_v42, %v3099_v51  ;;  %v799_v57 = vor.u32 %v798_v49, %v794_v48  ;;  %v804_v58 = vrot.slane %v802_v50, 5  ;;  %v1318_v59 = vrot.slane %v1174_v35, 5  ;;  %v561_v20 = vld [vmem:[%s10466_s16 + $0x70] sm:$0xf] }
  0x7d   : > { %v790_v61 = vrot.slane %v789_v53, 4  ;;  %v1321_v62 = vrot.slane %v1175_v40, 5  ;;  %v3101_v63 = vshrl.u32 %v9443_v41, 16  ;;  %v3104_v0 = vshll.u32 %v9443_v41, 16  ;;  %v10230_v50 = vld [vmem:[%s10466_s16 + $0x6c] sm:$0xff]  }
  0x7e   : > { %v800_v6 = vrot.slane %v799_v57, 4  ;;  %v1319_v7 = vsel %vm10459_vm2, %v9121_v54, %v1318_v59  ;;  %v1320_v8 = vrot.slane %v1318_v59, 4  ;;  %v3110_v9 = vshll.u32 %v9444_v46, 16  ;;  %v1178_v54 = vld [vmem:[%s10466_s16 + $0x74] sm:$0x1] }
  0x7f   : > { %3408 = vrot.lane.b32.xlu0 %v9480_v55, %s10381_s22  ;;  %v795_v10 = vsel %vm10529_vm5, %v790_v61, %v794_v48  ;;  %v3103_v11 = vrot.slane %v3101_v63, 4  ;;  %v3106_v12 = vrot.slane %v3104_v0, 5  ;;  %v3114_v14 = vshrl.u32 %v9444_v46, 16  ;;  %v1177_v48 = vld [vmem:[%s10466_s16 + $0x70] sm:$0xf] }
  0x80   : > { %1657 = vrot.lane.b32.xlu1 %v10225_v56, %s10381_s22  ;;  %v805_v15 = vsel %vm10529_vm5, %v800_v6, %v804_v58  ;;  %v1322_v16 = vsel %vm10459_vm2, %v1320_v8, %v1321_v62  ;;  %v3112_v17 = vrot.slane %v3110_v9, 5  ;;  %v3120_v18 = vshll.u32 %v9445_v60, 16  ;;  %v9446_v56 = vld [vmem:[%s10466_s16 + $0x84] sm:$0xf]  ;;  %v9447_v61 = vld [vmem:[%s10466_s16 + $0x88] sm:$0xf] }
  0x81   : > { %v9103_v21 = vcombine.low %v795_v10, %v805_v15  ;;  %v9139_v22 = vcombine.low %v1319_v7, %v1322_v16  ;;  %v3107_v23 = vor.u32 %v3106_v12, %v3103_v11  ;;  %v3116_v24 = vrot.slane %v3114_v14, 4  ;;  %v9448_v62 = vld [vmem:[%s10466_s16 + $0x8c] sm:$0x1]  ;;  %v10239_v6 = vld [vmem:[%s10466_s16] sm:$0xff]   ;;  %v10248_v8 = vld [vmem:[%s10466_s16 + $0x18] sm:$0xff]  }
  0x82   : > { %v3122_v26 = vrot.slane %v3120_v18, 5  ;;  %v9338_v27 = vrot.slane %v9302_v2, 9  ;;  %v2465_v28 = vrot.slane %v9303_v4, 5  ;;  %v2468_v29 = vrot.slane %v9304_v5, 5  ;;  %v10242_v7 = vld [vmem:[%s10466_s16 + $0xc] sm:$0xff]   ;;  %v10251_v9 = vld [vmem:[%s10466_s16 + $0x24] sm:$0xff]  }
  0x83   : > { %2596 = vrot.lane.b32.xlu0 %v9355_v52, %s10382_s25  ;;  %v3108_v31 = vrot.slane %v3107_v23, 4  ;;  %v3117_v32 = vor.u32 %v3116_v24, %v3112_v17  ;;  %v807_v33 = vshrl.u32 %v560_v19, 16  ;;  %v810_v34 = vshll.u32 %v560_v19, 16  ;;  %v10254_v10 = vld [vmem:[%s10466_s16 + $0x30] sm:$0xff]   ;;  %v10257_v16 = vld [vmem:[%s10466_s16 + $0x3c] sm:$0xff]   ;;  %515 = vst.msk [vmem:[#allocation3] sm:$0xff] %vm514_vm6, %v10239_v6 }
  0x84   : > { %1092 = vrot.lane.b32.xlu1 %v9103_v21, %s10382_s25  ;;  %v10880_v35 = vsel %vm10459_vm2, %v9338_v27, %v2465_v28  ;;  %v2467_v36 = vrot.slane %v2465_v28, 4  ;;  %v816_v37 = vshll.u32 %v561_v20, 16  ;;  %v820_v38 = vshrl.u32 %v561_v20, 16  ;;  %v10260_v21 = vld [vmem:[%s10466_s16 + $0x48] sm:$0xff]   ;;  %516 = vst.msk [vmem:[#allocation3 + $0x18] sm:$0xff] %vm514_vm6, %v10242_v7  ;;  %517 = vst.msk [vmem:[#allocation3 + $0x30] sm:$0xff] %vm514_vm6, %v10248_v8 }
  0x85   : > { %v3113_v39 = vsel %vm10529_vm5, %v3108_v31, %v3112_v17  ;;  %v3118_v40 = vrot.slane %v3117_v32, 4  ;;  %v809_v41 = vrot.slane %v807_v33, 4  ;;  %v812_v42 = vrot.slane %v810_v34, 5  ;;  %v9204_v31 = vld [vmem:[%s10466_s16 + $0x10] sm:$0xf]  ;;  %518 = vst.msk [vmem:[#allocation3 + $0x48] sm:$0xff] %vm514_vm6, %v10251_v9 }
  0x86   : > { %v2469_v44 = vsel %vm10459_vm2, %v2467_v36, %v2468_v29  ;;  %v818_v45 = vrot.slane %v816_v37, 5  ;;  %v822_v46 = vrot.slane %v820_v38, 4  ;;  %v826_v47 = vshll.u32 %v562_v25, 16  ;;  %v9205_v32 = vld [vmem:[%s10466_s16 + $0x14] sm:$0x1]  ;;  %v10232_v37 = vld [vmem:[%s10466_s16 + $0x84] sm:$0xff]  }
  0x87   : > { %2798 = vrot.lane.b32.xlu0 %v10227_v30, %s10380_s19  ;;  %v3123_v49 = vsel %vm10529_vm5, %v3118_v40, %v3122_v26  ;;  %v9356_v51 = vcombine.low %v10880_v35, %v2469_v44  ;;  %v813_v52 = vor.u32 %v812_v42, %v809_v41  ;;  %v10893_v53 = vpop.permute.xlu1 %2782  ;;  %v9122_v55 = vrot.slane %v1176_v43, 9  ;;  %v9203_v26 = vld [vmem:[%s10466_s16 + $0xc] sm:$0xf]  ;;  %v9305_v36 = vld [vmem:[%s10466_s16 + $0x84] sm:$0xe]  ;;  %519 = vst.msk [vmem:[#allocation3 + $0x60] sm:$0xff] %vm514_vm6, %v10254_v10 }
  0x88   : > { %1456 = vrot.lane.b32.xlu1 %v9139_v22, %s10380_s19  ;;  %v9481_v57 = vcombine.low %v3113_v39, %v3123_v49  ;;  %v823_v58 = vor.u32 %v822_v46, %v818_v45  ;;  %v828_v59 = vrot.slane %v826_v47, 5  ;;  %v1325_v60 = vrot.slane %v1177_v48, 5  ;;  %v10900_v2 = vpop.permute.xlu0 %2784  ;;  %v9306_v43 = vld [vmem:[%s10466_s16 + $0x88] sm:$0xf]  ;;  %520 = vst.msk [vmem:[#allocation3 + $0x78] sm:$0xff] %vm514_vm6, %v10257_v16  ;;  %521 = vst.msk [vmem:[#allocation3 + $0x90] sm:$0xff] %vm514_vm6, %v10260_v21 }
  0x89   : > { %v814_v63 = vrot.slane %v813_v52, 4  ;;  %v1328_v0 = vrot.slane %v1178_v54, 5  ;;  %v3125_v4 = vshrl.u32 %v9446_v56, 16  ;;  %v3128_v5 = vshll.u32 %v9446_v56, 16  ;;  %v9307_v47 = vld [vmem:[%s10466_s16 + $0x8c] sm:$0x1] }
  0x8a   : > { %v824_v11 = vrot.slane %v823_v58, 4  ;;  %v10909_v12 = vsel %vm10459_vm2, %v9122_v55, %v1325_v60  ;;  %v1327_v14 = vrot.slane %v1325_v60, 4  ;;  %v3134_v15 = vshll.u32 %v9447_v61, 16  ;;  %v9206_v8 = vld [vmem:[%s10466_s16 + $0x18] sm:$0xf] }
  0x8b   : > { %3410 = vrot.lane.b32.xlu0 %v9481_v57, %s10381_s22  ;;  %v819_v17 = vsel %vm10529_vm5, %v814_v63, %v818_v45  ;;  %v3127_v18 = vrot.slane %v3125_v4, 4  ;;  %v3130_v19 = vrot.slane %v3128_v5, 5  ;;  %v3138_v20 = vshrl.u32 %v9447_v61, 16  ;;  %v10922_v30 = vpop.permute.xlu1 %1643  ;;  %v563_v61 = vld [vmem:[%s10466_s16 + $0x78] sm:$0xf] }
  0x8c   : > { %1659 = vrot.lane.b32.xlu1 %v10230_v50, %s10381_s22  ;;  %v829_v22 = vsel %vm10529_vm5, %v824_v11, %v828_v59  ;;  %v1329_v23 = vsel %vm10459_vm2, %v1327_v14, %v1328_v0  ;;  %v3136_v24 = vrot.slane %v3134_v15, 5  ;;  %v3144_v25 = vshll.u32 %v9448_v62, 16  ;;  %v564_v62 = vld [vmem:[%s10466_s16 + $0x7c] sm:$0xf]  ;;  %v565_v63 = vld [vmem:[%s10466_s16 + $0x80] sm:$0x1] }
  0x8d   : > { %v9104_v27 = vcombine.low %v819_v17, %v829_v22  ;;  %v3131_v28 = vor.u32 %v3130_v19, %v3127_v18  ;;  %v3140_v29 = vrot.slane %v3138_v20, 4  ;;  %v9140_v33 = vcombine.low %v10909_v12, %v1329_v23  ;;  %v10235_v4 = vld [vmem:[%s10466_s16 + $0x78] sm:$0xff]   ;;  %v9208_v16 = vld [vmem:[%s10466_s16 + $0x20] sm:$0x1] }
  0x8e   : > { %v3146_v34 = vrot.slane %v3144_v25, 5  ;;  %v1771_v35 = vshrl.u32 %v9203_v26, 16  ;;  %v1774_v41 = vshll.u32 %v9203_v26, 16  ;;  %v1780_v42 = vshll.u32 %v9204_v31, 16  ;;  %v9207_v15 = vld [vmem:[%s10466_s16 + $0x1c] sm:$0xf] }
  0x8f   : > { %2598 = vrot.lane.b32.xlu0 %v9356_v51, %s10382_s25  ;;  %v3132_v38 = vrot.slane %v3131_v28, 4  ;;  %v3141_v39 = vor.u32 %v3140_v29, %v3136_v24  ;;  %v10930_v40 = vpop.permute.xlu0 %2580  ;;  %v1784_v45 = vshrl.u32 %v9204_v31, 16  ;;  %v1790_v46 = vshll.u32 %v9205_v32, 16  ;;  %v10263_v21 = vld [vmem:[%s10466_s16 + $0x54] sm:$0xff]  }
  0x90   : > { %1094 = vrot.lane.b32.xlu1 %v9104_v27, %s10382_s25  ;;  %v1773_v44 = vrot.slane %v1771_v35, 4  ;;  %v9339_v48 = vrot.slane %v9305_v36, 9  ;;  %v1776_v51 = vrot.slane %v1774_v41, 5  ;;  %v1782_v52 = vrot.slane %v1780_v42, 5  ;;  %522 = vst.msk [vmem:[#allocation3 + $0xa8] sm:$0xff] %vm514_vm6, %v10263_v21 }
  0x91   : > { %v3137_v49 = vsel %vm10529_vm5, %v3132_v38, %v3136_v24  ;;  %v3142_v50 = vrot.slane %v3141_v39, 4  ;;  %v1786_v54 = vrot.slane %v1784_v45, 4  ;;  %v1792_v55 = vrot.slane %v1790_v46, 5  ;;  %v10947_v60 = vpop.permute.xlu1 %1440  ;;  %v1179_v36 = vld [vmem:[%s10466_s16 + $0x78] sm:$0xe] }
  0x92   : > { %v2472_v56 = vrot.slane %v9306_v43, 5  ;;  %v2475_v57 = vrot.slane %v9307_v47, 5  ;;  %v1777_v59 = vor.u32 %v1776_v51, %v1773_v44  ;;  %v831_v10 = vshrl.u32 %v563_v61, 16  ;;  %v10237_v43 = vld [vmem:[%s10466_s16 + $0x90] sm:$0xff]   ;;  %v1181_v44 = vld [vmem:[%s10466_s16 + $0x80] sm:$0x1] }
  0x93   : > { %2800 = vrot.lane.b32.xlu0 %v10232_v37, %s10380_s19  ;;  %v3147_v58 = vsel %vm10529_vm5, %v3142_v50, %v3146_v34  ;;  %v1787_v5 = vor.u32 %v1786_v54, %v1782_v52  ;;  %v834_v11 = vshll.u32 %v563_v61, 16  ;;  %v840_v12 = vshll.u32 %v564_v62, 16  ;;  %v10957_v14 = vpop.permute.xlu0 %2582  ;;  %v1180_v37 = vld [vmem:[%s10466_s16 + $0x7c] sm:$0xf]  ;;  %v9450_v61 = vld [vmem:[%s10466_s16 + $0x94] sm:$0xf] }
  0x94   : > { %1458 = vrot.lane.b32.xlu1 %v9140_v33, %s10380_s19  ;;  %v9482_v0 = vcombine.low %v3137_v49, %v3147_v58  ;;  %v2473_v6 = vsel %vm10459_vm2, %v9339_v48, %v2472_v56  ;;  %v2474_v7 = vrot.slane %v2472_v56, 4  ;;  %v1778_v9 = vrot.slane %v1777_v59, 4  ;;  %v9449_v59 = vld [vmem:[%s10466_s16 + $0x90] sm:$0xf] }
  0x95   : > { %v1788_v17 = vrot.slane %v1787_v5, 4  ;;  %v844_v19 = vshrl.u32 %v564_v62, 16  ;;  %v850_v20 = vshll.u32 %v565_v63, 16  ;;  %v833_v24 = vrot.slane %v831_v10, 4  ;;  %v1443_v35 = vpop.permute.xlu1 %1442 }
  0x96   : > { %v2476_v18 = vsel %vm10459_vm2, %v2474_v7, %v2475_v57  ;;  %v1783_v22 = vsel %vm10529_vm5, %v1778_v9, %v1782_v52  ;;  %v836_v25 = vrot.slane %v834_v11, 5  ;;  %v842_v27 = vrot.slane %v840_v12, 5 }
  0x97   : > { %3412 = vrot.lane.b32.xlu0 %v9482_v0, %s10381_s22  ;;  %v9357_v23 = vcombine.low %v2473_v6, %v2476_v18  ;;  %v1793_v26 = vsel %vm10529_vm5, %v1788_v17, %v1792_v55  ;;  %v846_v28 = vrot.slane %v844_v19, 4  ;;  %v852_v29 = vrot.slane %v850_v20, 5  ;;  %v9308_v19 = vld [vmem:[%s10466_s16 + $0x90] sm:$0xe]  ;;  %v9309_v20 = vld [vmem:[%s10466_s16 + $0x94] sm:$0xf] }
  0x98   : > { %1661 = vrot.lane.b32.xlu1 %v10235_v4, %s10381_s22  ;;  %v9257_v31 = vcombine.low %v1783_v22, %v1793_v26  ;;  %v837_v32 = vor.u32 %v836_v25, %v833_v24  ;;  %v1795_v33 = vshrl.u32 %v9206_v8, 16  ;;  %v1798_v34 = vshll.u32 %v9206_v8, 16  ;;  %v9310_v26 = vld [vmem:[%s10466_s16 + $0x98] sm:$0x1] }
  0x99   : > { %v847_v38 = vor.u32 %v846_v28, %v842_v27  ;;  %v1804_v39 = vshll.u32 %v9207_v15, 16  ;;  %v1808_v41 = vshrl.u32 %v9207_v15, 16  ;;  %v1814_v42 = vshll.u32 %v9208_v16, 16 }
  0x9a   : > { %2274 = vst.msk [vmem:[#allocation3 + $0x8] sm:$0xff] %vm514_vm6, %v9257_v31  ;;  %v838_v45 = vrot.slane %v837_v32, 4  ;;  %v1797_v46 = vrot.slane %v1795_v33, 4  ;;  %v1800_v47 = vrot.slane %v1798_v34, 5  ;;  %v9123_v48 = vrot.slane %v1179_v36, 9 }
  0x9b   : > { %2600 = vrot.lane.b32.xlu0 %v9357_v23, %s10382_s25  ;;  %v1077_v49 = vpop.permute.xlu0 %1076  ;;  %2634 = vst.msk [vmem:[#allocation3 + $0x8] sm:$0xff] %vm1130_vm7, %v10930_v40  ;;  %v848_v50 = vrot.slane %v847_v38, 4  ;;  %v1806_v51 = vrot.slane %v1804_v39, 5  ;;  %v1810_v52 = vrot.slane %v1808_v41, 4  ;;  %v1816_v54 = vrot.slane %v1814_v42, 5 }
  0x9c   : > { %1131 = vst.msk [vmem:[#allocation3] sm:$0xff] %vm1130_vm7, %v1077_v49  ;;  %v843_v55 = vsel %vm10529_vm5, %v838_v45, %v842_v27  ;;  %v1801_v56 = vor.u32 %v1800_v47, %v1797_v46  ;;  %v1332_v57 = vrot.slane %v1180_v37, 5  ;;  %v1335_v58 = vrot.slane %v1181_v44, 5  ;;  %v9451_v40 = vld [vmem:[%s10466_s16 + $0x98] sm:$0x1] }
  0x9d   : > { %v853_v62 = vsel %vm10529_vm5, %v848_v50, %v852_v29  ;;  %v1811_v63 = vor.u32 %v1810_v52, %v1806_v51  ;;  %1495 = vst.msk [vmem:[#allocation3] sm:$0xff] %vm1494_vm8, %v10947_v60  ;;  %2836 = vst.msk [vmem:[#allocation3 + $0x8] sm:$0xff] %vm1494_vm8, %v10893_v53  ;;  %v3149_v9 = vshrl.u32 %v9449_v59, 16  ;;  %v3152_v10 = vshll.u32 %v9449_v59, 16  ;;  %v10241_v29 = vld [vmem:[%s10466_s16 + $0x84] sm:$0xff]  }
  0x9e   : > { %v9105_v0 = vcombine.low %v843_v55, %v853_v62  ;;  %v1802_v4 = vrot.slane %v1801_v56, 4  ;;  %v1333_v5 = vsel %vm10459_vm2, %v9123_v48, %v1332_v57  ;;  %v1334_v6 = vrot.slane %v1332_v57, 4  ;;  %1698 = vst.msk [vmem:[#allocation3] sm:$0xff] %vm1697_vm9, %v10922_v30  ;;  %v566_v37 = vld [vmem:[%s10466_s16 + $0x84] sm:$0xf] }
  0x9f   : > { %2802 = vrot.lane.b32.xlu0 %v10237_v43, %s10380_s19  ;;  %v1079_v7 = vpop.permute.xlu1 %1078  ;;  %v1812_v8 = vrot.slane %v1811_v63, 4  ;;  %v3158_v11 = vshll.u32 %v9450_v61, 16  ;;  %v3162_v12 = vshrl.u32 %v9450_v61, 16  ;;  %v3168_v15 = vshll.u32 %v9451_v40, 16  ;;  %v567_v38 = vld [vmem:[%s10466_s16 + $0x88] sm:$0xf] }
  0xa0   : > { %1132 = vst.msk [vmem:[#allocation3 + $0x18] sm:$0xff] %vm1130_vm7, %v1079_v7  ;;  %1096 = vrot.lane.b32.xlu1 %v9105_v0, %s10382_s25  ;;  %v1807_v60 = vsel %vm10529_vm5, %v1802_v4, %v1806_v51  ;;  %v1336_v53 = vsel %vm10459_vm2, %v1334_v6, %v1335_v58  ;;  %v3151_v17 = vrot.slane %v3149_v9, 4  ;;  %v3154_v18 = vrot.slane %v3152_v10, 5  ;;  %v568_v41 = vld [vmem:[%s10466_s16 + $0x8c] sm:$0x1] }
  0xa1   : > { %1496 = vst.msk [vmem:[#allocation3 + $0x18] sm:$0xff] %vm1494_vm8, %v1443_v35  ;;  %v1817_v30 = vsel %vm10529_vm5, %v1812_v8, %v1816_v54  ;;  %v9141_v16 = vcombine.low %v1333_v5, %v1336_v53  ;;  %v3160_v22 = vrot.slane %v3158_v11, 5  ;;  %v3164_v23 = vrot.slane %v3162_v12, 4  ;;  %v1182_v58 = vld [vmem:[%s10466_s16 + $0x84] sm:$0xe]  ;;  %v10245_v11 = vld [vmem:[%s10466_s16 + $0x9c] sm:$0xff]  }
  0xa2   : > { %v9258_v21 = vcombine.low %v1807_v60, %v1817_v30  ;;  %v3170_v24 = vrot.slane %v3168_v15, 5  ;;  %v3155_v28 = vor.u32 %v3154_v18, %v3151_v17  ;;  %v9340_v31 = vrot.slane %v9308_v19, 9  ;;  %v1183_v59 = vld [vmem:[%s10466_s16 + $0x88] sm:$0xf]  ;;  %v1184_v63 = vld [vmem:[%s10466_s16 + $0x8c] sm:$0x1] }
  0xa3   : > { %v3395_v25 = vpop.permute.xlu0 %3394  ;;  %v1646_v27 = vpop.permute.xlu1 %1645  ;;  %v2479_v32 = vrot.slane %v9309_v20, 5  ;;  %v2482_v33 = vrot.slane %v9310_v26, 5  ;;  %v3165_v34 = vor.u32 %v3164_v23, %v3160_v22  ;;  %v855_v42 = vshrl.u32 %v566_v37, 16  ;;  %v9209_v4 = vld [vmem:[%s10466_s16 + $0x24] sm:$0xf] }
  0xa4   : > { %3448 = vst.msk [vmem:[#allocation3 + $0x8] sm:$0xff] %vm1697_vm9, %v3395_v25  ;;  %1699 = vst.msk [vmem:[#allocation3 + $0x18] sm:$0xff] %vm1697_vm9, %v1646_v27  ;;  %1460 = vrot.lane.b32.xlu1 %v9141_v16, %s10380_s19  ;;  %v3156_v35 = vrot.slane %v3155_v28, 4  ;;  %v858_v43 = vshll.u32 %v566_v37, 16  ;;  %v864_v44 = vshll.u32 %v567_v38, 16  ;;  %v874_v47 = vshll.u32 %v568_v41, 16 }
  0xa5   : > { %2275 = vst.msk [vmem:[#allocation3 + $0x20] sm:$0xff] %vm514_vm6, %v9258_v21  ;;  %v2481_v36 = vrot.slane %v2479_v32, 4  ;;  %v3166_v39 = vrot.slane %v3165_v34, 4  ;;  %v2480_v46 = vsel %vm10459_vm2, %v9340_v31, %v2479_v32  ;;  %v857_v49 = vrot.slane %v855_v42, 4  ;;  %v9210_v7 = vld [vmem:[%s10466_s16 + $0x28] sm:$0xf] }
  0xa6   : > { %2635 = vst.msk [vmem:[#allocation3 + $0x20] sm:$0xff] %vm1130_vm7, %v10957_v14  ;;  %v3161_v45 = vsel %vm10529_vm5, %v3156_v35, %v3160_v22  ;;  %v868_v14 = vshrl.u32 %v567_v38, 16  ;;  %v860_v50 = vrot.slane %v858_v43, 5  ;;  %v866_v54 = vrot.slane %v864_v44, 5  ;;  %v9211_v8 = vld [vmem:[%s10466_s16 + $0x2c] sm:$0x1] }
  0xa7   : > { %2837 = vst.msk [vmem:[#allocation3 + $0x20] sm:$0xff] %vm1494_vm8, %v10900_v2  ;;  %v3171_v48 = vsel %vm10529_vm5, %v3166_v39, %v3170_v24  ;;  %v2483_v2 = vsel %vm10459_vm2, %v2481_v36, %v2482_v33  ;;  %v876_v56 = vrot.slane %v874_v47, 5  ;;  %v9124_v40 = vrot.slane %v1182_v58, 9  ;;  %v3790_v20 = vld [vmem:[#allocation3] sm:$0xff]  ;;  %v9493_v32 = vld [vmem:[%s10466_s16 + $0x20] sm:$0x1] }
  0xa8   : > { %1663 = vrot.lane.b32.xlu1 %v10241_v29, %s10381_s22  ;;  %v9483_v52 = vcombine.low %v3161_v45, %v3171_v48  ;;  %v870_v55 = vrot.slane %v868_v14, 4  ;;  %v861_v57 = vor.u32 %v860_v50, %v857_v49  ;;  %v9358_v61 = vcombine.low %v2480_v46, %v2483_v2  ;;  %v9491_v25 = vld [vmem:[%s10466_s16 + $0x18] sm:$0xe]  ;;  %v9492_v26 = vld [vmem:[%s10466_s16 + $0x1c] sm:$0xf]  ;;  %v10249_v58 = vld [vmem:[%s10466_s16 + $0x90] sm:$0xff]  }
  0xa9   : > { %v3397_v51 = vpop.permute.xlu0 %3396  ;;  %v1339_v0 = vrot.slane %v1183_v59, 5  ;;  %v1342_v6 = vrot.slane %v1184_v63, 5  ;;  %v1819_v12 = vshrl.u32 %v9209_v4, 16  ;;  %v1822_v17 = vshll.u32 %v9209_v4, 16  ;;  %v9452_v33 = vld [vmem:[%s10466_s16 + $0x9c] sm:$0xf] }
  0xaa   : > { %3449 = vst.msk [vmem:[#allocation3 + $0x20] sm:$0xff] %vm1697_vm9, %v3397_v51  ;;  %3414 = vrot.lane.b32.xlu0 %v9483_v52, %s10381_s22  ;;  %v871_v62 = vor.u32 %v870_v55, %v866_v54  ;;  %v862_v5 = vrot.slane %v861_v57, 4  ;;  %v1828_v18 = vshll.u32 %v9210_v7, 16  ;;  %v1832_v19 = vshrl.u32 %v9210_v7, 16  ;;  %v9453_v39 = vld [vmem:[%s10466_s16 + $0xa0] sm:$0xf] }
  0xab   : > { %v1340_v60 = vsel %vm10459_vm2, %v9124_v40, %v1339_v0  ;;  %v1341_v53 = vrot.slane %v1339_v0, 4  ;;  %v3791_v30 = vld [vmem:[#allocation3 + $0x8] sm:$0xff]  ;;  %v1821_v23 = vrot.slane %v1819_v12, 4  ;;  %v1838_v24 = vshll.u32 %v9211_v8, 16  ;;  %v9495_v51 = vld [vmem:[%s10466_s16 + $0x28] sm:$0xf] }
  0xac   : > { %v872_v10 = vrot.slane %v871_v62, 4  ;;  %v867_v16 = vsel %vm10529_vm5, %v862_v5, %v866_v54  ;;  %4081 = vmatprep.mubr.bf16.mxu0 %v3791_v30  ;;  %v1824_v29 = vrot.slane %v1822_v17, 5  ;;  %v1830_v31 = vrot.slane %v1828_v18, 5  ;;  %v9454_v44 = vld [vmem:[%s10466_s16 + $0xa4] sm:$0x1]  ;;  %v3793_v4 = vld [vmem:[#allocation3 + $0x18] sm:$0xff] }
  0xad   : > { %v11037_v9 = vpop.permute.xlu0 %2584  ;;  %v1343_v22 = vsel %vm10459_vm2, %v1341_v53, %v1342_v6  ;;  %4082 = vmatmul.mubr.bf16.vlgmr.msra.gmra.mrb[0].mxu0 %v3790_v20  ;;  %v1834_v35 = vrot.slane %v1832_v19, 4  ;;  %v1840_v36 = vrot.slane %v1838_v24, 5  ;;  %v9545_v37 = vrot.slane %v9491_v25, 9  ;;  %v9494_v50 = vld [vmem:[%s10466_s16 + $0x24] sm:$0xe] }
  0xae   : > { %v1081_v15 = vpop.permute.xlu1 %1080  ;;  %2602 = vrot.lane.b32.xlu0 %v9358_v61, %s10382_s25  ;;  %v877_v21 = vsel %vm10529_vm5, %v872_v10, %v876_v56  ;;  %v9142_v28 = vcombine.low %v1340_v60, %v1343_v22  ;;  %v3576_v38 = vrot.slane %v9492_v26, 5  ;;  %v1825_v42 = vor.u32 %v1824_v29, %v1821_v23  ;;  %v9496_v57 = vld [vmem:[%s10466_s16 + $0x2c] sm:$0x1]  ;;  %v9311_v10 = vld [vmem:[%s10466_s16 + $0x9c] sm:$0xe] }
  0xaf   : > { %1133 = vst.msk [vmem:[#allocation3 + $0x30] sm:$0xff] %vm1130_vm7, %v1081_v15  ;;  %v9106_v27 = vcombine.low %v867_v16, %v877_v21  ;;  %v3579_v43 = vrot.slane %v9493_v32, 5  ;;  %v3173_v45 = vshrl.u32 %v9452_v33, 16  ;;  %v3176_v46 = vshll.u32 %v9452_v33, 16  ;;  %v9312_v30 = vld [vmem:[%s10466_s16 + $0xa0] sm:$0xf] }
  0xb0   : > { %v1835_v47 = vor.u32 %v1834_v35, %v1830_v31  ;;  %v3577_v48 = vsel %vm10459_vm2, %v9545_v37, %v3576_v38  ;;  %v3578_v2 = vrot.slane %v3576_v38, 4  ;;  %v3182_v49 = vshll.u32 %v9453_v39, 16  ;;  %v9313_v20 = vld [vmem:[%s10466_s16 + $0xa4] sm:$0x1]  ;;  %v569_v21 = vld [vmem:[%s10466_s16 + $0x90] sm:$0xf] }
  0xb1   : > { %v11054_v34 = vpop.permute.xlu0 %2786  ;;  %1098 = vrot.lane.b32.xlu1 %v9106_v27, %s10382_s25  ;;  %v3794_v14 = vld [vmem:[#allocation3 + $0x20] sm:$0xff]  ;;  %v1826_v52 = vrot.slane %v1825_v42, 4  ;;  %v3175_v54 = vrot.slane %v3173_v45, 4  ;;  %v3178_v55 = vrot.slane %v3176_v46, 5  ;;  %v3186_v56 = vshrl.u32 %v9453_v39, 16  ;;  %v10268_v29 = vld [vmem:[%s10466_s16 + $0x6c] sm:$0xff]  }
  0xb2   : > { %v1445_v41 = vpop.permute.xlu1 %1444  ;;  %2804 = vrot.lane.b32.xlu0 %v10245_v11, %s10380_s19  ;;  %4089 = vmatprep.mubr.bf16.mxu0 %v3794_v14  ;;  %v1836_v61 = vrot.slane %v1835_v47, 4  ;;  %v3580_v62 = vsel %vm10459_vm2, %v3578_v2, %v3579_v43  ;;  %v3184_v63 = vrot.slane %v3182_v49, 5  ;;  %v3192_v40 = vshll.u32 %v9454_v44, 16  ;;  %v10266_v11 = vld [vmem:[%s10466_s16 + $0x60] sm:$0xff]   ;;  %v570_v27 = vld [vmem:[%s10466_s16 + $0x94] sm:$0xf] }
  0xb3   : > { %1497 = vst.msk [vmem:[#allocation3 + $0x30] sm:$0xff] %vm1494_vm8, %v1445_v41  ;;  %v1831_v5 = vsel %vm10529_vm5, %v1826_v52, %v1830_v31  ;;  %v9563_v6 = vcombine.low %v3577_v48, %v3580_v62  ;;  %v3179_v7 = vor.u32 %v3178_v55, %v3175_v54  ;;  %v3188_v8 = vrot.slane %v3186_v56, 4  ;;  %v571_v35 = vld [vmem:[%s10466_s16 + $0x98] sm:$0x1]  ;;  %v1185_v45 = vld [vmem:[%s10466_s16 + $0x90] sm:$0xe] }
  0xb4   : > { %v1841_v60 = vsel %vm10529_vm5, %v1836_v61, %v1840_v36  ;;  %v3194_v53 = vrot.slane %v3192_v40, 5  ;;  %v9546_v12 = vrot.slane %v9494_v50, 9  ;;  %v3583_v15 = vrot.slane %v9495_v51, 5  ;;  %523 = vst.msk [vmem:[#allocation3 + $0xc0] sm:$0xff] %vm514_vm6, %v10266_v11  ;;  %524 = vst.msk [vmem:[#allocation3 + $0xd8] sm:$0xff] %vm514_vm6, %v10268_v29  ;;  %v10250_v11 = vld [vmem:[%s10466_s16 + $0xa8] sm:$0xff]  }
  0xb5   : > { %v11067_v59 = vpop.permute.xlu0 %3398  ;;  %1462 = vrot.lane.b32.xlu1 %v9142_v28, %s10380_s19  ;;  %4090 = vmatmul.mubr.bf16.gmra.mrb[4].mxu0 %v3793_v4  ;;  %v9259_v16 = vcombine.low %v1831_v5, %v1841_v60  ;;  %3772 = vst.msk [vmem:[#allocation3 + $0x10] sm:$0xff] %vm514_vm6, %v9563_v6  ;;  %v3180_v17 = vrot.slane %v3179_v7, 4  ;;  %v3189_v18 = vor.u32 %v3188_v8, %v3184_v63  ;;  %v3586_v19 = vrot.slane %v9496_v57, 5  ;;  %v1186_v46 = vld [vmem:[%s10466_s16 + $0x94] sm:$0xf] }
  0xb6   : > { %v1648_v0 = vpop.permute.xlu1 %1647  ;;  %v3584_v23 = vsel %vm10459_vm2, %v9546_v12, %v3583_v15  ;;  %v3585_v24 = vrot.slane %v3583_v15, 4  ;;  %v9341_v25 = vrot.slane %v9311_v10, 9  ;;  %v2486_v26 = vrot.slane %v9312_v30, 5  ;;  %v1187_v50 = vld [vmem:[%s10466_s16 + $0x98] sm:$0x1] }
  0xb7   : > { %1700 = vst.msk [vmem:[#allocation3 + $0x30] sm:$0xff] %vm1697_vm9, %v1648_v0  ;;  %v3185_v31 = vsel %vm10529_vm5, %v3180_v17, %v3184_v63  ;;  %v3190_v32 = vrot.slane %v3189_v18, 4  ;;  %v2489_v33 = vrot.slane %v9313_v20, 5  ;;  %v879_v36 = vshrl.u32 %v569_v21, 16  ;;  %v9212_v51 = vld [vmem:[%s10466_s16 + $0x30] sm:$0xf] }
  0xb8   : > { %2276 = vst.msk [vmem:[#allocation3 + $0x38] sm:$0xff] %vm514_vm6, %v9259_v16  ;;  %v3587_v37 = vsel %vm10459_vm2, %v3585_v24, %v3586_v19  ;;  %v2487_v38 = vsel %vm10459_vm2, %v9341_v25, %v2486_v26  ;;  %v2488_v39 = vrot.slane %v2486_v26, 4  ;;  %v882_v41 = vshll.u32 %v569_v21, 16  ;;  %v9213_v57 = vld [vmem:[%s10466_s16 + $0x34] sm:$0xf] }
  0xb9   : > { %v11083_v22 = vpop.permute.xlu0 %2586  ;;  %1665 = vrot.lane.b32.xlu1 %v10249_v58, %s10381_s22  ;;  %2636 = vst.msk [vmem:[#allocation3 + $0x38] sm:$0xff] %vm1130_vm7, %v11037_v9  ;;  %v3195_v42 = vsel %vm10529_vm5, %v3190_v32, %v3194_v53  ;;  %v9564_v43 = vcombine.low %v3584_v23, %v3587_v37  ;;  %v881_v9 = vrot.slane %v879_v36, 4  ;;  %v888_v44 = vshll.u32 %v570_v27, 16  ;;  %v9214_v40 = vld [vmem:[%s10466_s16 + $0x38] sm:$0x1] }
  0xba   : > { %v1083_v28 = vpop.permute.xlu1 %1082  ;;  %2838 = vst.msk [vmem:[#allocation3 + $0x38] sm:$0xff] %vm1494_vm8, %v11054_v34  ;;  %v9484_v47 = vcombine.low %v3185_v31, %v3195_v42  ;;  %v2490_v48 = vsel %vm10459_vm2, %v2488_v39, %v2489_v33  ;;  %v884_v2 = vrot.slane %v882_v41, 5  ;;  %v892_v49 = vshrl.u32 %v570_v27, 16  ;;  %v9455_v12 = vld [vmem:[%s10466_s16 + $0xa8] sm:$0xf] }
  0xbb   : > { %1134 = vst.msk [vmem:[#allocation3 + $0x48] sm:$0xff] %vm1130_vm7, %v1083_v28  ;;  %v9359_v52 = vcombine.low %v2487_v38, %v2490_v48  ;;  %v890_v54 = vrot.slane %v888_v44, 5  ;;  %v898_v55 = vshll.u32 %v571_v35, 16  ;;  %v9125_v56 = vrot.slane %v1185_v45, 9  ;;  %v9456_v20 = vld [vmem:[%s10466_s16 + $0xac] sm:$0xf] }
  0xbc   : > { %3450 = vst.msk [vmem:[#allocation3 + $0x38] sm:$0xff] %vm1697_vm9, %v11067_v59  ;;  %v3792_v58 = vld [vmem:[#allocation3 + $0x10] sm:$0xff]  ;;  %3416 = vrot.lane.b32.xlu0 %v9484_v47, %s10381_s22  ;;  %v885_v61 = vor.u32 %v884_v2, %v881_v9  ;;  %v894_v59 = vrot.slane %v892_v49, 4  ;;  %v1346_v62 = vrot.slane %v1186_v46, 5  ;;  %v1349_v63 = vrot.slane %v1187_v50, 5  ;;  %v10269_v35 = vld [vmem:[%s10466_s16 + $0x78] sm:$0xff]  }
  0xbd   : > { %v11109_v14 = vpop.permute.xlu0 %2788  ;;  %3773 = vst.msk [vmem:[#allocation3 + $0x28] sm:$0xff] %vm514_vm6, %v9564_v43  ;;  %10094 = vmatprep.mubr.msk.bf16.mxu1 %vm514_vm6, %v3792_v58  ;;  %v900_v0 = vrot.slane %v898_v55, 5  ;;  %v1843_v4 = vshrl.u32 %v9212_v51, 16  ;;  %v1846_v5 = vshll.u32 %v9212_v51, 16  ;;  %v1852_v6 = vshll.u32 %v9213_v57, 16  ;;  %525 = vst.msk [vmem:[#allocation3 + $0xf0] sm:$0xff] %vm514_vm6, %v10269_v35 }
  0xbe   : > { %v1447_v34 = vpop.permute.xlu1 %1446  ;;  %v886_v8 = vrot.slane %v885_v61, 4  ;;  %v895_v10 = vor.u32 %v894_v59, %v890_v54  ;;  %v11128_v60 = vsel %vm10459_vm2, %v9125_v56, %v1346_v62  ;;  %v1348_v53 = vrot.slane %v1346_v62, 4  ;;  %v3796_v15 = vld [vmem:[#allocation3 + $0x30] sm:$0xff]  ;;  %v9457_v26 = vld [vmem:[%s10466_s16 + $0xb0] sm:$0x1] }
  0xbf   : > { %1498 = vst.msk [vmem:[#allocation3 + $0x48] sm:$0xff] %vm1494_vm8, %v1447_v34  ;;  %v1845_v16 = vrot.slane %v1843_v4, 4  ;;  %v1848_v17 = vrot.slane %v1846_v5, 5  ;;  %v11131_v18 = vrot.slane %v1852_v6, 5  ;;  %v1856_v19 = vshrl.u32 %v9213_v57, 16  ;;  %v10270_v61 = vld [vmem:[%s10466_s16 + $0x84] sm:$0xff]  }
  0xc0   : > { %2604 = vrot.lane.b32.xlu0 %v9359_v52, %s10382_s25  ;;  %v891_v21 = vsel %vm10529_vm5, %v886_v8, %v890_v54  ;;  %v896_v23 = vrot.slane %v895_v10, 4  ;;  %v11140_v24 = vsel %vm10459_vm2, %v1348_v53, %v1349_v63  ;;  %v1862_v25 = vshll.u32 %v9214_v40, 16  ;;  %v9497_v42 = vld [vmem:[%s10466_s16 + $0x30] sm:$0xe]  ;;  %v9498_v47 = vld [vmem:[%s10466_s16 + $0x34] sm:$0xf] }
  0xc1   : > { %v11123_v7 = vpop.permute.xlu0 %3400  ;;  %v9143_v27 = vcombine.low %v11128_v60, %v11140_v24  ;;  %v1849_v28 = vor.u32 %v1848_v17, %v1845_v16  ;;  %v1858_v29 = vrot.slane %v1856_v19, 4  ;;  %v3197_v31 = vshrl.u32 %v9455_v12, 16  ;;  %v9499_v48 = vld [vmem:[%s10466_s16 + $0x38] sm:$0x1]  ;;  %v9314_v34 = vld [vmem:[%s10466_s16 + $0xa8] sm:$0xe] }
  0xc2   : > { %v1650_v30 = vpop.permute.xlu1 %1649  ;;  %v901_v37 = vsel %vm10529_vm5, %v896_v23, %v900_v0  ;;  %v1864_v38 = vrot.slane %v1862_v25, 5  ;;  %v3200_v39 = vshll.u32 %v9455_v12, 16  ;;  %v3206_v41 = vshll.u32 %v9456_v20, 16  ;;  %v9315_v57 = vld [vmem:[%s10466_s16 + $0xac] sm:$0xf]  ;;  %v10252_v6 = vld [vmem:[%s10466_s16 + $0x9c] sm:$0xff]  }
  0xc3   : > { %1701 = vst.msk [vmem:[#allocation3 + $0x48] sm:$0xff] %vm1697_vm9, %v1650_v30  ;;  %v3797_v32 = vld [vmem:[#allocation3 + $0x38] sm:$0xff]  ;;  %v9107_v9 = vcombine.low %v891_v21, %v901_v37  ;;  %v1850_v44 = vrot.slane %v1849_v28, 4  ;;  %v1859_v45 = vor.u32 %v1858_v29, %v11131_v18  ;;  %v3199_v46 = vrot.slane %v3197_v31, 4  ;;  %v9500_v60 = vld [vmem:[%s10466_s16 + $0x3c] sm:$0xe] }
  0xc4   : > { %v3795_v36 = vld [vmem:[#allocation3 + $0x28] sm:$0xff]  ;;  %4097 = vmatprep.mubr.bf16.mxu0 %v3797_v32  ;;  %2806 = vrot.lane.b32.xlu0 %v10250_v11, %s10380_s19  ;;  %v3202_v2 = vrot.slane %v3200_v39, 5  ;;  %v11158_v49 = vrot.slane %v3206_v41, 5  ;;  %v3210_v50 = vshrl.u32 %v9456_v20, 16  ;;  %v3216_v51 = vshll.u32 %v9457_v26, 16  ;;  %526 = vst.msk [vmem:[#allocation3 + $0x108] sm:$0xff] %vm514_vm6, %v10270_v61 }
  0xc5   : > { %v11145_v33 = vpop.permute.xlu0 %2588  ;;  %10095 = vmatmul.mubr.msk.bf16.vlgmr.msra.gmra.mrb[0].mxu1 %vm514_vm6, %v3795_v36  ;;  %4098 = vmatmul.mubr.bf16.gmra.mrb[8].mxu0 %v3796_v15  ;;  %v1855_v52 = vsel %vm10529_vm5, %v1850_v44, %v11131_v18  ;;  %v1860_v54 = vrot.slane %v1859_v45, 4  ;;  %v9547_v55 = vrot.slane %v9497_v42, 9  ;;  %v3590_v56 = vrot.slane %v9498_v47, 5  ;;  %v9316_v0 = vld [vmem:[%s10466_s16 + $0xb0] sm:$0x1]  ;;  %v10272_v41 = vld [vmem:[%s10466_s16 + $0x9c] sm:$0xff]  }
  0xc6   : > { %v1085_v43 = vpop.permute.xlu1 %1084  ;;  %1100 = vrot.lane.b32.xlu1 %v9107_v9, %s10382_s25  ;;  %v3203_v59 = vor.u32 %v3202_v2, %v3199_v46  ;;  %v3212_v62 = vrot.slane %v3210_v50, 4  ;;  %v3218_v63 = vrot.slane %v3216_v51, 5  ;;  %v3593_v40 = vrot.slane %v9499_v48, 5  ;;  %v9501_v53 = vld [vmem:[%s10466_s16 + $0x40] sm:$0xf]  ;;  %v10271_v26 = vld [vmem:[%s10466_s16 + $0x90] sm:$0xff]  }
  0xc7   : > { %1135 = vst.msk [vmem:[#allocation3 + $0x60] sm:$0xff] %vm1130_vm7, %v1085_v43  ;;  %v1865_v5 = vsel %vm10529_vm5, %v1860_v54, %v1864_v38  ;;  %v3591_v8 = vsel %vm10459_vm2, %v9547_v55, %v3590_v56  ;;  %v3592_v10 = vrot.slane %v3590_v56, 4  ;;  %v9342_v11 = vrot.slane %v9314_v34, 9  ;;  %v9502_v17 = vld [vmem:[%s10466_s16 + $0x44] sm:$0x1] }
  0xc8   : > { %v9260_v12 = vcombine.low %v1855_v52, %v1865_v5  ;;  %v3204_v15 = vrot.slane %v3203_v59, 4  ;;  %v3213_v30 = vor.u32 %v3212_v62, %v11158_v49  ;;  %v2493_v16 = vrot.slane %v9315_v57, 5  ;;  %v572_v18 = vld [vmem:[%s10466_s16 + $0x9c] sm:$0xf]  ;;  %v573_v24 = vld [vmem:[%s10466_s16 + $0xa0] sm:$0xf] }
  0xc9   : > { %v11166_v58 = vpop.permute.xlu0 %2790  ;;  %v3594_v19 = vsel %vm10459_vm2, %v3592_v10, %v3593_v40  ;;  %v2496_v20 = vrot.slane %v9316_v0, 5  ;;  %v9548_v21 = vrot.slane %v9500_v60, 9  ;;  %v3597_v23 = vrot.slane %v9501_v53, 5  ;;  %v574_v32 = vld [vmem:[%s10466_s16 + $0xa4] sm:$0x1]  ;;  %527 = vst.msk [vmem:[#allocation3 + $0x120] sm:$0xff] %vm514_vm6, %v10271_v26 }
  0xca   : > { %v1449_v4 = vpop.permute.xlu1 %1448  ;;  %1464 = vrot.lane.b32.xlu1 %v9143_v27, %s10380_s19  ;;  %2277 = vst.msk [vmem:[#allocation3 + $0x50] sm:$0xff] %vm514_vm6, %v9260_v12  ;;  %v3209_v28 = vsel %vm10529_vm5, %v3204_v15, %v11158_v49  ;;  %v3214_v29 = vrot.slane %v3213_v30, 4  ;;  %v9565_v31 = vcombine.low %v3591_v8, %v3594_v19  ;;  %v2494_v27 = vsel %vm10459_vm2, %v9342_v11, %v2493_v16  ;;  %v1188_v44 = vld [vmem:[%s10466_s16 + $0x9c] sm:$0xe]  ;;  %v1190_v2 = vld [vmem:[%s10466_s16 + $0xa4] sm:$0x1] }
  0xcb   : > { %1499 = vst.msk [vmem:[#allocation3 + $0x60] sm:$0xff] %vm1494_vm8, %v1449_v4  ;;  %v2495_v36 = vrot.slane %v2493_v16, 4  ;;  %v3598_v37 = vsel %vm10459_vm2, %v9548_v21, %v3597_v23  ;;  %v3599_v38 = vrot.slane %v3597_v23, 4  ;;  %v3600_v39 = vrot.slane %v9502_v17, 5  ;;  %v9215_v54 = vld [vmem:[%s10466_s16 + $0x3c] sm:$0xf] }
  0xcc   : > { %2637 = vst.msk [vmem:[#allocation3 + $0x50] sm:$0xff] %vm1130_vm7, %v11083_v22  ;;  %v3219_v42 = vsel %vm10529_vm5, %v3214_v29, %v3218_v63  ;;  %v903_v22 = vshrl.u32 %v572_v18, 16  ;;  %v906_v43 = vshll.u32 %v572_v18, 16  ;;  %v912_v9 = vshll.u32 %v573_v24, 16  ;;  %v9216_v55 = vld [vmem:[%s10466_s16 + $0x40] sm:$0xf] }
  0xcd   : > { %v11186_v25 = vpop.permute.xlu0 %3402  ;;  %2839 = vst.msk [vmem:[#allocation3 + $0x50] sm:$0xff] %vm1494_vm8, %v11109_v14  ;;  %v9485_v45 = vcombine.low %v3209_v28, %v3219_v42  ;;  %v2497_v46 = vsel %vm10459_vm2, %v2495_v36, %v2496_v20  ;;  %v3601_v47 = vsel %vm10459_vm2, %v3599_v38, %v3600_v39  ;;  %v916_v48 = vshrl.u32 %v573_v24, 16  ;;  %v1189_v14 = vld [vmem:[%s10466_s16 + $0xa0] sm:$0xf]  ;;  %v9217_v62 = vld [vmem:[%s10466_s16 + $0x44] sm:$0x1] }
  0xce   : > { %v1652_v35 = vpop.permute.xlu1 %1651  ;;  %3774 = vst.msk [vmem:[#allocation3 + $0x40] sm:$0xff] %vm514_vm6, %v9565_v31  ;;  %1667 = vrot.lane.b32.xlu1 %v10252_v6, %s10381_s22  ;;  %528 = vst.msk [vmem:[#allocation3 + $0x138] sm:$0xff] %vm514_vm6, %v10272_v41  ;;  %v9360_v50 = vcombine.low %v2494_v27, %v2497_v46  ;;  %v9566_v51 = vcombine.low %v3598_v37, %v3601_v47  ;;  %v905_v34 = vrot.slane %v903_v22, 4  ;;  %v908_v52 = vrot.slane %v906_v43, 5  ;;  %v10253_v53 = vld [vmem:[%s10466_s16 + $0xb4] sm:$0xff]   ;;  %v3799_v24 = vld [vmem:[#allocation3 + $0x48] sm:$0xff] }
  0xcf   : > { %1702 = vst.msk [vmem:[#allocation3 + $0x60] sm:$0xff] %vm1697_vm9, %v1652_v35  ;;  %3451 = vst.msk [vmem:[#allocation3 + $0x50] sm:$0xff] %vm1697_vm9, %v11123_v7  ;;  %3418 = vrot.lane.b32.xlu0 %v9485_v45, %s10381_s22  ;;  %v914_v57 = vrot.slane %v912_v9, 5  ;;  %v918_v61 = vrot.slane %v916_v48, 4  ;;  %v922_v7 = vshll.u32 %v574_v32, 16  ;;  %v9126_v59 = vrot.slane %v1188_v44, 9 }
  0xd0   : > { %3775 = vst.msk [vmem:[#allocation3 + $0x58] sm:$0xff] %vm514_vm6, %v9566_v51  ;;  %v909_v63 = vor.u32 %v908_v52, %v905_v34  ;;  %v1353_v40 = vrot.slane %v1189_v14, 5  ;;  %v1356_v0 = vrot.slane %v1190_v2, 5  ;;  %v1867_v4 = vshrl.u32 %v9215_v54, 16  ;;  %v9458_v16 = vld [vmem:[%s10466_s16 + $0xb4] sm:$0xf] }
  0xd1   : > { %v11218_v49 = vpop.permute.xlu0 %2590  ;;  %v919_v5 = vor.u32 %v918_v61, %v914_v57  ;;  %v924_v6 = vrot.slane %v922_v7, 5  ;;  %v1870_v8 = vshll.u32 %v9215_v54, 16  ;;  %v1876_v10 = vshll.u32 %v9216_v55, 16  ;;  %v9459_v31 = vld [vmem:[%s10466_s16 + $0xb8] sm:$0xf] }
  0xd2   : > { %v1087_v56 = vpop.permute.xlu1 %1086  ;;  %v910_v60 = vrot.slane %v909_v63, 4  ;;  %v11232_v12 = vsel %vm10459_vm2, %v9126_v59, %v1353_v40  ;;  %v1355_v15 = vrot.slane %v1353_v40, 4  ;;  %v1869_v30 = vrot.slane %v1867_v4, 4  ;;  %v9460_v27 = vld [vmem:[%s10466_s16 + $0xbc] sm:$0x1] }
  0xd3   : > { %1136 = vst.msk [vmem:[#allocation3 + $0x78] sm:$0xff] %vm1130_vm7, %v1087_v56  ;;  %2606 = vrot.lane.b32.xlu0 %v9360_v50, %s10382_s25  ;;  %v920_v19 = vrot.slane %v919_v5, 4  ;;  %v1872_v20 = vrot.slane %v1870_v8, 5  ;;  %v1878_v21 = vrot.slane %v1876_v10, 5  ;;  %v1880_v23 = vshrl.u32 %v9216_v55, 16 }
  0xd4   : > { %v915_v26 = vsel %vm10529_vm5, %v910_v60, %v914_v57  ;;  %v1357_v28 = vsel %vm10459_vm2, %v1355_v15, %v1356_v0  ;;  %v1886_v29 = vshll.u32 %v9217_v62, 16  ;;  %v3221_v32 = vshrl.u32 %v9458_v16, 16  ;;  %v9317_v44 = vld [vmem:[%s10466_s16 + $0xb4] sm:$0xe]  ;;  %v9318_v50 = vld [vmem:[%s10466_s16 + $0xb8] sm:$0xf] }
  0xd5   : > { %v11227_v11 = vpop.permute.xlu0 %2792  ;;  %v3798_v18 = vld [vmem:[#allocation3 + $0x40] sm:$0xff]  ;;  %v925_v35 = vsel %vm10529_vm5, %v920_v19, %v924_v6  ;;  %v9144_v36 = vcombine.low %v11232_v12, %v1357_v28  ;;  %v1873_v37 = vor.u32 %v1872_v20, %v1869_v30  ;;  %v1882_v38 = vrot.slane %v1880_v23, 4  ;;  %v575_v59 = vld [vmem:[%s10466_s16 + $0xa8] sm:$0xf]  ;;  %v576_v6 = vld [vmem:[%s10466_s16 + $0xac] sm:$0xf] }
  0xd6   : > { %v1451_v17 = vpop.permute.xlu1 %1450  ;;  %10098 = vmatprep.mubr.msk.bf16.mxu1 %vm514_vm6, %v3798_v18  ;;  %v3800_v39 = vld [vmem:[#allocation3 + $0x50] sm:$0xff]  ;;  %v9108_v42 = vcombine.low %v915_v26, %v925_v35  ;;  %v1888_v22 = vrot.slane %v1886_v29, 5  ;;  %v3223_v43 = vrot.slane %v3221_v32, 4  ;;  %v3224_v9 = vshll.u32 %v9458_v16, 16  ;;  %v9319_v52 = vld [vmem:[%s10466_s16 + $0xbc] sm:$0x1] }
  0xd7   : > { %1500 = vst.msk [vmem:[#allocation3 + $0x78] sm:$0xff] %vm1494_vm8, %v1451_v17  ;;  %4105 = vmatprep.mubr.bf16.mxu0 %v3800_v39  ;;  %v3801_v46 = vld [vmem:[#allocation3 + $0x58] sm:$0xff]  ;;  %2808 = vrot.lane.b32.xlu0 %v10253_v53, %s10380_s19  ;;  %v1874_v47 = vrot.slane %v1873_v37, 4  ;;  %v1883_v48 = vor.u32 %v1882_v38, %v1878_v21  ;;  %v3230_v14 = vshll.u32 %v9459_v31, 16  ;;  %v3234_v2 = vshrl.u32 %v9459_v31, 16  ;;  %v10255_v0 = vld [vmem:[%s10466_s16 + $0xa8] sm:$0xff]  }
  0xd8   : > { %4106 = vmatmul.mubr.bf16.gmra.mrb[12].mxu0 %v3799_v24  ;;  %10099 = vmatmul.mubr.msk.bf16.gmra.mrb[4].mxu1 %vm514_vm6, %v3801_v46  ;;  %v3226_v51 = vrot.slane %v3224_v9, 5  ;;  %v3240_v34 = vshll.u32 %v9460_v27, 16  ;;  %v9343_v54 = vrot.slane %v9317_v44, 9  ;;  %v2500_v55 = vrot.slane %v9318_v50, 5  ;;  %v577_v8 = vld [vmem:[%s10466_s16 + $0xb0] sm:$0x1] }
  0xd9   : > { %v11247_v41 = vpop.permute.xlu0 %3404  ;;  %1102 = vrot.lane.b32.xlu1 %v9108_v42, %s10382_s25  ;;  %v1879_v56 = vsel %vm10529_vm5, %v1874_v47, %v1878_v21  ;;  %v1884_v57 = vrot.slane %v1883_v48, 4  ;;  %v3232_v61 = vrot.slane %v3230_v14, 5  ;;  %v3236_v7 = vrot.slane %v3234_v2, 4  ;;  %v1191_v19 = vld [vmem:[%s10466_s16 + $0xa8] sm:$0xe] }
  0xda   : > { %v1654_v45 = vpop.permute.xlu1 %1653  ;;  %v3227_v63 = vor.u32 %v3226_v51, %v3223_v43  ;;  %v3242_v40 = vrot.slane %v3240_v34, 5  ;;  %v11264_v4 = vsel %vm10459_vm2, %v9343_v54, %v2500_v55  ;;  %v2502_v5 = vrot.slane %v2500_v55, 4  ;;  %v10273_v20 = vld [vmem:[%s10466_s16 + $0xa8] sm:$0xff]   ;;  %v9461_v55 = vld [vmem:[%s10466_s16 + $0xc0] sm:$0xf] }
  0xdb   : > { %1703 = vst.msk [vmem:[#allocation3 + $0x78] sm:$0xff] %vm1697_vm9, %v1654_v45  ;;  %v1889_v60 = vsel %vm10529_vm5, %v1884_v57, %v1888_v22  ;;  %v3237_v53 = vor.u32 %v3236_v7, %v3232_v61  ;;  %v2503_v12 = vrot.slane %v9319_v52, 5  ;;  %v927_v15 = vshrl.u32 %v575_v59, 16  ;;  %v1192_v28 = vld [vmem:[%s10466_s16 + $0xac] sm:$0xf] }
  0xdc   : > { %v9261_v30 = vcombine.low %v1879_v56, %v1889_v60  ;;  %v3228_v16 = vrot.slane %v3227_v63, 4  ;;  %v930_v17 = vshll.u32 %v575_v59, 16  ;;  %v936_v18 = vshll.u32 %v576_v6, 16  ;;  %v9218_v37 = vld [vmem:[%s10466_s16 + $0x48] sm:$0xf]  ;;  %529 = vst.msk [vmem:[#allocation3 + $0x150] sm:$0xff] %vm514_vm6, %v10273_v20 }
  0xdd   : > { %v11259_v62 = vpop.permute.xlu0 %2592  ;;  %1466 = vrot.lane.b32.xlu1 %v9144_v36, %s10380_s19  ;;  %v3238_v21 = vrot.slane %v3237_v53, 4  ;;  %v2504_v23 = vsel %vm10459_vm2, %v2502_v5, %v2503_v12  ;;  %v929_v24 = vrot.slane %v927_v15, 4  ;;  %v940_v26 = vshrl.u32 %v576_v6, 16  ;;  %v1193_v36 = vld [vmem:[%s10466_s16 + $0xb0] sm:$0x1] }
  0xde   : > { %v1089_v10 = vpop.permute.xlu1 %1088  ;;  %2278 = vst.msk [vmem:[#allocation3 + $0x68] sm:$0xff] %vm514_vm6, %v9261_v30  ;;  %v3233_v31 = vsel %vm10529_vm5, %v3228_v16, %v3232_v61  ;;  %v9361_v27 = vcombine.low %v11264_v4, %v2504_v23  ;;  %v932_v32 = vrot.slane %v930_v17, 5  ;;  %v938_v35 = vrot.slane %v936_v18, 5  ;;  %v9219_v9 = vld [vmem:[%s10466_s16 + $0x4c] sm:$0xf]  ;;  %v10256_v17 = vld [vmem:[%s10466_s16 + $0xc0] sm:$0xff]  }
  0xdf   : > { %1137 = vst.msk [vmem:[#allocation3 + $0x90] sm:$0xff] %vm1130_vm7, %v1089_v10  ;;  %2638 = vst.msk [vmem:[#allocation3 + $0x68] sm:$0xff] %vm1130_vm7, %v11145_v33  ;;  %v3243_v39 = vsel %vm10529_vm5, %v3238_v21, %v3242_v40  ;;  %v942_v42 = vrot.slane %v940_v26, 4  ;;  %v946_v22 = vshll.u32 %v577_v8, 16  ;;  %v9127_v43 = vrot.slane %v1191_v19, 9 }
  0xe0   : > { %v9486_v44 = vcombine.low %v3233_v31, %v3243_v39  ;;  %2840 = vst.msk [vmem:[#allocation3 + $0x68] sm:$0xff] %vm1494_vm8, %v11166_v58  ;;  %v933_v45 = vor.u32 %v932_v32, %v929_v24  ;;  %v1360_v46 = vrot.slane %v1192_v28, 5  ;;  %v1363_v47 = vrot.slane %v1193_v36, 5  ;;  %v9220_v33 = vld [vmem:[%s10466_s16 + $0x50] sm:$0x1]  ;;  %v3802_v31 = vld [vmem:[#allocation3 + $0x60] sm:$0xff] }
  0xe1   : > { %v11277_v29 = vpop.permute.xlu0 %2794  ;;  %1669 = vrot.lane.b32.xlu1 %v10255_v0, %s10381_s22  ;;  %v943_v48 = vor.u32 %v942_v42, %v938_v35  ;;  %v948_v14 = vrot.slane %v946_v22, 5  ;;  %3452 = vst.msk [vmem:[#allocation3 + $0x68] sm:$0xff] %vm1697_vm9, %v11186_v25  ;;  %v1891_v2 = vshrl.u32 %v9218_v37, 16  ;;  %v1894_v50 = vshll.u32 %v9218_v37, 16  ;;  %v9462_v59 = vld [vmem:[%s10466_s16 + $0xc4] sm:$0xf] }
  0xe2   : > { %v1453_v38 = vpop.permute.xlu1 %1452  ;;  %3420 = vrot.lane.b32.xlu0 %v9486_v44, %s10381_s22  ;;  %v934_v34 = vrot.slane %v933_v45, 4  ;;  %v11303_v58 = vsel %vm10459_vm2, %v9127_v43, %v1360_v46  ;;  %v1362_v52 = vrot.slane %v1360_v46, 4  ;;  %v1900_v54 = vshll.u32 %v9219_v9, 16  ;;  %v9463_v5 = vld [vmem:[%s10466_s16 + $0xc8] sm:$0x1] }
  0xe3   : > { %1501 = vst.msk [vmem:[#allocation3 + $0x90] sm:$0xff] %vm1494_vm8, %v1453_v38  ;;  %v944_v57 = vrot.slane %v943_v48, 4  ;;  %v1893_v25 = vrot.slane %v1891_v2, 4  ;;  %v1896_v61 = vrot.slane %v1894_v50, 5  ;;  %v1904_v7 = vshrl.u32 %v9219_v9, 16  ;;  %v10258_v48 = vld [vmem:[%s10466_s16 + $0xb4] sm:$0xff]  }
  0xe4   : > { %v939_v63 = vsel %vm10529_vm5, %v934_v34, %v938_v35  ;;  %v1364_v40 = vsel %vm10459_vm2, %v1362_v52, %v1363_v47  ;;  %v1902_v0 = vrot.slane %v1900_v54, 5  ;;  %v1910_v4 = vshll.u32 %v9220_v33, 16  ;;  %v9503_v6 = vld [vmem:[%s10466_s16 + $0x48] sm:$0xe]  ;;  %v9504_v12 = vld [vmem:[%s10466_s16 + $0x4c] sm:$0xf] }
  0xe5   : > { %v11298_v51 = vpop.permute.xlu0 %3406  ;;  %v949_v8 = vsel %vm10529_vm5, %v944_v57, %v948_v14  ;;  %v9145_v10 = vcombine.low %v11303_v58, %v1364_v40  ;;  %v1897_v60 = vor.u32 %v1896_v61, %v1893_v25  ;;  %v1906_v53 = vrot.slane %v1904_v7, 4  ;;  %v9505_v15 = vld [vmem:[%s10466_s16 + $0x50] sm:$0x1]  ;;  %v9506_v37 = vld [vmem:[%s10466_s16 + $0x54] sm:$0xe] }
  0xe6   : > { %v1656_v56 = vpop.permute.xlu1 %1655  ;;  %2608 = vrot.lane.b32.xlu0 %v9361_v27, %s10382_s25  ;;  %v9109_v16 = vcombine.low %v939_v63, %v949_v8  ;;  %v1912_v18 = vrot.slane %v1910_v4, 5  ;;  %v3245_v19 = vshrl.u32 %v9461_v55, 16  ;;  %v3248_v20 = vshll.u32 %v9461_v55, 16  ;;  %v9507_v43 = vld [vmem:[%s10466_s16 + $0x58] sm:$0xf] }
  0xe7   : > { %1704 = vst.msk [vmem:[#allocation3 + $0x90] sm:$0xff] %vm1697_vm9, %v1656_v56  ;;  %v1898_v23 = vrot.slane %v1897_v60, 4  ;;  %v1907_v24 = vor.u32 %v1906_v53, %v1902_v0  ;;  %v3254_v26 = vshll.u32 %v9462_v59, 16  ;;  %v3258_v28 = vshrl.u32 %v9462_v59, 16  ;;  %v9508_v14 = vld [vmem:[%s10466_s16 + $0x5c] sm:$0x1] }
  0xe8   : > { %1104 = vrot.lane.b32.xlu1 %v9109_v16, %s10382_s25  ;;  %v3247_v32 = vrot.slane %v3245_v19, 4  ;;  %v3250_v35 = vrot.slane %v3248_v20, 5  ;;  %v3264_v27 = vshll.u32 %v9463_v5, 16  ;;  %v9549_v36 = vrot.slane %v9503_v6, 9  ;;  %v3803_v9 = vld [vmem:[#allocation3 + $0x68] sm:$0xff] }
  0xe9   : > { %v11319_v30 = vpop.permute.xlu0 %2594  ;;  %v1903_v38 = vsel %vm10529_vm5, %v1898_v23, %v1902_v0  ;;  %v1908_v39 = vrot.slane %v1907_v24, 4  ;;  %v3256_v42 = vrot.slane %v3254_v26, 5  ;;  %v3260_v22 = vrot.slane %v3258_v28, 4  ;;  %4113 = vmatprep.mubr.bf16.mxu0 %v3803_v9  ;;  %v9320_v54 = vld [vmem:[%s10466_s16 + $0xc0] sm:$0xe] }
  0xea   : > { %v1091_v21 = vpop.permute.xlu1 %1090  ;;  %2810 = vrot.lane.b32.xlu0 %v10256_v17, %s10380_s19  ;;  %v3251_v45 = vor.u32 %v3250_v35, %v3247_v32  ;;  %v3266_v46 = vrot.slane %v3264_v27, 5  ;;  %v3604_v47 = vrot.slane %v9504_v12, 5  ;;  %v3607_v33 = vrot.slane %v9505_v15, 5  ;;  %v9321_v55 = vld [vmem:[%s10466_s16 + $0xc4] sm:$0xf]  ;;  %4114 = vmatmul.mubr.bf16.gmra.mrb[16].mxu0 %v3802_v31 }
  0xeb   : > { %1138 = vst.msk [vmem:[#allocation3 + $0xa8] sm:$0xff] %vm1130_vm7, %v1091_v21  ;;  %v1913_v50 = vsel %vm10529_vm5, %v1908_v39, %v1912_v18  ;;  %v3261_v34 = vor.u32 %v3260_v22, %v3256_v42  ;;  %v9550_v58 = vrot.slane %v9506_v37, 9  ;;  %v3611_v52 = vrot.slane %v9507_v43, 5  ;;  %v9322_v7 = vld [vmem:[%s10466_s16 + $0xc8] sm:$0x1]  ;;  %v10274_v21 = vld [vmem:[%s10466_s16 + $0xb4] sm:$0xff]  }
  0xec   : > { %1468 = vrot.lane.b32.xlu1 %v9145_v10, %s10380_s19  ;;  %v9262_v56 = vcombine.low %v1903_v38, %v1913_v50  ;;  %v3252_v57 = vrot.slane %v3251_v45, 4  ;;  %v3605_v25 = vsel %vm10459_vm2, %v9549_v36, %v3604_v47  ;;  %v3606_v61 = vrot.slane %v3604_v47, 4  ;;  %v578_v59 = vld [vmem:[%s10466_s16 + $0xb4] sm:$0xf]  ;;  %v579_v5 = vld [vmem:[%s10466_s16 + $0xb8] sm:$0xf] }
  0xed   : > { %v11329_v44 = vpop.permute.xlu0 %2796  ;;  %v3262_v63 = vrot.slane %v3261_v34, 4  ;;  %v3612_v40 = vsel %vm10459_vm2, %v9550_v58, %v3611_v52  ;;  %v3613_v0 = vrot.slane %v3611_v52, 4  ;;  %v3614_v4 = vrot.slane %v9508_v14, 5  ;;  %v580_v12 = vld [vmem:[%s10466_s16 + $0xbc] sm:$0x1]  ;;  %530 = vst.msk [vmem:[#allocation3 + $0x168] sm:$0xff] %vm514_vm6, %v10274_v21 }
  0xee   : > { %v1455_v2 = vpop.permute.xlu1 %1454  ;;  %2279 = vst.msk [vmem:[#allocation3 + $0x80] sm:$0xff] %vm514_vm6, %v9262_v56  ;;  %v3257_v8 = vsel %vm10529_vm5, %v3252_v57, %v3256_v42  ;;  %v3608_v10 = vsel %vm10459_vm2, %v3606_v61, %v3607_v33  ;;  %v9344_v60 = vrot.slane %v9320_v54, 9  ;;  %v2507_v53 = vrot.slane %v9321_v55, 5  ;;  %v1194_v20 = vld [vmem:[%s10466_s16 + $0xb4] sm:$0xe]  ;;  %v10259_v57 = vld [vmem:[%s10466_s16 + $0xcc] sm:$0xff]  }
  0xef   : > { %1502 = vst.msk [vmem:[#allocation3 + $0xa8] sm:$0xff] %vm1494_vm8, %v1455_v2  ;;  %v3267_v16 = vsel %vm10529_vm5, %v3262_v63, %v3266_v46  ;;  %v9567_v17 = vcombine.low %v3605_v25, %v3608_v10  ;;  %v3615_v18 = vsel %vm10459_vm2, %v3613_v0, %v3614_v4  ;;  %v2510_v19 = vrot.slane %v9322_v7, 5  ;;  %v1195_v28 = vld [vmem:[%s10466_s16 + $0xb8] sm:$0xf]  ;;  %v1196_v31 = vld [vmem:[%s10466_s16 + $0xbc] sm:$0x1] }
  0xf0   : > { %2639 = vst.msk [vmem:[#allocation3 + $0x80] sm:$0xff] %vm1130_vm7, %v11218_v49  ;;  %v9487_v23 = vcombine.low %v3257_v8, %v3267_v16  ;;  %1671 = vrot.lane.b32.xlu1 %v10258_v48, %s10381_s22  ;;  %v9568_v24 = vcombine.low %v3612_v40, %v3615_v18  ;;  %v2508_v49 = vsel %vm10459_vm2, %v9344_v60, %v2507_v53  ;;  %v2509_v26 = vrot.slane %v2507_v53, 4  ;;  %v9221_v37 = vld [vmem:[%s10466_s16 + $0x54] sm:$0xf]  ;;  %v9222_v43 = vld [vmem:[%s10466_s16 + $0x58] sm:$0xf] }
  0xf1   : > { %v11347_v6 = vpop.permute.xlu0 %3408  ;;  %2841 = vst.msk [vmem:[#allocation3 + $0x80] sm:$0xff] %vm1494_vm8, %v11227_v11  ;;  %v951_v32 = vshrl.u32 %v578_v59, 16  ;;  %v954_v35 = vshll.u32 %v578_v59, 16  ;;  %v960_v27 = vshll.u32 %v579_v5, 16  ;;  %v964_v36 = vshrl.u32 %v579_v5, 16  ;;  %v3805_v10 = vld [vmem:[#allocation3 + $0x78] sm:$0xff] }
  0xf2   : > { %v1658_v15 = vpop.permute.xlu1 %1657  ;;  %3776 = vst.msk [vmem:[#allocation3 + $0x70] sm:$0xff] %vm514_vm6, %v9567_v17  ;;  %3422 = vrot.lane.b32.xlu0 %v9487_v23, %s10381_s22  ;;  %3777 = vst.msk [vmem:[#allocation3 + $0x88] sm:$0xff] %vm514_vm6, %v9568_v24  ;;  %v2511_v11 = vsel %vm10459_vm2, %v2509_v26, %v2510_v19  ;;  %v970_v39 = vshll.u32 %v580_v12, 16  ;;  %v9128_v42 = vrot.slane %v1194_v20, 9  ;;  %v1367_v22 = vrot.slane %v1195_v28, 5 }
  0xf3   : > { %1705 = vst.msk [vmem:[#allocation3 + $0xa8] sm:$0xff] %vm1697_vm9, %v1658_v15  ;;  %3453 = vst.msk [vmem:[#allocation3 + $0x80] sm:$0xff] %vm1697_vm9, %v11247_v41  ;;  %v9362_v45 = vcombine.low %v2508_v49, %v2511_v11  ;;  %v953_v41 = vrot.slane %v951_v32, 4  ;;  %v956_v46 = vrot.slane %v954_v35, 5  ;;  %v962_v47 = vrot.slane %v960_v27, 5 }
  0xf4   : > { %v9223_v33 = vld [vmem:[%s10466_s16 + $0x5c] sm:$0x1]  ;;  %v966_v48 = vrot.slane %v964_v36, 4  ;;  %v972_v14 = vrot.slane %v970_v39, 5  ;;  %v11387_v2 = vsel %vm10459_vm2, %v9128_v42, %v1367_v22  ;;  %v1369_v50 = vrot.slane %v1367_v22, 4 }
  0xf5   : > { %v11375_v38 = vpop.permute.xlu0 %2596  ;;  %v957_v34 = vor.u32 %v956_v46, %v953_v41  ;;  %v1370_v58 = vrot.slane %v1196_v31, 5  ;;  %v1915_v52 = vshrl.u32 %v9221_v37, 16  ;;  %v1918_v54 = vshll.u32 %v9221_v37, 16  ;;  %v9464_v59 = vld [vmem:[%s10466_s16 + $0xcc] sm:$0xf] }
  0xf6   : > { %v1093_v9 = vpop.permute.xlu1 %1092  ;;  %2610 = vrot.lane.b32.xlu0 %v9362_v45, %s10382_s25  ;;  %v967_v56 = vor.u32 %v966_v48, %v962_v47  ;;  %v1924_v25 = vshll.u32 %v9222_v43, 16  ;;  %v1928_v61 = vshrl.u32 %v9222_v43, 16  ;;  %v1934_v7 = vshll.u32 %v9223_v33, 16  ;;  %v9465_v8 = vld [vmem:[%s10466_s16 + $0xd0] sm:$0xf] }
  0xf7   : > { %1139 = vst.msk [vmem:[#allocation3 + $0xc0] sm:$0xff] %vm1130_vm7, %v1093_v9  ;;  %v958_v40 = vrot.slane %v957_v34, 4  ;;  %v11396_v0 = vsel %vm10459_vm2, %v1369_v50, %v1370_v58  ;;  %v1917_v4 = vrot.slane %v1915_v52, 4  ;;  %v1920_v5 = vrot.slane %v1918_v54, 5  ;;  %v9466_v17 = vld [vmem:[%s10466_s16 + $0xd4] sm:$0x1] }
  0xf8   : > { %v968_v53 = vrot.slane %v967_v56, 4  ;;  %v9146_v12 = vcombine.low %v11387_v2, %v11396_v0  ;;  %v1926_v15 = vrot.slane %v1924_v25, 5  ;;  %v1930_v16 = vrot.slane %v1928_v61, 4  ;;  %v9323_v35 = vld [vmem:[%s10466_s16 + $0xcc] sm:$0xe] }
  0xf9   : > { %v11389_v55 = vpop.permute.xlu0 %2798  ;;  %v3804_v60 = vld [vmem:[#allocation3 + $0x70] sm:$0xff]  ;;  %v3807_v18 = vld [vmem:[#allocation3 + $0x88] sm:$0xff]  ;;  %v963_v19 = vsel %vm10529_vm5, %v958_v40, %v962_v47  ;;  %v1921_v20 = vor.u32 %v1920_v5, %v1917_v4  ;;  %v1936_v21 = vrot.slane %v1934_v7, 5  ;;  %v3269_v23 = vshrl.u32 %v9464_v59, 16  ;;  %v9324_v42 = vld [vmem:[%s10466_s16 + $0xd0] sm:$0xf] }
  0xfa   : > { %v1457_v63 = vpop.permute.xlu1 %1456  ;;  %10102 = vmatprep.mubr.msk.bf16.mxu1 %vm514_vm6, %v3804_v60  ;;  %v3806_v24 = vld [vmem:[#allocation3 + $0x80] sm:$0xff]  ;;  %v973_v26 = vsel %vm10529_vm5, %v968_v53, %v972_v14  ;;  %2812 = vrot.lane.b32.xlu0 %v10259_v57, %s10380_s19  ;;  %v1931_v28 = vor.u32 %v1930_v16, %v1926_v15  ;;  %v3272_v31 = vshll.u32 %v9464_v59, 16  ;;  %v3278_v32 = vshll.u32 %v9465_v8, 16  ;;  %v9325_v41 = vld [vmem:[%s10466_s16 + $0xd4] sm:$0x1]  ;;  %v10261_v60 = vld [vmem:[%s10466_s16 + $0xc0] sm:$0xff]  }
  0xfb   : > { %1503 = vst.msk [vmem:[#allocation3 + $0xc0] sm:$0xff] %vm1494_vm8, %v1457_v63  ;;  %10103 = vmatmul.mubr.msk.bf16.gmra.mrb[8].mxu1 %vm514_vm6, %v3807_v18  ;;  %v9110_v36 = vcombine.low %v963_v19, %v973_v26  ;;  %v1922_v37 = vrot.slane %v1921_v20, 4  ;;  %v3271_v11 = vrot.slane %v3269_v23, 4  ;;  %v3282_v39 = vshrl.u32 %v9465_v8, 16  ;;  %4121 = vmatprep.mubr.bf16.mxu0 %v3806_v24  ;;  %v581_v14 = vld [vmem:[%s10466_s16 + $0xc0] sm:$0xf] }
  0xfc   : > { %v1932_v22 = vrot.slane %v1931_v28, 4  ;;  %v3274_v43 = vrot.slane %v3272_v31, 5  ;;  %v3280_v9 = vrot.slane %v3278_v32, 5  ;;  %v3288_v45 = vshll.u32 %v9466_v17, 16  ;;  %4122 = vmatmul.mubr.bf16.gmra.mrb[20].mxu0 %v3805_v10  ;;  %v582_v52 = vld [vmem:[%s10466_s16 + $0xc4] sm:$0xf] }
  0xfd   : > { %v11406_v49 = vpop.permute.xlu0 %3410  ;;  %1106 = vrot.lane.b32.xlu1 %v9110_v36, %s10382_s25  ;;  %v1927_v46 = vsel %vm10529_vm5, %v1922_v37, %v1926_v15  ;;  %v3284_v47 = vrot.slane %v3282_v39, 4  ;;  %v9345_v33 = vrot.slane %v9323_v35, 9  ;;  %v2514_v48 = vrot.slane %v9324_v42, 5  ;;  %v583_v54 = vld [vmem:[%s10466_s16 + $0xc8] sm:$0x1]  ;;  %v10275_v63 = vld [vmem:[%s10466_s16 + $0xc0] sm:$0xff]  }
  0xfe   : > { %v1660_v27 = vpop.permute.xlu1 %1659  ;;  %v1937_v2 = vsel %vm10529_vm5, %v1932_v22, %v1936_v21  ;;  %v3275_v50 = vor.u32 %v3274_v43, %v3271_v11  ;;  %v3290_v34 = vrot.slane %v3288_v45, 5  ;;  %v2517_v58 = vrot.slane %v9325_v41, 5  ;;  %v1197_v8 = vld [vmem:[%s10466_s16 + $0xc0] sm:$0xe]  ;;  %v1198_v17 = vld [vmem:[%s10466_s16 + $0xc4] sm:$0xf] }
  0xff   : > { %1706 = vst.msk [vmem:[#allocation3 + $0xc0] sm:$0xff] %vm1697_vm9, %v1660_v27  ;;  %v9263_v57 = vcombine.low %v1927_v46, %v1937_v2  ;;  %v3285_v25 = vor.u32 %v3284_v47, %v3280_v9  ;;  %v11426_v61 = vsel %vm10459_vm2, %v9345_v33, %v2514_v48  ;;  %v2516_v7 = vrot.slane %v2514_v48, 4  ;;  %v1199_v21 = vld [vmem:[%s10466_s16 + $0xc8] sm:$0x1]  ;;  %v9224_v23 = vld [vmem:[%s10466_s16 + $0x60] sm:$0xf] }
 0x100   : > { %v3276_v40 = vrot.slane %v3275_v50, 4  ;;  %v975_v0 = vshrl.u32 %v581_v14, 16  ;;  %v978_v4 = vshll.u32 %v581_v14, 16  ;;  %v984_v5 = vshll.u32 %v582_v52, 16  ;;  %531 = vst.msk [vmem:[#allocation3 + $0x180] sm:$0xff] %vm514_vm6, %v10275_v63 }
 0x101   : > { %v11428_v59 = vpop.permute.xlu0 %2598  ;;  %1470 = vrot.lane.b32.xlu1 %v9146_v12, %s10380_s19  ;;  %2280 = vst.msk [vmem:[#allocation3 + $0x98] sm:$0xff] %vm514_vm6, %v9263_v57  ;;  %v3286_v10 = vrot.slane %v3285_v25, 4  ;;  %v2518_v53 = vsel %vm10459_vm2, %v2516_v7, %v2517_v58  ;;  %v988_v15 = vshrl.u32 %v582_v52, 16  ;;  %v994_v16 = vshll.u32 %v583_v54, 16  ;;  %v9225_v32 = vld [vmem:[%s10466_s16 + $0x64] sm:$0xf] }
 0x102   : > { %v1095_v56 = vpop.permute.xlu1 %1094  ;;  %2640 = vst.msk [vmem:[#allocation3 + $0x98] sm:$0xff] %vm1130_vm7, %v11259_v62  ;;  %v3281_v18 = vsel %vm10529_vm5, %v3276_v40, %v3280_v9  ;;  %v9363_v12 = vcombine.low %v11426_v61, %v2518_v53  ;;  %v977_v19 = vrot.slane %v975_v0, 4  ;;  %v980_v20 = vrot.slane %v978_v4, 5  ;;  %v9226_v11 = vld [vmem:[%s10466_s16 + $0x68] sm:$0x1]  ;;  %v10262_v61 = vld [vmem:[%s10466_s16 + $0xd8] sm:$0xff]  }
 0x103   : > { %1140 = vst.msk [vmem:[#allocation3 + $0xd8] sm:$0xff] %vm1130_vm7, %v1095_v56  ;;  %v3291_v26 = vsel %vm10529_vm5, %v3286_v10, %v3290_v34  ;;  %v986_v28 = vrot.slane %v984_v5, 5  ;;  %v990_v31 = vrot.slane %v988_v15, 4  ;;  %v996_v62 = vrot.slane %v994_v16, 5  ;;  %v9467_v46 = vld [vmem:[%s10466_s16 + $0xd8] sm:$0xf] }
 0x104   : > { %2842 = vst.msk [vmem:[#allocation3 + $0x98] sm:$0xff] %vm1494_vm8, %v11277_v29  ;;  %v9488_v35 = vcombine.low %v3281_v18, %v3291_v26  ;;  %v981_v27 = vor.u32 %v980_v20, %v977_v19  ;;  %v9129_v36 = vrot.slane %v1197_v8, 9  ;;  %v1374_v37 = vrot.slane %v1198_v17, 5  ;;  %v9468_v50 = vld [vmem:[%s10466_s16 + $0xdc] sm:$0xf]  ;;  %v3808_v53 = vld [vmem:[#allocation3 + $0x90] sm:$0xff] }
 0x105   : > { %3454 = vst.msk [vmem:[#allocation3 + $0x98] sm:$0xff] %vm1697_vm9, %v11298_v51  ;;  %1673 = vrot.lane.b32.xlu1 %v10261_v60, %s10381_s22  ;;  %v991_v39 = vor.u32 %v990_v31, %v986_v28  ;;  %v1377_v29 = vrot.slane %v1199_v21, 5  ;;  %v1939_v42 = vshrl.u32 %v9224_v23, 16  ;;  %v1942_v22 = vshll.u32 %v9224_v23, 16  ;;  %v11457_v43 = vpop.permute.xlu0 %2800  ;;  %v9469_v56 = vld [vmem:[%s10466_s16 + $0xe0] sm:$0x1] }
 0x106   : > { %v1459_v24 = vpop.permute.xlu1 %1458  ;;  %3424 = vrot.lane.b32.xlu0 %v9488_v35, %s10381_s22  ;;  %v982_v9 = vrot.slane %v981_v27, 4  ;;  %v11462_v45 = vsel %vm10459_vm2, %v9129_v36, %v1374_v37  ;;  %v1376_v51 = vrot.slane %v1374_v37, 4  ;;  %v1948_v41 = vshll.u32 %v9225_v32, 16  ;;  %v9509_v57 = vld [vmem:[%s10466_s16 + $0x60] sm:$0xe] }
 0x107   : > { %1504 = vst.msk [vmem:[#allocation3 + $0xd8] sm:$0xff] %vm1494_vm8, %v1459_v24  ;;  %v992_v33 = vrot.slane %v991_v39, 4  ;;  %v1941_v48 = vrot.slane %v1939_v42, 4  ;;  %v1944_v14 = vrot.slane %v1942_v22, 5  ;;  %v1952_v2 = vshrl.u32 %v9225_v32, 16  ;;  %v10264_v39 = vld [vmem:[%s10466_s16 + $0xcc] sm:$0xff]  }
 0x108   : > { %v987_v34 = vsel %vm10529_vm5, %v982_v9, %v986_v28  ;;  %v1378_v58 = vsel %vm10459_vm2, %v1376_v51, %v1377_v29  ;;  %v1950_v52 = vrot.slane %v1948_v41, 5  ;;  %v1958_v54 = vshll.u32 %v9226_v11, 16  ;;  %v9510_v0 = vld [vmem:[%s10466_s16 + $0x64] sm:$0xf]  ;;  %v9511_v4 = vld [vmem:[%s10466_s16 + $0x68] sm:$0x1] }
 0x109   : > { %v997_v25 = vsel %vm10529_vm5, %v992_v33, %v996_v62  ;;  %v9147_v7 = vcombine.low %v11462_v45, %v1378_v58  ;;  %v1945_v63 = vor.u32 %v1944_v14, %v1941_v48  ;;  %v1954_v40 = vrot.slane %v1952_v2, 4  ;;  %v11480_v20 = vpop.permute.xlu0 %3412  ;;  %v9512_v26 = vld [vmem:[%s10466_s16 + $0x6c] sm:$0xe]  ;;  %v9513_v35 = vld [vmem:[%s10466_s16 + $0x70] sm:$0xf] }
 0x10a   : > { %v1662_v47 = vpop.permute.xlu1 %1661  ;;  %2612 = vrot.lane.b32.xlu0 %v9363_v12, %s10382_s25  ;;  %v9111_v5 = vcombine.low %v987_v34, %v997_v25  ;;  %v1960_v8 = vrot.slane %v1958_v54, 5  ;;  %v3293_v10 = vshrl.u32 %v9467_v46, 16  ;;  %v3296_v60 = vshll.u32 %v9467_v46, 16  ;;  %v9514_v29 = vld [vmem:[%s10466_s16 + $0x74] sm:$0x1] }
 0x10b   : > { %1707 = vst.msk [vmem:[#allocation3 + $0xd8] sm:$0xff] %vm1697_vm9, %v1662_v47  ;;  %v1946_v15 = vrot.slane %v1945_v63, 4  ;;  %v1955_v16 = vor.u32 %v1954_v40, %v1950_v52  ;;  %v3302_v17 = vshll.u32 %v9468_v50, 16  ;;  %v3306_v18 = vshrl.u32 %v9468_v50, 16  ;;  %v9326_v51 = vld [vmem:[%s10466_s16 + $0xd8] sm:$0xe] }
 0x10c   : > { %v3809_v19 = vld [vmem:[#allocation3 + $0x98] sm:$0xff]  ;;  %1108 = vrot.lane.b32.xlu1 %v9111_v5, %s10382_s25  ;;  %v3295_v21 = vrot.slane %v3293_v10, 4  ;;  %v3298_v23 = vrot.slane %v3296_v60, 5  ;;  %v3312_v12 = vshll.u32 %v9469_v56, 16  ;;  %v9551_v24 = vrot.slane %v9509_v57, 9 }
 0x10d   : > { %4129 = vmatprep.mubr.bf16.mxu0 %v3809_v19  ;;  %v1951_v28 = vsel %vm10529_vm5, %v1946_v15, %v1950_v52  ;;  %v1956_v31 = vrot.slane %v1955_v16, 4  ;;  %v3304_v62 = vrot.slane %v3302_v17, 5  ;;  %v3308_v32 = vrot.slane %v3306_v18, 4  ;;  %v9327_v41 = vld [vmem:[%s10466_s16 + $0xdc] sm:$0xf]  ;;  %v11503_v57 = vpop.permute.xlu0 %2600 }
 0x10e   : > { %4130 = vmatmul.mubr.bf16.gmra.mrb[24].mxu0 %v3808_v53  ;;  %2814 = vrot.lane.b32.xlu0 %v10262_v61, %s10380_s19  ;;  %v3299_v27 = vor.u32 %v3298_v23, %v3295_v21  ;;  %v3314_v36 = vrot.slane %v3312_v12, 5  ;;  %v3618_v37 = vrot.slane %v9510_v0, 5  ;;  %v3621_v11 = vrot.slane %v9511_v4, 5  ;;  %v9328_v2 = vld [vmem:[%s10466_s16 + $0xe0] sm:$0x1]  ;;  %v10276_v53 = vld [vmem:[%s10466_s16 + $0xcc] sm:$0xff]  }
 0x10f   : > { %v1961_v42 = vsel %vm10529_vm5, %v1956_v31, %v1960_v8  ;;  %v3309_v22 = vor.u32 %v3308_v32, %v3304_v62  ;;  %v9552_v9 = vrot.slane %v9512_v26, 9  ;;  %v3625_v45 = vrot.slane %v9513_v35, 5  ;;  %v584_v50 = vld [vmem:[%s10466_s16 + $0xcc] sm:$0xf]  ;;  %v585_v56 = vld [vmem:[%s10466_s16 + $0xd0] sm:$0xf] }
 0x110   : > { %1472 = vrot.lane.b32.xlu1 %v9147_v7, %s10380_s19  ;;  %v9264_v47 = vcombine.low %v1951_v28, %v1961_v42  ;;  %v3300_v33 = vrot.slane %v3299_v27, 4  ;;  %v3619_v48 = vsel %vm10459_vm2, %v9551_v24, %v3618_v37  ;;  %v3620_v14 = vrot.slane %v3618_v37, 4  ;;  %v586_v40 = vld [vmem:[%s10466_s16 + $0xd4] sm:$0x1]  ;;  %v1200_v10 = vld [vmem:[%s10466_s16 + $0xcc] sm:$0xe] }
 0x111   : > { %v3310_v34 = vrot.slane %v3309_v22, 4  ;;  %v3626_v58 = vsel %vm10459_vm2, %v9552_v9, %v3625_v45  ;;  %v3627_v52 = vrot.slane %v3625_v45, 4  ;;  %v3628_v54 = vrot.slane %v9514_v29, 5  ;;  %v1201_v18 = vld [vmem:[%s10466_s16 + $0xd0] sm:$0xf]  ;;  %532 = vst.msk [vmem:[#allocation3 + $0x198] sm:$0xff] %vm514_vm6, %v10276_v53 }
 0x112   : > { %v1097_v46 = vpop.permute.xlu1 %1096  ;;  %2281 = vst.msk [vmem:[#allocation3 + $0xb0] sm:$0xff] %vm514_vm6, %v9264_v47  ;;  %v3305_v25 = vsel %vm10529_vm5, %v3300_v33, %v3304_v62  ;;  %v3622_v61 = vsel %vm10459_vm2, %v3620_v14, %v3621_v11  ;;  %v9346_v7 = vrot.slane %v9326_v51, 9  ;;  %v2521_v63 = vrot.slane %v9327_v41, 5  ;;  %v1202_v19 = vld [vmem:[%s10466_s16 + $0xd4] sm:$0x1]  ;;  %v11538_v11 = vpop.permute.xlu0 %2802  ;;  %v10265_v33 = vld [vmem:[%s10466_s16 + $0xe4] sm:$0xff]  }
 0x113   : > { %1141 = vst.msk [vmem:[#allocation3 + $0xf0] sm:$0xff] %vm1130_vm7, %v1097_v46  ;;  %2641 = vst.msk [vmem:[#allocation3 + $0xb0] sm:$0xff] %vm1130_vm7, %v11319_v30  ;;  %v3315_v0 = vsel %vm10529_vm5, %v3310_v34, %v3314_v36  ;;  %v9569_v4 = vcombine.low %v3619_v48, %v3622_v61  ;;  %v3629_v5 = vsel %vm10459_vm2, %v3627_v52, %v3628_v54  ;;  %v2524_v8 = vrot.slane %v9328_v2, 5  ;;  %v9228_v32 = vld [vmem:[%s10466_s16 + $0x70] sm:$0xf] }
 0x114   : > { %v9489_v15 = vcombine.low %v3305_v25, %v3315_v0  ;;  %1675 = vrot.lane.b32.xlu1 %v10264_v39, %s10381_s22  ;;  %v9570_v16 = vcombine.low %v3626_v58, %v3629_v5  ;;  %2843 = vst.msk [vmem:[#allocation3 + $0xb0] sm:$0xff] %vm1494_vm8, %v11329_v44  ;;  %v2522_v30 = vsel %vm10459_vm2, %v9346_v7, %v2521_v63  ;;  %v2523_v17 = vrot.slane %v2521_v63, 4  ;;  %v9227_v44 = vld [vmem:[%s10466_s16 + $0x6c] sm:$0xf]  ;;  %v3811_v25 = vld [vmem:[#allocation3 + $0xa8] sm:$0xff] }
 0x115   : > { %3778 = vst.msk [vmem:[#allocation3 + $0xa0] sm:$0xff] %vm514_vm6, %v9569_v4  ;;  %v999_v21 = vshrl.u32 %v584_v50, 16  ;;  %v1002_v23 = vshll.u32 %v584_v50, 16  ;;  %v1008_v12 = vshll.u32 %v585_v56, 16  ;;  %v1012_v24 = vshrl.u32 %v585_v56, 16 }
 0x116   : > { %v1461_v60 = vpop.permute.xlu1 %1460  ;;  %3455 = vst.msk [vmem:[#allocation3 + $0xb0] sm:$0xff] %vm1697_vm9, %v11347_v6  ;;  %3426 = vrot.lane.b32.xlu0 %v9489_v15, %s10381_s22  ;;  %v2525_v26 = vsel %vm10459_vm2, %v2523_v17, %v2524_v8  ;;  %v1018_v28 = vshll.u32 %v586_v40, 16  ;;  %v9130_v31 = vrot.slane %v1200_v10, 9  ;;  %v1381_v62 = vrot.slane %v1201_v18, 5  ;;  %v9229_v6 = vld [vmem:[%s10466_s16 + $0x74] sm:$0x1] }
 0x117   : > { %1505 = vst.msk [vmem:[#allocation3 + $0xf0] sm:$0xff] %vm1494_vm8, %v1461_v60  ;;  %v9364_v35 = vcombine.low %v2522_v30, %v2525_v26  ;;  %v1001_v27 = vrot.slane %v999_v21, 4  ;;  %v1004_v36 = vrot.slane %v1002_v23, 5  ;;  %v1010_v37 = vrot.slane %v1008_v12, 5  ;;  %v9470_v50 = vld [vmem:[%s10466_s16 + $0xe4] sm:$0xf] }
 0x118   : > { %3779 = vst.msk [vmem:[#allocation3 + $0xb8] sm:$0xff] %vm514_vm6, %v9570_v16  ;;  %v1014_v29 = vrot.slane %v1012_v24, 4  ;;  %v1020_v42 = vrot.slane %v1018_v28, 5  ;;  %v11542_v22 = vsel %vm10459_vm2, %v9130_v31, %v1381_v62  ;;  %v1383_v9 = vrot.slane %v1381_v62, 4  ;;  %v9471_v56 = vld [vmem:[%s10466_s16 + $0xe8] sm:$0xf] }
 0x119   : > { %v1005_v45 = vor.u32 %v1004_v36, %v1001_v27  ;;  %v1384_v51 = vrot.slane %v1202_v19, 5  ;;  %v1963_v41 = vshrl.u32 %v9227_v44, 16  ;;  %v1966_v46 = vshll.u32 %v9227_v44, 16  ;;  %v9472_v4 = vld [vmem:[%s10466_s16 + $0xec] sm:$0x1] }
 0x11a   : > { %v1664_v39 = vpop.permute.xlu1 %1663  ;;  %2614 = vrot.lane.b32.xlu0 %v9364_v35, %s10382_s25  ;;  %v1015_v47 = vor.u32 %v1014_v29, %v1010_v37  ;;  %v1972_v48 = vshll.u32 %v9228_v32, 16  ;;  %v1976_v14 = vshrl.u32 %v9228_v32, 16  ;;  %v1982_v2 = vshll.u32 %v9229_v6, 16  ;;  %v9230_v21 = vld [vmem:[%s10466_s16 + $0x78] sm:$0xf] }
 0x11b   : > { %1708 = vst.msk [vmem:[#allocation3 + $0xf0] sm:$0xff] %vm1697_vm9, %v1664_v39  ;;  %v1006_v34 = vrot.slane %v1005_v45, 4  ;;  %v1385_v58 = vsel %vm10459_vm2, %v1383_v9, %v1384_v51  ;;  %v1965_v52 = vrot.slane %v1963_v41, 4  ;;  %v1968_v54 = vrot.slane %v1966_v46, 5  ;;  %v9231_v26 = vld [vmem:[%s10466_s16 + $0x7c] sm:$0xf] }
 0x11c   : > { %v3810_v61 = vld [vmem:[#allocation3 + $0xa0] sm:$0xff]  ;;  %v1016_v7 = vrot.slane %v1015_v47, 4  ;;  %v9148_v63 = vcombine.low %v11542_v22, %v1385_v58  ;;  %v1974_v40 = vrot.slane %v1972_v48, 5  ;;  %v1978_v0 = vrot.slane %v1976_v14, 4  ;;  %v11556_v16 = vpop.permute.xlu0 %3414  ;;  %v9232_v35 = vld [vmem:[%s10466_s16 + $0x80] sm:$0x1] }
 0x11d   : > { %10106 = vmatprep.mubr.msk.bf16.mxu1 %vm514_vm6, %v3810_v61  ;;  %v1011_v8 = vsel %vm10529_vm5, %v1006_v34, %v1010_v37  ;;  %v1969_v10 = vor.u32 %v1968_v54, %v1965_v52  ;;  %v1984_v60 = vrot.slane %v1982_v2, 5  ;;  %v3317_v53 = vshrl.u32 %v9470_v50, 16  ;;  %v3812_v15 = vld [vmem:[#allocation3 + $0xb0] sm:$0xff]  ;;  %v9515_v45 = vld [vmem:[%s10466_s16 + $0x78] sm:$0xe] }
 0x11e   : > { %v1021_v30 = vsel %vm10529_vm5, %v1016_v7, %v1020_v42  ;;  %2816 = vrot.lane.b32.xlu0 %v10265_v33, %s10380_s19  ;;  %v1979_v17 = vor.u32 %v1978_v0, %v1974_v40  ;;  %v3320_v18 = vshll.u32 %v9470_v50, 16  ;;  %v3326_v19 = vshll.u32 %v9471_v56, 16  ;;  %4137 = vmatprep.mubr.bf16.mxu0 %v3812_v15  ;;  %v9516_v33 = vld [vmem:[%s10466_s16 + $0x7c] sm:$0xf]  ;;  %v9517_v48 = vld [vmem:[%s10466_s16 + $0x80] sm:$0x1] }
 0x11f   : > { %v3813_v5 = vld [vmem:[#allocation3 + $0xb8] sm:$0xff]  ;;  %v9112_v23 = vcombine.low %v1011_v8, %v1021_v30  ;;  %v1970_v12 = vrot.slane %v1969_v10, 4  ;;  %v3319_v24 = vrot.slane %v3317_v53, 4  ;;  %v3330_v44 = vshrl.u32 %v9471_v56, 16  ;;  %4138 = vmatmul.mubr.bf16.gmra.mrb[28].mxu0 %v3811_v25  ;;  %v9518_v52 = vld [vmem:[%s10466_s16 + $0x84] sm:$0xe] }
 0x120   : > { %10107 = vmatmul.mubr.msk.bf16.gmra.mrb[12].mxu1 %vm514_vm6, %v3813_v5  ;;  %v1980_v28 = vrot.slane %v1979_v17, 4  ;;  %v3322_v31 = vrot.slane %v3320_v18, 5  ;;  %v3328_v62 = vrot.slane %v3326_v19, 5  ;;  %v3336_v32 = vshll.u32 %v9472_v4, 16  ;;  %v11574_v14 = vpop.permute.xlu0 %2602  ;;  %v10267_v56 = vld [vmem:[%s10466_s16 + $0xd8] sm:$0xff]  }
 0x121   : > { %1110 = vrot.lane.b32.xlu1 %v9112_v23, %s10382_s25  ;;  %v1975_v27 = vsel %vm10529_vm5, %v1970_v12, %v1974_v40  ;;  %v3332_v36 = vrot.slane %v3330_v44, 4  ;;  %v1987_v37 = vshrl.u32 %v9230_v21, 16  ;;  %v1990_v6 = vshll.u32 %v9230_v21, 16  ;;  %v9519_v40 = vld [vmem:[%s10466_s16 + $0x88] sm:$0xf] }
 0x122   : > { %v1985_v29 = vsel %vm10529_vm5, %v1980_v28, %v1984_v60  ;;  %v3323_v42 = vor.u32 %v3322_v31, %v3319_v24  ;;  %v3338_v22 = vrot.slane %v3336_v32, 5  ;;  %v1996_v9 = vshll.u32 %v9231_v26, 16  ;;  %v9520_v10 = vld [vmem:[%s10466_s16 + $0x8c] sm:$0x1]  ;;  %v9233_v30 = vld [vmem:[%s10466_s16 + $0x84] sm:$0xf] }
 0x123   : > { %v1099_v39 = vpop.permute.xlu1 %1098  ;;  %v9265_v51 = vcombine.low %v1975_v27, %v1985_v29  ;;  %v3333_v41 = vor.u32 %v3332_v36, %v3328_v62  ;;  %v1989_v46 = vrot.slane %v1987_v37, 4  ;;  %v1992_v47 = vrot.slane %v1990_v6, 5  ;;  %v9234_v17 = vld [vmem:[%s10466_s16 + $0x88] sm:$0xf]  ;;  %v9235_v12 = vld [vmem:[%s10466_s16 + $0x8c] sm:$0x1] }
 0x124   : > { %1142 = vst.msk [vmem:[#allocation3 + $0x108] sm:$0xff] %vm1130_vm7, %v1099_v39  ;;  %v3324_v2 = vrot.slane %v3323_v42, 4  ;;  %v1998_v50 = vrot.slane %v1996_v9, 5  ;;  %v2000_v34 = vshrl.u32 %v9231_v26, 16  ;;  %v2006_v58 = vshll.u32 %v9232_v35, 16  ;;  %v11604_v31 = vpop.permute.xlu0 %2804  ;;  %v3814_v9 = vld [vmem:[#allocation3 + $0xc0] sm:$0xff] }
 0x125   : > { %1474 = vrot.lane.b32.xlu1 %v9148_v63, %s10380_s19  ;;  %2282 = vst.msk [vmem:[#allocation3 + $0xc8] sm:$0xff] %vm514_vm6, %v9265_v51  ;;  %v3334_v54 = vrot.slane %v3333_v41, 4  ;;  %v1993_v25 = vor.u32 %v1992_v47, %v1989_v46  ;;  %v9553_v61 = vrot.slane %v9515_v45, 9  ;;  %v3632_v7 = vrot.slane %v9516_v33, 5  ;;  %v9236_v28 = vld [vmem:[%s10466_s16 + $0x90] sm:$0xf] }
 0x126   : > { %2642 = vst.msk [vmem:[#allocation3 + $0xc8] sm:$0xff] %vm1130_vm7, %v11375_v38  ;;  %v3329_v4 = vsel %vm10529_vm5, %v3324_v2, %v3328_v62  ;;  %v2002_v5 = vrot.slane %v2000_v34, 4  ;;  %v2008_v8 = vrot.slane %v2006_v58, 5  ;;  %v3635_v63 = vrot.slane %v9517_v48, 5  ;;  %v9237_v36 = vld [vmem:[%s10466_s16 + $0x94] sm:$0xf] }
 0x127   : > { %v1463_v0 = vpop.permute.xlu1 %1462  ;;  %v3339_v60 = vsel %vm10529_vm5, %v3334_v54, %v3338_v22  ;;  %2844 = vst.msk [vmem:[#allocation3 + $0xc8] sm:$0xff] %vm1494_vm8, %v11389_v55  ;;  %v1994_v53 = vrot.slane %v1993_v25, 4  ;;  %v3633_v38 = vsel %vm10459_vm2, %v9553_v61, %v3632_v7  ;;  %v3634_v15 = vrot.slane %v3632_v7, 4  ;;  %v9238_v51 = vld [vmem:[%s10466_s16 + $0x98] sm:$0x1] }
 0x128   : > { %1506 = vst.msk [vmem:[#allocation3 + $0x108] sm:$0xff] %vm1494_vm8, %v1463_v0  ;;  %v9490_v18 = vcombine.low %v3329_v4, %v3339_v60  ;;  %v2003_v19 = vor.u32 %v2002_v5, %v1998_v50  ;;  %v9554_v21 = vrot.slane %v9518_v52, 9  ;;  %v3639_v23 = vrot.slane %v9519_v40, 5  ;;  %v9521_v2 = vld [vmem:[%s10466_s16 + $0x90] sm:$0xe] }
 0x129   : > { %3456 = vst.msk [vmem:[#allocation3 + $0xc8] sm:$0xff] %vm1697_vm9, %v11406_v49  ;;  %1677 = vrot.lane.b32.xlu1 %v10267_v56, %s10381_s22  ;;  %v1999_v55 = vsel %vm10529_vm5, %v1994_v53, %v1998_v50  ;;  %v3636_v24 = vsel %vm10459_vm2, %v3634_v15, %v3635_v63  ;;  %v3642_v44 = vrot.slane %v9520_v10, 5  ;;  %v2011_v26 = vshrl.u32 %v9233_v30, 16  ;;  %v9522_v50 = vld [vmem:[%s10466_s16 + $0x94] sm:$0xf] }
 0x12a   : > { %3428 = vrot.lane.b32.xlu0 %v9490_v18, %s10381_s22  ;;  %v2004_v49 = vrot.slane %v2003_v19, 4  ;;  %v9571_v32 = vcombine.low %v3633_v38, %v3636_v24  ;;  %v3640_v35 = vsel %vm10459_vm2, %v9554_v21, %v3639_v23  ;;  %v3641_v27 = vrot.slane %v3639_v23, 4  ;;  %v9523_v56 = vld [vmem:[%s10466_s16 + $0x98] sm:$0x1]  ;;  %v9524_v4 = vld [vmem:[%s10466_s16 + $0x9c] sm:$0xe] }
 0x12b   : > { %v1666_v62 = vpop.permute.xlu1 %1665  ;;  %v2013_v37 = vrot.slane %v2011_v26, 4  ;;  %v2014_v6 = vshll.u32 %v9233_v30, 16  ;;  %v2020_v39 = vshll.u32 %v9234_v17, 16  ;;  %v2024_v29 = vshrl.u32 %v9234_v17, 16  ;;  %v9525_v53 = vld [vmem:[%s10466_s16 + $0xa0] sm:$0xf] }
 0x12c   : > { %1709 = vst.msk [vmem:[#allocation3 + $0x108] sm:$0xff] %vm1697_vm9, %v1666_v62  ;;  %v2009_v42 = vsel %vm10529_vm5, %v2004_v49, %v2008_v8  ;;  %v3643_v22 = vsel %vm10459_vm2, %v3641_v27, %v3642_v44  ;;  %v2030_v45 = vshll.u32 %v9235_v12, 16  ;;  %v2035_v41 = vshrl.u32 %v9236_v28, 16  ;;  %v9526_v18 = vld [vmem:[%s10466_s16 + $0xa4] sm:$0x1] }
 0x12d   : > { %3780 = vst.msk [vmem:[#allocation3 + $0xd0] sm:$0xff] %vm514_vm6, %v9571_v32  ;;  %v9266_v46 = vcombine.low %v1999_v55, %v2009_v42  ;;  %v9572_v47 = vcombine.low %v3640_v35, %v3643_v22  ;;  %v2016_v33 = vrot.slane %v2014_v6, 5  ;;  %v2022_v48 = vrot.slane %v2020_v39, 5  ;;  %v9239_v12 = vld [vmem:[%s10466_s16 + $0x9c] sm:$0xf] }
 0x12e   : > { %v2026_v34 = vrot.slane %v2024_v29, 4  ;;  %v2032_v58 = vrot.slane %v2030_v45, 5  ;;  %v2037_v52 = vrot.slane %v2035_v41, 4  ;;  %v2038_v54 = vshll.u32 %v9236_v28, 16  ;;  %v11623_v5 = vpop.permute.xlu0 %3416  ;;  %v9240_v55 = vld [vmem:[%s10466_s16 + $0xa0] sm:$0xf] }
 0x12f   : > { %2283 = vst.msk [vmem:[#allocation3 + $0xe0] sm:$0xff] %vm514_vm6, %v9266_v46  ;;  %3781 = vst.msk [vmem:[#allocation3 + $0xe8] sm:$0xff] %vm514_vm6, %v9572_v47  ;;  %v2017_v61 = vor.u32 %v2016_v33, %v2013_v37  ;;  %v2044_v7 = vshll.u32 %v9237_v36, 16  ;;  %v2048_v40 = vshrl.u32 %v9237_v36, 16  ;;  %v2054_v0 = vshll.u32 %v9238_v51, 16  ;;  %v3817_v47 = vld [vmem:[#allocation3 + $0xd8] sm:$0xff] }
 0x130   : > { %v3815_v25 = vld [vmem:[#allocation3 + $0xc8] sm:$0xff]  ;;  %2643 = vst.msk [vmem:[#allocation3 + $0xe0] sm:$0xff] %vm1130_vm7, %v11428_v59  ;;  %v2027_v8 = vor.u32 %v2026_v34, %v2022_v48  ;;  %v2040_v63 = vrot.slane %v2038_v54, 5  ;;  %v9555_v10 = vrot.slane %v9521_v2, 9  ;;  %v3646_v60 = vrot.slane %v9522_v50, 5 }
 0x131   : > { %4145 = vmatprep.mubr.bf16.mxu0 %v3815_v25  ;;  %2845 = vst.msk [vmem:[#allocation3 + $0xe0] sm:$0xff] %vm1494_vm8, %v11457_v43  ;;  %v2018_v38 = vrot.slane %v2017_v61, 4  ;;  %v2046_v15 = vrot.slane %v2044_v7, 5  ;;  %v2050_v30 = vrot.slane %v2048_v40, 4  ;;  %v2056_v17 = vrot.slane %v2054_v0, 5 }
 0x132   : > { %4146 = vmatmul.mubr.bf16.gmra.mrb[32].mxu0 %v3814_v9  ;;  %3457 = vst.msk [vmem:[#allocation3 + $0xe0] sm:$0xff] %vm1697_vm9, %v11480_v20  ;;  %v2028_v59 = vrot.slane %v2027_v8, 4  ;;  %v2041_v19 = vor.u32 %v2040_v63, %v2037_v52  ;;  %v3647_v21 = vsel %vm10459_vm2, %v9555_v10, %v3646_v60  ;;  %v3648_v23 = vrot.slane %v3646_v60, 4  ;;  %v9241_v62 = vld [vmem:[%s10466_s16 + $0xa4] sm:$0x1]  ;;  %v11645_v39 = vpop.permute.xlu0 %2604 }
 0x133   : > { %v2023_v43 = vsel %vm10529_vm5, %v2018_v38, %v2022_v48  ;;  %v2051_v44 = vor.u32 %v2050_v30, %v2046_v15  ;;  %v3649_v26 = vrot.slane %v9523_v56, 5  ;;  %v9556_v28 = vrot.slane %v9524_v4, 9  ;;  %v9242_v29 = vld [vmem:[%s10466_s16 + $0xa8] sm:$0xf]  ;;  %v9243_v42 = vld [vmem:[%s10466_s16 + $0xac] sm:$0xf] }
 0x134   : > { %v3816_v24 = vld [vmem:[#allocation3 + $0xd0] sm:$0xff]  ;;  %v2033_v20 = vsel %vm10529_vm5, %v2028_v59, %v2032_v58  ;;  %v2042_v49 = vrot.slane %v2041_v19, 4  ;;  %v3653_v32 = vrot.slane %v9525_v53, 5  ;;  %v3656_v35 = vrot.slane %v9526_v18, 5  ;;  %v9244_v46 = vld [vmem:[%s10466_s16 + $0xb0] sm:$0x1] }
 0x135   : > { %10110 = vmatprep.mubr.msk.bf16.mxu1 %vm514_vm6, %v3816_v24  ;;  %v9267_v27 = vcombine.low %v2023_v43, %v2033_v20  ;;  %v2052_v36 = vrot.slane %v2051_v44, 4  ;;  %v3650_v37 = vsel %vm10459_vm2, %v3648_v23, %v3649_v26  ;;  %v2059_v6 = vshrl.u32 %v9239_v12, 16  ;;  %v9527_v25 = vld [vmem:[%s10466_s16 + $0xa8] sm:$0xe]  ;;  %v9528_v61 = vld [vmem:[%s10466_s16 + $0xac] sm:$0xf] }
 0x136   : > { %v3819_v22 = vld [vmem:[#allocation3 + $0xe8] sm:$0xff]  ;;  %v2047_v9 = vsel %vm10529_vm5, %v2042_v49, %v2046_v15  ;;  %v9573_v45 = vcombine.low %v3647_v21, %v3650_v37  ;;  %v3654_v51 = vsel %vm10459_vm2, %v9556_v28, %v3653_v32  ;;  %v3655_v41 = vrot.slane %v3653_v32, 4  ;;  %v9529_v8 = vld [vmem:[%s10466_s16 + $0xb0] sm:$0x1]  ;;  %v9530_v38 = vld [vmem:[%s10466_s16 + $0xb4] sm:$0xe]  ;;  %v11676_v15 = vpop.permute.xlu0 %2806 }
 0x137   : > { %10111 = vmatmul.mubr.msk.bf16.gmra.mrb[16].mxu1 %vm514_vm6, %v3819_v22  ;;  %2284 = vst.msk [vmem:[#allocation3 + $0xf8] sm:$0xff] %vm514_vm6, %v9267_v27  ;;  %v2057_v33 = vsel %vm10529_vm5, %v2052_v36, %v2056_v17  ;;  %v2061_v48 = vrot.slane %v2059_v6, 4  ;;  %v2062_v2 = vshll.u32 %v9239_v12, 16  ;;  %v2068_v50 = vshll.u32 %v9240_v55, 16  ;;  %v9531_v59 = vld [vmem:[%s10466_s16 + $0xb8] sm:$0xf] }
 0x138   : > { %v1101_v34 = vpop.permute.xlu1 %1100  ;;  %2644 = vst.msk [vmem:[#allocation3 + $0xf8] sm:$0xff] %vm1130_vm7, %v11503_v57  ;;  %v9268_v58 = vcombine.low %v2047_v9, %v2057_v33  ;;  %v3657_v52 = vsel %vm10459_vm2, %v3655_v41, %v3656_v35  ;;  %v2072_v54 = vshrl.u32 %v9240_v55, 16  ;;  %v2078_v56 = vshll.u32 %v9241_v62, 16  ;;  %v9532_v12 = vld [vmem:[%s10466_s16 + $0xbc] sm:$0x1] }
 0x139   : > { %3782 = vst.msk [vmem:[#allocation3 + $0x100] sm:$0xff] %vm514_vm6, %v9573_v45  ;;  %v3818_v7 = vld [vmem:[#allocation3 + $0xe0] sm:$0xff]  ;;  %v9574_v40 = vcombine.low %v3654_v51, %v3657_v52  ;;  %v2064_v0 = vrot.slane %v2062_v2, 5  ;;  %v2070_v57 = vrot.slane %v2068_v50, 5  ;;  %v2083_v4 = vshrl.u32 %v9242_v29, 16 }
 0x13a   : > { %1143 = vst.msk [vmem:[#allocation3 + $0x120] sm:$0xff] %vm1130_vm7, %v1101_v34  ;;  %4153 = vmatprep.mubr.bf16.mxu0 %v3818_v7  ;;  %v2074_v63 = vrot.slane %v2072_v54, 4  ;;  %v2080_v10 = vrot.slane %v2078_v56, 5  ;;  %v2086_v60 = vshll.u32 %v9242_v29, 16  ;;  %v2092_v53 = vshll.u32 %v9243_v42, 16  ;;  %v3820_v29 = vld [vmem:[#allocation3 + $0xf0] sm:$0xff] }
 0x13b   : > { %2846 = vst.msk [vmem:[#allocation3 + $0xf8] sm:$0xff] %vm1494_vm8, %v11538_v11  ;;  %4154 = vmatmul.mubr.bf16.gmra.mrb[36].mxu0 %v3817_v47  ;;  %v2065_v11 = vor.u32 %v2064_v0, %v2061_v48  ;;  %v2096_v17 = vshrl.u32 %v9243_v42, 16  ;;  %v2102_v18 = vshll.u32 %v9244_v46, 16  ;;  %v9557_v23 = vrot.slane %v9527_v25, 9  ;;  %v9245_v26 = vld [vmem:[%s10466_s16 + $0xb4] sm:$0xf] }
 0x13c   : > { %3458 = vst.msk [vmem:[#allocation3 + $0xf8] sm:$0xff] %vm1697_vm9, %v11556_v16  ;;  %v1465_v30 = vpop.permute.xlu1 %1464  ;;  %v2085_v16 = vrot.slane %v2083_v4, 4  ;;  %v2075_v19 = vor.u32 %v2074_v63, %v2070_v57  ;;  %v2088_v21 = vrot.slane %v2086_v60, 5  ;;  %v3660_v44 = vrot.slane %v9528_v61, 5  ;;  %v9246_v49 = vld [vmem:[%s10466_s16 + $0xb8] sm:$0xf] }
 0x13d   : > { %2285 = vst.msk [vmem:[#allocation3 + $0x110] sm:$0xff] %vm514_vm6, %v9268_v58  ;;  %3783 = vst.msk [vmem:[#allocation3 + $0x118] sm:$0xff] %vm514_vm6, %v9574_v40  ;;  %v2066_v55 = vrot.slane %v2065_v11, 4  ;;  %v2098_v24 = vrot.slane %v2096_v17, 4  ;;  %v2104_v43 = vrot.slane %v2102_v18, 5  ;;  %v9558_v20 = vrot.slane %v9530_v38, 9 }
 0x13e   : > { %2645 = vst.msk [vmem:[#allocation3 + $0x110] sm:$0xff] %vm1130_vm7, %v11574_v14  ;;  %v2094_v14 = vrot.slane %v2092_v53, 5  ;;  %v2076_v28 = vrot.slane %v2075_v19, 4  ;;  %v2089_v62 = vor.u32 %v2088_v21, %v2085_v16  ;;  %v3662_v37 = vrot.slane %v3660_v44, 4  ;;  %v9247_v6 = vld [vmem:[%s10466_s16 + $0xbc] sm:$0x1] }
 0x13f   : > { %2847 = vst.msk [vmem:[#allocation3 + $0x110] sm:$0xff] %vm1494_vm8, %v11604_v31  ;;  %1507 = vst.msk [vmem:[#allocation3 + $0x120] sm:$0xff] %vm1494_vm8, %v1465_v30  ;;  %v3663_v31 = vrot.slane %v9529_v8, 5  ;;  %v2071_v35 = vsel %vm10529_vm5, %v2066_v55, %v2070_v57  ;;  %v3667_v9 = vrot.slane %v9531_v59, 5  ;;  %v3670_v45 = vrot.slane %v9532_v12, 5  ;;  %v3823_v55 = vld [vmem:[#allocation3 + $0x108] sm:$0xff] }
 0x140   : > { %3459 = vst.msk [vmem:[#allocation3 + $0x110] sm:$0xff] %vm1697_vm9, %v11623_v5  ;;  %v3822_v32 = vld [vmem:[#allocation3 + $0x100] sm:$0xff]  ;;  %v1668_v27 = vpop.permute.xlu1 %1667  ;;  %v2099_v36 = vor.u32 %v2098_v24, %v2094_v14  ;;  %v3661_v5 = vsel %vm10459_vm2, %v9557_v23, %v3660_v44  ;;  %v2081_v42 = vsel %vm10529_vm5, %v2076_v28, %v2080_v10  ;;  %v2090_v22 = vrot.slane %v2089_v62, 4  ;;  %v9248_v2 = vld [vmem:[%s10466_s16 + $0xc0] sm:$0xf] }
 0x141   : > { %10114 = vmatprep.mubr.msk.bf16.mxu1 %vm514_vm6, %v3822_v32  ;;  %1710 = vst.msk [vmem:[#allocation3 + $0x120] sm:$0xff] %vm1697_vm9, %v1668_v27  ;;  %v9269_v41 = vcombine.low %v2071_v35, %v2081_v42  ;;  %v3419_v46 = vpop.permute.xlu0 %3418  ;;  %v3664_v33 = vsel %vm10459_vm2, %v3662_v37, %v3663_v31  ;;  %v2107_v48 = vshrl.u32 %v9245_v26, 16  ;;  %v3668_v52 = vsel %vm10459_vm2, %v9558_v20, %v3667_v9  ;;  %v9249_v56 = vld [vmem:[%s10466_s16 + $0xc4] sm:$0xf]  ;;  %v9250_v25 = vld [vmem:[%s10466_s16 + $0xc8] sm:$0x1] }
 0x142   : > { %v2100_v47 = vrot.slane %v2099_v36, 4  ;;  %v2095_v34 = vsel %vm10529_vm5, %v2090_v22, %v2094_v14  ;;  %v9575_v58 = vcombine.low %v3661_v5, %v3664_v33  ;;  %v3669_v54 = vrot.slane %v3667_v9, 4  ;;  %v9533_v30 = vld [vmem:[%s10466_s16 + $0xc0] sm:$0xe]  ;;  %v9534_v19 = vld [vmem:[%s10466_s16 + $0xc4] sm:$0xf] }
 0x143   : > { %v3821_v51 = vld [vmem:[#allocation3 + $0xf8] sm:$0xff]  ;;  %2286 = vst.msk [vmem:[#allocation3 + $0x128] sm:$0xff] %vm514_vm6, %v9269_v41  ;;  %v2109_v7 = vrot.slane %v2107_v48, 4  ;;  %v2110_v40 = vshll.u32 %v9245_v26, 16  ;;  %v2116_v0 = vshll.u32 %v9246_v49, 16  ;;  %v2120_v63 = vshrl.u32 %v9246_v49, 16 }
 0x144   : > { %v3825_v50 = vld [vmem:[#allocation3 + $0x118] sm:$0xff]  ;;  %4161 = vmatprep.mubr.bf16.mxu0 %v3821_v51  ;;  %v2105_v61 = vsel %vm10529_vm5, %v2100_v47, %v2104_v43  ;;  %2646 = vst.msk [vmem:[#allocation3 + $0x128] sm:$0xff] %vm1130_vm7, %v11645_v39  ;;  %v3671_v8 = vsel %vm10459_vm2, %v3669_v54, %v3670_v45  ;;  %v2126_v10 = vshll.u32 %v9247_v6, 16  ;;  %v2131_v39 = vshrl.u32 %v9248_v2, 16  ;;  %v9535_v12 = vld [vmem:[%s10466_s16 + $0xc8] sm:$0x1] }
 0x145   : > { %10115 = vmatmul.mubr.msk.bf16.gmra.mrb[20].mxu1 %vm514_vm6, %v3825_v50  ;;  %4162 = vmatmul.mubr.bf16.gmra.mrb[40].mxu0 %v3820_v29  ;;  %v9270_v4 = vcombine.low %v2095_v34, %v2105_v61  ;;  %3784 = vst.msk [vmem:[#allocation3 + $0x130] sm:$0xff] %vm514_vm6, %v9575_v58  ;;  %v2607_v60 = vpop.permute.xlu0 %2606  ;;  %v9576_v53 = vcombine.low %v3668_v52, %v3671_v8  ;;  %v2112_v38 = vrot.slane %v2110_v40, 5  ;;  %v2118_v11 = vrot.slane %v2116_v0, 5  ;;  %v9536_v28 = vld [vmem:[%s10466_s16 + $0xcc] sm:$0xe] }
 0x146   : > { %2848 = vst.msk [vmem:[#allocation3 + $0x128] sm:$0xff] %vm1494_vm8, %v11676_v15  ;;  %v2122_v16 = vrot.slane %v2120_v63, 4  ;;  %v2128_v17 = vrot.slane %v2126_v10, 5  ;;  %v2134_v18 = vshll.u32 %v9248_v2, 16  ;;  %v2140_v59 = vshll.u32 %v9249_v56, 16 }
 0x147   : > { %v3824_v57 = vld [vmem:[#allocation3 + $0x110] sm:$0xff]  ;;  %3460 = vst.msk [vmem:[#allocation3 + $0x128] sm:$0xff] %vm1697_vm9, %v3419_v46  ;;  %v2113_v15 = vor.u32 %v2112_v38, %v2109_v7  ;;  %v2133_v21 = vrot.slane %v2131_v39, 4  ;;  %v2144_v14 = vshrl.u32 %v9249_v56, 16  ;;  %v2150_v23 = vshll.u32 %v9250_v25, 16 }
 0x148   : > { %4169 = vmatprep.mubr.bf16.mxu0 %v3824_v57  ;;  %2287 = vst.msk [vmem:[#allocation3 + $0x140] sm:$0xff] %vm514_vm6, %v9270_v4  ;;  %3785 = vst.msk [vmem:[#allocation3 + $0x148] sm:$0xff] %vm514_vm6, %v9576_v53  ;;  %v2123_v24 = vor.u32 %v2122_v16, %v2118_v11  ;;  %v2136_v43 = vrot.slane %v2134_v18, 5  ;;  %v2142_v44 = vrot.slane %v2140_v59, 5  ;;  %v9559_v26 = vrot.slane %v9533_v30, 9  ;;  %v3826_v8 = vld [vmem:[#allocation3 + $0x120] sm:$0xff] }
 0x149   : > { %2647 = vst.msk [vmem:[#allocation3 + $0x140] sm:$0xff] %vm1130_vm7, %v2607_v60  ;;  %v2809_v62 = vpop.permute.xlu0 %2808  ;;  %v2114_v31 = vrot.slane %v2113_v15, 4  ;;  %v2146_v20 = vrot.slane %v2144_v14, 4  ;;  %v2152_v49 = vrot.slane %v2150_v23, 5  ;;  %v3674_v32 = vrot.slane %v9534_v19, 5 }
 0x14a   : > { %v9537_v35 = vld [vmem:[%s10466_s16 + $0xd0] sm:$0xf]  ;;  %2849 = vst.msk [vmem:[#allocation3 + $0x140] sm:$0xff] %vm1494_vm8, %v2809_v62  ;;  %v2124_v36 = vrot.slane %v2123_v24, 4  ;;  %v2137_v5 = vor.u32 %v2136_v43, %v2133_v21  ;;  %v3677_v37 = vrot.slane %v9535_v12, 5  ;;  %v9560_v29 = vrot.slane %v9536_v28, 9 }
 0x14b   : > { %v1103_v27 = vpop.permute.xlu1 %1102  ;;  %v9538_v6 = vld [vmem:[%s10466_s16 + $0xd4] sm:$0x1]  ;;  %v2119_v22 = vsel %vm10529_vm5, %v2114_v31, %v2118_v11  ;;  %v2147_v9 = vor.u32 %v2146_v20, %v2142_v44  ;;  %v3675_v45 = vsel %vm10459_vm2, %v9559_v26, %v3674_v32  ;;  %v3676_v51 = vrot.slane %v3674_v32, 4  ;;  %v9251_v41 = vld [vmem:[%s10466_s16 + $0xcc] sm:$0xf] }
 0x14c   : > { %1144 = vst.msk [vmem:[#allocation3 + $0x138] sm:$0xff] %vm1130_vm7, %v1103_v27  ;;  %v3828_v42 = vld [vmem:[#allocation3 + $0x130] sm:$0xff]  ;;  %v9252_v46 = vld [vmem:[%s10466_s16 + $0xd0] sm:$0xf]  ;;  %v2129_v47 = vsel %vm10529_vm5, %v2124_v36, %v2128_v17  ;;  %v2138_v33 = vrot.slane %v2137_v5, 4  ;;  %v3681_v48 = vrot.slane %v9537_v35, 5 }
 0x14d   : > { %4170 = vmatmul.mubr.bf16.gmra.mrb[44].mxu0 %v3823_v55  ;;  %10118 = vmatprep.mubr.msk.bf16.mxu1 %vm514_vm6, %v3828_v42  ;;  %v3684_v2 = vrot.slane %v9538_v6, 5  ;;  %v9253_v50 = vld [vmem:[%s10466_s16 + $0xd4] sm:$0x1]  ;;  %v9271_v58 = vcombine.low %v2119_v22, %v2129_v47  ;;  %v2148_v52 = vrot.slane %v2147_v9, 4  ;;  %v3678_v54 = vsel %vm10459_vm2, %v3676_v51, %v3677_v37  ;;  %v9254_v4 = vld [vmem:[%s10466_s16 + $0xd8] sm:$0xf] }
 0x14e   : > { %v3827_v34 = vld [vmem:[#allocation3 + $0x128] sm:$0xff]  ;;  %v2155_v56 = vshrl.u32 %v9251_v41, 16  ;;  %v2143_v7 = vsel %vm10529_vm5, %v2138_v33, %v2142_v44  ;;  %v9577_v40 = vcombine.low %v3675_v45, %v3678_v54  ;;  %v3682_v0 = vsel %vm10459_vm2, %v9560_v29, %v3681_v48  ;;  %v9255_v38 = vld [vmem:[%s10466_s16 + $0xdc] sm:$0xf]  ;;  %v9539_v24 = vld [vmem:[%s10466_s16 + $0xd8] sm:$0xe] }
 0x14f   : > { %v1467_v25 = vpop.permute.xlu1 %1466  ;;  %4177 = vmatprep.mubr.bf16.mxu0 %v3827_v34  ;;  %v3831_v61 = vld [vmem:[#allocation3 + $0x148] sm:$0xff]  ;;  %v3683_v57 = vrot.slane %v3681_v48, 4  ;;  %2288 = vst.msk [vmem:[#allocation3 + $0x158] sm:$0xff] %vm514_vm6, %v9271_v58  ;;  %v2153_v63 = vsel %vm10529_vm5, %v2148_v52, %v2152_v49  ;;  %v2158_v60 = vshll.u32 %v9251_v41, 16  ;;  %v2164_v53 = vshll.u32 %v9252_v46, 16 }
 0x150   : > { %1508 = vst.msk [vmem:[#allocation3 + $0x138] sm:$0xff] %vm1494_vm8, %v1467_v25  ;;  %10119 = vmatmul.mubr.msk.bf16.gmra.mrb[24].mxu1 %vm514_vm6, %v3831_v61  ;;  %v2157_v10 = vrot.slane %v2155_v56, 4  ;;  %v9272_v11 = vcombine.low %v2143_v7, %v2153_v63  ;;  %v2168_v30 = vshrl.u32 %v9252_v46, 16  ;;  %v2174_v16 = vshll.u32 %v9253_v50, 16  ;;  %v9256_v17 = vld [vmem:[%s10466_s16 + $0xe0] sm:$0x1] }
 0x151   : > { %3786 = vst.msk [vmem:[#allocation3 + $0x160] sm:$0xff] %vm514_vm6, %v9577_v40  ;;  %v3685_v39 = vsel %vm10459_vm2, %v3683_v57, %v3684_v2  ;;  %v2160_v59 = vrot.slane %v2158_v60, 5  ;;  %v2166_v19 = vrot.slane %v2164_v53, 5  ;;  %v2179_v15 = vshrl.u32 %v9254_v4, 16  ;;  %v9540_v62 = vld [vmem:[%s10466_s16 + $0xdc] sm:$0xf] }
 0x152   : > { %v9578_v18 = vcombine.low %v3682_v0, %v3685_v39  ;;  %2289 = vst.msk [vmem:[#allocation3 + $0x170] sm:$0xff] %vm514_vm6, %v9272_v11  ;;  %v2170_v14 = vrot.slane %v2168_v30, 4  ;;  %v2176_v23 = vrot.slane %v2174_v16, 5  ;;  %v2182_v12 = vshll.u32 %v9254_v4, 16  ;;  %v9541_v35 = vld [vmem:[%s10466_s16 + $0xe0] sm:$0x1] }
 0x153   : > { %v1670_v21 = vpop.permute.xlu1 %1669  ;;  %v2188_v55 = vshll.u32 %v9255_v38, 16  ;;  %v2161_v43 = vor.u32 %v2160_v59, %v2157_v10  ;;  %v2181_v44 = vrot.slane %v2179_v15, 4  ;;  %v2192_v26 = vshrl.u32 %v9255_v38, 16  ;;  %v9542_v29 = vld [vmem:[%s10466_s16 + $0xe4] sm:$0xe] }
 0x154   : > { %1711 = vst.msk [vmem:[#allocation3 + $0x138] sm:$0xff] %vm1697_vm9, %v1670_v21  ;;  %v2198_v28 = vshll.u32 %v9256_v17, 16  ;;  %v3421_v31 = vpop.permute.xlu0 %3420  ;;  %v2171_v20 = vor.u32 %v2170_v14, %v2166_v19  ;;  %v2184_v49 = vrot.slane %v2182_v12, 5  ;;  %v9561_v27 = vrot.slane %v9539_v24, 9  ;;  %v9543_v45 = vld [vmem:[%s10466_s16 + $0xe8] sm:$0xf] }
 0x155   : > { %4178 = vmatmul.mubr.bf16.gmra.mrb[48].mxu0 %v3826_v8  ;;  %3787 = vst.msk [vmem:[#allocation3 + $0x178] sm:$0xff] %vm514_vm6, %v9578_v18  ;;  %v2190_v32 = vrot.slane %v2188_v55, 5  ;;  %v2162_v36 = vrot.slane %v2161_v43, 4  ;;  %v2194_v5 = vrot.slane %v2192_v26, 4  ;;  %v3688_v6 = vrot.slane %v9540_v62, 5  ;;  %v10281_v24 = vld [vmem:[%s13642_s4 + $0x80] sm:$0xff]  }
 0x156   : > { %3461 = vst.msk [vmem:[#allocation3 + $0x140] sm:$0xff] %vm1697_vm9, %v3421_v31  ;;  %v2200_v37 = vrot.slane %v2198_v28, 5  ;;  %v2172_v42 = vrot.slane %v2171_v20, 4  ;;  %v2185_v22 = vor.u32 %v2184_v49, %v2181_v44  ;;  %v3691_v9 = vrot.slane %v9541_v35, 5  ;;  %v9544_v51 = vld [vmem:[%s10466_s16 + $0xec] sm:$0x1]  ;;  %10130 = vmatprep.subr.bf16.mxu0 %v10281_v24 }
 0x157   : > { %v2167_v46 = vsel %vm10529_vm5, %v2162_v36, %v2166_v19  ;;  %v2195_v47 = vor.u32 %v2194_v5, %v2190_v32  ;;  %v3689_v33 = vsel %vm10459_vm2, %v9561_v27, %v3688_v6  ;;  %v3690_v48 = vrot.slane %v3688_v6, 4  ;;  %10131 = vmatpush3.bf16.msra.mxu0 %v10281_v24  ;;  %v10283_v44 = vld [vmem:[%s13642_s4 + $0x88] sm:$0xff]  }
 0x158   : > { %v3834_v41 = vld [vmem:[#allocation3 + $0x160] sm:$0xff]  ;;  %v2609_v2 = vpop.permute.xlu0 %2608  ;;  %v2177_v50 = vsel %vm10529_vm5, %v2172_v42, %v2176_v23  ;;  %v2186_v34 = vrot.slane %v2185_v22, 4  ;;  %v9562_v58 = vrot.slane %v9542_v29, 9  ;;  %v3695_v52 = vrot.slane %v9543_v45, 5  ;;  %10132 = vmatprep.subr.bf16.mxu0 %v10283_v44 }
 0x159   : > { %10122 = vmatprep.mubr.msk.bf16.mxu1 %vm514_vm6, %v3834_v41  ;;  %2648 = vst.msk [vmem:[#allocation3 + $0x158] sm:$0xff] %vm1130_vm7, %v2609_v2  ;;  %v9273_v54 = vcombine.low %v2167_v46, %v2177_v50  ;;  %v2196_v56 = vrot.slane %v2195_v47, 4  ;;  %v3692_v25 = vsel %vm10459_vm2, %v3690_v48, %v3691_v9  ;;  %v3698_v61 = vrot.slane %v9544_v51, 5  ;;  %v11818_v46 = vld [vmem:[%s13641_s3] ss:$0 sm:$0xff] }
 0x15a   : > { %v1105_v7 = vpop.permute.xlu1 %1104  ;;  %v2191_v0 = vsel %vm10529_vm5, %v2186_v34, %v2190_v32  ;;  %v9579_v57 = vcombine.low %v3689_v33, %v3692_v25  ;;  %v3696_v4 = vsel %vm10459_vm2, %v9562_v58, %v3695_v52  ;;  %v3697_v8 = vrot.slane %v3695_v52, 4 }
 0x15b   : > { %1145 = vst.msk [vmem:[#allocation3 + $0x150] sm:$0xff] %vm1130_vm7, %v1105_v7  ;;  %v3829_v63 = vld [vmem:[#allocation3 + $0x138] sm:$0xff]  ;;  %v2201_v10 = vsel %vm10529_vm5, %v2196_v56, %v2200_v37  ;;  %10133 = vmatpush3.bf16.msra.mxu0 %v10283_v44 }
 0x15c   : > { %v3837_v40 = vld [vmem:[#allocation3 + $0x178] sm:$0xff]  ;;  %2290 = vst.msk [vmem:[#allocation3 + $0x188] sm:$0xff] %vm514_vm6, %v9273_v54  ;;  %v2811_v60 = vpop.permute.xlu0 %2810  ;;  %v9274_v38 = vcombine.low %v2191_v0, %v2201_v10  ;;  %3788 = vst.msk [vmem:[#allocation3 + $0x190] sm:$0xff] %vm514_vm6, %v9579_v57  ;;  %v3699_v11 = vsel %vm10459_vm2, %v3697_v8, %v3698_v61 }
 0x15d   : > { %10123 = vmatmul.mubr.msk.bf16.gmra.mrb[28].mxu1 %vm514_vm6, %v3837_v40  ;;  %v3830_v53 = vld [vmem:[#allocation3 + $0x140] sm:$0xff]  ;;  %2850 = vst.msk [vmem:[#allocation3 + $0x158] sm:$0xff] %vm1494_vm8, %v2811_v60  ;;  %v9580_v39 = vcombine.low %v3696_v4, %v3699_v11 }
 0x15e   : > { %4185 = vmatprep.mubr.bf16.mxu0 %v3830_v53  ;;  %v1469_v30 = vpop.permute.xlu1 %1468  ;;  %2291 = vst.msk [vmem:[#allocation3 + $0x1a0] sm:$0xff] %vm514_vm6, %v9274_v38 }
 0x15f   : > { %4186 = vmatmul.mubr.bf16.gmra.mrb[52].mxu0 %v3829_v63  ;;  %1509 = vst.msk [vmem:[#allocation3 + $0x150] sm:$0xff] %vm1494_vm8, %v1469_v30 }
 0x160   : > { %3789 = vst.msk [vmem:[#allocation3 + $0x1a8] sm:$0xff] %vm514_vm6, %v9580_v39 }
 0x162   : > { %v1672_v16 = vpop.permute.xlu1 %1671 }
 0x163   : > { %1712 = vst.msk [vmem:[#allocation3 + $0x150] sm:$0xff] %vm1697_vm9, %v1672_v16  ;;  %v3840_v17 = vld [vmem:[#allocation3 + $0x190] sm:$0xff] }
 0x164   : > { %v3423_v18 = vpop.permute.xlu0 %3422  ;;  %10126 = vmatprep.mubr.msk.bf16.mxu1 %vm514_vm6, %v3840_v17 }
 0x165   : > { %3462 = vst.msk [vmem:[#allocation3 + $0x158] sm:$0xff] %vm1697_vm9, %v3423_v18 }
 0x167   : > { %v3843_v59 = vld [vmem:[#allocation3 + $0x1a8] sm:$0xff] }
 0x168   : > { %10127 = vmatmul.mubr.msk.bf16.gmra.mrb[32].mxu1 %vm514_vm6, %v3843_v59  ;;  %v2611_v19 = vpop.permute.xlu0 %2610 }
 0x169   : > { %2649 = vst.msk [vmem:[#allocation3 + $0x170] sm:$0xff] %vm1130_vm7, %v2611_v19 }
 0x16a   : > { %v3832_v15 = vld [vmem:[#allocation3 + $0x150] sm:$0xff] }
 0x16c   : > { %v2813_v21 = vpop.permute.xlu0 %2812  ;;  %v3833_v14 = vld [vmem:[#allocation3 + $0x158] sm:$0xff] }
 0x16d   : > { %2851 = vst.msk [vmem:[#allocation3 + $0x170] sm:$0xff] %vm1494_vm8, %v2813_v21  ;;  %4193 = vmatprep.mubr.bf16.mxu0 %v3833_v14  ;;  %v4923_v21 = vld [vmem:[#allocation2 + $0xc] sm:$0xf] }
 0x16e   : > { %4194 = vmatmul.mubr.bf16.gmra.mrb[56].mxu0 %v3832_v15 }
 0x16f   : > { %v1107_v23 = vpop.permute.xlu1 %1106 }
 0x170   : > { %1146 = vst.msk [vmem:[#allocation3 + $0x168] sm:$0xff] %vm1130_vm7, %v1107_v23 }
 0x173   : > { %v1471_v12 = vpop.permute.xlu1 %1470 }
 0x174   : > { %1510 = vst.msk [vmem:[#allocation3 + $0x168] sm:$0xff] %vm1494_vm8, %v1471_v12 }
 0x177   : > { %v1674_v55 = vpop.permute.xlu1 %1673 }
 0x178   : > { %v3425_v43 = vpop.permute.xlu0 %3424  ;;  %1713 = vst.msk [vmem:[#allocation3 + $0x168] sm:$0xff] %vm1697_vm9, %v1674_v55 }
 0x179   : > { %3463 = vst.msk [vmem:[#allocation3 + $0x170] sm:$0xff] %vm1697_vm9, %v3425_v43  ;;  %v4913_v43 = vld [vmem:[#allocation2] sm:$0xf] }
 0x17c   : > { %v2613_v26 = vpop.permute.xlu0 %2612 }
 0x17d   : > { %2650 = vst.msk [vmem:[#allocation3 + $0x188] sm:$0xff] %vm1130_vm7, %v2613_v26 }
 0x17e   : > { %v1109_v28 = vpop.permute.xlu1 %1108 }
 0x17f   : > { %1147 = vst.msk [vmem:[#allocation3 + $0x180] sm:$0xff] %vm1130_vm7, %v1109_v28  ;;  %v3835_v62 = vld [vmem:[#allocation3 + $0x168] sm:$0xff] }
 0x180   : > { %v4083_v31 = vpop.f32.mrb[0].mxu0  ;;  %v2815_v20 = vpop.permute.xlu0 %2814  ;;  %v3836_v49 = vld [vmem:[#allocation3 + $0x170] sm:$0xff] }
 0x181   : > { %v4085_v32 = vpop.f32.mrb[1].mxu0  ;;  %2852 = vst.msk [vmem:[#allocation3 + $0x188] sm:$0xff] %vm1494_vm8, %v2815_v20  ;;  %4201 = vmatprep.mubr.bf16.mxu0 %v3836_v49  ;;  %v4084_v48 = vadd.f32 %v11818_v46, %v4083_v31 }
 0x182   : > { %v4086_v35 = vpop.f32.mrb[2].mxu0  ;;  %v1473_v27 = vpop.permute.xlu1 %1472  ;;  %4202 = vmatmul.mubr.bf16.gmra.mrb[60].mxu0 %v3835_v62  ;;  %v4927_v32 = vld [vmem:[#allocation2 + $0x14] sm:$0x1] }
 0x183   : > { %v4088_v36 = vpop.f32.mrb[3].mxu0  ;;  %1511 = vst.msk [vmem:[#allocation3 + $0x180] sm:$0xff] %vm1494_vm8, %v1473_v27  ;;  %v4087_v34 = vadd.f32 %v11818_v46, %v4086_v35 }
 0x184   : > { %v4920_v36 = vld [vmem:[#allocation2 + $0x8] sm:$0x1] }
 0x186   : > { %v1676_v5 = vpop.permute.xlu1 %1675 }
 0x187   : > { %1714 = vst.msk [vmem:[#allocation3 + $0x180] sm:$0xff] %vm1697_vm9, %v1676_v5 }
 0x188   : > { %v4091_v37 = vpop.f32.mrb[4].mxu0  ;;  %v3427_v6 = vpop.permute.xlu0 %3426 }
 0x189   : > { %v4093_v29 = vpop.f32.mrb[5].mxu0  ;;  %3464 = vst.msk [vmem:[#allocation3 + $0x188] sm:$0xff] %vm1697_vm9, %v3427_v6  ;;  %v4092_v33 = vadd.f32 %v11818_v46, %v4091_v37 }
 0x18a   : > { %v4094_v42 = vpop.f32.mrb[6].mxu0 }
 0x18b   : > { %v4096_v22 = vpop.f32.mrb[7].mxu0  ;;  %v4095_v2 = vadd.f32 %v11818_v46, %v4094_v42 }
 0x18c   : > { %v2615_v9 = vpop.permute.xlu0 %2614 }
 0x18d   : > { %2651 = vst.msk [vmem:[#allocation3 + $0x1a0] sm:$0xff] %vm1130_vm7, %v2615_v9 }
 0x18e   : > { %v3838_v45 = vld [vmem:[#allocation3 + $0x180] sm:$0xff] }
 0x190   : > { %v2817_v51 = vpop.permute.xlu0 %2816  ;;  %v3839_v41 = vld [vmem:[#allocation3 + $0x188] sm:$0xff] }
 0x191   : > { %2853 = vst.msk [vmem:[#allocation3 + $0x1a0] sm:$0xff] %vm1494_vm8, %v2817_v51  ;;  %4209 = vmatprep.mubr.bf16.mxu0 %v3839_v41 }
 0x192   : > { %4210 = vmatmul.mubr.bf16.gmra.mrb[64].mxu0 %v3838_v45 }
 0x193   : > { %v1111_v47 = vpop.permute.xlu1 %1110 }
 0x194   : > { %1148 = vst.msk [vmem:[#allocation3 + $0x198] sm:$0xff] %vm1130_vm7, %v1111_v47 }
 0x197   : > { %v1475_v52 = vpop.permute.xlu1 %1474 }
 0x198   : > { %v10096_v50 = vpop.f32.mrb[0].mxu1  ;;  %v11825_v58 = vpop.f32.mrb[8].mxu0  ;;  %1512 = vst.msk [vmem:[#allocation3 + $0x198] sm:$0xff] %vm1494_vm8, %v1475_v52 }
 0x199   : > { %v4260_v54 = vpop.f32.mrb[1].mxu1  ;;  %v4269_v56 = vadd.f32 %v10096_v50, %v4092_v33  ;;  %v4101_v7 = vpop.f32.mrb[9].mxu0 }
 0x19a   : > { %v4261_v25 = vadd.f32 %v4260_v54, %v4084_v48  ;;  %v10097_v61 = vpop.f32.mrb[2].mxu1  ;;  %v11828_v4 = vpop.f32.mrb[10].mxu0 }
 0x19b   : > { %v4263_v40 = vpop.f32.mrb[3].mxu1  ;;  %v4405_v0 = vmax.f32 %v4269_v56, 0.0  ;;  %v4272_v57 = vadd.f32 %v10097_v61, %v4095_v2  ;;  %v4104_v10 = vpop.f32.mrb[11].mxu0  ;;  %v4100_v2 = vadd.f32 %v11818_v46, %v11825_v58  ;;  %v4103_v54 = vadd.f32 %v11818_v46, %v11828_v4 }
 0x19c   : > { %v4403_v8 = vmax.f32 %v4261_v25, 0.0  ;;  %v4264_v63 = vadd.f32 %v4263_v40, %v4087_v34  ;;  %v1678_v60 = vpop.permute.xlu1 %1677  ;;  %v3429_v11 = vpop.permute.xlu0 %3428 }
 0x19d   : > { %v9888_v53 = vpack.c.bf16 %v4405_v0, %v4405_v0  ;;  %v4406_v38 = vmax.f32 %v4272_v57, 0.0  ;;  %1715 = vst.msk [vmem:[#allocation3 + $0x198] sm:$0xff] %vm1697_vm9, %v1678_v60  ;;  %3465 = vst.msk [vmem:[#allocation3 + $0x1a0] sm:$0xff] %vm1697_vm9, %v3429_v11 }
 0x19e   : > { %v9886_v39 = vpack.c.bf16 %v4403_v8, %v4403_v8  ;;  %v4404_v30 = vmax.f32 %v4264_v63, 0.0 }
 0x19f   : > { %v4568_v16 = vshrl.u32 %v9888_v53, 16  ;;  %v9889_v17 = vpack.c.bf16 %v4406_v38, %v4406_v38  ;;  %v4571_v15 = vshll.u32 %v9888_v53, 16 }
 0x1a0   : > { %v4551_v18 = vshrl.u32 %v9886_v39, 16  ;;  %v9887_v59 = vpack.c.bf16 %v4404_v30, %v4404_v30  ;;  %v4554_v12 = vshll.u32 %v9886_v39, 16 }
 0x1a1   : > { %v4570_v19 = vrot.slane %v4568_v16, 7  ;;  %v4576_v14 = vshrl.u32 %v9889_v17, 16  ;;  %v4579_v28 = vshll.u32 %v9889_v17, 16 }
 0x1a2   : > { %v4553_v23 = vrot.slane %v4551_v18, 7  ;;  %v4559_v55 = vshrl.u32 %v9887_v59, 16  ;;  %v4562_v49 = vshll.u32 %v9887_v59, 16 }
 0x1a3   : > { %v4573_v44 = vor.u32 %v4571_v15, %v4570_v19  ;;  %v4578_v26 = vrot.slane %v4576_v14, 7  ;;  %v4574_v5 = vrot.slane %v4570_v19, 4 }
 0x1a4   : > { %v4556_v62 = vor.u32 %v4554_v12, %v4553_v23  ;;  %v4561_v20 = vrot.slane %v4559_v55, 7  ;;  %v3841_v35 = vld [vmem:[#allocation3 + $0x198] sm:$0xff]  ;;  %v3842_v42 = vld [vmem:[#allocation3 + $0x1a0] sm:$0xff]  ;;  %v4557_v22 = vrot.slane %v4553_v23, 4 }
 0x1a5   : > { %v4924_v37 = vsel %vm11834_vm15, %v4573_v44, %v4923_v21  ;;  %v4581_v6 = vor.u32 %v4579_v28, %v4578_v26  ;;  %v4583_v29 = vrot.slane %v4578_v26, 4  ;;  %4217 = vmatprep.mubr.bf16.mxu0 %v3842_v42 }
 0x1a6   : > { %v4914_v9 = vsel %vm11834_vm15, %v4556_v62, %v4913_v43  ;;  %v4564_v45 = vor.u32 %v4562_v49, %v4561_v20  ;;  %v4566_v51 = vrot.slane %v4561_v20, 4  ;;  %4925 = vst [vmem:[#allocation2 + $0xc] sm:$0xf] %v4924_v37  ;;  %4218 = vmatmul.mubr.bf16.gmra.mrb[68].mxu0 %v3841_v35  ;;  %v4930_v37 = vld [vmem:[#allocation2 + $0x18] sm:$0xf] }
 0x1a7   : > { %4915 = vst [vmem:[#allocation2] sm:$0xf] %v4914_v9  ;;  %v4582_v41 = vsel %vm11845_vm1, %v4574_v5, %v4581_v6  ;;  %v4928_v47 = vsel %vm11840_vm0, %v4583_v29, %v4927_v32 }
 0x1a8   : > { %v4565_v33 = vsel %vm11845_vm1, %v4557_v22, %v4564_v45  ;;  %v4921_v48 = vsel %vm11840_vm0, %v4566_v51, %v4920_v36  ;;  %4926 = vst.msk [vmem:[#allocation2 + $0x10] sm:$0xf] %vm4910_vm11, %v4582_v41  ;;  %4929 = vst [vmem:[#allocation2 + $0x14] sm:$0x1] %v4928_v47  ;;  %v4937_v41 = vld [vmem:[#allocation2 + $0x24] sm:$0xf] }
 0x1a9   : > { %4917 = vst.msk [vmem:[#allocation2 + $0x4] sm:$0xf] %vm4910_vm11, %v4565_v33  ;;  %4922 = vst [vmem:[#allocation2 + $0x8] sm:$0x1] %v4921_v48 }
 0x1aa   : > { %5156 = vst.msk [vmem:[#allocation2 + $0x4] sm:$0xf] %vm4910_vm11, %v13647_v1 }
 0x1ab   : > { %v4107_v50 = vpop.f32.mrb[12].mxu0  ;;  %v10100_v52 = vpop.f32.mrb[4].mxu1 }
 0x1ac   : > { %v4108_v56 = vadd.f32 %v11818_v46, %v4107_v50  ;;  %v4109_v25 = vpop.f32.mrb[13].mxu0  ;;  %v4276_v58 = vpop.f32.mrb[5].mxu1 }
 0x1ad   : > { %v5045_v34 = vld [vmem:[#allocation2 + $0xc] sm:$0x1]  ;;  %v4110_v0 = vpop.f32.mrb[14].mxu0  ;;  %v4277_v8 = vadd.f32 %v4276_v58, %v4100_v2  ;;  %v10101_v63 = vpop.f32.mrb[6].mxu1  ;;  %v6860_v38 = vld [vmem:[#allocation2 + $0xc] sm:$0xe] }
 0x1ae   : > { %v5042_v61 = vld [vmem:[#allocation2] sm:$0x1]  ;;  %v5046_v40 = vsel %vm11840_vm0, 0, %v5045_v34  ;;  %v4285_v10 = vadd.f32 %v10100_v52, %v4108_v56  ;;  %v4111_v60 = vadd.f32 %v11818_v46, %v4110_v0  ;;  %v4112_v53 = vpop.f32.mrb[15].mxu0  ;;  %v4279_v30 = vpop.f32.mrb[7].mxu1  ;;  %v9750_v62 = vrot.slane %v6860_v38, 9 }
 0x1af   : > { %v5043_v57 = vsel %vm11840_vm0, 0, %v5042_v61  ;;  %5047 = vst [vmem:[#allocation2 + $0xc] sm:$0x1] %v5046_v40  ;;  %v5100_v4 = vld [vmem:[#allocation2 + $0x14] sm:$0x1]  ;;  %v4407_v17 = vmax.f32 %v4277_v8, 0.0  ;;  %v4280_v18 = vadd.f32 %v4279_v30, %v4103_v54 }
 0x1b0   : > { %5044 = vst [vmem:[#allocation2] sm:$0x1] %v5043_v57  ;;  %v5097_v11 = vld [vmem:[#allocation2 + $0x8] sm:$0x1]  ;;  %v5101_v39 = vsel %vm11872_vm3, 0, %v5100_v4  ;;  %v4409_v59 = vmax.f32 %v4285_v10, 0.0  ;;  %v4288_v15 = vadd.f32 %v10101_v63, %v4111_v60 }
 0x1b1   : > { %5155 = vst.msk [vmem:[#allocation2] sm:$0xf] %vm4910_vm11, %v13647_v1  ;;  %v5098_v16 = vsel %vm11872_vm3, 0, %v5097_v11  ;;  %5102 = vst [vmem:[#allocation2 + $0x14] sm:$0x1] %v5101_v39  ;;  %v9890_v12 = vpack.c.bf16 %v4407_v17, %v4407_v17  ;;  %v4408_v55 = vmax.f32 %v4280_v18, 0.0 }
 0x1b2   : > { %v5852_v19 = vld [vmem:[#allocation2 + $0x4] sm:$0xf]  ;;  %5099 = vst [vmem:[#allocation2 + $0x8] sm:$0x1] %v5098_v16  ;;  %v6861_v14 = vld [vmem:[#allocation2 + $0x10] sm:$0xf]  ;;  %v9892_v43 = vpack.c.bf16 %v4409_v59, %v4409_v59 }
 0x1b3   : > { %v5949_v21 = vrot.slane %v5852_v19, 5  ;;  %v11887_v23 = vld [vmem:[#allocation2 + $0x4] sm:$0xf]  ;;  %5158 = vst.msk [vmem:[#allocation2 + $0x8] sm:$0x1] %vm4918_vm13, %v13647_v1  ;;  %v6958_v44 = vrot.slane %v6861_v14, 5  ;;  %v9891_v32 = vpack.c.bf16 %v4408_v55, %v4408_v55 }
 0x1b4   : > { %v4410_v26 = vmax.f32 %v4288_v15, 0.0  ;;  %v5365_v20 = vshll.u32 %v11887_v23, 16  ;;  %v4585_v49 = vshrl.u32 %v9890_v12, 16  ;;  %v4602_v35 = vshrl.u32 %v9892_v43, 16  ;;  %v4934_v56 = vld [vmem:[#allocation2 + $0x20] sm:$0x1] }
 0x1b5   : > { %v5951_v28 = vrot.slane %v5949_v21, 4  ;;  %v5369_v36 = vshrl.u32 %v11887_v23, 16  ;;  %v4588_v5 = vshll.u32 %v9890_v12, 16  ;;  %v4605_v6 = vshll.u32 %v9892_v43, 16  ;;  %v4941_v53 = vld [vmem:[#allocation2 + $0x2c] sm:$0x1] }
 0x1b6   : > { %v9893_v29 = vpack.c.bf16 %v4410_v26, %v4410_v26  ;;  %v6960_v42 = vrot.slane %v6958_v44, 4  ;;  %v4587_v22 = vrot.slane %v4585_v49, 7  ;;  %v4593_v9 = vshrl.u32 %v9891_v32, 16  ;;  %v11907_v15 = vld [vmem:[#allocation2 + $0xc] sm:$0xe] }
 0x1b7   : > { %v4596_v45 = vshll.u32 %v9891_v32, 16  ;;  %v4604_v51 = vrot.slane %v4602_v35, 7  ;;  %v6959_v50 = vsel %vm10459_vm2, %v9750_v62, %v6958_v44  ;;  %v11916_v55 = vld [vmem:[#allocation2 + $0x10] sm:$0xf]  ;;  %v5367_v62 = vrot.slane %v5365_v20, 5 }
 0x1b8   : > { %v4610_v47 = vshrl.u32 %v9893_v29, 16  ;;  %v4613_v33 = vshll.u32 %v9893_v29, 16  ;;  %v5851_v48 = vld [vmem:[#allocation2] sm:$0xe]  ;;  %v6862_v2 = vld [vmem:[#allocation2 + $0x14] sm:$0x1]  ;;  %v4590_v34 = vor.u32 %v4588_v5, %v4587_v22 }
 0x1b9   : > { %v4591_v52 = vrot.slane %v4587_v22, 4  ;;  %v4595_v54 = vrot.slane %v4593_v9, 7  ;;  %v4607_v25 = vor.u32 %v4605_v6, %v4604_v51  ;;  %v5307_v61 = vld [vmem:[#allocation2] sm:$0xf]  ;;  %v4608_v40 = vrot.slane %v4604_v51, 4  ;;  %v10277_v22 = vld [vmem:[#allocation2 + $0xc] sm:$0xff]  }
 0x1ba   : > { %v4612_v58 = vrot.slane %v4610_v47, 7  ;;  %v5853_v0 = vld [vmem:[#allocation2 + $0x8] sm:$0x1]  ;;  %v9686_v57 = vrot.slane %v5851_v48, 9  ;;  %v6961_v4 = vrot.slane %v6862_v2, 5  ;;  %v4931_v8 = vsel %vm11834_vm15, %v4590_v34, %v4930_v37 }
 0x1bb   : > { %v4598_v63 = vor.u32 %v4596_v45, %v4595_v54  ;;  %v4600_v10 = vrot.slane %v4595_v54, 4  ;;  %v4938_v60 = vsel %vm11834_vm15, %v4607_v25, %v4937_v41  ;;  %4932 = vst [vmem:[#allocation2 + $0x18] sm:$0xf] %v4931_v8  ;;  %v5952_v30 = vrot.slane %v5853_v0, 5  ;;  %v5309_v16 = vld [vmem:[#allocation2 + $0x8] sm:$0x1] }
 0x1bc   : > { %4939 = vst [vmem:[#allocation2 + $0x24] sm:$0xf] %v4938_v60  ;;  %v4615_v38 = vor.u32 %v4613_v33, %v4612_v58  ;;  %v4617_v11 = vrot.slane %v4612_v58, 4  ;;  %v5950_v39 = vsel %vm10459_vm2, %v9686_v57, %v5949_v21  ;;  %v6962_v59 = vsel %vm10459_vm2, %v6960_v42, %v6961_v4  ;;  %v5856_v49 = vld [vmem:[#allocation2 + $0x14] sm:$0x1] }
 0x1bd   : > { %v4599_v17 = vsel %vm11845_vm1, %v4591_v52, %v4598_v63  ;;  %v4935_v18 = vsel %vm11840_vm0, %v4600_v10, %v4934_v56  ;;  %v5356_v19 = vshrl.u32 %v5307_v61, 16  ;;  %v5953_v23 = vsel %vm10459_vm2, %v5951_v28, %v5952_v30  ;;  %v4115_v32 = vpop.f32.mrb[16].mxu0  ;;  %v5310_v29 = vld [vmem:[#allocation2 + $0xc] sm:$0xf]  ;;  %v5312_v4 = vld [vmem:[#allocation2 + $0x14] sm:$0x1] }
 0x1be   : > { %4933 = vst.msk [vmem:[#allocation2 + $0x1c] sm:$0xf] %vm4910_vm11, %v4599_v17  ;;  %4936 = vst [vmem:[#allocation2 + $0x20] sm:$0x1] %v4935_v18  ;;  %v4616_v21 = vsel %vm11845_vm1, %v4608_v40, %v4615_v38  ;;  %v4942_v14 = vsel %vm11840_vm0, %v4617_v11, %v4941_v53  ;;  %v9766_v12 = vcombine.low %v6959_v50, %v6962_v59  ;;  %v5359_v26 = vshll.u32 %v5307_v61, 16  ;;  %v4117_v37 = vpop.f32.mrb[17].mxu0 }
 0x1bf   : > { %4940 = vst.msk [vmem:[#allocation2 + $0x28] sm:$0xf] %vm4910_vm11, %v4616_v21  ;;  %4943 = vst [vmem:[#allocation2 + $0x2c] sm:$0x1] %v4942_v14  ;;  %v9702_v43 = vcombine.low %v5950_v39, %v5953_v23  ;;  %v5358_v44 = vrot.slane %v5356_v19, 4  ;;  %v5371_v35 = vrot.slane %v5369_v36, 4 }
 0x1c0   : > { %7116 = vrot.lane.b32.xlu0 %v9766_v12, %s10382_s25  ;;  %v5375_v5 = vshll.u32 %v5309_v16, 16  ;;  %v5361_v28 = vrot.slane %v5359_v26, 5  ;;  %v5956_v6 = vrot.slane %v11916_v55, 5  ;;  %v4118_v42 = vpop.f32.mrb[18].mxu0  ;;  %v9687_v9 = vrot.slane %v11907_v15, 9 }
 0x1c1   : > { %6107 = vrot.lane.b32.xlu1 %v9702_v43, %s10380_s19  ;;  %v5959_v45 = vrot.slane %v5856_v49, 5  ;;  %v5372_v33 = vor.u32 %v5371_v35, %v5367_v62  ;;  %v4120_v2 = vpop.f32.mrb[19].mxu0  ;;  %v5380_v34 = vshrl.u32 %v5310_v29, 16  ;;  %v5311_v61 = vld [vmem:[#allocation2 + $0x10] sm:$0xf]  ;;  %v5383_v19 = vshll.u32 %v5310_v29, 16 }
 0x1c2   : > { %v5048_v51 = vld [vmem:[#allocation2 + $0x18] sm:$0x1]  ;;  %v7901_v20 = vld [vmem:[#allocation2 + $0x18] sm:$0xe]  ;;  %v5362_v47 = vor.u32 %v5361_v28, %v5358_v44  ;;  %v5377_v50 = vrot.slane %v5375_v5, 5  ;;  %v5958_v25 = vrot.slane %v5956_v6, 4  ;;  %v4116_v44 = vadd.f32 %v11818_v46, %v4115_v32 }
 0x1c3   : > { %v5051_v41 = vld [vmem:[#allocation2 + $0x24] sm:$0x1]  ;;  %v5049_v36 = vsel %vm11840_vm0, 0, %v5048_v51  ;;  %v9814_v40 = vrot.slane %v7901_v20, 9  ;;  %v5373_v60 = vrot.slane %v5372_v33, 4  ;;  %v5382_v18 = vrot.slane %v5380_v34, 4 }
 0x1c4   : > { %v5052_v48 = vsel %vm11840_vm0, 0, %v5051_v41  ;;  %5050 = vst [vmem:[#allocation2 + $0x18] sm:$0x1] %v5049_v36  ;;  %v5363_v56 = vrot.slane %v5362_v47, 4  ;;  %v11936_v53 = vld [vmem:[#allocation2 + $0x24] sm:$0xe]  ;;  %v5960_v38 = vsel %vm10459_vm2, %v5958_v25, %v5959_v45  ;;  %v4119_v26 = vadd.f32 %v11818_v46, %v4118_v42 }
 0x1c5   : > { %v5103_v52 = vld [vmem:[#allocation2 + $0x20] sm:$0x1]  ;;  %v7902_v54 = vld [vmem:[#allocation2 + $0x1c] sm:$0xf]  ;;  %5053 = vst [vmem:[#allocation2 + $0x24] sm:$0x1] %v5052_v48  ;;  %6284 = vrot.lane.b32.xlu1 %v10277_v22, %s10381_s22  ;;  %v5378_v16 = vsel %vm10529_vm5, %v5373_v60, %v5377_v50  ;;  %v5957_v49 = vsel %vm10459_vm2, %v9687_v9, %v5956_v6 }
 0x1c6   : > { %v5104_v58 = vsel %vm11872_vm3, 0, %v5103_v52  ;;  %v5106_v0 = vld [vmem:[#allocation2 + $0x2c] sm:$0x1]  ;;  %v11930_v57 = vld [vmem:[#allocation2 + $0x28] sm:$0xf]  ;;  %v7999_v8 = vrot.slane %v7902_v54, 5  ;;  %v5368_v10 = vsel %vm10529_vm5, %v5363_v56, %v5367_v62  ;;  %v9703_v5 = vcombine.low %v5957_v49, %v5960_v38 }
 0x1c7   : > { %5105 = vst [vmem:[#allocation2 + $0x20] sm:$0x1] %v5104_v58  ;;  %v5107_v63 = vsel %vm11872_vm3, 0, %v5106_v0  ;;  %v6863_v11 = vld [vmem:[#allocation2 + $0x18] sm:$0xe]  ;;  %v8006_v30 = vrot.slane %v11930_v57, 5  ;;  %v9670_v59 = vcombine.low %v5368_v10, %v5378_v16 }
 0x1c8   : > { %5108 = vst [vmem:[#allocation2 + $0x2c] sm:$0x1] %v5107_v63  ;;  %v6864_v39 = vld [vmem:[#allocation2 + $0x1c] sm:$0xf]  ;;  %v5389_v15 = vshll.u32 %v5311_v61, 16  ;;  %v5393_v21 = vshrl.u32 %v5311_v61, 16  ;;  %v8000_v29 = vsel %vm10459_vm2, %v9814_v40, %v7999_v8 }
 0x1c9   : > { %v6965_v17 = vrot.slane %v6864_v39, 5  ;;  %v8001_v14 = vrot.slane %v7999_v8, 4  ;;  %v9815_v23 = vrot.slane %v11936_v53, 9  ;;  %v9751_v12 = vrot.slane %v6863_v11, 9  ;;  %v5857_v43 = vld [vmem:[#allocation2 + $0x18] sm:$0xe]  ;;  %5787 = vrot.lane.b32.xlu1 %v9670_v59, %s10382_s25 }
 0x1ca   : > { %v5399_v55 = vshll.u32 %v5312_v4, 16  ;;  %v5385_v35 = vrot.slane %v5383_v19, 5  ;;  %v5391_v37 = vrot.slane %v5389_v15, 5  ;;  %v5395_v28 = vrot.slane %v5393_v21, 4  ;;  %v5858_v22 = vld [vmem:[#allocation2 + $0x1c] sm:$0xf] }
 0x1cb   : > { %v10278_v62 = vld [vmem:[#allocation2 + $0x18] sm:$0xff]   ;;  %v11953_v32 = vrot.slane %v8006_v30, 4  ;;  %v6966_v51 = vsel %vm10459_vm2, %v9751_v12, %v6965_v17  ;;  %v6967_v6 = vrot.slane %v6965_v17, 4  ;;  %v9688_v52 = vrot.slane %v5857_v43, 9 }
 0x1cc   : > { %7293 = vrot.lane.b32.xlu0 %v10278_v62, %s10380_s19  ;;  %v5386_v9 = vor.u32 %v5385_v35, %v5382_v18  ;;  %v5396_v36 = vor.u32 %v5395_v28, %v5391_v37  ;;  %v5401_v48 = vrot.slane %v5399_v55, 5  ;;  %v5963_v54 = vrot.slane %v5858_v22, 5  ;;  %v10279_v58 = vld [vmem:[#allocation2 + $0x18] sm:$0xff]   ;;  %v10280_v12 = vld [vmem:[#allocation2 + $0x24] sm:$0xff]  }
 0x1cd   : > { %6109 = vrot.lane.b32.xlu1 %v9703_v5, %s10380_s19  ;;  %v7357_v39 = vld [vmem:[#allocation2 + $0x18] sm:$0xf] }
 0x1ce   : > { %v7903_v45 = vld [vmem:[#allocation2 + $0x20] sm:$0x1]  ;;  %v10104_v47 = vpop.f32.mrb[8].mxu1  ;;  %v5387_v34 = vrot.slane %v5386_v9, 4  ;;  %v5397_v0 = vrot.slane %v5396_v36, 4  ;;  %v5964_v55 = vsel %vm10459_vm2, %v9688_v52, %v5963_v54  ;;  %v5965_v43 = vrot.slane %v5963_v54, 4 }
 0x1cf   : > { %v6865_v42 = vld [vmem:[#allocation2 + $0x20] sm:$0x1]  ;;  %v8002_v20 = vrot.slane %v7903_v45, 5  ;;  %v11958_v41 = vld [vmem:[#allocation2 + $0x2c] sm:$0x1]  ;;  %v4292_v50 = vpop.f32.mrb[9].mxu1 }
 0x1d0   : > { %v6968_v33 = vrot.slane %v6865_v42, 5  ;;  %v8009_v2 = vrot.slane %v11958_v41, 5  ;;  %v4293_v56 = vadd.f32 %v4292_v50, %v4116_v44  ;;  %v10105_v25 = vpop.f32.mrb[10].mxu1  ;;  %v4123_v61 = vpop.f32.mrb[20].mxu0  ;;  %v5859_v11 = vld [vmem:[#allocation2 + $0x20] sm:$0x1]  ;;  %v5392_v59 = vsel %vm10529_vm5, %v5387_v34, %v5391_v37 }
 0x1d1   : > { %v8003_v4 = vsel %vm10459_vm2, %v8001_v14, %v8002_v20  ;;  %v4295_v8 = vpop.f32.mrb[11].mxu1  ;;  %v4124_v63 = vadd.f32 %v11818_v46, %v4123_v61  ;;  %v4125_v10 = vpop.f32.mrb[21].mxu0  ;;  %v5402_v19 = vsel %vm10529_vm5, %v5397_v0, %v5401_v48  ;;  %6286 = vrot.lane.b32.xlu1 %v10279_v58, %s10381_s22  ;;  %v7358_v44 = vld [vmem:[#allocation2 + $0x1c] sm:$0xf]  ;;  %v5966_v49 = vrot.slane %v5859_v11, 5 }
 0x1d2   : > { %v6969_v40 = vsel %vm10459_vm2, %v6967_v6, %v6968_v33  ;;  %v9830_v38 = vcombine.low %v8000_v29, %v8003_v4  ;;  %v4411_v16 = vmax.f32 %v4293_v56, 0.0  ;;  %v4296_v17 = vadd.f32 %v4295_v8, %v4119_v26  ;;  %v4126_v18 = vpop.f32.mrb[22].mxu0  ;;  %v4944_v34 = vld [vmem:[#allocation2 + $0x30] sm:$0xf]  ;;  %v4948_v58 = vld [vmem:[#allocation2 + $0x38] sm:$0x1] }
 0x1d3   : > { %v9767_v60 = vcombine.low %v6966_v51, %v6969_v40  ;;  %v4301_v15 = vadd.f32 %v10104_v47, %v4124_v63  ;;  %v4127_v21 = vadd.f32 %v11818_v46, %v4126_v18  ;;  %v4128_v14 = vpop.f32.mrb[23].mxu0  ;;  %v7406_v35 = vshrl.u32 %v7357_v39, 16  ;;  %v4951_v18 = vld [vmem:[#allocation2 + $0x3c] sm:$0xf] }
 0x1d4   : > { %8173 = vst.msk [vmem:[#allocation3 + $0x10] sm:$0xff] %vm514_vm6, %v9830_v38  ;;  %v9894_v26 = vpack.c.bf16 %v4411_v16, %v4411_v16  ;;  %v4412_v62 = vmax.f32 %v4296_v17, 0.0  ;;  %v9671_v28 = vcombine.low %v5392_v59, %v5402_v19  ;;  %v7409_v29 = vshll.u32 %v7357_v39, 16  ;;  %v7359_v38 = vld [vmem:[#allocation2 + $0x20] sm:$0x1] }
 0x1d5   : > { %7118 = vrot.lane.b32.xlu0 %v9767_v60, %s10382_s25  ;;  %v4413_v5 = vmax.f32 %v4301_v15, 0.0  ;;  %v4304_v37 = vadd.f32 %v10105_v25, %v4127_v21  ;;  %v5967_v42 = vsel %vm10459_vm2, %v5965_v43, %v5966_v49  ;;  %v7415_v51 = vshll.u32 %v7358_v44, 16  ;;  %v6867_v19 = vld [vmem:[#allocation2 + $0x28] sm:$0xf]  ;;  %v6868_v43 = vld [vmem:[#allocation2 + $0x2c] sm:$0x1] }
 0x1d6   : > { %v4619_v22 = vshrl.u32 %v9894_v26, 16  ;;  %v9895_v45 = vpack.c.bf16 %v4412_v62, %v4412_v62  ;;  %v4622_v6 = vshll.u32 %v9894_v26, 16  ;;  %5789 = vrot.lane.b32.xlu1 %v9671_v28, %s10382_s25  ;;  %v7408_v47 = vrot.slane %v7406_v35, 4  ;;  %v4955_v49 = vld [vmem:[#allocation2 + $0x44] sm:$0x1] }
 0x1d7   : > { %v9896_v9 = vpack.c.bf16 %v4413_v5, %v4413_v5  ;;  %v4414_v20 = vmax.f32 %v4304_v37, 0.0  ;;  %v9704_v48 = vcombine.low %v5964_v55, %v5967_v42  ;;  %v7411_v50 = vrot.slane %v7409_v29, 5  ;;  %v10282_v55 = vld [vmem:[#allocation2 + $0x24] sm:$0xff]   ;;  %v5313_v5 = vld [vmem:[#allocation2 + $0x18] sm:$0xf] }
 0x1d8   : > { %v4621_v33 = vrot.slane %v4619_v22, 7  ;;  %v4627_v36 = vshrl.u32 %v9895_v45, 16  ;;  %v4630_v52 = vshll.u32 %v9895_v45, 16  ;;  %v7417_v8 = vrot.slane %v7415_v51, 5  ;;  %v6866_v45 = vld [vmem:[#allocation2 + $0x24] sm:$0xe] }
 0x1d9   : > { %7295 = vrot.lane.b32.xlu0 %v10280_v12, %s10380_s19  ;;  %v4636_v54 = vshrl.u32 %v9896_v9, 16  ;;  %v4639_v56 = vshll.u32 %v9896_v9, 16  ;;  %v9897_v25 = vpack.c.bf16 %v4414_v20, %v4414_v20  ;;  %v7412_v4 = vor.u32 %v7411_v50, %v7408_v47  ;;  %v5314_v42 = vld [vmem:[#allocation2 + $0x1c] sm:$0xf]  ;;  %v5315_v50 = vld [vmem:[#allocation2 + $0x20] sm:$0x1] }
 0x1da   : > { %v4624_v61 = vor.u32 %v4622_v6, %v4621_v33  ;;  %v4629_v40 = vrot.slane %v4627_v36, 7  ;;  %v4625_v63 = vrot.slane %v4621_v33, 4  ;;  %6111 = vrot.lane.b32.xlu1 %v9704_v48, %s10380_s19  ;;  %v7419_v11 = vshrl.u32 %v7358_v44, 16 }
 0x1db   : > { %v8191_v0 = vld [vmem:[#allocation3 + $0x10] sm:$0xff]  ;;  %v4638_v10 = vrot.slane %v4636_v54, 7  ;;  %v4644_v60 = vshrl.u32 %v9897_v25, 16  ;;  %v7413_v59 = vrot.slane %v7412_v4, 4  ;;  %v4647_v14 = vshll.u32 %v9897_v25, 16 }
 0x1dc   : > { %10134 = vmatprep.mubr.msk.bf16.mxu0 %vm514_vm6, %v8191_v0  ;;  %v4945_v39 = vsel %vm11834_vm15, %v4624_v61, %v4944_v34  ;;  %v4632_v16 = vor.u32 %v4630_v52, %v4629_v40  ;;  %v4634_v17 = vrot.slane %v4629_v40, 4  ;;  %v7421_v12 = vrot.slane %v7419_v11, 4 }
 0x1dd   : > { %4946 = vst [vmem:[#allocation2 + $0x30] sm:$0xf] %v4945_v39  ;;  %v4641_v15 = vor.u32 %v4639_v56, %v4638_v10  ;;  %v4646_v21 = vrot.slane %v4644_v60, 7  ;;  %v4642_v62 = vrot.slane %v4638_v10, 4  ;;  %v7425_v35 = vshll.u32 %v7359_v38, 16 }
 0x1de   : > { %v4633_v26 = vsel %vm11845_vm1, %v4625_v63, %v4632_v16  ;;  %v4949_v44 = vsel %vm11840_vm0, %v4634_v17, %v4948_v58  ;;  %v7422_v22 = vor.u32 %v7421_v12, %v7417_v8  ;;  %6288 = vrot.lane.b32.xlu1 %v10282_v55, %s10381_s22  ;;  %v7418_v51 = vsel %vm10529_vm5, %v7413_v59, %v7417_v8  ;;  %v7360_v12 = vld [vmem:[#allocation2 + $0x24] sm:$0xf] }
 0x1df   : > { %4947 = vst.msk [vmem:[#allocation2 + $0x34] sm:$0xf] %vm4910_vm11, %v4633_v26  ;;  %4950 = vst [vmem:[#allocation2 + $0x38] sm:$0x1] %v4949_v44  ;;  %v4952_v37 = vsel %vm11834_vm15, %v4641_v15, %v4951_v18  ;;  %v4649_v28 = vor.u32 %v4647_v14, %v4646_v21  ;;  %v4651_v29 = vrot.slane %v4646_v21, 4  ;;  %v7427_v6 = vrot.slane %v7425_v35, 5 }
 0x1e0   : > { %4953 = vst [vmem:[#allocation2 + $0x3c] sm:$0xf] %v4952_v37  ;;  %v6972_v9 = vrot.slane %v6867_v19, 5  ;;  %v6975_v20 = vrot.slane %v6868_v43, 5  ;;  %v7423_v48 = vrot.slane %v7422_v22, 4  ;;  %v5404_v34 = vshrl.u32 %v5313_v5, 16 }
 0x1e1   : > { %v4650_v47 = vsel %vm11845_vm1, %v4642_v62, %v4649_v28  ;;  %v4956_v33 = vsel %vm11840_vm0, %v4651_v29, %v4955_v49  ;;  %v4131_v36 = vpop.f32.mrb[24].mxu0  ;;  %v9752_v54 = vrot.slane %v6866_v45, 9  ;;  %v5407_v25 = vshll.u32 %v5313_v5, 16  ;;  %v5861_v21 = vld [vmem:[#allocation2 + $0x28] sm:$0xf] }
 0x1e2   : > { %4954 = vst.msk [vmem:[#allocation2 + $0x40] sm:$0xf] %vm4910_vm11, %v4650_v47  ;;  %4957 = vst [vmem:[#allocation2 + $0x44] sm:$0x1] %v4956_v33  ;;  %v4133_v52 = vpop.f32.mrb[25].mxu0  ;;  %v6974_v56 = vrot.slane %v6972_v9, 4  ;;  %v7428_v40 = vsel %vm10529_vm5, %v7423_v48, %v7427_v6  ;;  %v8007_v11 = vsel %vm10459_vm2, %v9815_v23, %v8006_v30  ;;  %v8010_v30 = vsel %vm10459_vm2, %v11953_v32, %v8009_v2 }
 0x1e3   : > { %v4134_v61 = vpop.f32.mrb[26].mxu0  ;;  %v5406_v58 = vrot.slane %v5404_v34, 4  ;;  %v5413_v0 = vshll.u32 %v5314_v42, 16  ;;  %v5417_v4 = vshrl.u32 %v5314_v42, 16  ;;  %v9798_v60 = vcombine.low %v7418_v51, %v7428_v40  ;;  %v5860_v23 = vld [vmem:[#allocation2 + $0x24] sm:$0xe] }
 0x1e4   : > { %v5054_v8 = vld [vmem:[#allocation2 + $0x30] sm:$0x1]  ;;  %v7907_v63 = vld [vmem:[#allocation2 + $0x30] sm:$0xe]  ;;  %v4136_v10 = vpop.f32.mrb[27].mxu0  ;;  %v5409_v38 = vrot.slane %v5407_v25, 5  ;;  %v6973_v16 = vsel %vm10459_vm2, %v9752_v54, %v6972_v9  ;;  %v6976_v17 = vsel %vm10459_vm2, %v6974_v56, %v6975_v20  ;;  %v9831_v62 = vcombine.low %v8007_v11, %v8010_v30 }
 0x1e5   : > { %v5055_v39 = vsel %vm11840_vm0, 0, %v5054_v8  ;;  %v5415_v18 = vrot.slane %v5413_v0, 5  ;;  %7837 = vrot.lane.b32.xlu0 %v9798_v60, %s10381_s22  ;;  %v5419_v53 = vrot.slane %v5417_v4, 4  ;;  %v5423_v15 = vshll.u32 %v5315_v50, 16  ;;  %v5862_v14 = vld [vmem:[#allocation2 + $0x2c] sm:$0x1] }
 0x1e6   : > { %5056 = vst [vmem:[#allocation2 + $0x30] sm:$0x1] %v5055_v39  ;;  %v5109_v59 = vld [vmem:[#allocation2 + $0x38] sm:$0x1]  ;;  %v7908_v19 = vld [vmem:[#allocation2 + $0x34] sm:$0xf]  ;;  %v5410_v57 = vor.u32 %v5409_v38, %v5406_v58  ;;  %v9768_v41 = vcombine.low %v6973_v16, %v6976_v17  ;;  %v4132_v29 = vadd.f32 %v11818_v46, %v4131_v36  ;;  %v12030_v22 = vadd.f32 %v11818_v46, %v4134_v61 }
 0x1e7   : > { %v9816_v55 = vrot.slane %v7907_v63, 9  ;;  %v5110_v43 = vsel %vm11872_vm3, 0, %v5109_v59  ;;  %v8013_v26 = vrot.slane %v7908_v19, 5  ;;  %v5057_v44 = vld [vmem:[#allocation2 + $0x3c] sm:$0x1]  ;;  %v5420_v5 = vor.u32 %v5419_v53, %v5415_v18  ;;  %8174 = vst.msk [vmem:[#allocation3 + $0x28] sm:$0xff] %vm514_vm6, %v9831_v62 }
 0x1e8   : > { %5111 = vst [vmem:[#allocation2 + $0x38] sm:$0x1] %v5110_v43  ;;  %v5058_v49 = vsel %vm11840_vm0, 0, %v5057_v44  ;;  %v5411_v35 = vrot.slane %v5410_v57, 4  ;;  %v7361_v37 = vld [vmem:[#allocation2 + $0x28] sm:$0xf] }
 0x1e9   : > { %v12024_v32 = vrot.slane %v8013_v26, 4  ;;  %5059 = vst [vmem:[#allocation2 + $0x3c] sm:$0x1] %v5058_v49  ;;  %v5112_v2 = vld [vmem:[#allocation2 + $0x44] sm:$0x1]  ;;  %v5425_v45 = vrot.slane %v5423_v15, 5  ;;  %7120 = vrot.lane.b32.xlu0 %v9768_v41, %s10382_s25  ;;  %v12045_v25 = vsel %vm10459_vm2, %v9816_v55, %v8013_v26 }
 0x1ea   : > { %v12026_v28 = vld [vmem:[#allocation2 + $0x40] sm:$0xf]  ;;  %v7362_v42 = vld [vmem:[#allocation2 + $0x2c] sm:$0x1]  ;;  %v5113_v51 = vsel %vm11872_vm3, 0, %v5112_v2  ;;  %v5416_v9 = vsel %vm10529_vm5, %v5411_v35, %v5415_v18  ;;  %v5421_v20 = vrot.slane %v5420_v5, 4 }
 0x1eb   : > { %v8020_v6 = vrot.slane %v12026_v28, 5  ;;  %v12039_v47 = vld [vmem:[#allocation2 + $0x24] sm:$0xf]  ;;  %5114 = vst [vmem:[#allocation2 + $0x44] sm:$0x1] %v5113_v51  ;;  %v9689_v46 = vrot.slane %v5860_v23, 9 }
 0x1ec   : > { %v5970_v33 = vrot.slane %v5861_v21, 5  ;;  %v5973_v36 = vrot.slane %v5862_v14, 5  ;;  %v7430_v48 = vshrl.u32 %v7360_v12, 16  ;;  %v6869_v50 = vld [vmem:[#allocation2 + $0x30] sm:$0xe]  ;;  %v5426_v34 = vsel %vm10529_vm5, %v5421_v20, %v5425_v45 }
 0x1ed   : > { %v7433_v52 = vshll.u32 %v7360_v12, 16  ;;  %v7439_v54 = vshll.u32 %v7361_v37, 16  ;;  %v6870_v56 = vld [vmem:[#allocation2 + $0x34] sm:$0xf]  ;;  %v9672_v61 = vcombine.low %v5416_v9, %v5426_v34  ;;  %v5317_v8 = vld [vmem:[#allocation2 + $0x28] sm:$0xf] }
 0x1ee   : > { %v10284_v40 = vld [vmem:[#allocation2 + $0x30] sm:$0xff]   ;;  %v5971_v58 = vsel %vm10459_vm2, %v9689_v46, %v5970_v33  ;;  %v5972_v0 = vrot.slane %v5970_v33, 4  ;;  %v7432_v4 = vrot.slane %v7430_v48, 4  ;;  %v7443_v60 = vshrl.u32 %v7361_v37, 16  ;;  %v5318_v11 = vld [vmem:[#allocation2 + $0x2c] sm:$0x1] }
 0x1ef   : > { %v7435_v63 = vrot.slane %v7433_v52, 5  ;;  %v7441_v10 = vrot.slane %v7439_v54, 5  ;;  %v7449_v38 = vshll.u32 %v7362_v42, 16  ;;  %5791 = vrot.lane.b32.xlu1 %v9672_v61, %s10382_s25  ;;  %7297 = vrot.lane.b32.xlu0 %v10284_v40, %s10380_s19  ;;  %v6871_v16 = vld [vmem:[#allocation2 + $0x38] sm:$0x1]  ;;  %v9753_v17 = vrot.slane %v6869_v50, 9 }
 0x1f0   : > { %v5974_v39 = vsel %vm10459_vm2, %v5972_v0, %v5973_v36  ;;  %v6979_v18 = vrot.slane %v6870_v56, 5  ;;  %v5428_v59 = vshrl.u32 %v12039_v47, 16  ;;  %v8194_v19 = vld [vmem:[#allocation3 + $0x28] sm:$0xff]  ;;  %v7445_v15 = vrot.slane %v7443_v60, 4  ;;  %v7909_v55 = vld [vmem:[#allocation2 + $0x38] sm:$0x1] }
 0x1f1   : > { %v9705_v57 = vcombine.low %v5971_v58, %v5974_v39  ;;  %v7436_v53 = vor.u32 %v7435_v63, %v7432_v4  ;;  %v7451_v30 = vrot.slane %v7449_v38, 5  ;;  %10135 = vmatmul.mubr.msk.bf16.vlgmr.msra.gmra.mrb[72].mxu0 %vm514_vm6, %v8194_v19  ;;  %v6982_v14 = vrot.slane %v6871_v16, 5  ;;  %v12069_v33 = vld [vmem:[%s13641_s3] ss:$0 sm:$0xff]  ;;  %v10285_v50 = vld [vmem:[#allocation2 + $0x30] sm:$0xff]  }
 0x1f2   : > { %v12057_v23 = vsel %vm10459_vm2, %v9753_v17, %v6979_v18  ;;  %v6981_v21 = vrot.slane %v6979_v18, 4  ;;  %v5430_v12 = vrot.slane %v5428_v59, 4  ;;  %v7446_v44 = vor.u32 %v7445_v15, %v7441_v10  ;;  %v4139_v51 = vpop.f32.mrb[28].mxu0  ;;  %v5863_v60 = vld [vmem:[#allocation2 + $0x30] sm:$0xe] }
 0x1f3   : > { %v10108_v43 = vpop.f32.mrb[12].mxu1  ;;  %v7437_v26 = vrot.slane %v7436_v53, 4  ;;  %v5431_v62 = vshll.u32 %v12039_v47, 16  ;;  %v5437_v49 = vshll.u32 %v5317_v8, 16  ;;  %6113 = vrot.lane.b32.xlu1 %v9705_v57, %s10380_s19  ;;  %v5441_v5 = vshrl.u32 %v5317_v8, 16  ;;  %v4141_v48 = vpop.f32.mrb[29].mxu0 }
 0x1f4   : > { %v4308_v41 = vpop.f32.mrb[13].mxu1  ;;  %v6983_v35 = vsel %vm10459_vm2, %v6981_v21, %v6982_v14  ;;  %v5447_v37 = vshll.u32 %v5318_v11, 16  ;;  %v8016_v2 = vrot.slane %v7909_v55, 5  ;;  %v7447_v20 = vrot.slane %v7446_v44, 4  ;;  %v4142_v61 = vpop.f32.mrb[30].mxu0 }
 0x1f5   : > { %v4309_v45 = vadd.f32 %v4308_v41, %v4132_v29  ;;  %v10109_v42 = vpop.f32.mrb[14].mxu1  ;;  %v7442_v9 = vsel %vm10529_vm5, %v7437_v26, %v7441_v10  ;;  %v9769_v46 = vcombine.low %v12057_v23, %v6983_v35  ;;  %v4140_v36 = vadd.f32 %v12069_v33, %v4139_v51  ;;  %v4144_v8 = vpop.f32.mrb[31].mxu0  ;;  %v5864_v14 = vld [vmem:[#allocation2 + $0x34] sm:$0xf]  ;;  %v4958_v44 = vld [vmem:[#allocation2 + $0x48] sm:$0xf] }
 0x1f6   : > { %v4311_v47 = vpop.f32.mrb[15].mxu1  ;;  %v5433_v34 = vrot.slane %v5431_v62, 5  ;;  %v5439_v29 = vrot.slane %v5437_v49, 5  ;;  %v5443_v52 = vrot.slane %v5441_v5, 4  ;;  %v7452_v40 = vsel %vm10529_vm5, %v7447_v20, %v7451_v30  ;;  %v10286_v5 = vld [vmem:[#allocation2 + $0x3c] sm:$0xff]  }
 0x1f7   : > { %v4415_v54 = vmax.f32 %v4309_v45, 0.0  ;;  %v4312_v56 = vadd.f32 %v4311_v47, %v12030_v22  ;;  %v5449_v58 = vrot.slane %v5447_v37, 5  ;;  %v4317_v0 = vadd.f32 %v10108_v43, %v4140_v36  ;;  %6290 = vrot.lane.b32.xlu1 %v10285_v50, %s10381_s22  ;;  %v7363_v48 = vld [vmem:[#allocation2 + $0x30] sm:$0xf]  ;;  %v7364_v8 = vld [vmem:[#allocation2 + $0x34] sm:$0xf] }
 0x1f8   : > { %v4143_v4 = vadd.f32 %v12069_v33, %v4142_v61  ;;  %v9799_v63 = vcombine.low %v7442_v9, %v7452_v40  ;;  %v5434_v10 = vor.u32 %v5433_v34, %v5430_v12  ;;  %v5444_v39 = vor.u32 %v5443_v52, %v5439_v29  ;;  %v4969_v52 = vld [vmem:[#allocation2 + $0x5c] sm:$0x1]  ;;  %v12096_v61 = vld [vmem:[#allocation2 + $0x3c] sm:$0xe] }
 0x1f9   : > { %v9898_v38 = vpack.c.bf16 %v4415_v54, %v4415_v54  ;;  %v4416_v11 = vmax.f32 %v4312_v56, 0.0  ;;  %v8017_v22 = vsel %vm10459_vm2, %v12024_v32, %v8016_v2  ;;  %v4417_v16 = vmax.f32 %v4317_v0, 0.0  ;;  %v10298_v56 = vld [vmem:[%s13642_s4 + $0x40] sm:$0xff]   ;;  %v5866_v28 = vld [vmem:[#allocation2 + $0x3c] sm:$0xe] }
 0x1fa   : > { %v4320_v17 = vadd.f32 %v10109_v42, %v4143_v4  ;;  %7839 = vrot.lane.b32.xlu0 %v9799_v63, %s10381_s22  ;;  %v5435_v18 = vrot.slane %v5434_v10, 4  ;;  %v9832_v59 = vcombine.low %v12045_v25, %v8017_v22  ;;  %v5445_v15 = vrot.slane %v5444_v39, 4  ;;  %v5865_v25 = vld [vmem:[#allocation2 + $0x38] sm:$0x1]  ;;  %v4962_v42 = vld [vmem:[#allocation2 + $0x50] sm:$0x1]  ;;  %9942 = vmatprep.subr.bf16.mxu1 %v10298_v56 }
 0x1fb   : > { %v4653_v19 = vshrl.u32 %v9898_v38, 16  ;;  %v4656_v57 = vshll.u32 %v9898_v38, 16  ;;  %v9899_v53 = vpack.c.bf16 %v4416_v11, %v4416_v11  ;;  %v9900_v30 = vpack.c.bf16 %v4417_v16, %v4417_v16  ;;  %v10300_v63 = vld [vmem:[%s13642_s4] sm:$0xff]   ;;  %v7365_v11 = vld [vmem:[#allocation2 + $0x38] sm:$0x1] }
 0x1fc   : > { %v4418_v23 = vmax.f32 %v4320_v17, 0.0  ;;  %v5440_v21 = vsel %vm10529_vm5, %v5435_v18, %v5439_v29  ;;  %8175 = vst.msk [vmem:[#allocation3 + $0x40] sm:$0xff] %vm514_vm6, %v9832_v59  ;;  %v9690_v32 = vrot.slane %v5863_v60, 9  ;;  %v5450_v26 = vsel %vm10529_vm5, %v5445_v15, %v5449_v58  ;;  %9943 = vmatpush3.bf16.msra.mxu1 %v10300_v63 }
 0x1fd   : > { %v4655_v12 = vrot.slane %v4653_v19, 7  ;;  %v4661_v55 = vshrl.u32 %v9899_v53, 16  ;;  %v4664_v43 = vshll.u32 %v9899_v53, 16  ;;  %v4670_v62 = vshrl.u32 %v9900_v30, 16  ;;  %v6872_v19 = vld [vmem:[#allocation2 + $0x3c] sm:$0xe] }
 0x1fe   : > { %v4673_v49 = vshll.u32 %v9900_v30, 16  ;;  %v9901_v41 = vpack.c.bf16 %v4418_v23, %v4418_v23  ;;  %7122 = vrot.lane.b32.xlu0 %v9769_v46, %s10382_s25  ;;  %v9673_v35 = vcombine.low %v5440_v21, %v5450_v26  ;;  %v5977_v51 = vrot.slane %v5864_v14, 5  ;;  %v4965_v46 = vld [vmem:[#allocation2 + $0x54] sm:$0xf]  ;;  %v6874_v21 = vld [vmem:[#allocation2 + $0x44] sm:$0x1] }
 0x1ff   : > { %v4658_v37 = vor.u32 %v4656_v57, %v4655_v12  ;;  %v4659_v2 = vrot.slane %v4655_v12, 4  ;;  %v4663_v45 = vrot.slane %v4661_v55, 7  ;;  %v4672_v9 = vrot.slane %v4670_v62, 7  ;;  %v6873_v57 = vld [vmem:[#allocation2 + $0x40] sm:$0xf] }
 0x200   : > { %v4678_v20 = vshrl.u32 %v9901_v41, 16  ;;  %v4681_v47 = vshll.u32 %v9901_v41, 16  ;;  %5793 = vrot.lane.b32.xlu1 %v9673_v35, %s10382_s25  ;;  %v5980_v36 = vrot.slane %v5865_v25, 5  ;;  %v5978_v54 = vsel %vm10459_vm2, %v9690_v32, %v5977_v51  ;;  %v12123_v41 = vld [vmem:[#allocation2 + $0x30] sm:$0xf] }
 0x201   : > { %v4959_v50 = vsel %vm11834_vm15, %v4658_v37, %v4958_v44  ;;  %v4666_v34 = vor.u32 %v4664_v43, %v4663_v45  ;;  %v4668_v29 = vrot.slane %v4663_v45, 4  ;;  %v4675_v40 = vor.u32 %v4673_v49, %v4672_v9  ;;  %v10287_v37 = vld [vmem:[#allocation2 + $0x3c] sm:$0xff]  }
 0x202   : > { %4960 = vst [vmem:[#allocation2 + $0x48] sm:$0xf] %v4959_v50  ;;  %v4676_v58 = vrot.slane %v4672_v9, 4  ;;  %v4680_v0 = vrot.slane %v4678_v20, 7  ;;  %7299 = vrot.lane.b32.xlu0 %v10286_v5, %s10380_s19  ;;  %v5979_v4 = vrot.slane %v5977_v51, 4  ;;  %v7454_v39 = vshrl.u32 %v7363_v48, 16 }
 0x203   : > { %v4667_v10 = vsel %vm11845_vm1, %v4659_v2, %v4666_v34  ;;  %v4963_v60 = vsel %vm11840_vm0, %v4668_v29, %v4962_v42  ;;  %v8197_v38 = vld [vmem:[#allocation3 + $0x40] sm:$0xff]  ;;  %v7457_v22 = vshll.u32 %v7363_v48, 16  ;;  %v4966_v16 = vsel %vm11834_vm15, %v4675_v40, %v4965_v46 }
 0x204   : > { %4961 = vst.msk [vmem:[#allocation2 + $0x4c] sm:$0xf] %vm4910_vm11, %v4667_v10  ;;  %4964 = vst [vmem:[#allocation2 + $0x50] sm:$0x1] %v4963_v60  ;;  %v4683_v17 = vor.u32 %v4681_v47, %v4680_v0  ;;  %v4685_v18 = vrot.slane %v4680_v0, 4  ;;  %10138 = vmatprep.mubr.msk.bf16.mxu0 %vm514_vm6, %v8197_v38  ;;  %v5981_v59 = vsel %vm10459_vm2, %v5979_v4, %v5980_v36  ;;  %v7456_v15 = vrot.slane %v7454_v39, 4 }
 0x205   : > { %4967 = vst [vmem:[#allocation2 + $0x54] sm:$0xf] %v4966_v16  ;;  %v9706_v53 = vcombine.low %v5978_v54, %v5981_v59  ;;  %v7459_v30 = vrot.slane %v7457_v22, 5  ;;  %v7463_v23 = vshll.u32 %v7364_v8, 16  ;;  %v4147_v12 = vpop.f32.mrb[32].mxu0  ;;  %v7467_v55 = vshrl.u32 %v7364_v8, 16 }
 0x206   : > { %v4684_v14 = vsel %vm11845_vm1, %v4676_v58, %v4683_v17  ;;  %v4970_v32 = vsel %vm11840_vm0, %v4685_v18, %v4969_v52  ;;  %v7473_v43 = vshll.u32 %v7365_v11, 16  ;;  %v9817_v26 = vrot.slane %v12096_v61, 9  ;;  %v4149_v44 = vpop.f32.mrb[33].mxu0  ;;  %v5320_v61 = vld [vmem:[#allocation2 + $0x34] sm:$0xf] }
 0x207   : > { %v12119_v25 = vrot.slane %v8020_v6, 4  ;;  %4968 = vst.msk [vmem:[#allocation2 + $0x58] sm:$0xf] %vm4910_vm11, %v4684_v14  ;;  %4971 = vst [vmem:[#allocation2 + $0x5c] sm:$0x1] %v4970_v32  ;;  %6115 = vrot.lane.b32.xlu1 %v9706_v53, %s10380_s19  ;;  %v7460_v62 = vor.u32 %v7459_v30, %v7456_v15  ;;  %v7465_v49 = vrot.slane %v7463_v23, 5  ;;  %v4148_v52 = vadd.f32 %v12069_v33, %v4147_v12 }
 0x208   : > { %v4150_v35 = vpop.f32.mrb[34].mxu0  ;;  %v7469_v5 = vrot.slane %v7467_v55, 4  ;;  %v9754_v2 = vrot.slane %v6872_v19, 9  ;;  %v6986_v45 = vrot.slane %v6873_v57, 5  ;;  %v6989_v42 = vrot.slane %v6874_v21, 5 }
 0x209   : > { %v5060_v51 = vld [vmem:[#allocation2 + $0x48] sm:$0x1]  ;;  %v7913_v9 = vld [vmem:[#allocation2 + $0x48] sm:$0xe]  ;;  %v4152_v20 = vpop.f32.mrb[35].mxu0  ;;  %v7461_v47 = vrot.slane %v7460_v62, 4  ;;  %v4151_v54 = vadd.f32 %v12069_v33, %v4150_v35  ;;  %v12152_v15 = vsel %vm10459_vm2, %v9817_v26, %v8020_v6 }
 0x20a   : > { %v5061_v36 = vsel %vm11840_vm0, 0, %v5060_v51  ;;  %v9818_v48 = vrot.slane %v7913_v9, 9  ;;  %v7470_v50 = vor.u32 %v7469_v5, %v7465_v49  ;;  %v7475_v34 = vrot.slane %v7473_v43, 5  ;;  %v10112_v11 = vpop.f32.mrb[16].mxu1  ;;  %v5321_v16 = vld [vmem:[#allocation2 + $0x38] sm:$0x1] }
 0x20b   : > { %5062 = vst [vmem:[#allocation2 + $0x48] sm:$0x1] %v5061_v36  ;;  %v5115_v29 = vld [vmem:[#allocation2 + $0x50] sm:$0x1]  ;;  %v7914_v46 = vld [vmem:[#allocation2 + $0x4c] sm:$0xf]  ;;  %6292 = vrot.lane.b32.xlu1 %v10287_v37, %s10381_s22  ;;  %v7466_v63 = vsel %vm10529_vm5, %v7461_v47, %v7465_v49  ;;  %v6987_v10 = vsel %vm10459_vm2, %v9754_v2, %v6986_v45 }
 0x20c   : > { %v6988_v56 = vrot.slane %v6986_v45, 4  ;;  %v5452_v40 = vshrl.u32 %v12123_v41, 16  ;;  %v5116_v58 = vsel %vm11872_vm3, 0, %v5115_v29  ;;  %v8027_v0 = vrot.slane %v7914_v46, 5  ;;  %v5063_v4 = vld [vmem:[#allocation2 + $0x54] sm:$0x1] }
 0x20d   : > { %v12133_v8 = vld [vmem:[#allocation2 + $0x54] sm:$0xe]  ;;  %5117 = vst [vmem:[#allocation2 + $0x50] sm:$0x1] %v5116_v58  ;;  %v5064_v60 = vsel %vm11840_vm0, 0, %v5063_v4  ;;  %v7471_v39 = vrot.slane %v7470_v50, 4 }
 0x20e   : > { %v9819_v38 = vrot.slane %v12133_v8, 9  ;;  %v6990_v22 = vsel %vm10459_vm2, %v6988_v56, %v6989_v42  ;;  %v12144_v17 = vrot.slane %v8027_v0, 4  ;;  %5065 = vst [vmem:[#allocation2 + $0x54] sm:$0x1] %v5064_v60  ;;  %v5118_v18 = vld [vmem:[#allocation2 + $0x5c] sm:$0x1]  ;;  %v12156_v30 = vsel %vm10459_vm2, %v9818_v48, %v8027_v0 }
 0x20f   : > { %v12146_v59 = vld [vmem:[#allocation2 + $0x58] sm:$0xf]  ;;  %v4324_v19 = vpop.f32.mrb[17].mxu1  ;;  %v9770_v57 = vcombine.low %v6987_v10, %v6990_v22  ;;  %v7912_v53 = vld [vmem:[#allocation2 + $0x44] sm:$0x1]  ;;  %v5119_v23 = vsel %vm11872_vm3, 0, %v5118_v18  ;;  %v7476_v12 = vsel %vm10529_vm5, %v7471_v39, %v7475_v34 }
 0x210   : > { %v8034_v21 = vrot.slane %v12146_v59, 5  ;;  %v4325_v14 = vadd.f32 %v4324_v19, %v4148_v52  ;;  %v12161_v32 = vpop.f32.mrb[18].mxu1  ;;  %5120 = vst [vmem:[#allocation2 + $0x5c] sm:$0x1] %v5119_v23  ;;  %v9800_v6 = vcombine.low %v7466_v63, %v7476_v12  ;;  %v5454_v43 = vrot.slane %v5452_v40, 4  ;;  %v4155_v62 = vpop.f32.mrb[36].mxu0 }
 0x211   : > { %v4327_v55 = vpop.f32.mrb[19].mxu1  ;;  %v5455_v26 = vshll.u32 %v12123_v41, 16  ;;  %v5461_v44 = vshll.u32 %v5320_v61, 16  ;;  %v10301_v49 = vld [vmem:[%s13642_s4 + $0x48] sm:$0xff]   ;;  %v5465_v2 = vshrl.u32 %v5320_v61, 16  ;;  %v4157_v45 = vpop.f32.mrb[37].mxu0  ;;  %v4156_v20 = vadd.f32 %v12069_v33, %v4155_v62 }
 0x212   : > { %v12171_v35 = vrot.slane %v8034_v21, 4  ;;  %v4419_v5 = vmax.f32 %v4325_v14, 0.0  ;;  %v4328_v37 = vadd.f32 %v4327_v55, %v4151_v54  ;;  %v5867_v42 = vld [vmem:[#allocation2 + $0x40] sm:$0xf]  ;;  %7841 = vrot.lane.b32.xlu0 %v9800_v6, %s10381_s22  ;;  %v5471_v41 = vshll.u32 %v5321_v16, 16  ;;  %9944 = vmatprep.subr.bf16.mxu1 %v10301_v49  ;;  %v4158_v34 = vpop.f32.mrb[38].mxu0 }
 0x213   : > { %v5457_v51 = vrot.slane %v5455_v26, 5  ;;  %v5463_v9 = vrot.slane %v5461_v44, 5  ;;  %v5467_v48 = vrot.slane %v5465_v2, 4  ;;  %v8023_v50 = vrot.slane %v7912_v53, 5  ;;  %v4160_v56 = vpop.f32.mrb[39].mxu0  ;;  %v10288_v63 = vld [vmem:[#allocation2 + $0x48] sm:$0xff]  }
 0x214   : > { %v9902_v47 = vpack.c.bf16 %v4419_v5, %v4419_v5  ;;  %v4420_v36 = vmax.f32 %v4328_v37, 0.0  ;;  %v5473_v46 = vrot.slane %v5471_v41, 5  ;;  %v4333_v52 = vadd.f32 %v10112_v11, %v4156_v20  ;;  %v4972_v16 = vld [vmem:[#allocation2 + $0x60] sm:$0xf]  ;;  %v4976_v53 = vld [vmem:[#allocation2 + $0x68] sm:$0x1] }
 0x215   : > { %v5458_v29 = vor.u32 %v5457_v51, %v5454_v43  ;;  %v9691_v54 = vrot.slane %v5866_v28, 9  ;;  %v5468_v0 = vor.u32 %v5467_v48, %v5463_v9  ;;  %v8024_v60 = vsel %vm10459_vm2, %v12119_v25, %v8023_v50  ;;  %v5868_v12 = vld [vmem:[#allocation2 + $0x44] sm:$0x1]  ;;  %v7366_v55 = vld [vmem:[#allocation2 + $0x3c] sm:$0xf] }
 0x216   : > { %v4687_v61 = vshrl.u32 %v9902_v47, 16  ;;  %v4690_v40 = vshll.u32 %v9902_v47, 16  ;;  %v9903_v58 = vpack.c.bf16 %v4420_v36, %v4420_v36  ;;  %7124 = vrot.lane.b32.xlu0 %v9770_v57, %s10382_s25  ;;  %v4421_v10 = vmax.f32 %v4333_v52, 0.0  ;;  %v7367_v49 = vld [vmem:[#allocation2 + $0x40] sm:$0xf] }
 0x217   : > { %v5459_v4 = vrot.slane %v5458_v29, 4  ;;  %v5984_v39 = vrot.slane %v5867_v42, 5  ;;  %v5469_v19 = vrot.slane %v5468_v0, 4  ;;  %v9833_v57 = vcombine.low %v12152_v15, %v8024_v60  ;;  %v4979_v36 = vld [vmem:[#allocation2 + $0x6c] sm:$0xf] }
 0x218   : > { %v4689_v22 = vrot.slane %v4687_v61, 7  ;;  %v4695_v18 = vshrl.u32 %v9903_v58, 16  ;;  %v4698_v11 = vshll.u32 %v9903_v58, 16  ;;  %v9904_v14 = vpack.c.bf16 %v4421_v10, %v4421_v10  ;;  %v12184_v6 = vpop.f32.mrb[20].mxu1  ;;  %v12186_v25 = vpop.f32.mrb[40].mxu0  ;;  %v10311_v60 = vld [vmem:[#allocation2 + $0xc] sm:$0xff]  }
 0x219   : > { %v5464_v23 = vsel %vm10529_vm5, %v5459_v4, %v5463_v9  ;;  %v5985_v28 = vsel %vm10459_vm2, %v9691_v54, %v5984_v39  ;;  %v5474_v62 = vsel %vm10529_vm5, %v5469_v19, %v5473_v46  ;;  %v12190_v5 = vpop.f32.mrb[21].mxu1  ;;  %v4165_v37 = vpop.f32.mrb[41].mxu0  ;;  %8176 = vst.msk [vmem:[#allocation3 + $0x58] sm:$0xff] %vm514_vm6, %v9833_v57  ;;  %v5986_v42 = vrot.slane %v5984_v39, 4  ;;  %v7368_v50 = vld [vmem:[#allocation2 + $0x44] sm:$0x1] }
 0x21a   : > { %v4692_v43 = vor.u32 %v4690_v40, %v4689_v22  ;;  %v4693_v26 = vrot.slane %v4689_v22, 4  ;;  %v4697_v44 = vrot.slane %v4695_v18, 7  ;;  %v9674_v15 = vcombine.low %v5464_v23, %v5474_v62  ;;  %7301 = vrot.lane.b32.xlu0 %v10288_v63, %s10380_s19  ;;  %v12194_v51 = vpop.f32.mrb[22].mxu1  ;;  %v12196_v9 = vpop.f32.mrb[42].mxu0  ;;  %v10302_v40 = vld [vmem:[#allocation2] sm:$0xff]   ;;  %5292 = vst.msk [vmem:[#allocation3 + $0x18] sm:$0xff] %vm514_vm6, %v10311_v60 }
 0x21b   : > { %v4704_v2 = vshrl.u32 %v9904_v14, 16  ;;  %v4707_v45 = vshll.u32 %v9904_v14, 16  ;;  %v5987_v48 = vrot.slane %v5868_v12, 5  ;;  %v12200_v29 = vpop.f32.mrb[23].mxu1  ;;  %v4168_v46 = vpop.f32.mrb[43].mxu0  ;;  %v4159_v54 = vadd.f32 %v12069_v33, %v4158_v34  ;;  %5291 = vst.msk [vmem:[#allocation3] sm:$0xff] %vm514_vm6, %v10302_v40 }
 0x21c   : > { %v4973_v41 = vsel %vm11834_vm15, %v4692_v43, %v4972_v16  ;;  %v4700_v20 = vor.u32 %v4698_v11, %v4697_v44  ;;  %v4702_v47 = vrot.slane %v4697_v44, 4  ;;  %5795 = vrot.lane.b32.xlu1 %v9674_v15, %s10382_s25  ;;  %v7478_v56 = vshrl.u32 %v7366_v55, 16  ;;  %v6875_v10 = vld [vmem:[#allocation2 + $0x48] sm:$0xe]  ;;  %v6876_v18 = vld [vmem:[#allocation2 + $0x4c] sm:$0xf] }
 0x21d   : > { %4974 = vst [vmem:[#allocation2 + $0x60] sm:$0xf] %v4973_v41  ;;  %v12203_v52 = vrot.slane %v4704_v2, 7  ;;  %v7481_v61 = vshll.u32 %v7366_v55, 16  ;;  %v5988_v4 = vsel %vm10459_vm2, %v5986_v42, %v5987_v48  ;;  %v7487_v63 = vshll.u32 %v7367_v49, 16 }
 0x21e   : > { %v4701_v58 = vsel %vm11845_vm1, %v4693_v26, %v4700_v20  ;;  %v4977_v0 = vsel %vm11840_vm0, %v4702_v47, %v4976_v53  ;;  %v9707_v22 = vcombine.low %v5985_v28, %v5988_v4  ;;  %v4336_v16 = vadd.f32 %v12161_v32, %v4159_v54  ;;  %v6877_v11 = vld [vmem:[#allocation2 + $0x50] sm:$0x1]  ;;  %v5322_v57 = vld [vmem:[#allocation2 + $0x3c] sm:$0xf] }
 0x21f   : > { %4975 = vst.msk [vmem:[#allocation2 + $0x64] sm:$0xf] %vm4910_vm11, %v4701_v58  ;;  %4978 = vst [vmem:[#allocation2 + $0x68] sm:$0x1] %v4977_v0  ;;  %v4709_v34 = vor.u32 %v4707_v45, %v12203_v52  ;;  %v4710_v39 = vrot.slane %v12203_v52, 4  ;;  %v7480_v19 = vrot.slane %v7478_v56, 4 }
 0x220   : > { %v7483_v53 = vrot.slane %v7481_v61, 5  ;;  %v12217_v23 = vrot.slane %v7487_v63, 5  ;;  %v7491_v14 = vshrl.u32 %v7367_v49, 16  ;;  %6117 = vrot.lane.b32.xlu1 %v9707_v22, %s10380_s19  ;;  %v4422_v28 = vmax.f32 %v4336_v16, 0.0  ;;  %v12223_v43 = vpop.f32.mrb[44].mxu0  ;;  %v8200_v26 = vld [vmem:[#allocation3 + $0x58] sm:$0xff] }
 0x221   : > { %v4980_v12 = vsel %vm11834_vm15, %v4709_v34, %v4979_v36  ;;  %v7497_v55 = vshll.u32 %v7368_v50, 16  ;;  %v9755_v32 = vrot.slane %v6875_v10, 9  ;;  %v6993_v37 = vrot.slane %v6876_v18, 5  ;;  %10139 = vmatmul.mubr.msk.bf16.gmra.mrb[76].mxu0 %vm514_vm6, %v8200_v26  ;;  %v10289_v45 = vld [vmem:[#allocation2 + $0x48] sm:$0xff]   ;;  %v4173_v20 = vpop.f32.mrb[45].mxu0 }
 0x222   : > { %4981 = vst [vmem:[#allocation2 + $0x6c] sm:$0xf] %v4980_v12  ;;  %v7484_v44 = vor.u32 %v7483_v53, %v7480_v19  ;;  %v7493_v62 = vrot.slane %v7491_v14, 4  ;;  %v6996_v15 = vrot.slane %v6877_v11, 5  ;;  %v9905_v49 = vpack.c.bf16 %v4422_v28, %v4422_v28  ;;  %v5323_v0 = vld [vmem:[#allocation2 + $0x40] sm:$0xf] }
 0x223   : > { %v7499_v2 = vrot.slane %v7497_v55, 5  ;;  %v5476_v42 = vshrl.u32 %v5322_v57, 16  ;;  %v5479_v41 = vshll.u32 %v5322_v57, 16  ;;  %v12231_v46 = vsel %vm10459_vm2, %v9755_v32, %v6993_v37  ;;  %v4983_v10 = vld [vmem:[#allocation2 + $0x74] sm:$0x1]  ;;  %v12248_v28 = vpop.f32.mrb[46].mxu0 }
 0x224   : > { %v5066_v47 = vld [vmem:[#allocation2 + $0x60] sm:$0x1]  ;;  %v12226_v36 = vld [vmem:[#allocation2 + $0x60] sm:$0xe]  ;;  %v7485_v48 = vrot.slane %v7484_v44, 4  ;;  %v7494_v50 = vor.u32 %v7493_v62, %v12217_v23  ;;  %v6995_v54 = vrot.slane %v6993_v37, 4  ;;  %6294 = vrot.lane.b32.xlu1 %v10289_v45, %s10381_s22 }
 0x225   : > { %v5067_v56 = vsel %vm11840_vm0, 0, %v5066_v47  ;;  %v9820_v61 = vrot.slane %v12226_v36, 9  ;;  %v4712_v40 = vshrl.u32 %v9905_v49, 16  ;;  %v4715_v58 = vshll.u32 %v9905_v49, 16  ;;  %v5324_v16 = vld [vmem:[#allocation2 + $0x44] sm:$0x1] }
 0x226   : > { %5068 = vst [vmem:[#allocation2 + $0x60] sm:$0x1] %v5067_v56  ;;  %v5121_v4 = vld [vmem:[#allocation2 + $0x68] sm:$0x1]  ;;  %v12237_v63 = vld [vmem:[#allocation2 + $0x64] sm:$0xf]  ;;  %v7490_v60 = vsel %vm10529_vm5, %v7485_v48, %v12217_v23  ;;  %v6997_v22 = vsel %vm10459_vm2, %v6995_v54, %v6996_v15 }
 0x227   : > { %v7495_v34 = vrot.slane %v7494_v50, 4  ;;  %v5478_v18 = vrot.slane %v5476_v42, 4  ;;  %v5122_v11 = vsel %vm11872_vm3, 0, %v5121_v4  ;;  %v8041_v19 = vrot.slane %v12237_v63, 5  ;;  %v7915_v57 = vld [vmem:[#allocation2 + $0x50] sm:$0x1] }
 0x228   : > { %v4714_v53 = vrot.slane %v4712_v40, 7  ;;  %v9771_v14 = vcombine.low %v12231_v46, %v6997_v22  ;;  %v5869_v12 = vld [vmem:[#allocation2 + $0x48] sm:$0xe]  ;;  %5123 = vst [vmem:[#allocation2 + $0x68] sm:$0x1] %v5122_v11  ;;  %v5481_v55 = vrot.slane %v5479_v41, 5 }
 0x229   : > { %v7500_v23 = vsel %vm10529_vm5, %v7495_v34, %v7499_v2  ;;  %v5485_v32 = vshll.u32 %v5323_v0, 16  ;;  %v5489_v26 = vshrl.u32 %v5323_v0, 16  ;;  %v5870_v44 = vld [vmem:[#allocation2 + $0x4c] sm:$0xf]  ;;  %v4176_v62 = vpop.f32.mrb[47].mxu0  ;;  %v12254_v37 = vrot.slane %v8041_v19, 4 }
 0x22a   : > { %v5069_v15 = vld [vmem:[#allocation2 + $0x6c] sm:$0x1]  ;;  %v12256_v49 = vld [vmem:[#allocation2 + $0x6c] sm:$0xe]  ;;  %v4717_v45 = vor.u32 %v4715_v58, %v4714_v53  ;;  %v4719_v42 = vrot.slane %v4714_v53, 4  ;;  %v9801_v20 = vcombine.low %v7490_v60, %v7500_v23  ;;  %v5482_v41 = vor.u32 %v5481_v55, %v5478_v18  ;;  %v12261_v46 = vpop.f32.mrb[48].mxu0 }
 0x22b   : > { %v5070_v47 = vsel %vm11840_vm0, 0, %v5069_v15  ;;  %v9821_v2 = vrot.slane %v12256_v49, 9  ;;  %v5487_v48 = vrot.slane %v5485_v32, 5  ;;  %v5871_v50 = vld [vmem:[#allocation2 + $0x50] sm:$0x1]  ;;  %v5491_v40 = vrot.slane %v5489_v26, 4 }
 0x22c   : > { %5071 = vst [vmem:[#allocation2 + $0x6c] sm:$0x1] %v5070_v47  ;;  %v4718_v54 = vsel %vm11845_vm1, %v4710_v39, %v4717_v45  ;;  %v4984_v56 = vsel %vm11840_vm0, %v4719_v42, %v4983_v10  ;;  %7843 = vrot.lane.b32.xlu0 %v9801_v20, %s10381_s22  ;;  %v5495_v58 = vshll.u32 %v5324_v16, 16  ;;  %v7369_v0 = vld [vmem:[#allocation2 + $0x48] sm:$0xf]  ;;  %v5483_v4 = vrot.slane %v5482_v41, 4 }
 0x22d   : > { %4982 = vst.msk [vmem:[#allocation2 + $0x70] sm:$0xf] %vm4910_vm11, %v4718_v54  ;;  %4985 = vst [vmem:[#allocation2 + $0x74] sm:$0x1] %v4984_v56  ;;  %v4164_v60 = vadd.f32 %v12069_v33, %v12186_v25  ;;  %v8030_v34 = vrot.slane %v7915_v57, 5  ;;  %v9692_v52 = vrot.slane %v5869_v12, 9  ;;  %v5492_v39 = vor.u32 %v5491_v40, %v5487_v48 }
 0x22e   : > { %v7370_v22 = vld [vmem:[#allocation2 + $0x4c] sm:$0xf]  ;;  %v4181_v18 = vpop.f32.mrb[49].mxu0  ;;  %v5497_v11 = vrot.slane %v5495_v58, 5  ;;  %v5991_v53 = vrot.slane %v5870_v44, 5  ;;  %v5994_v10 = vrot.slane %v5871_v50, 5  ;;  %v5488_v23 = vsel %vm10529_vm5, %v5483_v4, %v5487_v48 }
 0x22f   : > { %v4341_v16 = vadd.f32 %v12190_v5, %v4164_v60  ;;  %v8031_v55 = vsel %vm10459_vm2, %v12144_v17, %v8030_v34  ;;  %v4167_v25 = vadd.f32 %v12069_v33, %v12196_v9  ;;  %v12281_v57 = vpop.f32.mrb[24].mxu1  ;;  %v5493_v12 = vrot.slane %v5492_v39, 4  ;;  %v10290_v32 = vld [vmem:[#allocation2 + $0x54] sm:$0xff]   ;;  %v12288_v42 = vpop.f32.mrb[50].mxu0  ;;  %v10312_v49 = vld [vmem:[%s13642_s4 + $0x20] sm:$0xff]  }
 0x230   : > { %7126 = vrot.lane.b32.xlu0 %v9771_v14, %s10382_s25  ;;  %v9834_v26 = vcombine.low %v12156_v30, %v8031_v55  ;;  %v5992_v44 = vsel %vm10459_vm2, %v9692_v52, %v5991_v53  ;;  %v5993_v62 = vrot.slane %v5991_v53, 4  ;;  %v7502_v45 = vshrl.u32 %v7369_v0, 16  ;;  %v7371_v30 = vld [vmem:[#allocation2 + $0x50] sm:$0x1]  ;;  %v12295_v56 = vpop.f32.mrb[25].mxu1 }
 0x231   : > { %v4423_v5 = vmax.f32 %v4341_v16, 0.0  ;;  %v4344_v15 = vadd.f32 %v12200_v29, %v4167_v25  ;;  %v7505_v17 = vshll.u32 %v7369_v0, 16  ;;  %v5498_v9 = vsel %vm10529_vm5, %v5493_v12, %v5497_v11  ;;  %v6878_v29 = vld [vmem:[#allocation2 + $0x54] sm:$0xe]  ;;  %v6880_v25 = vld [vmem:[#allocation2 + $0x5c] sm:$0x1] }
 0x232   : > { %8177 = vst.msk [vmem:[#allocation3 + $0x70] sm:$0xff] %vm514_vm6, %v9834_v26  ;;  %v5995_v14 = vsel %vm10459_vm2, %v5993_v62, %v5994_v10  ;;  %v7511_v20 = vshll.u32 %v7370_v22, 16  ;;  %v7515_v47 = vshrl.u32 %v7370_v22, 16  ;;  %v9675_v41 = vcombine.low %v5488_v23, %v5498_v9  ;;  %v6879_v23 = vld [vmem:[#allocation2 + $0x58] sm:$0xf] }
 0x233   : > { %v9906_v48 = vpack.c.bf16 %v4423_v5, %v4423_v5  ;;  %v9708_v50 = vcombine.low %v5992_v44, %v5995_v14  ;;  %v4424_v54 = vmax.f32 %v4344_v15, 0.0  ;;  %v7504_v0 = vrot.slane %v7502_v45, 4  ;;  %v12316_v11 = vpop.permute.xlu1 %6107  ;;  %v5325_v5 = vld [vmem:[#allocation2 + $0x48] sm:$0xf]  ;;  %v4184_v15 = vpop.f32.mrb[51].mxu0 }
 0x234   : > { %v5124_v40 = vld [vmem:[#allocation2 + $0x74] sm:$0x1]  ;;  %v12297_v58 = vld [vmem:[#allocation2 + $0x70] sm:$0xf]  ;;  %7303 = vrot.lane.b32.xlu0 %v10290_v32, %s10380_s19  ;;  %v7507_v4 = vrot.slane %v7505_v17, 5  ;;  %v12302_v60 = vadd.f32 %v12069_v33, %v12223_v43  ;;  %v12310_v34 = vsel %vm10459_vm2, %v9819_v38, %v8034_v21  ;;  %5797 = vrot.lane.b32.xlu1 %v9675_v41, %s10382_s25  ;;  %v7513_v8 = vrot.slane %v7511_v20, 5 }
 0x235   : > { %v5125_v52 = vsel %vm11872_vm3, 0, %v5124_v40  ;;  %v8048_v22 = vrot.slane %v12297_v58, 5  ;;  %v4721_v18 = vshrl.u32 %v9906_v48, 16  ;;  %v4724_v39 = vshll.u32 %v9906_v48, 16  ;;  %v4986_v43 = vld [vmem:[#allocation2 + $0x78] sm:$0xf] }
 0x236   : > { %5126 = vst [vmem:[#allocation2 + $0x74] sm:$0x1] %v5125_v52  ;;  %v9907_v59 = vpack.c.bf16 %v4424_v54, %v4424_v54  ;;  %v7508_v53 = vor.u32 %v7507_v4, %v7504_v0  ;;  %v7517_v10 = vrot.slane %v7515_v47, 4  ;;  %v12318_v38 = vpop.f32.mrb[26].mxu1  ;;  %v7521_v55 = vshll.u32 %v7371_v30, 16  ;;  %v10291_v47 = vld [vmem:[#allocation2 + $0x54] sm:$0xff]  }
 0x237   : > { %v12322_v21 = vrot.slane %v8048_v22, 4  ;;  %v4723_v16 = vrot.slane %v4721_v18, 7  ;;  %v9756_v12 = vrot.slane %v6878_v29, 9  ;;  %v4990_v14 = vld [vmem:[#allocation2 + $0x80] sm:$0x1]  ;;  %v7000_v41 = vrot.slane %v6879_v23, 5  ;;  %v6285_v52 = vpop.permute.xlu1 %6284 }
 0x238   : > { %v4729_v32 = vshrl.u32 %v9907_v59, 16  ;;  %v4732_v26 = vshll.u32 %v9907_v59, 16  ;;  %v7509_v44 = vrot.slane %v7508_v53, 4  ;;  %v7518_v62 = vor.u32 %v7517_v10, %v7513_v8  ;;  %6119 = vrot.lane.b32.xlu1 %v9708_v50, %s10380_s19  ;;  %v5326_v48 = vld [vmem:[#allocation2 + $0x4c] sm:$0xf]  ;;  %v12328_v4 = vpop.f32.mrb[27].mxu1 }
 0x239   : > { %v4726_v45 = vor.u32 %v4724_v39, %v4723_v16  ;;  %v4727_v17 = vrot.slane %v4723_v16, 4  ;;  %v8203_v9 = vld [vmem:[#allocation3 + $0x70] sm:$0xff]  ;;  %v7523_v20 = vrot.slane %v7521_v55, 5  ;;  %v7003_v40 = vrot.slane %v6880_v25, 5  ;;  %v5327_v0 = vld [vmem:[#allocation2 + $0x50] sm:$0x1] }
 0x23a   : > { %10142 = vmatprep.mubr.msk.bf16.mxu0 %vm514_vm6, %v8203_v9  ;;  %v4731_v30 = vrot.slane %v4729_v32, 7  ;;  %v7514_v54 = vsel %vm10529_vm5, %v7509_v44, %v7513_v8  ;;  %v7519_v29 = vrot.slane %v7518_v62, 4  ;;  %v7001_v18 = vsel %vm10459_vm2, %v9756_v12, %v7000_v41  ;;  %v7918_v53 = vld [vmem:[#allocation2 + $0x5c] sm:$0x1]  ;;  %v5872_v10 = vld [vmem:[#allocation2 + $0x54] sm:$0xe] }
 0x23b   : > { %v4987_v50 = vsel %vm11834_vm15, %v4726_v45, %v4986_v43  ;;  %v7002_v39 = vrot.slane %v7000_v41, 4  ;;  %v5500_v59 = vshrl.u32 %v5325_v5, 16  ;;  %v5503_v55 = vshll.u32 %v5325_v5, 16  ;;  %v5873_v12 = vld [vmem:[#allocation2 + $0x58] sm:$0xf]  ;;  %v12339_v62 = vpop.f32.mrb[52].mxu0 }
 0x23c   : > { %4988 = vst [vmem:[#allocation2 + $0x78] sm:$0xf] %v4987_v50  ;;  %v4734_v23 = vor.u32 %v4732_v26, %v4731_v30  ;;  %v4736_v16 = vrot.slane %v4731_v30, 4  ;;  %v7524_v8 = vsel %vm10529_vm5, %v7519_v29, %v7523_v20  ;;  %6296 = vrot.lane.b32.xlu1 %v10291_v47, %s10381_s22  ;;  %v5509_v44 = vshll.u32 %v5326_v48, 16  ;;  %v5874_v5 = vld [vmem:[#allocation2 + $0x5c] sm:$0x1] }
 0x23d   : > { %v9802_v25 = vcombine.low %v7514_v54, %v7524_v8  ;;  %v7004_v43 = vsel %vm10459_vm2, %v7002_v39, %v7003_v40  ;;  %v5502_v32 = vrot.slane %v5500_v59, 4  ;;  %v5505_v9 = vrot.slane %v5503_v55, 5  ;;  %v4189_v20 = vpop.f32.mrb[53].mxu0  ;;  %v5788_v39 = vpop.permute.xlu1 %5787 }
 0x23e   : > { %v4735_v15 = vsel %vm11845_vm1, %v4727_v17, %v4734_v23  ;;  %v4991_v26 = vsel %vm11840_vm0, %v4736_v16, %v4990_v14  ;;  %v9772_v45 = vcombine.low %v7001_v18, %v7004_v43  ;;  %v5511_v47 = vrot.slane %v5509_v44, 5  ;;  %v12349_v29 = vpop.f32.mrb[54].mxu0  ;;  %5835 = vst.msk [vmem:[#allocation3] sm:$0xff] %vm1130_vm7, %v5788_v39  ;;  %v10292_v43 = vld [vmem:[#allocation2 + $0x60] sm:$0xff]  }
 0x23f   : > { %4989 = vst.msk [vmem:[#allocation2 + $0x7c] sm:$0xf] %vm4910_vm11, %v4735_v15  ;;  %4992 = vst [vmem:[#allocation2 + $0x80] sm:$0x1] %v4991_v26  ;;  %7845 = vrot.lane.b32.xlu0 %v9802_v25, %s10381_s22  ;;  %v5513_v41 = vshrl.u32 %v5326_v48, 16  ;;  %v5519_v30 = vshll.u32 %v5327_v0, 16  ;;  %v4349_v54 = vadd.f32 %v12184_v6, %v12302_v60  ;;  %v5506_v17 = vor.u32 %v5505_v9, %v5502_v32 }
 0x240   : > { %v8037_v40 = vrot.slane %v7918_v53, 5  ;;  %v9693_v14 = vrot.slane %v5872_v10, 9  ;;  %v5998_v50 = vrot.slane %v5873_v12, 5  ;;  %v4192_v18 = vpop.f32.mrb[55].mxu0  ;;  %v6001_v8 = vrot.slane %v5874_v5, 5  ;;  %6155 = vst.msk [vmem:[#allocation3] sm:$0xff] %vm1494_vm8, %v12316_v11 }
 0x241   : > { %v5515_v59 = vrot.slane %v5513_v41, 4  ;;  %v5521_v23 = vrot.slane %v5519_v30, 5  ;;  %v4425_v16 = vmax.f32 %v4349_v54, 0.0  ;;  %v5507_v55 = vrot.slane %v5506_v17, 4  ;;  %v7372_v0 = vld [vmem:[#allocation2 + $0x54] sm:$0xf]  ;;  %v12377_v9 = vpop.permute.xlu1 %6109 }
 0x242   : > { %v8038_v48 = vsel %vm10459_vm2, %v12171_v35, %v8037_v40  ;;  %v12357_v6 = vsel %vm10459_vm2, %v9693_v14, %v5998_v50  ;;  %v6000_v60 = vrot.slane %v5998_v50, 4  ;;  %v4175_v35 = vadd.f32 %v12069_v33, %v12248_v28  ;;  %6332 = vst.msk [vmem:[#allocation3] sm:$0xff] %vm1697_vm9, %v6285_v52  ;;  %v7374_v5 = vld [vmem:[#allocation2 + $0x5c] sm:$0x1]  ;;  %v12382_v20 = vpop.f32.mrb[56].mxu0 }
 0x243   : > { %v5072_v53 = vld [vmem:[#allocation2 + $0x78] sm:$0x1]  ;;  %v12361_v10 = vld [vmem:[#allocation2 + $0x78] sm:$0xe]  ;;  %7128 = vrot.lane.b32.xlu0 %v9772_v45, %s10382_s25  ;;  %v5516_v25 = vor.u32 %v5515_v59, %v5511_v47  ;;  %v9908_v32 = vpack.c.bf16 %v4425_v16, %v4425_v16  ;;  %v9835_v44 = vcombine.low %v12310_v34, %v8038_v48  ;;  %v5512_v15 = vsel %vm10529_vm5, %v5507_v55, %v5511_v47  ;;  %v4993_v30 = vld [vmem:[#allocation2 + $0x84] sm:$0xf] }
 0x244   : > { %v5073_v12 = vsel %vm11840_vm0, 0, %v5072_v53  ;;  %v9822_v11 = vrot.slane %v12361_v10, 9  ;;  %v12375_v26 = vsel %vm10459_vm2, %v6000_v60, %v6001_v8  ;;  %v7373_v45 = vld [vmem:[#allocation2 + $0x58] sm:$0xf]  ;;  %v4352_v54 = vadd.f32 %v12194_v51, %v4175_v35  ;;  %v6881_v14 = vld [vmem:[#allocation2 + $0x60] sm:$0xe] }
 0x245   : > { %5074 = vst [vmem:[#allocation2 + $0x78] sm:$0x1] %v5073_v12  ;;  %v5517_v34 = vrot.slane %v5516_v25, 4  ;;  %v4738_v33 = vshrl.u32 %v9908_v32, 16  ;;  %v4741_v28 = vshll.u32 %v9908_v32, 16  ;;  %8178 = vst.msk [vmem:[#allocation3 + $0x88] sm:$0xff] %vm514_vm6, %v9835_v44  ;;  %v9709_v52 = vcombine.low %v12357_v6, %v12375_v26  ;;  %v6287_v44 = vpop.permute.xlu1 %6286 }
 0x246   : > { %v5127_v47 = vld [vmem:[#allocation2 + $0x80] sm:$0x1]  ;;  %v12384_v41 = vld [vmem:[#allocation2 + $0x7c] sm:$0xf]  ;;  %v7526_v17 = vshrl.u32 %v7372_v0, 16  ;;  %v7529_v40 = vshll.u32 %v7372_v0, 16 }
 0x247   : > { %v12390_v50 = vld [vmem:[%s13641_s3] ss:$0 sm:$0xff]  ;;  %v5128_v39 = vsel %vm11872_vm3, 0, %v5127_v47  ;;  %v8055_v59 = vrot.slane %v12384_v41, 5  ;;  %v5522_v51 = vsel %vm10529_vm5, %v5517_v34, %v5521_v23  ;;  %7305 = vrot.lane.b32.xlu0 %v10292_v43, %s10380_s19  ;;  %v12402_v16 = vrot.slane %v4738_v33, 7  ;;  %v4197_v8 = vpop.f32.mrb[57].mxu0 }
 0x248   : > { %v12394_v18 = vadd.f32 %v12390_v50, %v12261_v46  ;;  %5129 = vst [vmem:[#allocation2 + $0x80] sm:$0x1] %v5128_v39  ;;  %v9676_v55 = vcombine.low %v5512_v15, %v5522_v51  ;;  %v4426_v48 = vmax.f32 %v4352_v54, 0.0  ;;  %v7528_v6 = vrot.slane %v7526_v17, 4  ;;  %v6882_v46 = vld [vmem:[#allocation2 + $0x64] sm:$0xf] }
 0x249   : > { %v7531_v60 = vrot.slane %v7529_v40, 5  ;;  %v12404_v0 = vpop.f32.mrb[28].mxu1  ;;  %v12408_v53 = vrot.slane %v8055_v59, 4  ;;  %v4743_v25 = vor.u32 %v4741_v28, %v12402_v16  ;;  %v4744_v23 = vrot.slane %v12402_v16, 4  ;;  %v12412_v32 = vpop.f32.mrb[58].mxu0 }
 0x24a   : > { %v7535_v43 = vshll.u32 %v7373_v45, 16  ;;  %5799 = vrot.lane.b32.xlu1 %v9676_v55, %s10382_s25  ;;  %v9909_v35 = vpack.c.bf16 %v4426_v48, %v4426_v48  ;;  %v7539_v15 = vshrl.u32 %v7373_v45, 16  ;;  %v7545_v26 = vshll.u32 %v7374_v5, 16  ;;  %v6883_v34 = vld [vmem:[#allocation2 + $0x68] sm:$0x1]  ;;  %v12417_v39 = vpop.f32.mrb[29].mxu1 }
 0x24b   : > { %v7532_v12 = vor.u32 %v7531_v60, %v7528_v6  ;;  %v5328_v33 = vld [vmem:[#allocation2 + $0x54] sm:$0xf]  ;;  %v4994_v47 = vsel %vm11834_vm15, %v4743_v25, %v4993_v30  ;;  %v9757_v17 = vrot.slane %v6881_v14, 9  ;;  %v7007_v28 = vrot.slane %v6882_v46, 5  ;;  %v5329_v40 = vld [vmem:[#allocation2 + $0x58] sm:$0xf]  ;;  %v5790_v14 = vpop.permute.xlu1 %5789 }
 0x24c   : > { %v7537_v54 = vrot.slane %v7535_v43, 5  ;;  %4995 = vst [vmem:[#allocation2 + $0x84] sm:$0xf] %v4994_v47  ;;  %v8206_v51 = vld [vmem:[#allocation3 + $0x88] sm:$0xff]  ;;  %v4746_v16 = vshrl.u32 %v9909_v35, 16  ;;  %v4749_v8 = vshll.u32 %v9909_v35, 16 }
 0x24d   : > { %v7533_v55 = vrot.slane %v7532_v12, 4  ;;  %v7541_v48 = vrot.slane %v7539_v15, 4  ;;  %10143 = vmatmul.mubr.msk.bf16.gmra.mrb[80].mxu0 %vm514_vm6, %v8206_v51  ;;  %v7547_v45 = vrot.slane %v7545_v26, 5  ;;  %v12422_v5 = vsel %vm10459_vm2, %v9757_v17, %v7007_v28  ;;  %v4997_v46 = vld [vmem:[#allocation2 + $0x8c] sm:$0x1]  ;;  %5836 = vst.msk [vmem:[#allocation3 + $0x18] sm:$0xff] %vm1130_vm7, %v5790_v14 }
 0x24e   : > { %v7009_v30 = vrot.slane %v7007_v28, 4  ;;  %v7010_v6 = vrot.slane %v6883_v34, 5  ;;  %6121 = vrot.lane.b32.xlu1 %v9709_v52, %s10380_s19  ;;  %v4748_v60 = vrot.slane %v4746_v16, 7  ;;  %v5524_v35 = vshrl.u32 %v5328_v33, 16  ;;  %v5330_v15 = vld [vmem:[#allocation2 + $0x5c] sm:$0x1] }
 0x24f   : > { %v7538_v25 = vsel %vm10529_vm5, %v7533_v55, %v7537_v54  ;;  %v7542_v43 = vor.u32 %v7541_v48, %v7537_v54  ;;  %v5527_v26 = vshll.u32 %v5328_v33, 16  ;;  %v5533_v47 = vshll.u32 %v5329_v40, 16  ;;  %v12432_v17 = vpop.f32.mrb[30].mxu1  ;;  %6156 = vst.msk [vmem:[#allocation3 + $0x18] sm:$0xff] %vm1494_vm8, %v12377_v9  ;;  %v10293_v54 = vld [vmem:[#allocation2 + $0x60] sm:$0xff]  }
 0x250   : > { %v12430_v12 = vsel %vm10459_vm2, %v7009_v30, %v7010_v6  ;;  %v5537_v34 = vshrl.u32 %v5329_v40, 16  ;;  %v4751_v52 = vor.u32 %v4749_v8, %v4748_v60  ;;  %v4753_v28 = vrot.slane %v4748_v60, 4  ;;  %6333 = vst.msk [vmem:[#allocation3 + $0x18] sm:$0xff] %vm1697_vm9, %v6287_v44  ;;  %v7921_v6 = vld [vmem:[#allocation2 + $0x68] sm:$0x1]  ;;  %v12446_v44 = vpop.f32.mrb[31].mxu1 }
 0x251   : > { %v7543_v51 = vrot.slane %v7542_v43, 4  ;;  %v9773_v16 = vcombine.low %v12422_v5, %v12430_v12  ;;  %v5526_v55 = vrot.slane %v5524_v35, 4  ;;  %v5529_v48 = vrot.slane %v5527_v26, 5  ;;  %v5875_v5 = vld [vmem:[#allocation2 + $0x60] sm:$0xe] }
 0x252   : > { %v5535_v30 = vrot.slane %v5533_v47, 5  ;;  %v5539_v33 = vrot.slane %v5537_v34, 4  ;;  %v4752_v40 = vsel %vm11845_vm1, %v4744_v23, %v4751_v52  ;;  %v4998_v9 = vsel %vm11840_vm0, %v4753_v28, %v4997_v46  ;;  %6298 = vrot.lane.b32.xlu1 %v10293_v54, %s10381_s22  ;;  %v5876_v60 = vld [vmem:[#allocation2 + $0x64] sm:$0xf]  ;;  %v5877_v46 = vld [vmem:[#allocation2 + $0x68] sm:$0x1] }
 0x253   : > { %v7548_v8 = vsel %vm10529_vm5, %v7543_v51, %v7547_v45  ;;  %v5543_v14 = vshll.u32 %v5330_v15, 16  ;;  %v5075_v43 = vld [vmem:[#allocation2 + $0x84] sm:$0x1]  ;;  %v12448_v35 = vld [vmem:[#allocation2 + $0x84] sm:$0xe]  ;;  %v5530_v12 = vor.u32 %v5529_v48, %v5526_v55  ;;  %v8042_v45 = vsel %vm10459_vm2, %v9820_v61, %v8041_v19 }
 0x254   : > { %4996 = vst.msk [vmem:[#allocation2 + $0x88] sm:$0xf] %vm4910_vm11, %v4752_v40  ;;  %4999 = vst [vmem:[#allocation2 + $0x8c] sm:$0x1] %v4998_v9  ;;  %v9803_v23 = vcombine.low %v7538_v25, %v7548_v8  ;;  %v5540_v26 = vor.u32 %v5539_v33, %v5535_v30  ;;  %v5076_v15 = vsel %vm11840_vm0, 0, %v5075_v43  ;;  %v8044_v52 = vrot.slane %v7921_v6, 5 }
 0x255   : > { %v5545_v34 = vrot.slane %v5543_v14, 5  ;;  %5077 = vst [vmem:[#allocation2 + $0x84] sm:$0x1] %v5076_v15  ;;  %v5531_v25 = vrot.slane %v5530_v12, 4  ;;  %v9694_v51 = vrot.slane %v5875_v5, 9  ;;  %v6005_v63 = vrot.slane %v5876_v60, 5 }
 0x256   : > { %7847 = vrot.lane.b32.xlu0 %v9803_v23, %s10381_s22  ;;  %v5541_v28 = vrot.slane %v5540_v26, 4  ;;  %v7375_v54 = vld [vmem:[#allocation2 + $0x60] sm:$0xf]  ;;  %v8045_v36 = vsel %vm10459_vm2, %v12254_v37, %v8044_v52  ;;  %v6008_v61 = vrot.slane %v5877_v46, 5  ;;  %v4183_v19 = vadd.f32 %v12390_v50, %v12288_v42  ;;  %v7376_v48 = vld [vmem:[#allocation2 + $0x64] sm:$0xf] }
 0x257   : > { %v4357_v55 = vadd.f32 %v12295_v56, %v12394_v18  ;;  %v7377_v33 = vld [vmem:[#allocation2 + $0x68] sm:$0x1]  ;;  %v5536_v40 = vsel %vm10529_vm5, %v5531_v25, %v5535_v30  ;;  %v9836_v37 = vcombine.low %v8042_v45, %v8045_v36  ;;  %v6006_v8 = vsel %vm10459_vm2, %v9694_v51, %v6005_v63  ;;  %v10305_v42 = vld [vmem:[%s13642_s4 + $0x50] sm:$0xff]   ;;  %v4200_v56 = vpop.f32.mrb[59].mxu0  ;;  %v6884_v46 = vld [vmem:[#allocation2 + $0x6c] sm:$0xe] }
 0x258   : > { %v10303_v6 = vld [vmem:[%s13642_s4 + $0x8] sm:$0xff]   ;;  %v5546_v9 = vsel %vm10529_vm5, %v5541_v28, %v5545_v34  ;;  %v6007_v5 = vrot.slane %v6005_v63, 4  ;;  %v7550_v43 = vshrl.u32 %v7375_v54, 16  ;;  %v10306_v30 = vld [vmem:[%s13642_s4 + $0x10] sm:$0xff]   ;;  %v7553_v23 = vshll.u32 %v7375_v54, 16  ;;  %v10307_v36 = vld [vmem:[%s13642_s4 + $0x58] sm:$0xff]  }
 0x259   : > { %v9677_v18 = vcombine.low %v5536_v40, %v5546_v9  ;;  %v10294_v14 = vld [vmem:[#allocation2 + $0x6c] sm:$0xff]   ;;  %v4427_v60 = vmax.f32 %v4357_v55, 0.0  ;;  %9945 = vmatpush3.bf16.msra.mxu1 %v10303_v6  ;;  %8179 = vst.msk [vmem:[#allocation3 + $0xa0] sm:$0xff] %vm514_vm6, %v9836_v37  ;;  %v7559_v12 = vshll.u32 %v7376_v48, 16  ;;  %v7563_v26 = vshrl.u32 %v7376_v48, 16  ;;  %v12497_v40 = vpop.f32.mrb[60].mxu0 }
 0x25a   : > { %7130 = vrot.lane.b32.xlu0 %v9773_v16, %s10382_s25  ;;  %v7569_v45 = vshll.u32 %v7377_v33, 16  ;;  %v6885_v15 = vld [vmem:[#allocation2 + $0x70] sm:$0xf]  ;;  %9946 = vmatprep.subr.bf16.mxu1 %v10305_v42  ;;  %v6009_v25 = vsel %vm10459_vm2, %v6007_v5, %v6008_v61  ;;  %v7552_v51 = vrot.slane %v7550_v43, 4  ;;  %v4360_v16 = vadd.f32 %v12328_v4, %v4183_v19  ;;  %v6886_v63 = vld [vmem:[#allocation2 + $0x74] sm:$0x1] }
 0x25b   : > { %v5130_v34 = vld [vmem:[#allocation2 + $0x8c] sm:$0x1]  ;;  %v12485_v52 = vld [vmem:[#allocation2 + $0x88] sm:$0xf]  ;;  %5801 = vrot.lane.b32.xlu1 %v9677_v18, %s10382_s25  ;;  %v9910_v28 = vpack.c.bf16 %v4427_v60, %v4427_v60  ;;  %v5331_v54 = vld [vmem:[#allocation2 + $0x60] sm:$0xf]  ;;  %v9710_v33 = vcombine.low %v6006_v8, %v6009_v25 }
 0x25c   : > { %v5131_v55 = vsel %vm11872_vm3, 0, %v5130_v34  ;;  %v13650_v48 = vrot.slane %v12485_v52, 5  ;;  %v7555_v6 = vrot.slane %v7553_v23, 5  ;;  %v7561_v37 = vrot.slane %v7559_v12, 5  ;;  %v5000_v42 = vld [vmem:[#allocation2 + $0x90] sm:$0xf] }
 0x25d   : > { %5132 = vst [vmem:[#allocation2 + $0x8c] sm:$0x1] %v5131_v55  ;;  %v4755_v61 = vshrl.u32 %v9910_v28, 16  ;;  %v4758_v9 = vshll.u32 %v9910_v28, 16  ;;  %v7565_v4 = vrot.slane %v7563_v26, 4  ;;  %9947 = vmatpush3.bf16.msra.mxu1 %v10306_v30  ;;  %v7571_v18 = vrot.slane %v7569_v45, 5 }
 0x25e   : > { %v12501_v19 = vrot.slane %v13650_v48, 4  ;;  %7307 = vrot.lane.b32.xlu0 %v10294_v14, %s10380_s19  ;;  %v7556_v56 = vor.u32 %v7555_v6, %v7552_v51  ;;  %v4428_v5 = vmax.f32 %v4360_v16, 0.0  ;;  %9948 = vmatprep.subr.bf16.mxu1 %v10307_v36  ;;  %v9758_v43 = vrot.slane %v6884_v46, 9  ;;  %v10295_v30 = vld [vmem:[#allocation2 + $0x6c] sm:$0xff]   ;;  %v10309_v14 = vld [vmem:[%s13642_s4 + $0x18] sm:$0xff]   ;;  %v12510_v46 = vpop.permute.xlu1 %6111 }
 0x25f   : > { %6123 = vrot.lane.b32.xlu1 %v9710_v33, %s10380_s19  ;;  %v4757_v8 = vrot.slane %v4755_v61, 7  ;;  %v7566_v60 = vor.u32 %v7565_v4, %v7561_v37  ;;  %v7014_v23 = vrot.slane %v6885_v15, 5  ;;  %v7017_v34 = vrot.slane %v6886_v63, 5  ;;  %v5332_v55 = vld [vmem:[#allocation2 + $0x64] sm:$0xf]  ;;  %v4205_v33 = vpop.f32.mrb[61].mxu0 }
 0x260   : > { %v7557_v12 = vrot.slane %v7556_v56, 4  ;;  %v9911_v26 = vpack.c.bf16 %v4428_v5, %v4428_v5  ;;  %v5548_v25 = vshrl.u32 %v5331_v54, 16  ;;  %v8209_v28 = vld [vmem:[#allocation3 + $0xa0] sm:$0xff]  ;;  %v5333_v4 = vld [vmem:[#allocation2 + $0x68] sm:$0x1]  ;;  %v5561_v33 = vshrl.u32 %v5332_v55, 16 }
 0x261   : > { %v4760_v51 = vor.u32 %v4758_v9, %v4757_v8  ;;  %v4761_v45 = vrot.slane %v4757_v8, 4  ;;  %v7567_v16 = vrot.slane %v7566_v60, 4  ;;  %v7015_v36 = vsel %vm10459_vm2, %v9758_v43, %v7014_v23  ;;  %10146 = vmatprep.mubr.msk.bf16.mxu0 %vm514_vm6, %v8209_v28  ;;  %9949 = vmatpush3.bf16.msra.mxu1 %v10309_v14  ;;  %v12515_v9 = vpop.f32.mrb[62].mxu0  ;;  %v6889_v10 = vld [vmem:[#allocation2 + $0x80] sm:$0x1] }
 0x262   : > { %v7562_v15 = vsel %vm10529_vm5, %v7557_v12, %v7561_v37  ;;  %v4763_v63 = vshrl.u32 %v9911_v26, 16  ;;  %v4766_v6 = vshll.u32 %v9911_v26, 16  ;;  %v7016_v61 = vrot.slane %v7014_v23, 4  ;;  %v5004_v12 = vld [vmem:[#allocation2 + $0x98] sm:$0x1] }
 0x263   : > { %v5001_v56 = vsel %vm11834_vm15, %v4760_v51, %v5000_v42  ;;  %v7572_v5 = vsel %vm10529_vm5, %v7567_v16, %v7571_v18  ;;  %6300 = vrot.lane.b32.xlu1 %v10295_v30, %s10381_s22  ;;  %v5550_v8 = vrot.slane %v5548_v25, 4  ;;  %v5551_v60 = vshll.u32 %v5331_v54, 16  ;;  %v7924_v42 = vld [vmem:[#allocation2 + $0x74] sm:$0x1]  ;;  %v12524_v51 = vpop.permute.xlu0 %7116  ;;  %v10310_v18 = vld [vmem:[%s13642_s4 + $0x60] sm:$0xff]  }
 0x264   : > { %5002 = vst [vmem:[#allocation2 + $0x90] sm:$0xf] %v5001_v56  ;;  %v9804_v43 = vcombine.low %v7562_v15, %v7572_v5  ;;  %v4765_v37 = vrot.slane %v4763_v63, 7  ;;  %v7018_v23 = vsel %vm10459_vm2, %v7016_v61, %v7017_v34  ;;  %v5557_v26 = vshll.u32 %v5332_v55, 16  ;;  %v5878_v16 = vld [vmem:[#allocation2 + $0x6c] sm:$0xe]  ;;  %9950 = vmatprep.subr.bf16.mxu1 %v10310_v18 }
 0x265   : > { %v9774_v14 = vcombine.low %v7015_v36, %v7018_v23  ;;  %v5553_v28 = vrot.slane %v5551_v60, 5  ;;  %v5567_v1 = vshll.u32 %v5333_v4, 16  ;;  %v4188_v34 = vadd.f32 %v12390_v50, %v12339_v62  ;;  %v5879_v36 = vld [vmem:[#allocation2 + $0x70] sm:$0xf]  ;;  %v5880_v4 = vld [vmem:[#allocation2 + $0x74] sm:$0x1]  ;;  %9951 = vmatpush3.bf16.msra.mxu1 %v10312_v49 }
 0x266   : > { %7849 = vrot.lane.b32.xlu0 %v9804_v43, %s10381_s22  ;;  %v4768_v54 = vor.u32 %v4766_v6, %v4765_v37  ;;  %v4770_v30 = vrot.slane %v4765_v37, 4  ;;  %v5559_v25 = vrot.slane %v5557_v26, 5  ;;  %v5563_v55 = vrot.slane %v5561_v33, 4  ;;  %v12538_v6 = vpop.permute.xlu1 %6288  ;;  %v7378_v60 = vld [vmem:[#allocation2 + $0x6c] sm:$0xf] }
 0x267   : > { %v5554_v15 = vor.u32 %v5553_v28, %v5550_v8  ;;  %v5569_v63 = vrot.slane %v5567_v1, 5  ;;  %v8049_v61 = vsel %vm10459_vm2, %v9821_v2, %v8048_v22  ;;  %v4365_v5 = vadd.f32 %v12281_v57, %v4188_v34  ;;  %v10296_v57 = vld [vmem:[#allocation2 + $0x78] sm:$0xff]   ;;  %v10315_v26 = vld [vmem:[%s13642_s4 + $0x28] sm:$0xff]   ;;  %v4208_v28 = vpop.f32.mrb[63].mxu0  ;;  %v12656_v47 = vld [vmem:[#allocation2 + $0x10] sm:$0xf] }
 0x268   : > { %v4769_v56 = vsel %vm11845_vm1, %v4761_v45, %v4768_v54  ;;  %v5005_v62 = vsel %vm11840_vm0, %v4770_v30, %v5004_v12  ;;  %v8051_v1 = vrot.slane %v7924_v42, 5  ;;  %v5564_v58 = vor.u32 %v5563_v55, %v5559_v25  ;;  %v10314_v45 = vld [vmem:[%s13642_s4 + $0x68] sm:$0xff]   ;;  %v12569_v30 = vpop.permute.xlu0 %7293 }
 0x269   : > { %5003 = vst.msk [vmem:[#allocation2 + $0x94] sm:$0xf] %vm4910_vm11, %v4769_v56  ;;  %5006 = vst [vmem:[#allocation2 + $0x98] sm:$0x1] %v5005_v62  ;;  %v5555_v2 = vrot.slane %v5554_v15, 4  ;;  %v9695_v22 = vrot.slane %v5878_v16, 9  ;;  %v4191_v23 = vadd.f32 %v12390_v50, %v12349_v29  ;;  %9952 = vmatprep.subr.bf16.mxu1 %v10314_v45 }
 0x26a   : > { %v6012_v8 = vrot.slane %v5879_v36, 5  ;;  %7132 = vrot.lane.b32.xlu0 %v9774_v14, %s10382_s25  ;;  %v4429_v43 = vmax.f32 %v4365_v5, 0.0  ;;  %v8052_v37 = vsel %vm10459_vm2, %v12322_v21, %v8051_v1  ;;  %v6015_v12 = vrot.slane %v5880_v4, 5  ;;  %v10316_v29 = vld [vmem:[%s13642_s4 + $0x70] sm:$0xff]   ;;  %v12577_v15 = vpop.f32.mrb[64].mxu0  ;;  %v12583_v5 = vpop.permute.xlu1 %5791  ;;  %9953 = vmatpush3.bf16.msra.mxu1 %v10315_v26  ;;  %v10297_v16 = vld [vmem:[#allocation2 + $0x78] sm:$0xff]  }
 0x26b   : > { %v5078_v33 = vld [vmem:[#allocation2 + $0x90] sm:$0x1]  ;;  %v12561_v42 = vld [vmem:[#allocation2 + $0x90] sm:$0xe]  ;;  %v5560_v14 = vsel %vm10529_vm5, %v5555_v2, %v5559_v25  ;;  %v5565_v18 = vrot.slane %v5564_v58, 4  ;;  %v9837_v54 = vcombine.low %v8049_v61, %v8052_v37  ;;  %v4368_v61 = vadd.f32 %v12318_v38, %v4191_v23  ;;  %9954 = vmatprep.subr.bf16.mxu1 %v10316_v29 }
 0x26c   : > { %v12567_v21 = vsel %vm10459_vm2, %v9695_v22, %v6012_v8  ;;  %v5079_v34 = vsel %vm11840_vm0, 0, %v5078_v33  ;;  %v9912_v36 = vpack.c.bf16 %v4429_v43, %v4429_v43  ;;  %v6014_v25 = vrot.slane %v6012_v8, 4  ;;  %v7379_v4 = vld [vmem:[#allocation2 + $0x70] sm:$0xf]  ;;  %v12591_v22 = vpop.f32.mrb[32].mxu1 }
 0x26d   : > { %5080 = vst [vmem:[#allocation2 + $0x90] sm:$0x1] %v5079_v34  ;;  %v5570_v55 = vsel %vm10529_vm5, %v5565_v18, %v5569_v63  ;;  %8180 = vst.msk [vmem:[#allocation3 + $0xb8] sm:$0xff] %vm514_vm6, %v9837_v54  ;;  %v7574_v56 = vshrl.u32 %v7378_v60, 16  ;;  %v7577_v62 = vshll.u32 %v7378_v60, 16  ;;  %v10318_v63 = vld [vmem:[%s13642_s4 + $0x30] sm:$0xff]   ;;  %v12601_v18 = vadd.f32 %v12390_v50, %v12382_v20 }
 0x26e   : > { %v9678_v1 = vcombine.low %v5560_v14, %v5570_v55  ;;  %7309 = vrot.lane.b32.xlu0 %v10296_v57, %s10380_s19  ;;  %v4772_v49 = vshrl.u32 %v9912_v36, 16  ;;  %v4775_v2 = vshll.u32 %v9912_v36, 16  ;;  %v6016_v58 = vsel %vm10459_vm2, %v6014_v25, %v6015_v12  ;;  %13665 = vst [vmem:[#allocation4_spill] sm:$0xff] %v12591_v22  ;;  %v5007_v38 = vld [vmem:[#allocation2 + $0x9c] sm:$0xf]  ;;  %v12594_v23 = vpop.f32.mrb[33].mxu1  ;;  %v12614_v55 = vpop.permute.xlu0 %7118  ;;  %9955 = vmatpush3.bf16.msra.mxu1 %v10318_v63 }
 0x26f   : > { %v9711_v8 = vcombine.low %v12567_v21, %v6016_v58  ;;  %v4430_v60 = vmax.f32 %v4368_v61, 0.0  ;;  %v7380_v45 = vld [vmem:[#allocation2 + $0x74] sm:$0x1]  ;;  %v7576_v43 = vrot.slane %v7574_v56, 4  ;;  %v7579_v37 = vrot.slane %v7577_v62, 5 }
 0x270   : > { %v6887_v57 = vld [vmem:[#allocation2 + $0x78] sm:$0xe]  ;;  %v5133_v28 = vld [vmem:[#allocation2 + $0x98] sm:$0x1]  ;;  %v12596_v12 = vld [vmem:[#allocation2 + $0x94] sm:$0xf]  ;;  %5803 = vrot.lane.b32.xlu1 %v9678_v1, %s10382_s25  ;;  %v12609_v54 = vsel %vm10459_vm2, %v9822_v11, %v8055_v59 }
 0x271   : > { %v4774_v26 = vrot.slane %v4772_v49, 7  ;;  %v7583_v33 = vshll.u32 %v7379_v4, 16  ;;  %v6888_v14 = vld [vmem:[#allocation2 + $0x7c] sm:$0xf]  ;;  %v5134_v21 = vsel %vm11872_vm3, 0, %v5133_v28  ;;  %v13649_v29 = vrot.slane %v12596_v12, 5 }
 0x272   : > { %v9913_v34 = vpack.c.bf16 %v4430_v60, %v4430_v60  ;;  %v7580_v36 = vor.u32 %v7579_v37, %v7576_v43  ;;  %v5334_v25 = vld [vmem:[#allocation2 + $0x6c] sm:$0xf]  ;;  %5135 = vst [vmem:[#allocation2 + $0x98] sm:$0x1] %v5134_v21  ;;  %v7587_v56 = vshrl.u32 %v7379_v4, 16  ;;  %v10319_v11 = vld [vmem:[%s13642_s4 + $0x78] sm:$0xff]   ;;  %v12623_v60 = vpop.permute.xlu1 %6113 }
 0x273   : > { %v4777_v20 = vor.u32 %v4775_v2, %v4774_v26  ;;  %v4778_v61 = vrot.slane %v4774_v26, 4  ;;  %v7585_v41 = vrot.slane %v7583_v33, 5  ;;  %v12621_v59 = vrot.slane %v13649_v29, 4  ;;  %v5335_v58 = vld [vmem:[#allocation2 + $0x70] sm:$0xf]  ;;  %9956 = vmatprep.subr.bf16.mxu1 %v10319_v11 }
 0x274   : > { %v4780_v62 = vshrl.u32 %v9913_v34, 16  ;;  %v4783_v1 = vshll.u32 %v9913_v34, 16  ;;  %v7581_v49 = vrot.slane %v7580_v36, 4  ;;  %v8212_v4 = vld [vmem:[#allocation3 + $0xb8] sm:$0xff]  ;;  %6125 = vrot.lane.b32.xlu1 %v9711_v8, %s10380_s19  ;;  %v7589_v63 = vrot.slane %v7587_v56, 4  ;;  %v12631_v34 = vpop.permute.xlu0 %7295 }
 0x275   : > { %v5008_v2 = vsel %vm11834_vm15, %v4777_v20, %v5007_v38  ;;  %v7593_v43 = vshll.u32 %v7380_v45, 16  ;;  %v9759_v37 = vrot.slane %v6887_v57, 9  ;;  %10147 = vmatmul.mubr.msk.bf16.gmra.mrb[84].mxu0 %vm514_vm6, %v8212_v4  ;;  %v7021_v33 = vrot.slane %v6888_v14, 5  ;;  %v5011_v36 = vld [vmem:[#allocation2 + $0xa4] sm:$0x1] }
 0x276   : > { %5009 = vst [vmem:[#allocation2 + $0x9c] sm:$0xf] %v5008_v2  ;;  %v4782_v28 = vrot.slane %v4780_v62, 7  ;;  %v7586_v26 = vsel %vm10529_vm5, %v7581_v49, %v7585_v41  ;;  %v7024_v21 = vrot.slane %v6889_v10, 5  ;;  %v7590_v38 = vor.u32 %v7589_v63, %v7585_v41  ;;  %v5336_v14 = vld [vmem:[#allocation2 + $0x74] sm:$0x1] }
 0x277   : > { %v7595_v20 = vrot.slane %v7593_v43, 5  ;;  %v5572_v8 = vshrl.u32 %v5334_v25, 16  ;;  %v5575_v56 = vshll.u32 %v5334_v25, 16  ;;  %v12635_v11 = vsel %vm10459_vm2, %v9759_v37, %v7021_v33  ;;  %v7927_v43 = vld [vmem:[#allocation2 + $0x80] sm:$0x1]  ;;  %v10320_v37 = vld [vmem:[#allocation2 + $0x18] sm:$0xff]  }
 0x278   : > { %v4785_v45 = vor.u32 %v4783_v1, %v4782_v28  ;;  %v4787_v57 = vrot.slane %v4782_v28, 4  ;;  %v7023_v62 = vrot.slane %v7021_v33, 4  ;;  %v7591_v2 = vrot.slane %v7590_v38, 4  ;;  %6302 = vrot.lane.b32.xlu1 %v10297_v16, %s10381_s22  ;;  %v12648_v16 = vpop.permute.xlu1 %6290  ;;  %v5881_v38 = vld [vmem:[#allocation2 + $0x78] sm:$0xe]  ;;  %v12658_v28 = vpop.permute.xlu0 %7837  ;;  %5293 = vst.msk [vmem:[#allocation3 + $0x30] sm:$0xff] %vm514_vm6, %v10320_v37 }
 0x279   : > { %v5574_v10 = vrot.slane %v5572_v8, 4  ;;  %v5577_v49 = vrot.slane %v5575_v56, 5  ;;  %v5581_v4 = vshll.u32 %v5335_v58, 16  ;;  %v12638_v29 = vld [vmem:[#allocation2 + $0x98] sm:$0x1]  ;;  %v5585_v63 = vshrl.u32 %v5335_v58, 16 }
 0x27a   : > { %v4786_v41 = vsel %vm11845_vm1, %v4778_v61, %v4785_v45  ;;  %v5012_v25 = vsel %vm11840_vm0, %v4787_v57, %v5011_v36  ;;  %v12646_v1 = vsel %vm10459_vm2, %v7023_v62, %v7024_v21  ;;  %v7596_v61 = vsel %vm10529_vm5, %v7591_v2, %v7595_v20  ;;  %v5882_v21 = vld [vmem:[#allocation2 + $0x7c] sm:$0xf]  ;;  %v4213_v8 = vpop.f32.mrb[65].mxu0  ;;  %v5883_v62 = vld [vmem:[#allocation2 + $0x80] sm:$0x1]  ;;  %5837 = vst.msk [vmem:[#allocation3 + $0x30] sm:$0xff] %vm1130_vm7, %v12583_v5 }
 0x27b   : > { %5010 = vst.msk [vmem:[#allocation2 + $0xa0] sm:$0xf] %vm4910_vm11, %v4786_v41  ;;  %5013 = vst [vmem:[#allocation2 + $0xa4] sm:$0x1] %v5012_v25  ;;  %v9775_v33 = vcombine.low %v12635_v11, %v12646_v1  ;;  %v5578_v36 = vor.u32 %v5577_v49, %v5574_v10  ;;  %v9805_v58 = vcombine.low %v7586_v26, %v7596_v61  ;;  %v5583_v56 = vrot.slane %v5581_v4, 5  ;;  %v10321_v20 = vld [vmem:[%s13642_s4 + $0x38] sm:$0xff]  }
 0x27c   : > { %v5587_v45 = vrot.slane %v5585_v63, 4  ;;  %v5591_v57 = vshll.u32 %v5336_v14, 16  ;;  %v8058_v49 = vrot.slane %v7927_v43, 5  ;;  %v12668_v26 = vadd.f32 %v12390_v50, %v12412_v32  ;;  %v6350_v4 = vld [vmem:[#allocation2 + $0x14] sm:$0x1]  ;;  %6157 = vst.msk [vmem:[#allocation3 + $0x30] sm:$0xff] %vm1494_vm8, %v12510_v46  ;;  %9957 = vmatpush3.bf16.msra.mxu1 %v10321_v20 }
 0x27d   : > { %v5081_v11 = vld [vmem:[#allocation2 + $0x9c] sm:$0x1]  ;;  %v12664_v2 = vld [vmem:[#allocation2 + $0x9c] sm:$0xe]  ;;  %v5579_v10 = vrot.slane %v5578_v36, 4  ;;  %v4373_v14 = vadd.f32 %v12417_v39, %v12601_v18  ;;  %7851 = vrot.lane.b32.xlu0 %v9805_v58, %s10381_s22  ;;  %v12680_v50 = vpop.f32.mrb[66].mxu0 }
 0x27e   : > { %13666 = vst [vmem:[#allocation5_spill] sm:$0xff] %v12664_v2  ;;  %v5082_v41 = vsel %vm11840_vm0, 0, %v5081_v11  ;;  %v5588_v1 = vor.u32 %v5587_v45, %v5583_v56  ;;  %v5593_v63 = vrot.slane %v5591_v57, 5  ;;  %v12682_v32 = vpop.f32.mrb[34].mxu1  ;;  %v8059_v5 = vsel %vm10459_vm2, %v12408_v53, %v8058_v49  ;;  %v6348_v37 = vld [vmem:[#allocation2 + $0xc] sm:$0xf] }
 0x27f   : > { %13667 = vst [vmem:[#allocation6_spill] sm:$0xff] %v12682_v32  ;;  %5083 = vst [vmem:[#allocation2 + $0x9c] sm:$0x1] %v5082_v41  ;;  %v5584_v39 = vsel %vm10529_vm5, %v5579_v10, %v5583_v56  ;;  %v9696_v18 = vrot.slane %v5881_v38, 9  ;;  %v6019_v43 = vrot.slane %v5882_v21, 5  ;;  %v12691_v46 = vpop.f32.mrb[35].mxu1  ;;  %v9838_v8 = vcombine.low %v12609_v54, %v8059_v5  ;;  %v5794_v56 = vpop.permute.xlu1 %5793 }
 0x280   : > { %6334 = vst.msk [vmem:[#allocation3 + $0x30] sm:$0xff] %vm1697_vm9, %v12538_v6  ;;  %v4216_v61 = vpop.f32.mrb[67].mxu0  ;;  %v5589_v36 = vrot.slane %v5588_v1, 4  ;;  %v6022_v58 = vrot.slane %v5883_v62, 5  ;;  %v4431_v45 = vmax.f32 %v4373_v14, 0.0  ;;  %v10299_v20 = vld [vmem:[#allocation2 + $0x84] sm:$0xff]  }
 0x281   : > { %v12694_v57 = vpop.f32.mrb[68].mxu0  ;;  %v6020_v53 = vsel %vm10459_vm2, %v9696_v18, %v6019_v43  ;;  %v6021_v38 = vrot.slane %v6019_v43, 4  ;;  %v6406_v21 = vshll.u32 %v12656_v47, 16  ;;  %v6410_v6 = vshrl.u32 %v12656_v47, 16  ;;  %v7381_v11 = vld [vmem:[#allocation2 + $0x78] sm:$0xf]  ;;  %7134 = vrot.lane.b32.xlu0 %v9775_v33, %s10382_s25  ;;  %v12706_v18 = vpop.permute.xlu0 %7120 }
 0x282   : > { %v4221_v10 = vpop.f32.mrb[69].mxu0  ;;  %v5136_v49 = vld [vmem:[#allocation2 + $0xa4] sm:$0x1]  ;;  %v12700_v41 = vld [vmem:[#allocation2 + $0xa0] sm:$0xf]  ;;  %v5594_v54 = vsel %vm10529_vm5, %v5589_v36, %v5593_v63  ;;  %8181 = vst.msk [vmem:[#allocation3 + $0xd0] sm:$0xff] %vm514_vm6, %v9838_v8  ;;  %v9914_v62 = vpack.c.bf16 %v4431_v45, %v4431_v45 }
 0x283   : > { %v6416_v14 = vshll.u32 %v6350_v4, 16  ;;  %v6397_v1 = vshrl.u32 %v6348_v37, 16  ;;  %v7382_v5 = vld [vmem:[#allocation2 + $0x7c] sm:$0xf]  ;;  %v5137_v47 = vsel %vm11872_vm3, 0, %v5136_v49  ;;  %v13651_v43 = vrot.slane %v12700_v41, 5 }
 0x284   : > { %v9679_v61 = vcombine.low %v5584_v39, %v5594_v54  ;;  %v6023_v33 = vsel %vm10459_vm2, %v6021_v38, %v6022_v58  ;;  %5138 = vst [vmem:[#allocation2 + $0xa4] sm:$0x1] %v5137_v47  ;;  %v4789_v63 = vshrl.u32 %v9914_v62, 16  ;;  %v4792_v36 = vshll.u32 %v9914_v62, 16  ;;  %v7383_v4 = vld [vmem:[#allocation2 + $0x80] sm:$0x1]  ;;  %v12724_v47 = vpop.permute.xlu1 %6115 }
 0x285   : > { %v9712_v10 = vcombine.low %v6020_v53, %v6023_v33  ;;  %v12713_v8 = vrot.slane %v6406_v21, 5  ;;  %v10324_v45 = vld [vmem:[#allocation2 + $0x24] sm:$0xff]   ;;  %v12717_v25 = vrot.slane %v13651_v43, 4  ;;  %v6412_v48 = vrot.slane %v6410_v6, 4  ;;  %7311 = vrot.lane.b32.xlu0 %v10299_v20, %s10380_s19 }
 0x286   : > { %5805 = vrot.lane.b32.xlu1 %v9679_v61, %s10382_s25  ;;  %v5014_v49 = vld [vmem:[#allocation2 + $0xa8] sm:$0xf]  ;;  %v6418_v39 = vrot.slane %v6416_v14, 5  ;;  %v6399_v54 = vrot.slane %v6397_v1, 4  ;;  %v12721_v58 = vrot.slane %v4789_v63, 7  ;;  %v6400_v53 = vshll.u32 %v6348_v37, 16  ;;  %v12730_v63 = vpop.permute.xlu0 %7297 }
 0x287   : > { %13668 = vst [vmem:[#allocation7_spill] sm:$0xff] %v12717_v25  ;;  %v7598_v38 = vshrl.u32 %v7381_v11, 16  ;;  %v7601_v21 = vshll.u32 %v7381_v11, 16  ;;  %v6890_v62 = vld [vmem:[#allocation2 + $0x84] sm:$0xe]  ;;  %5294 = vst.msk [vmem:[#allocation3 + $0x48] sm:$0xff] %vm514_vm6, %v10324_v45  ;;  %v6413_v33 = vor.u32 %v6412_v48, %v12713_v8 }
 0x288   : > { %v7607_v43 = vshll.u32 %v7382_v5, 16  ;;  %v7611_v61 = vshrl.u32 %v7382_v5, 16  ;;  %v7617_v32 = vshll.u32 %v7383_v4, 16  ;;  %v6891_v6 = vld [vmem:[#allocation2 + $0x88] sm:$0xf]  ;;  %5838 = vst.msk [vmem:[#allocation3 + $0x48] sm:$0xff] %vm1130_vm7, %v5794_v56  ;;  %v4794_v20 = vor.u32 %v4792_v36, %v12721_v58 }
 0x289   : > { %v6402_v37 = vrot.slane %v6400_v53, 5  ;;  %v7600_v1 = vrot.slane %v7598_v38, 4  ;;  %v6892_v11 = vld [vmem:[#allocation2 + $0x8c] sm:$0x1]  ;;  %6158 = vst.msk [vmem:[#allocation3 + $0x48] sm:$0xff] %vm1494_vm8, %v12623_v60  ;;  %v6414_v48 = vrot.slane %v6413_v33, 4  ;;  %v4376_v60 = vadd.f32 %v12446_v44, %v12668_v26 }
 0x28a   : > { %v8215_v45 = vld [vmem:[#allocation3 + $0xd0] sm:$0xff]  ;;  %6127 = vrot.lane.b32.xlu1 %v9712_v10, %s10380_s19  ;;  %v7603_v5 = vrot.slane %v7601_v21, 5  ;;  %v7609_v4 = vrot.slane %v7607_v43, 5  ;;  %v7613_v25 = vrot.slane %v7611_v61, 4  ;;  %6335 = vst.msk [vmem:[#allocation3 + $0x48] sm:$0xff] %vm1697_vm9, %v12648_v16  ;;  %v12737_v56 = vpop.f32.mrb[70].mxu0  ;;  %v5015_v36 = vsel %vm11834_vm15, %v4794_v20, %v5014_v49  ;;  %v12746_v49 = vpop.permute.xlu1 %6292 }
 0x28b   : > { %13669 = vst [vmem:[#allocation8_spill] sm:$0xff] %v12737_v56  ;;  %10150 = vmatprep.mubr.msk.bf16.mxu0 %vm514_vm6, %v8215_v45  ;;  %v6403_v53 = vor.u32 %v6402_v37, %v6399_v54  ;;  %v7619_v38 = vrot.slane %v7617_v32, 5  ;;  %v5337_v10 = vld [vmem:[#allocation2 + $0x78] sm:$0xf]  ;;  %5016 = vst [vmem:[#allocation2 + $0xa8] sm:$0xf] %v5015_v36  ;;  %v6419_v43 = vsel %vm10529_vm5, %v6414_v48, %v6418_v39  ;;  %v12755_v37 = vpop.permute.xlu0 %7839 }
 0x28c   : > { %v7604_v21 = vor.u32 %v7603_v5, %v7600_v1  ;;  %v7614_v33 = vor.u32 %v7613_v25, %v7609_v4  ;;  %v10304_v16 = vld [vmem:[#allocation2 + $0x84] sm:$0xff]   ;;  %v9760_v61 = vrot.slane %v6890_v62, 9  ;;  %v10327_v14 = vld [vmem:[#allocation2 + $0x30] sm:$0xff]   ;;  %v4432_v45 = vmax.f32 %v4376_v60, 0.0  ;;  %v5338_v20 = vld [vmem:[#allocation2 + $0x7c] sm:$0xf] }
 0x28d   : > { %v6404_v56 = vrot.slane %v6403_v53, 4  ;;  %v7028_v22 = vrot.slane %v6891_v6, 5  ;;  %v7031_v2 = vrot.slane %v6892_v11, 5  ;;  %v5596_v44 = vshrl.u32 %v5337_v10, 16  ;;  %5295 = vst.msk [vmem:[#allocation3 + $0x60] sm:$0xff] %vm514_vm6, %v10327_v14  ;;  %v10330_v36 = vld [vmem:[#allocation2 + $0x3c] sm:$0xff]  }
 0x28e   : > { %v7605_v32 = vrot.slane %v7604_v21, 4  ;;  %v7615_v54 = vrot.slane %v7614_v33, 4  ;;  %6304 = vrot.lane.b32.xlu1 %v10304_v16, %s10381_s22  ;;  %v5599_v26 = vshll.u32 %v5337_v10, 16  ;;  %v9915_v39 = vpack.c.bf16 %v4432_v45, %v4432_v45  ;;  %v5339_v14 = vld [vmem:[#allocation2 + $0x80] sm:$0x1]  ;;  %5296 = vst.msk [vmem:[#allocation3 + $0x78] sm:$0xff] %vm514_vm6, %v10330_v36 }
 0x28f   : > { %v6409_v25 = vsel %vm10529_vm5, %v6404_v56, %v12713_v8  ;;  %v7029_v62 = vsel %vm10459_vm2, %v9760_v61, %v7028_v22  ;;  %v7030_v6 = vrot.slane %v7028_v22, 4  ;;  %v5598_v5 = vrot.slane %v5596_v44, 4  ;;  %v6351_v22 = vld [vmem:[#allocation2 + $0x18] sm:$0xf]  ;;  %v5018_v10 = vld [vmem:[#allocation2 + $0xb0] sm:$0x1]  ;;  %v12793_v36 = vpop.permute.xlu0 %7122 }
 0x290   : > { %v9734_v1 = vcombine.low %v6409_v25, %v6419_v43  ;;  %v7610_v11 = vsel %vm10529_vm5, %v7605_v32, %v7609_v4  ;;  %v7620_v48 = vsel %vm10529_vm5, %v7615_v54, %v7619_v38  ;;  %v4797_v8 = vshrl.u32 %v9915_v39, 16  ;;  %v6352_v16 = vld [vmem:[#allocation2 + $0x1c] sm:$0xf]  ;;  %v12773_v32 = vld [vmem:[%s13641_s3] ss:$0 sm:$0xff] }
 0x291   : > { %v9806_v53 = vcombine.low %v7610_v11, %v7620_v48  ;;  %v4800_v56 = vshll.u32 %v9915_v39, 16  ;;  %v7032_v60 = vsel %vm10459_vm2, %v7030_v6, %v7031_v2  ;;  %v5601_v21 = vrot.slane %v5599_v26, 5 }
 0x292   : > { %6844 = vst.msk [vmem:[#allocation3 + $0x8] sm:$0xff] %vm514_vm6, %v9734_v1  ;;  %v9776_v43 = vcombine.low %v7029_v62, %v7032_v60  ;;  %v5605_v33 = vshll.u32 %v5338_v20, 16  ;;  %v5609_v4 = vshrl.u32 %v5338_v20, 16  ;;  %v5084_v38 = vld [vmem:[#allocation2 + $0xa8] sm:$0x1]  ;;  %v4799_v2 = vrot.slane %v4797_v8, 7 }
 0x293   : > { %v12765_v61 = vld [vmem:[#allocation2 + $0xa8] sm:$0xe]  ;;  %7164 = vst.msk [vmem:[#allocation3 + $0x8] sm:$0xff] %vm1130_vm7, %v12524_v51  ;;  %7853 = vrot.lane.b32.xlu0 %v9806_v53, %s10381_s22  ;;  %v5615_v45 = vshll.u32 %v5339_v14, 16  ;;  %v4204_v54 = vadd.f32 %v12773_v32, %v12497_v40  ;;  %v13670_v44 = vrot.slane %v12485_v52, 5  ;;  %v13671_v26 = vrot.slane %v12448_v35, 9  ;;  %v5796_v51 = vpop.permute.xlu1 %5795 }
 0x294   : > { %v5085_v39 = vsel %vm11840_vm0, 0, %v5084_v38  ;;  %v9826_v62 = vrot.slane %v12765_v61, 9  ;;  %7341 = vst.msk [vmem:[#allocation3 + $0x8] sm:$0xff] %vm1494_vm8, %v12569_v30  ;;  %v5602_v6 = vor.u32 %v5601_v21, %v5598_v5  ;;  %v5607_v20 = vrot.slane %v5605_v33, 5  ;;  %v6353_v40 = vld [vmem:[#allocation2 + $0x20] sm:$0x1] }
 0x295   : > { %v12783_v25 = vsel %vm10459_vm2, %v13671_v26, %v13670_v44  ;;  %5839 = vst.msk [vmem:[#allocation3 + $0x60] sm:$0xff] %vm1130_vm7, %v5796_v51  ;;  %v4224_v52 = vpop.f32.mrb[71].mxu0  ;;  %5086 = vst [vmem:[#allocation2 + $0xa8] sm:$0x1] %v5085_v39  ;;  %v4802_v35 = vor.u32 %v4800_v56, %v4799_v2  ;;  %v4804_v1 = vrot.slane %v4799_v2, 4  ;;  %v5611_v11 = vrot.slane %v5609_v4, 4 }
 0x296   : > { %v5617_v48 = vrot.slane %v5615_v45, 5  ;;  %v7930_v14 = vld [vmem:[#allocation2 + $0x8c] sm:$0x1]  ;;  %7885 = vst.msk [vmem:[#allocation3 + $0x8] sm:$0xff] %vm1697_vm9, %v12658_v28  ;;  %v5603_v5 = vrot.slane %v5602_v6, 4  ;;  %v6421_v53 = vshrl.u32 %v6351_v22, 16 }
 0x297   : > { %6159 = vst.msk [vmem:[#allocation3 + $0x60] sm:$0xff] %vm1494_vm8, %v12724_v47  ;;  %v10332_v30 = vld [vmem:[#allocation2 + $0x48] sm:$0xff]   ;;  %v6424_v8 = vshll.u32 %v6351_v22, 16  ;;  %v6430_v60 = vshll.u32 %v6352_v16, 16  ;;  %v5884_v21 = vld [vmem:[#allocation2 + $0x84] sm:$0xe]  ;;  %v5019_v28 = vsel %vm11840_vm0, %v4804_v1, %v5018_v10  ;;  %7136 = vrot.lane.b32.xlu0 %v9776_v43, %s10382_s25  ;;  %v5612_v47 = vor.u32 %v5611_v11, %v5607_v20 }
 0x298   : > { %6336 = vst.msk [vmem:[#allocation3 + $0x60] sm:$0xff] %vm1697_vm9, %v12746_v49  ;;  %v13672_v56 = vrot.slane %v12721_v58, 4  ;;  %v6434_v4 = vshrl.u32 %v6352_v16, 16  ;;  %v10308_v38 = vld [vmem:[#allocation2 + $0x90] sm:$0xff]   ;;  %v5885_v2 = vld [vmem:[#allocation2 + $0x88] sm:$0xf]  ;;  %v5608_v58 = vsel %vm10529_vm5, %v5603_v5, %v5607_v20  ;;  %v4381_v16 = vadd.f32 %v12404_v0, %v4204_v54 }
 0x299   : > { %5297 = vst.msk [vmem:[#allocation3 + $0x90] sm:$0xff] %vm514_vm6, %v10332_v30  ;;  %v10334_v22 = vld [vmem:[#allocation2 + $0x54] sm:$0xff]   ;;  %5020 = vst [vmem:[#allocation2 + $0xb0] sm:$0x1] %v5019_v28  ;;  %v6423_v49 = vrot.slane %v6421_v53, 4  ;;  %v6426_v45 = vrot.slane %v6424_v8, 5  ;;  %v12816_v53 = vpop.permute.xlu0 %7299 }
 0x29a   : > { %v4803_v33 = vsel %vm11845_vm1, %v13672_v56, %v4802_v35  ;;  %v6432_v44 = vrot.slane %v6430_v60, 5  ;;  %v10335_v26 = vld [vmem:[#allocation2 + $0x60] sm:$0xff]   ;;  %v5613_v10 = vrot.slane %v5612_v47, 4  ;;  %v6436_v51 = vrot.slane %v6434_v4, 4  ;;  %v5886_v39 = vld [vmem:[#allocation2 + $0x8c] sm:$0x1] }
 0x29b   : > { %5017 = vst.msk [vmem:[#allocation2 + $0xac] sm:$0xf] %vm4910_vm11, %v4803_v33  ;;  %v6440_v43 = vshll.u32 %v6353_v40, 16  ;;  %v6427_v6 = vor.u32 %v6426_v45, %v6423_v49  ;;  %v8065_v52 = vrot.slane %v7930_v14, 5  ;;  %v9697_v35 = vrot.slane %v5884_v21, 9  ;;  %7313 = vrot.lane.b32.xlu0 %v10308_v38, %s10380_s19  ;;  %v8189_v28 = vld [vmem:[#allocation3] sm:$0xff] }
 0x29c   : > { %5298 = vst.msk [vmem:[#allocation3 + $0xa8] sm:$0xff] %vm514_vm6, %v10334_v22  ;;  %v6026_v1 = vrot.slane %v5885_v2, 5  ;;  %v7384_v11 = vld [vmem:[#allocation2 + $0x84] sm:$0xf]  ;;  %5299 = vst.msk [vmem:[#allocation3 + $0xc0] sm:$0xff] %vm514_vm6, %v10335_v26  ;;  %v5618_v20 = vsel %vm10529_vm5, %v5613_v10, %v5617_v48  ;;  %v6437_v30 = vor.u32 %v6436_v51, %v6432_v44  ;;  %v4433_v40 = vmax.f32 %v4381_v16, 0.0  ;;  %v12829_v22 = vpop.permute.xlu1 %6117 }
 0x29d   : > { %v6442_v5 = vrot.slane %v6440_v43, 5  ;;  %v9680_v0 = vcombine.low %v5608_v58, %v5618_v20  ;;  %v6428_v54 = vrot.slane %v6427_v6, 4  ;;  %v8066_v14 = vsel %vm10459_vm2, %v12501_v19, %v8065_v52  ;;  %v8190_v60 = vld [vmem:[#allocation3 + $0x8] sm:$0xff]  ;;  %v7385_v38 = vld [vmem:[#allocation2 + $0x88] sm:$0xf] }
 0x29e   : > { %v6027_v8 = vsel %vm10459_vm2, %v9697_v35, %v6026_v1  ;;  %v6438_v21 = vrot.slane %v6437_v30, 4  ;;  %v9916_v56 = vpack.c.bf16 %v4433_v40, %v4433_v40  ;;  %v9839_v48 = vcombine.low %v12783_v25, %v8066_v14  ;;  %8468 = vmatprep.mubr.bf16.mxu1 %v8190_v60  ;;  %v5021_v43 = vld [vmem:[#allocation2 + $0xb4] sm:$0xf]  ;;  %v5340_v20 = vld [vmem:[#allocation2 + $0x84] sm:$0xf]  ;;  %v12848_v30 = vpop.permute.xlu0 %7841 }
 0x29f   : > { %v6028_v33 = vrot.slane %v6026_v1, 4  ;;  %5807 = vrot.lane.b32.xlu1 %v9680_v0, %s10382_s25  ;;  %v6433_v47 = vsel %vm10529_vm5, %v6428_v54, %v6432_v44  ;;  %v6029_v4 = vrot.slane %v5886_v39, 5  ;;  %v4207_v19 = vadd.f32 %v12773_v32, %v12515_v9  ;;  %8469 = vmatmul.mubr.bf16.vlgmr.msra.gmra.mrb[36].mxu1 %v8189_v28  ;;  %v7386_v39 = vld [vmem:[#allocation2 + $0x8c] sm:$0x1]  ;;  %v6894_v14 = vld [vmem:[#allocation2 + $0x94] sm:$0xf] }
 0x2a0   : > { %v7622_v2 = vshrl.u32 %v7384_v11, 16  ;;  %v5139_v58 = vld [vmem:[#allocation2 + $0xb0] sm:$0x1]  ;;  %v6443_v25 = vsel %vm10529_vm5, %v6438_v21, %v6442_v5  ;;  %v4806_v45 = vshrl.u32 %v9916_v56, 16  ;;  %v4809_v26 = vshll.u32 %v9916_v56, 16  ;;  %8182 = vst.msk [vmem:[#allocation3 + $0xe8] sm:$0xff] %vm514_vm6, %v9839_v48 }
 0x2a1   : > { %v12838_v44 = vadd.f32 %v12773_v32, %v12577_v15  ;;  %v5140_v9 = vsel %vm11872_vm3, 0, %v5139_v58  ;;  %v9735_v51 = vcombine.low %v6433_v47, %v6443_v25  ;;  %v6030_v16 = vsel %vm10459_vm2, %v6028_v33, %v6029_v4  ;;  %v6893_v15 = vld [vmem:[#allocation2 + $0x90] sm:$0xe]  ;;  %v6895_v56 = vld [vmem:[#allocation2 + $0x98] sm:$0x1]  ;;  %v12864_v4 = vpop.permute.xlu1 %6294 }
 0x2a2   : > { %v12831_v49 = vld [vmem:[#allocation2 + $0xac] sm:$0xf]  ;;  %5141 = vst [vmem:[#allocation2 + $0xb0] sm:$0x1] %v5140_v9  ;;  %v12845_v6 = vrot.slane %v4806_v45, 7  ;;  %v9713_v52 = vcombine.low %v6027_v8, %v6030_v16  ;;  %v4384_v35 = vadd.f32 %v12432_v17, %v4207_v19  ;;  %v7624_v1 = vrot.slane %v7622_v2, 4 }
 0x2a3   : > { %v8083_v10 = vrot.slane %v12831_v49, 5  ;;  %6845 = vst.msk [vmem:[#allocation3 + $0x20] sm:$0xff] %vm514_vm6, %v9735_v51  ;;  %v7625_v40 = vshll.u32 %v7384_v11, 16  ;;  %v7631_v0 = vshll.u32 %v7385_v38, 16  ;;  %v7635_v54 = vshrl.u32 %v7385_v38, 16  ;;  %v10313_v2 = vld [vmem:[#allocation2 + $0x90] sm:$0xff]  }
 0x2a4   : > { %7165 = vst.msk [vmem:[#allocation3 + $0x20] sm:$0xff] %vm1130_vm7, %v12614_v55  ;;  %v4811_v17 = vor.u32 %v4809_v26, %v12845_v6  ;;  %v4812_v8 = vrot.slane %v12845_v6, 4  ;;  %6129 = vrot.lane.b32.xlu1 %v9713_v52, %s10380_s19  ;;  %v4434_v60 = vmax.f32 %v4384_v35, 0.0  ;;  %v7641_v21 = vshll.u32 %v7386_v39, 16  ;;  %v12862_v47 = vld [vmem:[#allocation2 + $0x88] sm:$0xf]  ;;  %v12876_v35 = vpop.permute.xlu0 %7124 }
 0x2a5   : > { %v12852_v5 = vrot.slane %v8083_v10, 4  ;;  %v7627_v48 = vrot.slane %v7625_v40, 5  ;;  %v7633_v33 = vrot.slane %v7631_v0, 5  ;;  %v7637_v28 = vrot.slane %v7635_v54, 4  ;;  %7342 = vst.msk [vmem:[#allocation3 + $0x20] sm:$0xff] %vm1494_vm8, %v12631_v34  ;;  %v10336_v51 = vld [vmem:[#allocation2 + $0x6c] sm:$0xff]  }
 0x2a6   : > { %v9761_v11 = vrot.slane %v6893_v15, 9  ;;  %v5022_v55 = vsel %vm11834_vm15, %v4811_v17, %v5021_v43  ;;  %v9917_v19 = vpack.c.bf16 %v4434_v60, %v4434_v60  ;;  %v7643_v38 = vrot.slane %v7641_v21, 5  ;;  %7886 = vst.msk [vmem:[#allocation3 + $0x20] sm:$0xff] %vm1697_vm9, %v12755_v37  ;;  %v10337_v37 = vld [vmem:[#allocation2 + $0x78] sm:$0xff]   ;;  %v5342_v21 = vld [vmem:[#allocation2 + $0x8c] sm:$0x1] }
 0x2a7   : > { %v7035_v58 = vrot.slane %v6894_v14, 5  ;;  %5023 = vst [vmem:[#allocation2 + $0xb4] sm:$0xf] %v5022_v55  ;;  %v8218_v25 = vld [vmem:[#allocation3 + $0xe8] sm:$0xff]  ;;  %v7628_v45 = vor.u32 %v7627_v48, %v7624_v1  ;;  %v7638_v26 = vor.u32 %v7637_v28, %v7633_v33  ;;  %v7038_v34 = vrot.slane %v6895_v56, 5  ;;  %5300 = vst.msk [vmem:[#allocation3 + $0xd8] sm:$0xff] %vm514_vm6, %v10336_v51 }
 0x2a8   : > { %v5620_v9 = vshrl.u32 %v5340_v20, 16  ;;  %10151 = vmatmul.mubr.msk.bf16.gmra.mrb[88].mxu0 %vm514_vm6, %v8218_v25  ;;  %v4814_v16 = vshrl.u32 %v9917_v19, 16  ;;  %v4817_v39 = vshll.u32 %v9917_v19, 16  ;;  %6306 = vrot.lane.b32.xlu1 %v10313_v2, %s10381_s22  ;;  %v5623_v54 = vshll.u32 %v5340_v20, 16  ;;  %5301 = vst.msk [vmem:[#allocation3 + $0xf0] sm:$0xff] %vm514_vm6, %v10337_v37  ;;  %v5798_v2 = vpop.permute.xlu1 %5797 }
 0x2a9   : > { %v12874_v43 = vsel %vm10459_vm2, %v9761_v11, %v7035_v58  ;;  %v7037_v52 = vrot.slane %v7035_v58, 4  ;;  %v12878_v15 = vld [vmem:[#allocation2 + $0xb0] sm:$0x1]  ;;  %v7629_v1 = vrot.slane %v7628_v45, 4  ;;  %v7639_v40 = vrot.slane %v7638_v26, 4  ;;  %5840 = vst.msk [vmem:[#allocation3 + $0x78] sm:$0xff] %vm1130_vm7, %v5798_v2 }
 0x2aa   : > { %v5622_v0 = vrot.slane %v5620_v9, 4  ;;  %v8086_v14 = vrot.slane %v12878_v15, 5  ;;  %v4816_v17 = vrot.slane %v4814_v16, 7  ;;  %v5629_v56 = vshll.u32 %v12862_v47, 16  ;;  %v5025_v48 = vld [vmem:[#allocation2 + $0xbc] sm:$0x1] }
 0x2ab   : > { %v7039_v60 = vsel %vm10459_vm2, %v7037_v52, %v7038_v34  ;;  %v7634_v28 = vsel %vm10529_vm5, %v7629_v1, %v7633_v33  ;;  %v7644_v20 = vsel %vm10529_vm5, %v7639_v40, %v7643_v38  ;;  %v5625_v55 = vrot.slane %v5623_v54, 5  ;;  %v6354_v19 = vld [vmem:[#allocation2 + $0x24] sm:$0xf]  ;;  %v6355_v34 = vld [vmem:[#allocation2 + $0x28] sm:$0xf]  ;;  %6160 = vst.msk [vmem:[#allocation3 + $0x78] sm:$0xff] %vm1494_vm8, %v12829_v22 }
 0x2ac   : > { %v9777_v11 = vcombine.low %v12874_v43, %v7039_v60  ;;  %v4819_v58 = vor.u32 %v4817_v39, %v4816_v17  ;;  %v4821_v25 = vrot.slane %v4816_v17, 4  ;;  %v9807_v45 = vcombine.low %v7634_v28, %v7644_v20  ;;  %v6356_v52 = vld [vmem:[#allocation2 + $0x2c] sm:$0x1]  ;;  %v5887_v39 = vld [vmem:[#allocation2 + $0x90] sm:$0xe]  ;;  %v12917_v17 = vpop.permute.xlu0 %7301  ;;  %6337 = vst.msk [vmem:[#allocation3 + $0x78] sm:$0xff] %vm1697_vm9, %v12864_v4 }
 0x2ad   : > { %v12891_v26 = vrot.slane %v5629_v56, 5  ;;  %v5626_v9 = vor.u32 %v5625_v55, %v5622_v0  ;;  %v5633_v51 = vshrl.u32 %v12862_v47, 16  ;;  %v5639_v33 = vshll.u32 %v5342_v21, 16  ;;  %v8193_v37 = vld [vmem:[#allocation3 + $0x20] sm:$0xff]  ;;  %v8192_v54 = vld [vmem:[#allocation3 + $0x18] sm:$0xff]  ;;  %v10338_v4 = vld [vmem:[#allocation2 + $0x84] sm:$0xff]  }
 0x2ae   : > { %v13673_v16 = vrot.slane %v12596_v12, 5  ;;  %v13674_v38 = vrot.slane %v12561_v42, 9  ;;  %v5087_v1 = vld [vmem:[#allocation2 + $0xb4] sm:$0x1]  ;;  %v12903_v40 = vld [vmem:[#allocation2 + $0xb4] sm:$0xe]  ;;  %v4820_v47 = vsel %vm11845_vm1, %v4812_v8, %v4819_v58  ;;  %v5026_v42 = vsel %vm11840_vm0, %v4821_v25, %v5025_v48  ;;  %7855 = vrot.lane.b32.xlu0 %v9807_v45, %s10381_s22  ;;  %8476 = vmatprep.mubr.bf16.mxu1 %v8193_v37 }
 0x2af   : > { %v13675_v12 = vrot.slane %v12638_v29, 5  ;;  %v6445_v22 = vshrl.u32 %v6354_v19, 16  ;;  %v5088_v6 = vsel %vm11840_vm0, 0, %v5087_v1  ;;  %v9827_v8 = vrot.slane %v12903_v40, 9  ;;  %5024 = vst.msk [vmem:[#allocation2 + $0xb8] sm:$0xf] %vm4910_vm11, %v4820_v47  ;;  %8477 = vmatmul.mubr.bf16.gmra.mrb[40].mxu1 %v8192_v54 }
 0x2b0   : > { %v8070_v43 = vsel %vm10459_vm2, %v13674_v38, %v13673_v16  ;;  %5027 = vst [vmem:[#allocation2 + $0xbc] sm:$0x1] %v5026_v42  ;;  %v5627_v29 = vrot.slane %v5626_v9, 4  ;;  %v5635_v60 = vrot.slane %v5633_v51, 4  ;;  %v5888_v21 = vld [vmem:[#allocation2 + $0x94] sm:$0xf] }
 0x2b1   : > { %v8073_v0 = vsel %vm10459_vm2, %v12621_v59, %v13675_v12  ;;  %5089 = vst [vmem:[#allocation2 + $0xb4] sm:$0x1] %v5088_v6  ;;  %v5641_v59 = vrot.slane %v5639_v33, 5  ;;  %v6447_v48 = vrot.slane %v6445_v22, 4  ;;  %v6448_v28 = vshll.u32 %v6354_v19, 16  ;;  %v10317_v9 = vld [vmem:[#allocation2 + $0x9c] sm:$0xff]   ;;  %v12934_v12 = vpop.permute.xlu0 %7843 }
 0x2b2   : > { %v9840_v56 = vcombine.low %v8070_v43, %v8073_v0  ;;  %v5889_v20 = vld [vmem:[#allocation2 + $0x98] sm:$0x1]  ;;  %v7387_v55 = vld [vmem:[#allocation2 + $0x90] sm:$0xf]  ;;  %v5632_v2 = vsel %vm10529_vm5, %v5627_v29, %v12891_v26  ;;  %v5636_v58 = vor.u32 %v5635_v60, %v12891_v26  ;;  %v6454_v25 = vshll.u32 %v6355_v34, 16  ;;  %7138 = vrot.lane.b32.xlu0 %v9777_v11, %s10382_s25  ;;  %5302 = vst.msk [vmem:[#allocation3 + $0x108] sm:$0xff] %vm514_vm6, %v10338_v4  ;;  %v12936_v0 = vpop.permute.xlu1 %6119 }
 0x2b3   : > { %v6458_v45 = vshrl.u32 %v6355_v34, 16  ;;  %v6450_v51 = vrot.slane %v6448_v28, 5  ;;  %v6464_v33 = vshll.u32 %v6356_v52, 16  ;;  %v9698_v16 = vrot.slane %v5887_v39, 9  ;;  %v7388_v11 = vld [vmem:[#allocation2 + $0x94] sm:$0xf] }
 0x2b4   : > { %8183 = vst.msk [vmem:[#allocation3 + $0x100] sm:$0xff] %vm514_vm6, %v9840_v56  ;;  %v6033_v19 = vrot.slane %v5888_v21, 5  ;;  %v5637_v38 = vrot.slane %v5636_v58, 4  ;;  %v6456_v43 = vrot.slane %v6454_v25, 5  ;;  %v6036_v1 = vrot.slane %v5889_v20, 5 }
 0x2b5   : > { %v6460_v37 = vrot.slane %v6458_v45, 4  ;;  %v6451_v47 = vor.u32 %v6450_v51, %v6447_v48  ;;  %v6466_v42 = vrot.slane %v6464_v33, 5  ;;  %v4389_v22 = vadd.f32 %v12594_v23, %v12838_v44  ;;  %v7389_v54 = vld [vmem:[#allocation2 + $0x98] sm:$0x1]  ;;  %v6896_v20 = vld [vmem:[#allocation2 + $0x9c] sm:$0xe] }
 0x2b6   : > { %v6034_v26 = vsel %vm10459_vm2, %v9698_v16, %v6033_v19  ;;  %v6035_v34 = vrot.slane %v6033_v19, 4  ;;  %v5642_v52 = vsel %vm10529_vm5, %v5637_v38, %v5641_v59  ;;  %v7646_v6 = vshrl.u32 %v7387_v55, 16  ;;  %v12942_v60 = vld [vmem:[#allocation2 + $0xb8] sm:$0xf]  ;;  %7315 = vrot.lane.b32.xlu0 %v10317_v9, %s10380_s19  ;;  %v6897_v9 = vld [vmem:[#allocation2 + $0xa0] sm:$0xf] }
 0x2b7   : > { %v6461_v39 = vor.u32 %v6460_v37, %v6456_v43  ;;  %v5142_v29 = vld [vmem:[#allocation2 + $0xbc] sm:$0x1]  ;;  %v9681_v21 = vcombine.low %v5632_v2, %v5642_v52  ;;  %v6452_v56 = vrot.slane %v6451_v47, 4  ;;  %v7649_v28 = vshll.u32 %v7387_v55, 16  ;;  %v6898_v47 = vld [vmem:[#allocation2 + $0xa4] sm:$0x1] }
 0x2b8   : > { %v6037_v48 = vsel %vm10459_vm2, %v6035_v34, %v6036_v1  ;;  %v5143_v59 = vsel %vm11872_vm3, 0, %v5142_v29  ;;  %v8090_v4 = vrot.slane %v12942_v60, 5  ;;  %v4435_v58 = vmax.f32 %v4389_v22, 0.0  ;;  %v6297_v34 = vpop.permute.xlu1 %6296  ;;  %v5343_v29 = vld [vmem:[#allocation2 + $0x90] sm:$0xf] }
 0x2b9   : > { %v6462_v23 = vrot.slane %v6461_v39, 4  ;;  %v9714_v44 = vcombine.low %v6034_v26, %v6037_v48  ;;  %5144 = vst [vmem:[#allocation2 + $0xbc] sm:$0x1] %v5143_v59  ;;  %5809 = vrot.lane.b32.xlu1 %v9681_v21, %s10382_s25  ;;  %v6457_v2 = vsel %vm10529_vm5, %v6452_v56, %v6456_v43  ;;  %v7648_v25 = vrot.slane %v7646_v6, 4  ;;  %v12960_v26 = vpop.permute.xlu0 %7126  ;;  %v6901_v49 = vld [vmem:[#allocation2 + $0xb0] sm:$0x1] }
 0x2ba   : > { %v7651_v45 = vrot.slane %v7649_v28, 5  ;;  %v12955_v55 = vrot.slane %v8090_v4, 4  ;;  %v7655_v16 = vshll.u32 %v7388_v11, 16  ;;  %v7659_v19 = vshrl.u32 %v7388_v11, 16  ;;  %v7395_v27 = vld [vmem:[#allocation2 + $0xb0] sm:$0x1] }
 0x2bb   : > { %v8221_v51 = vld [vmem:[#allocation3 + $0x100] sm:$0xff]  ;;  %v6467_v33 = vsel %vm10529_vm5, %v6462_v23, %v6466_v42  ;;  %v9918_v37 = vpack.c.bf16 %v4435_v58, %v4435_v58  ;;  %v7665_v43 = vshll.u32 %v7389_v54, 16  ;;  %v4215_v22 = vadd.f32 %v12773_v32, %v12680_v50  ;;  %v10339_v42 = vld [vmem:[#allocation2 + $0x90] sm:$0xff]  }
 0x2bc   : > { %10154 = vmatprep.mubr.msk.bf16.mxu0 %vm514_vm6, %v8221_v51  ;;  %v9736_v38 = vcombine.low %v6457_v2, %v6467_v33  ;;  %v7652_v1 = vor.u32 %v7651_v45, %v7648_v25  ;;  %v7657_v52 = vrot.slane %v7655_v16, 5  ;;  %v7661_v39 = vrot.slane %v7659_v19, 4  ;;  %5303 = vst.msk [vmem:[#allocation3 + $0x120] sm:$0xff] %vm514_vm6, %v10339_v42  ;;  %v5344_v2 = vld [vmem:[#allocation2 + $0x94] sm:$0xf] }
 0x2bd   : > { %v9762_v6 = vrot.slane %v6896_v20, 9  ;;  %6131 = vrot.lane.b32.xlu1 %v9714_v44, %s10380_s19  ;;  %v4823_v11 = vshrl.u32 %v9918_v37, 16  ;;  %v4826_v21 = vshll.u32 %v9918_v37, 16  ;;  %v7667_v54 = vrot.slane %v7665_v43, 5  ;;  %v10322_v44 = vld [vmem:[#allocation2 + $0x9c] sm:$0xff]   ;;  %v5800_v37 = vpop.permute.xlu1 %5799 }
 0x2be   : > { %6846 = vst.msk [vmem:[#allocation3 + $0x38] sm:$0xff] %vm514_vm6, %v9736_v38  ;;  %v7653_v56 = vrot.slane %v7652_v1, 4  ;;  %v7662_v48 = vor.u32 %v7661_v39, %v7657_v52  ;;  %v4392_v28 = vadd.f32 %v12691_v46, %v4215_v22  ;;  %v7042_v59 = vrot.slane %v6897_v9, 5  ;;  %v12983_v38 = vpop.permute.xlu0 %7303  ;;  %v7936_v42 = vld [vmem:[#allocation2 + $0xa4] sm:$0x1] }
 0x2bf   : > { %7166 = vst.msk [vmem:[#allocation3 + $0x38] sm:$0xff] %vm1130_vm7, %v12706_v18  ;;  %v7045_v23 = vrot.slane %v6898_v47, 5  ;;  %v12970_v50 = vrot.slane %v4823_v11, 7  ;;  %v5644_v58 = vshrl.u32 %v5343_v29, 16  ;;  %v5647_v25 = vshll.u32 %v5343_v29, 16  ;;  %5841 = vst.msk [vmem:[#allocation3 + $0x90] sm:$0xff] %vm1130_vm7, %v5800_v37 }
 0x2c0   : > { %v7658_v20 = vsel %vm10529_vm5, %v7653_v56, %v7657_v52  ;;  %7343 = vst.msk [vmem:[#allocation3 + $0x38] sm:$0xff] %vm1494_vm8, %v12730_v63  ;;  %v5028_v18 = vld [vmem:[#allocation2 + $0xc0] sm:$0xf]  ;;  %v7663_v45 = vrot.slane %v7662_v48, 4  ;;  %v4436_v51 = vmax.f32 %v4392_v28, 0.0  ;;  %v7043_v46 = vsel %vm10459_vm2, %v9762_v6, %v7042_v59  ;;  %6161 = vst.msk [vmem:[#allocation3 + $0x90] sm:$0xff] %vm1494_vm8, %v12936_v0 }
 0x2c1   : > { %v7044_v9 = vrot.slane %v7042_v59, 4  ;;  %7887 = vst.msk [vmem:[#allocation3 + $0x38] sm:$0xff] %vm1697_vm9, %v12848_v30  ;;  %v4828_v33 = vor.u32 %v4826_v21, %v12970_v50  ;;  %v4829_v16 = vrot.slane %v12970_v50, 4  ;;  %6308 = vrot.lane.b32.xlu1 %v10322_v44, %s10381_s22  ;;  %v5646_v63 = vrot.slane %v5644_v58, 4  ;;  %v5345_v52 = vld [vmem:[#allocation2 + $0x98] sm:$0x1] }
 0x2c2   : > { %v5649_v19 = vrot.slane %v5647_v25, 5  ;;  %v7668_v1 = vsel %vm10529_vm5, %v7663_v45, %v7667_v54  ;;  %v9919_v43 = vpack.c.bf16 %v4436_v51, %v4436_v51  ;;  %v5653_v30 = vshll.u32 %v5344_v2, 16  ;;  %v6357_v11 = vld [vmem:[#allocation2 + $0x30] sm:$0xf]  ;;  %6338 = vst.msk [vmem:[#allocation3 + $0x90] sm:$0xff] %vm1697_vm9, %v6297_v34  ;;  %v13004_v25 = vpop.permute.xlu1 %6121  ;;  %v13009_v37 = vpop.permute.xlu0 %7845 }
 0x2c3   : > { %v7046_v47 = vsel %vm10459_vm2, %v7044_v9, %v7045_v23  ;;  %v5029_v39 = vsel %vm11834_vm15, %v4828_v33, %v5028_v18  ;;  %v9808_v22 = vcombine.low %v7658_v20, %v7668_v1  ;;  %v5657_v48 = vshrl.u32 %v5344_v2, 16  ;;  %v5032_v28 = vld [vmem:[#allocation2 + $0xc8] sm:$0x1]  ;;  %v13677_v44 = vld [vmem:[#allocation5_spill] sm:$0xff]  ;;  %v5897_v40 = vld [vmem:[#allocation2 + $0xb8] sm:$0xf] }
 0x2c4   : > { %v9778_v6 = vcombine.low %v7043_v46, %v7046_v47  ;;  %v5650_v29 = vor.u32 %v5649_v19, %v5646_v63  ;;  %5030 = vst [vmem:[#allocation2 + $0xc0] sm:$0xf] %v5029_v39  ;;  %v4831_v21 = vshrl.u32 %v9919_v43, 16  ;;  %v4834_v56 = vshll.u32 %v9919_v43, 16  ;;  %v6358_v45 = vld [vmem:[#allocation2 + $0x34] sm:$0xf] }
 0x2c5   : > { %v5655_v54 = vrot.slane %v5653_v30, 5  ;;  %7857 = vrot.lane.b32.xlu0 %v9808_v22, %s10381_s22  ;;  %v5663_v23 = vshll.u32 %v5345_v52, 16  ;;  %v4220_v50 = vadd.f32 %v12773_v32, %v12694_v57  ;;  %v13676_v20 = vrot.slane %v12700_v41, 5  ;;  %v13679_v33 = vld [vmem:[#allocation4_spill] sm:$0xff]  ;;  %v6359_v63 = vld [vmem:[#allocation2 + $0x38] sm:$0x1] }
 0x2c6   : > { %v5651_v59 = vrot.slane %v5650_v29, 4  ;;  %v13678_v58 = vrot.slane %v13677_v44, 9  ;;  %v4833_v2 = vrot.slane %v4831_v21, 7  ;;  %v5659_v18 = vrot.slane %v5657_v48, 4  ;;  %v13680_v52 = vld [vmem:[#allocation7_spill] sm:$0xff]  ;;  %v8195_v39 = vld [vmem:[#allocation3 + $0x30] sm:$0xff] }
 0x2c7   : > { %v8079_v34 = vrot.slane %v7936_v42, 5  ;;  %v6469_v51 = vshrl.u32 %v6357_v11, 16  ;;  %v5665_v9 = vrot.slane %v5663_v23, 5  ;;  %v4397_v57 = vadd.f32 %v13679_v33, %v4220_v50  ;;  %v10323_v22 = vld [vmem:[#allocation2 + $0xa8] sm:$0xff]   ;;  %v13019_v44 = vld [vmem:[#allocation2 + $0x9c] sm:$0xf] }
 0x2c8   : > { %v8077_v0 = vsel %vm10459_vm2, %v13678_v58, %v13676_v20  ;;  %v5656_v46 = vsel %vm10529_vm5, %v5651_v59, %v5655_v54  ;;  %v6472_v41 = vshll.u32 %v6357_v11, 16  ;;  %v8196_v19 = vld [vmem:[#allocation3 + $0x38] sm:$0xff]  ;;  %v4836_v1 = vor.u32 %v4834_v56, %v4833_v2  ;;  %v5890_v11 = vld [vmem:[#allocation2 + $0x9c] sm:$0xe]  ;;  %v5891_v59 = vld [vmem:[#allocation2 + $0xa0] sm:$0xf] }
 0x2c9   : > { %v4838_v43 = vrot.slane %v4833_v2, 4  ;;  %v5660_v47 = vor.u32 %v5659_v18, %v5655_v54  ;;  %v8080_v30 = vsel %vm10459_vm2, %v13680_v52, %v8079_v34  ;;  %8484 = vmatprep.mubr.bf16.mxu1 %v8196_v19  ;;  %7140 = vrot.lane.b32.xlu0 %v9778_v6, %s10382_s25  ;;  %v4437_v29 = vmax.f32 %v4397_v57, 0.0  ;;  %v5892_v20 = vld [vmem:[#allocation2 + $0xa4] sm:$0x1]  ;;  %v6299_v34 = vpop.permute.xlu1 %6298 }
 0x2ca   : > { %v9841_v42 = vcombine.low %v8077_v0, %v8080_v30  ;;  %v6471_v21 = vrot.slane %v6469_v51, 4  ;;  %v6474_v48 = vrot.slane %v6472_v41, 5  ;;  %8485 = vmatmul.mubr.bf16.gmra.mrb[44].mxu1 %v8195_v39  ;;  %v4837_v56 = vsel %vm11845_vm1, %v4829_v16, %v4836_v1  ;;  %v13030_v41 = vld [vmem:[#allocation2 + $0xa0] sm:$0xf] }
 0x2cb   : > { %v5033_v54 = vsel %vm11840_vm0, %v4838_v43, %v5032_v28  ;;  %v5661_v23 = vrot.slane %v5660_v47, 4  ;;  %v6478_v50 = vshll.u32 %v6358_v45, 16  ;;  %v5090_v6 = vld [vmem:[#allocation2 + $0xc0] sm:$0x1]  ;;  %v13021_v58 = vld [vmem:[#allocation2 + $0xc0] sm:$0xe]  ;;  %v9920_v0 = vpack.c.bf16 %v4437_v29, %v4437_v29 }
 0x2cc   : > { %5031 = vst.msk [vmem:[#allocation2 + $0xc4] sm:$0xf] %vm4910_vm11, %v4837_v56  ;;  %5034 = vst [vmem:[#allocation2 + $0xc8] sm:$0x1] %v5033_v54  ;;  %v6475_v2 = vor.u32 %v6474_v48, %v6471_v21  ;;  %v6482_v18 = vshrl.u32 %v6358_v45, 16  ;;  %v6488_v16 = vshll.u32 %v6359_v63, 16  ;;  %v13033_v63 = vpop.permute.xlu0 %7128 }
 0x2cd   : > { %8184 = vst.msk [vmem:[#allocation3 + $0x118] sm:$0xff] %vm514_vm6, %v9841_v42  ;;  %v5091_v28 = vsel %vm11840_vm0, 0, %v5090_v6  ;;  %v9828_v51 = vrot.slane %v13021_v58, 9  ;;  %v5666_v33 = vsel %vm10529_vm5, %v5661_v23, %v5665_v9  ;;  %v6480_v57 = vrot.slane %v6478_v50, 5  ;;  %7317 = vrot.lane.b32.xlu0 %v10323_v22, %s10380_s19  ;;  %v13035_v47 = vpop.f32.mrb[72].mxu0 }
 0x2ce   : > { %5092 = vst [vmem:[#allocation2 + $0xc0] sm:$0x1] %v5091_v28  ;;  %v9682_v19 = vcombine.low %v5656_v46, %v5666_v33  ;;  %v4840_v1 = vshrl.u32 %v9920_v0, 16  ;;  %v4843_v43 = vshll.u32 %v9920_v0, 16  ;;  %v6476_v45 = vrot.slane %v6475_v2, 4  ;;  %v13043_v48 = vpop.f32.mrb[73].mxu0  ;;  %v5802_v28 = vpop.permute.xlu1 %5801 }
 0x2cf   : > { %v6484_v52 = vrot.slane %v6482_v18, 4  ;;  %v6490_v30 = vrot.slane %v6488_v16, 5  ;;  %v9699_v39 = vrot.slane %v5890_v11, 9  ;;  %v6040_v29 = vrot.slane %v5891_v59, 5  ;;  %v5035_v42 = vld [vmem:[#allocation2 + $0xcc] sm:$0xf] }
 0x2d0   : > { %5811 = vrot.lane.b32.xlu1 %v9682_v19, %s10382_s25  ;;  %v13038_v9 = vrot.slane %v4840_v1, 7  ;;  %v6481_v46 = vsel %vm10529_vm5, %v6476_v45, %v6480_v57  ;;  %v6043_v22 = vrot.slane %v5892_v20, 5  ;;  %v7670_v21 = vshrl.u32 %v13019_v44, 16  ;;  %v7392_v11 = vld [vmem:[#allocation2 + $0xa4] sm:$0x1]  ;;  %v13048_v50 = vpop.f32.mrb[74].mxu0 }
 0x2d1   : > { %v6485_v56 = vor.u32 %v6484_v52, %v6480_v57  ;;  %v6041_v54 = vsel %vm10459_vm2, %v9699_v39, %v6040_v29  ;;  %v6042_v23 = vrot.slane %v6040_v29, 4  ;;  %v7673_v59 = vshll.u32 %v13019_v44, 16  ;;  %v6899_v18 = vld [vmem:[#allocation2 + $0xa8] sm:$0xe]  ;;  %v6900_v16 = vld [vmem:[#allocation2 + $0xac] sm:$0xf] }
 0x2d2   : > { %v4845_v6 = vor.u32 %v4843_v43, %v13038_v9  ;;  %v4846_v0 = vrot.slane %v13038_v9, 4  ;;  %v7672_v2 = vrot.slane %v7670_v21, 4  ;;  %v7679_v20 = vshll.u32 %v13030_v41, 16  ;;  %v13053_v33 = vpop.f32.mrb[75].mxu0  ;;  %v13681_v52 = vld [vmem:[#allocation8_spill] sm:$0xff]  ;;  %5842 = vst.msk [vmem:[#allocation3 + $0xa8] sm:$0xff] %vm1130_vm7, %v5802_v28 }
 0x2d3   : > { %v5145_v57 = vld [vmem:[#allocation2 + $0xc8] sm:$0x1]  ;;  %v13055_v19 = vld [vmem:[#allocation2 + $0xc4] sm:$0xf]  ;;  %v6486_v45 = vrot.slane %v6485_v56, 4  ;;  %v6044_v44 = vsel %vm10459_vm2, %v6042_v23, %v6043_v22  ;;  %v4223_v43 = vadd.f32 %v12773_v32, %v13681_v52  ;;  %v13069_v29 = vsel %vm10459_vm2, %v9826_v62, %v8083_v10  ;;  %v13078_v23 = vpop.permute.xlu0 %7305  ;;  %6162 = vst.msk [vmem:[#allocation3 + $0xa8] sm:$0xff] %vm1494_vm8, %v13004_v25 }
 0x2d4   : > { %v8224_v1 = vld [vmem:[#allocation3 + $0x118] sm:$0xff]  ;;  %v13061_v39 = vld [vmem:[#allocation2 + $0x9c] sm:$0xf]  ;;  %v5146_v21 = vsel %vm11872_vm3, 0, %v5145_v57  ;;  %v8097_v22 = vrot.slane %v13055_v19, 5  ;;  %v5036_v32 = vsel %vm11834_vm15, %v4845_v6, %v5035_v42  ;;  %v9715_v56 = vcombine.low %v6041_v54, %v6044_v44  ;;  %6339 = vst.msk [vmem:[#allocation3 + $0xa8] sm:$0xff] %vm1697_vm9, %v6299_v34 }
 0x2d5   : > { %10155 = vmatmul.mubr.msk.bf16.gmra.mrb[92].mxu0 %vm514_vm6, %v8224_v1  ;;  %5147 = vst [vmem:[#allocation2 + $0xc8] sm:$0x1] %v5146_v21  ;;  %5037 = vst [vmem:[#allocation2 + $0xcc] sm:$0xf] %v5036_v32  ;;  %v6491_v61 = vsel %vm10529_vm5, %v6486_v45, %v6490_v30  ;;  %v7675_v62 = vrot.slane %v7673_v59, 5  ;;  %v7681_v10 = vrot.slane %v7679_v20, 5 }
 0x2d6   : > { %v7683_v28 = vshrl.u32 %v13030_v41, 16  ;;  %v13088_v24 = vrot.slane %v8097_v22, 4  ;;  %v9737_v42 = vcombine.low %v6481_v46, %v6491_v61  ;;  %6133 = vrot.lane.b32.xlu1 %v9715_v56, %s10380_s19  ;;  %v7689_v54 = vshll.u32 %v7392_v11, 16  ;;  %v13682_v25 = vld [vmem:[#allocation6_spill] sm:$0xff]  ;;  %v5347_v59 = vld [vmem:[#allocation2 + $0xa0] sm:$0xf] }
 0x2d7   : > { %v4400_v6 = vadd.f32 %v13682_v25, %v4223_v43  ;;  %v7676_v57 = vor.u32 %v7675_v62, %v7672_v2  ;;  %v9763_v44 = vrot.slane %v6899_v18, 9  ;;  %v7049_v30 = vrot.slane %v6900_v16, 5  ;;  %v10325_v34 = vld [vmem:[#allocation2 + $0xa8] sm:$0xff]   ;;  %v13104_v56 = vpop.permute.xlu0 %7847  ;;  %v10331_v19 = vld [vmem:[#allocation2 + $0xc0] sm:$0xff]  }
 0x2d8   : > { %v7685_v1 = vrot.slane %v7683_v28, 4  ;;  %6847 = vst.msk [vmem:[#allocation3 + $0x50] sm:$0xff] %vm514_vm6, %v9737_v42  ;;  %v7691_v41 = vrot.slane %v7689_v54, 5  ;;  %v7052_v45 = vrot.slane %v6901_v49, 5  ;;  %v5668_v52 = vshrl.u32 %v13061_v39, 16  ;;  %v13114_v54 = vpop.permute.xlu1 %6123 }
 0x2d9   : > { %v4438_v20 = vmax.f32 %v4400_v6, 0.0  ;;  %7167 = vst.msk [vmem:[#allocation3 + $0x50] sm:$0xff] %vm1130_vm7, %v12793_v36  ;;  %v7677_v46 = vrot.slane %v7676_v57, 4  ;;  %v13098_v2 = vsel %vm10459_vm2, %v9763_v44, %v7049_v30  ;;  %v7051_v18 = vrot.slane %v7049_v30, 4  ;;  %v10340_v36 = vld [vmem:[#allocation2 + $0x9c] sm:$0xff]  }
 0x2da   : > { %v7686_v11 = vor.u32 %v7685_v1, %v7681_v10  ;;  %7344 = vst.msk [vmem:[#allocation3 + $0x50] sm:$0xff] %vm1494_vm8, %v12816_v53  ;;  %6310 = vrot.lane.b32.xlu1 %v10325_v34, %s10381_s22  ;;  %v5670_v43 = vrot.slane %v5668_v52, 4  ;;  %v5671_v21 = vshll.u32 %v13061_v39, 16  ;;  %v5677_v32 = vshll.u32 %v5347_v59, 16  ;;  %v5348_v28 = vld [vmem:[#allocation2 + $0xa4] sm:$0x1] }
 0x2db   : > { %v9921_v16 = vpack.c.bf16 %v4438_v20, %v4438_v20  ;;  %v7682_v49 = vsel %vm10529_vm5, %v7677_v46, %v7681_v10  ;;  %v13110_v62 = vsel %vm10459_vm2, %v7051_v18, %v7052_v45  ;;  %v5681_v42 = vshrl.u32 %v5347_v59, 16  ;;  %v6360_v53 = vld [vmem:[#allocation2 + $0x3c] sm:$0xf]  ;;  %7888 = vst.msk [vmem:[#allocation3 + $0x50] sm:$0xff] %vm1697_vm9, %v12934_v12  ;;  %v5039_v59 = vld [vmem:[#allocation2 + $0xd4] sm:$0x1] }
 0x2dc   : > { %v7687_v61 = vrot.slane %v7686_v11, 4  ;;  %v13116_v39 = vld [vmem:[#allocation2 + $0xc8] sm:$0x1]  ;;  %v5093_v25 = vld [vmem:[#allocation2 + $0xcc] sm:$0x1]  ;;  %v9779_v10 = vcombine.low %v13098_v2, %v13110_v62  ;;  %v8087_v1 = vsel %vm10459_vm2, %v12852_v5, %v8086_v14  ;;  %5304 = vst.msk [vmem:[#allocation3 + $0x138] sm:$0xff] %vm514_vm6, %v10340_v36 }
 0x2dd   : > { %v4848_v6 = vshrl.u32 %v9921_v16, 16  ;;  %v4851_v57 = vshll.u32 %v9921_v16, 16  ;;  %v8100_v12 = vrot.slane %v13116_v39, 5  ;;  %v5094_v44 = vsel %vm11840_vm0, 0, %v5093_v25  ;;  %v6361_v34 = vld [vmem:[#allocation2 + $0x40] sm:$0xf]  ;;  %v13135_v25 = vpop.permute.xlu0 %7130 }
 0x2de   : > { %v7692_v30 = vsel %vm10529_vm5, %v7687_v61, %v7691_v41  ;;  %v5673_v20 = vrot.slane %v5671_v21, 5  ;;  %5095 = vst [vmem:[#allocation2 + $0xcc] sm:$0x1] %v5094_v44  ;;  %v5679_v52 = vrot.slane %v5677_v32, 5  ;;  %v5683_v46 = vrot.slane %v5681_v42, 4 }
 0x2df   : > { %v9809_v45 = vcombine.low %v7682_v49, %v7692_v30  ;;  %v4850_v15 = vrot.slane %v4848_v6, 7  ;;  %v6362_v11 = vld [vmem:[#allocation2 + $0x44] sm:$0x1]  ;;  %v13683_v5 = vmov 0   ;;  %v5687_v2 = vshll.u32 %v5348_v28, 16 }
 0x2e0   : > { %5160 = vst.msk [vmem:[#allocation2 + $0xcc] sm:$0xf] %vm4910_vm11, %v13683_v5  ;;  %v5674_v14 = vor.u32 %v5673_v20, %v5670_v43  ;;  %v9842_v18 = vcombine.low %v13069_v29, %v8087_v1  ;;  %v6493_v16 = vshrl.u32 %v6360_v53, 16  ;;  %v5684_v21 = vor.u32 %v5683_v46, %v5679_v52  ;;  %v5893_v62 = vld [vmem:[#allocation2 + $0xa8] sm:$0xe]  ;;  %v8198_v29 = vld [vmem:[#allocation3 + $0x48] sm:$0xff]  ;;  %v13138_v1 = vpop.permute.xlu1 %6300 }
 0x2e1   : > { %7859 = vrot.lane.b32.xlu0 %v9809_v45, %s10381_s22  ;;  %v4853_v41 = vor.u32 %v4851_v57, %v4850_v15  ;;  %v4855_v36 = vrot.slane %v4850_v15, 4  ;;  %v6496_v61 = vshll.u32 %v6360_v53, 16  ;;  %v5894_v49 = vld [vmem:[#allocation2 + $0xac] sm:$0xf]  ;;  %v5689_v42 = vrot.slane %v5687_v2, 5  ;;  %v10326_v2 = vld [vmem:[#allocation2 + $0xb4] sm:$0xff]  }
 0x2e2   : > { %v5675_v32 = vrot.slane %v5674_v14, 4  ;;  %8185 = vst.msk [vmem:[#allocation3 + $0x130] sm:$0xff] %vm514_vm6, %v9842_v18  ;;  %v6495_v6 = vrot.slane %v6493_v16, 4  ;;  %v6502_v43 = vshll.u32 %v6361_v34, 16  ;;  %v5895_v28 = vld [vmem:[#allocation2 + $0xb0] sm:$0x1] }
 0x2e3   : > { %v7393_v44 = vld [vmem:[#allocation2 + $0xa8] sm:$0xf]  ;;  %v4854_v53 = vsel %vm11845_vm1, %v4846_v0, %v4853_v41  ;;  %v5040_v57 = vsel %vm11840_vm0, %v4855_v36, %v5039_v59  ;;  %v5685_v30 = vrot.slane %v5684_v21, 4  ;;  %v6498_v20 = vrot.slane %v6496_v61, 5  ;;  %v7394_v45 = vld [vmem:[#allocation2 + $0xac] sm:$0xf] }
 0x2e4   : > { %v8199_v15 = vld [vmem:[#allocation3 + $0x50] sm:$0xff]  ;;  %5038 = vst.msk [vmem:[#allocation2 + $0xd0] sm:$0xf] %vm4910_vm11, %v4854_v53  ;;  %5041 = vst [vmem:[#allocation2 + $0xd4] sm:$0x1] %v5040_v57  ;;  %v5680_v14 = vsel %vm10529_vm5, %v5675_v32, %v5679_v52  ;;  %v6504_v18 = vrot.slane %v6502_v43, 5  ;;  %v13157_v53 = vpop.permute.xlu0 %7307  ;;  %v5804_v57 = vpop.permute.xlu1 %5803 }
 0x2e5   : > { %v10341_v46 = vld [vmem:[#allocation2 + $0xa8] sm:$0xff]   ;;  %v6506_v9 = vshrl.u32 %v6361_v34, 16  ;;  %v6512_v16 = vshll.u32 %v6362_v11, 16  ;;  %8492 = vmatprep.mubr.bf16.mxu1 %v8199_v15  ;;  %5161 = vst.msk [vmem:[#allocation2 + $0xd0] sm:$0xf] %vm4910_vm11, %v13683_v5  ;;  %7142 = vrot.lane.b32.xlu0 %v9779_v10, %s10382_s25  ;;  %v5690_v31 = vsel %vm10529_vm5, %v5685_v30, %v5689_v42  ;;  %v6499_v0 = vor.u32 %v6498_v20, %v6495_v6 }
 0x2e6   : > { %v9700_v59 = vrot.slane %v5893_v62, 9  ;;  %v6047_v41 = vrot.slane %v5894_v49, 5  ;;  %8493 = vmatmul.mubr.bf16.gmra.mrb[48].mxu1 %v8198_v29  ;;  %5305 = vst.msk [vmem:[#allocation3 + $0x150] sm:$0xff] %vm514_vm6, %v10341_v46  ;;  %v9683_v52 = vcombine.low %v5680_v14, %v5690_v31  ;;  %v6050_v11 = vrot.slane %v5895_v28, 5  ;;  %v6902_v21 = vld [vmem:[#allocation2 + $0xb4] sm:$0xe] }
 0x2e7   : > { %v6508_v36 = vrot.slane %v6506_v9, 4  ;;  %v6514_v34 = vrot.slane %v6512_v16, 5  ;;  %v6500_v61 = vrot.slane %v6499_v0, 4  ;;  %v7694_v10 = vshrl.u32 %v7393_v44, 16  ;;  %v6903_v29 = vld [vmem:[#allocation2 + $0xb8] sm:$0xf] }
 0x2e8   : > { %v6048_v32 = vsel %vm10459_vm2, %v9700_v59, %v6047_v41  ;;  %v6049_v43 = vrot.slane %v6047_v41, 4  ;;  %5813 = vrot.lane.b32.xlu1 %v9683_v52, %s10382_s25  ;;  %v7697_v49 = vshll.u32 %v7393_v44, 16  ;;  %v7703_v42 = vshll.u32 %v7394_v45, 16  ;;  %v6904_v14 = vld [vmem:[#allocation2 + $0xbc] sm:$0x1]  ;;  %5843 = vst.msk [vmem:[#allocation3 + $0xc0] sm:$0xff] %vm1130_vm7, %v5804_v57  ;;  %v13183_v7 = vpop.permute.xlu0 %7849 }
 0x2e9   : > { %v6509_v62 = vor.u32 %v6508_v36, %v6504_v18  ;;  %v7707_v6 = vshrl.u32 %v7394_v45, 16  ;;  %7319 = vrot.lane.b32.xlu0 %v10326_v2, %s10380_s19  ;;  %v8227_v28 = vld [vmem:[#allocation3 + $0x130] sm:$0xff]  ;;  %v6505_v30 = vsel %vm10529_vm5, %v6500_v61, %v6504_v18  ;;  %v7696_v15 = vrot.slane %v7694_v10, 4  ;;  %v5351_v0 = vld [vmem:[#allocation2 + $0xb0] sm:$0x1]  ;;  %6163 = vst.msk [vmem:[#allocation3 + $0xc0] sm:$0xff] %vm1494_vm8, %v13114_v54 }
 0x2ea   : > { %v6051_v20 = vsel %vm10459_vm2, %v6049_v43, %v6050_v11  ;;  %v7713_v46 = vshll.u32 %v7395_v27, 16  ;;  %v5349_v9 = vld [vmem:[#allocation2 + $0xa8] sm:$0xf]  ;;  %10158 = vmatprep.mubr.msk.bf16.mxu0 %vm514_vm6, %v8227_v28  ;;  %v7699_v16 = vrot.slane %v7697_v49, 5  ;;  %v7705_v31 = vrot.slane %v7703_v42, 5  ;;  %6340 = vst.msk [vmem:[#allocation3 + $0xc0] sm:$0xff] %vm1697_vm9, %v13138_v1 }
 0x2eb   : > { %v6510_v44 = vrot.slane %v6509_v62, 4  ;;  %v9716_v45 = vcombine.low %v6048_v32, %v6051_v20  ;;  %v5350_v2 = vld [vmem:[#allocation2 + $0xac] sm:$0xf]  ;;  %v5148_v18 = vld [vmem:[#allocation2 + $0xd4] sm:$0x1]  ;;  %v7709_v59 = vrot.slane %v7707_v6, 4 }
 0x2ec   : > { %v7715_v41 = vrot.slane %v7713_v46, 5  ;;  %v9764_v52 = vrot.slane %v6902_v21, 9  ;;  %v7056_v27 = vrot.slane %v6903_v29, 5  ;;  %v5149_v36 = vsel %vm11872_vm3, 0, %v5148_v18  ;;  %v13173_v11 = vld [vmem:[#allocation2 + $0xd0] sm:$0xf] }
 0x2ed   : > { %v6515_v61 = vsel %vm10529_vm5, %v6510_v44, %v6514_v34  ;;  %6135 = vrot.lane.b32.xlu1 %v9716_v45, %s10380_s19  ;;  %v7700_v32 = vor.u32 %v7699_v16, %v7696_v15  ;;  %v7059_v54 = vrot.slane %v6904_v14, 5  ;;  %5150 = vst [vmem:[#allocation2 + $0xd4] sm:$0x1] %v5149_v36  ;;  %v8104_v43 = vrot.slane %v13173_v11, 5  ;;  %v10328_v62 = vld [vmem:[#allocation2 + $0xb4] sm:$0xff]   ;;  %v13195_v45 = vpop.permute.xlu1 %6125 }
 0x2ee   : > { %v9738_v21 = vcombine.low %v6505_v30, %v6515_v61  ;;  %v7710_v10 = vor.u32 %v7709_v59, %v7705_v31  ;;  %v13181_v1 = vsel %vm10459_vm2, %v9764_v52, %v7056_v27  ;;  %5162 = vst.msk [vmem:[#allocation2 + $0xd4] sm:$0x1] %vm4918_vm13, %v13683_v5  ;;  %v7058_v49 = vrot.slane %v7056_v27, 4  ;;  %v10342_v20 = vld [vmem:[#allocation2 + $0xb4] sm:$0xff]   ;;  %v6363_v44 = vld [vmem:[#allocation2 + $0x48] sm:$0xf] }
 0x2ef   : > { %v7701_v34 = vrot.slane %v7700_v32, 4  ;;  %v5692_v42 = vshrl.u32 %v5349_v9, 16  ;;  %v5695_v6 = vshll.u32 %v5349_v9, 16  ;;  %v5701_v57 = vshll.u32 %v5350_v2, 16  ;;  %v7942_v9 = vld [vmem:[#allocation2 + $0xbc] sm:$0x1] }
 0x2f0   : > { %6848 = vst.msk [vmem:[#allocation3 + $0x68] sm:$0xff] %vm514_vm6, %v9738_v21  ;;  %v7711_v29 = vrot.slane %v7710_v10, 4  ;;  %v5705_v28 = vshrl.u32 %v5350_v2, 16  ;;  %v5711_v30 = vshll.u32 %v5351_v0, 16  ;;  %v7060_v5 = vsel %vm10459_vm2, %v7058_v49, %v7059_v54  ;;  %v6364_v0 = vld [vmem:[#allocation2 + $0x4c] sm:$0xf]  ;;  %v13211_v21 = vpop.permute.xlu0 %7132 }
 0x2f1   : > { %7168 = vst.msk [vmem:[#allocation3 + $0x68] sm:$0xff] %vm1130_vm7, %v12876_v35  ;;  %v7706_v15 = vsel %vm10529_vm5, %v7701_v34, %v7705_v31  ;;  %6312 = vrot.lane.b32.xlu1 %v10328_v62, %s10381_s22  ;;  %v5694_v46 = vrot.slane %v5692_v42, 4  ;;  %v5697_v14 = vrot.slane %v5695_v6, 5  ;;  %v9780_v35 = vcombine.low %v13181_v1, %v7060_v5  ;;  %v6365_v18 = vld [vmem:[#allocation2 + $0x50] sm:$0x1] }
 0x2f2   : > { %v7716_v16 = vsel %vm10529_vm5, %v7711_v29, %v7715_v41  ;;  %7345 = vst.msk [vmem:[#allocation3 + $0x68] sm:$0xff] %vm1494_vm8, %v12917_v17  ;;  %v5703_v31 = vrot.slane %v5701_v57, 5  ;;  %v5707_v2 = vrot.slane %v5705_v28, 4  ;;  %v5713_v27 = vrot.slane %v5711_v30, 5  ;;  %v5896_v54 = vld [vmem:[#allocation2 + $0xb4] sm:$0xe] }
 0x2f3   : > { %5306 = vst.msk [vmem:[#allocation3 + $0x168] sm:$0xff] %vm514_vm6, %v10342_v20  ;;  %v9810_v59 = vcombine.low %v7706_v15, %v7716_v16  ;;  %v5698_v52 = vor.u32 %v5697_v14, %v5694_v46  ;;  %v8091_v41 = vsel %vm10459_vm2, %v9827_v8, %v8090_v4  ;;  %v8093_v36 = vrot.slane %v7942_v9, 5  ;;  %v5898_v49 = vld [vmem:[#allocation2 + $0xbc] sm:$0x1]  ;;  %v7396_v28 = vld [vmem:[#allocation2 + $0xb4] sm:$0xf]  ;;  %v13219_v20 = vpop.permute.xlu1 %6302 }
 0x2f4   : > { %7889 = vst.msk [vmem:[#allocation3 + $0x68] sm:$0xff] %vm1697_vm9, %v13009_v37  ;;  %v5708_v17 = vor.u32 %v5707_v2, %v5703_v31  ;;  %v6517_v61 = vshrl.u32 %v6363_v44, 16  ;;  %v6520_v32 = vshll.u32 %v6363_v44, 16  ;;  %v6526_v62 = vshll.u32 %v6364_v0, 16  ;;  %v7397_v30 = vld [vmem:[#allocation2 + $0xb8] sm:$0xf] }
 0x2f5   : > { %7861 = vrot.lane.b32.xlu0 %v9810_v59, %s10381_s22  ;;  %v5699_v10 = vrot.slane %v5698_v52, 4  ;;  %v6530_v60 = vshrl.u32 %v6364_v0, 16  ;;  %v6536_v1 = vshll.u32 %v6365_v18, 16  ;;  %v8094_v8 = vsel %vm10459_vm2, %v12955_v55, %v8093_v36  ;;  %v10329_v9 = vld [vmem:[#allocation2 + $0xc0] sm:$0xff]   ;;  %v7398_v2 = vld [vmem:[#allocation2 + $0xbc] sm:$0x1] }
 0x2f6   : > { %v5709_v34 = vrot.slane %v5708_v17, 4  ;;  %v6519_v4 = vrot.slane %v6517_v61, 4  ;;  %v6522_v37 = vrot.slane %v6520_v32, 5  ;;  %v9843_v6 = vcombine.low %v8091_v41, %v8094_v8  ;;  %v13225_v17 = vpop.permute.xlu0 %7309  ;;  %v5352_v32 = vld [vmem:[#allocation2 + $0xb4] sm:$0xf] }
 0x2f7   : > { %v5704_v42 = vsel %vm10529_vm5, %v5699_v10, %v5703_v31  ;;  %v6528_v29 = vrot.slane %v6526_v62, 5  ;;  %v6532_v57 = vrot.slane %v6530_v60, 4  ;;  %v6538_v46 = vrot.slane %v6536_v1, 5 }
 0x2f8   : > { %v5714_v15 = vsel %vm10529_vm5, %v5709_v34, %v5713_v27  ;;  %v6523_v5 = vor.u32 %v6522_v37, %v6519_v4  ;;  %v9701_v14 = vrot.slane %v5896_v54, 9  ;;  %8186 = vst.msk [vmem:[#allocation3 + $0x148] sm:$0xff] %vm514_vm6, %v9843_v6  ;;  %v6054_v16 = vrot.slane %v5897_v40, 5  ;;  %v8201_v54 = vld [vmem:[#allocation3 + $0x60] sm:$0xff]  ;;  %v5806_v6 = vpop.permute.xlu1 %5805 }
 0x2f9   : > { %7144 = vrot.lane.b32.xlu0 %v9780_v35, %s10382_s25  ;;  %v9684_v55 = vcombine.low %v5704_v42, %v5714_v15  ;;  %v6533_v44 = vor.u32 %v6532_v57, %v6528_v29  ;;  %v6057_v31 = vrot.slane %v5898_v49, 5  ;;  %v7718_v18 = vshrl.u32 %v7396_v28, 16  ;;  %v5353_v40 = vld [vmem:[#allocation2 + $0xb8] sm:$0xf]  ;;  %v5354_v49 = vld [vmem:[#allocation2 + $0xbc] sm:$0x1] }
 0x2fa   : > { %v6524_v0 = vrot.slane %v6523_v5, 4  ;;  %v7721_v59 = vshll.u32 %v7396_v28, 16  ;;  %v7727_v52 = vshll.u32 %v7397_v30, 16  ;;  %v6055_v35 = vsel %vm10459_vm2, %v9701_v14, %v6054_v16  ;;  %v6905_v42 = vld [vmem:[#allocation2 + $0xc0] sm:$0xe]  ;;  %5844 = vst.msk [vmem:[#allocation3 + $0xd8] sm:$0xff] %vm1130_vm7, %v5806_v6 }
 0x2fb   : > { %v8202_v41 = vld [vmem:[#allocation3 + $0x68] sm:$0xff]  ;;  %5815 = vrot.lane.b32.xlu1 %v9684_v55, %s10382_s25  ;;  %v6534_v27 = vrot.slane %v6533_v44, 4  ;;  %v6056_v36 = vrot.slane %v6054_v16, 4  ;;  %v7731_v61 = vshrl.u32 %v7397_v30, 16  ;;  %v7720_v62 = vrot.slane %v7718_v18, 4  ;;  %6164 = vst.msk [vmem:[#allocation3 + $0xd8] sm:$0xff] %vm1494_vm8, %v13195_v45 }
 0x2fc   : > { %8500 = vmatprep.mubr.bf16.mxu1 %v8202_v41  ;;  %v6529_v10 = vsel %vm10529_vm5, %v6524_v0, %v6528_v29  ;;  %v7723_v60 = vrot.slane %v7721_v59, 5  ;;  %v7729_v1 = vrot.slane %v7727_v52, 5  ;;  %v7737_v37 = vshll.u32 %v7398_v2, 16  ;;  %v6906_v15 = vld [vmem:[#allocation2 + $0xc4] sm:$0xf]  ;;  %v13240_v16 = vpop.f32.mrb[76].mxu0  ;;  %v13244_v52 = vpop.permute.xlu0 %7851 }
 0x2fd   : > { %8501 = vmatmul.mubr.bf16.gmra.mrb[52].mxu1 %v8201_v54  ;;  %7321 = vrot.lane.b32.xlu0 %v10329_v9, %s10380_s19  ;;  %v6539_v34 = vsel %vm10529_vm5, %v6534_v27, %v6538_v46  ;;  %v6058_v8 = vsel %vm10459_vm2, %v6056_v36, %v6057_v31  ;;  %v7733_v4 = vrot.slane %v7731_v61, 4  ;;  %v5716_v30 = vshrl.u32 %v5352_v32, 16  ;;  %v7399_v5 = vld [vmem:[#allocation2 + $0xc0] sm:$0xf]  ;;  %v6907_v44 = vld [vmem:[#allocation2 + $0xc8] sm:$0x1] }
 0x2fe   : > { %v9739_v57 = vcombine.low %v6529_v10, %v6539_v34  ;;  %v9717_v29 = vcombine.low %v6055_v35, %v6058_v8  ;;  %v7724_v28 = vor.u32 %v7723_v60, %v7720_v62  ;;  %v7739_v55 = vrot.slane %v7737_v37, 5  ;;  %6341 = vst.msk [vmem:[#allocation3 + $0xd8] sm:$0xff] %vm1697_vm9, %v13219_v20  ;;  %v13248_v41 = vpop.f32.mrb[77].mxu0  ;;  %v7400_v62 = vld [vmem:[#allocation2 + $0xc4] sm:$0xf] }
 0x2ff   : > { %v7734_v14 = vor.u32 %v7733_v4, %v7729_v1  ;;  %v5719_v9 = vshll.u32 %v5352_v32, 16  ;;  %v5725_v46 = vshll.u32 %v5353_v40, 16  ;;  %v8230_v31 = vld [vmem:[#allocation3 + $0x148] sm:$0xff]  ;;  %v5718_v0 = vrot.slane %v5716_v30, 4  ;;  %v13253_v61 = vpop.f32.mrb[78].mxu0 }
 0x300   : > { %6849 = vst.msk [vmem:[#allocation3 + $0x80] sm:$0xff] %vm514_vm6, %v9739_v57  ;;  %6137 = vrot.lane.b32.xlu1 %v9717_v29, %s10380_s19  ;;  %v7725_v2 = vrot.slane %v7724_v28, 4  ;;  %v5729_v18 = vshrl.u32 %v5353_v40, 16  ;;  %v5735_v59 = vshll.u32 %v5354_v49, 16  ;;  %10159 = vmatmul.mubr.msk.bf16.gmra.mrb[96].mxu0 %vm514_vm6, %v8230_v31  ;;  %v9765_v36 = vrot.slane %v6905_v42, 9  ;;  %v13259_v60 = vpop.f32.mrb[79].mxu0 }
 0x301   : > { %7169 = vst.msk [vmem:[#allocation3 + $0x80] sm:$0xff] %vm1130_vm7, %v12960_v26  ;;  %v7735_v45 = vrot.slane %v7734_v14, 4  ;;  %v5721_v27 = vrot.slane %v5719_v9, 5  ;;  %v5727_v35 = vrot.slane %v5725_v46, 5  ;;  %v7063_v10 = vrot.slane %v6906_v15, 5  ;;  %v13270_v9 = vpop.permute.xlu0 %7134 }
 0x302   : > { %v7730_v32 = vsel %vm10529_vm5, %v7725_v2, %v7729_v1  ;;  %7346 = vst.msk [vmem:[#allocation3 + $0x80] sm:$0xff] %vm1494_vm8, %v12983_v38  ;;  %v5731_v20 = vrot.slane %v5729_v18, 4  ;;  %v5737_v54 = vrot.slane %v5735_v59, 5  ;;  %v7066_v34 = vrot.slane %v6907_v44, 5  ;;  %v7401_v8 = vld [vmem:[#allocation2 + $0xc8] sm:$0x1] }
 0x303   : > { %v7740_v26 = vsel %vm10529_vm5, %v7735_v45, %v7739_v55  ;;  %v5722_v40 = vor.u32 %v5721_v27, %v5718_v0  ;;  %v7742_v4 = vshrl.u32 %v7399_v5, 16  ;;  %7890 = vst.msk [vmem:[#allocation3 + $0x80] sm:$0xff] %vm1697_vm9, %v13104_v56  ;;  %v7064_v38 = vsel %vm10459_vm2, %v9765_v36, %v7063_v10  ;;  %v6366_v28 = vld [vmem:[#allocation2 + $0x54] sm:$0xf]  ;;  %v6367_v56 = vld [vmem:[#allocation2 + $0x58] sm:$0xf] }
 0x304   : > { %v9811_v1 = vcombine.low %v7730_v32, %v7740_v26  ;;  %v5732_v37 = vor.u32 %v5731_v20, %v5727_v35  ;;  %v7065_v49 = vrot.slane %v7063_v10, 4  ;;  %v7745_v57 = vshll.u32 %v7399_v5, 16  ;;  %v6368_v5 = vld [vmem:[#allocation2 + $0x5c] sm:$0x1]  ;;  %v13276_v10 = vpop.permute.xlu1 %6127 }
 0x305   : > { %v5723_v42 = vrot.slane %v5722_v40, 4  ;;  %v7744_v6 = vrot.slane %v7742_v4, 4  ;;  %v7751_v29 = vshll.u32 %v7400_v62, 16  ;;  %v7755_v14 = vshrl.u32 %v7400_v62, 16 }
 0x306   : > { %7863 = vrot.lane.b32.xlu0 %v9811_v1, %s10381_s22  ;;  %v5733_v30 = vrot.slane %v5732_v37, 4  ;;  %v7067_v15 = vsel %vm10459_vm2, %v7065_v49, %v7066_v34  ;;  %v7761_v55 = vshll.u32 %v7401_v8, 16  ;;  %v7747_v31 = vrot.slane %v7745_v57, 5  ;;  %v7402_v34 = vld [vmem:[#allocation2 + $0xcc] sm:$0xf]  ;;  %v8204_v49 = vld [vmem:[#allocation3 + $0x78] sm:$0xff] }
 0x307   : > { %v5728_v46 = vsel %vm10529_vm5, %v5723_v42, %v5727_v35  ;;  %v9781_v44 = vcombine.low %v7064_v38, %v7067_v15  ;;  %v7753_v2 = vrot.slane %v7751_v29, 5  ;;  %v7757_v18 = vrot.slane %v7755_v14, 4  ;;  %v7403_v38 = vld [vmem:[#allocation2 + $0xd0] sm:$0xf] }
 0x308   : > { %v5738_v0 = vsel %vm10529_vm5, %v5733_v30, %v5737_v54  ;;  %v7763_v59 = vrot.slane %v7761_v55, 5  ;;  %v6541_v45 = vshrl.u32 %v6366_v28, 16  ;;  %v7748_v36 = vor.u32 %v7747_v31, %v7744_v6  ;;  %v7404_v30 = vld [vmem:[#allocation2 + $0xd4] sm:$0x1] }
 0x309   : > { %v9685_v27 = vcombine.low %v5728_v46, %v5738_v0  ;;  %v6544_v32 = vshll.u32 %v6366_v28, 16  ;;  %v6550_v20 = vshll.u32 %v6367_v56, 16  ;;  %v7758_v62 = vor.u32 %v7757_v18, %v7753_v2  ;;  %v13291_v28 = vpop.permute.xlu0 %7311  ;;  %v6369_v46 = vld [vmem:[#allocation2 + $0x60] sm:$0xf] }
 0x30a   : > { %7146 = vrot.lane.b32.xlu0 %v9781_v44, %s10382_s25  ;;  %v6543_v35 = vrot.slane %v6541_v45, 4  ;;  %v6554_v26 = vshrl.u32 %v6367_v56, 16  ;;  %v6560_v40 = vshll.u32 %v6368_v5, 16  ;;  %v8205_v8 = vld [vmem:[#allocation3 + $0x80] sm:$0xff]  ;;  %v7749_v54 = vrot.slane %v7748_v36, 4  ;;  %v6305_v5 = vpop.permute.xlu1 %6304  ;;  %v10333_v36 = vld [vmem:[#allocation2 + $0xcc] sm:$0xff]  }
 0x30b   : > { %5817 = vrot.lane.b32.xlu1 %v9685_v27, %s10382_s25  ;;  %v6546_v4 = vrot.slane %v6544_v32, 5  ;;  %v6552_v1 = vrot.slane %v6550_v20, 5  ;;  %v8098_v37 = vsel %vm10459_vm2, %v9828_v51, %v8097_v22  ;;  %8508 = vmatprep.mubr.bf16.mxu1 %v8205_v8  ;;  %v7759_v42 = vrot.slane %v7758_v62, 4  ;;  %v6371_v20 = vld [vmem:[#allocation2 + $0x68] sm:$0x1] }
 0x30c   : > { %v6556_v6 = vrot.slane %v6554_v26, 4  ;;  %v6562_v57 = vrot.slane %v6560_v40, 5  ;;  %v8101_v29 = vsel %vm10459_vm2, %v13088_v24, %v8100_v12  ;;  %8509 = vmatmul.mubr.bf16.gmra.mrb[56].mxu1 %v8204_v49  ;;  %v7754_v58 = vsel %vm10529_vm5, %v7749_v54, %v7753_v2  ;;  %v6370_v2 = vld [vmem:[#allocation2 + $0x64] sm:$0xf]  ;;  %v6372_v54 = vld [vmem:[#allocation2 + $0x6c] sm:$0xf] }
 0x30d   : > { %v6547_v51 = vor.u32 %v6546_v4, %v6543_v35  ;;  %v9844_v22 = vcombine.low %v8098_v37, %v8101_v29  ;;  %v7766_v15 = vshrl.u32 %v7402_v34, 16  ;;  %v7764_v14 = vsel %vm10529_vm5, %v7759_v42, %v7763_v59  ;;  %v13304_v4 = vpop.permute.xlu0 %7853 }
 0x30e   : > { %v6557_v55 = vor.u32 %v6556_v6, %v6552_v1  ;;  %v7769_v39 = vshll.u32 %v7402_v34, 16  ;;  %v7775_v56 = vshll.u32 %v7403_v38, 16  ;;  %v9812_v24 = vcombine.low %v7754_v58, %v7764_v14  ;;  %v6373_v6 = vld [vmem:[#allocation2 + $0x70] sm:$0xf] }
 0x30f   : > { %6314 = vrot.lane.b32.xlu1 %v10331_v19, %s10381_s22  ;;  %v6548_v12 = vrot.slane %v6547_v51, 4  ;;  %8187 = vst.msk [vmem:[#allocation3 + $0x160] sm:$0xff] %vm514_vm6, %v9844_v22  ;;  %v7768_v44 = vrot.slane %v7766_v15, 4  ;;  %v7779_v31 = vshrl.u32 %v7403_v38, 16  ;;  %v7785_v27 = vshll.u32 %v7404_v30, 16 }
 0x310   : > { %v6558_v0 = vrot.slane %v6557_v55, 4  ;;  %v7771_v18 = vrot.slane %v7769_v39, 5  ;;  %v7777_v45 = vrot.slane %v7775_v56, 5  ;;  %7865 = vrot.lane.b32.xlu0 %v9812_v24, %s10381_s22  ;;  %v6565_v62 = vshrl.u32 %v6369_v46, 16  ;;  %v6374_v22 = vld [vmem:[#allocation2 + $0x74] sm:$0x1] }
 0x311   : > { %v6553_v59 = vsel %vm10529_vm5, %v6548_v12, %v6552_v1  ;;  %v7781_v32 = vrot.slane %v7779_v31, 4  ;;  %v6568_v35 = vshll.u32 %v6369_v46, 16  ;;  %v7787_v34 = vrot.slane %v7785_v27, 5  ;;  %v5808_v14 = vpop.permute.xlu1 %5807  ;;  %v6375_v12 = vld [vmem:[#allocation2 + $0x78] sm:$0xf] }
 0x312   : > { %v6563_v26 = vsel %vm10529_vm5, %v6558_v0, %v6562_v57  ;;  %v7772_v40 = vor.u32 %v7771_v18, %v7768_v44  ;;  %v6574_v8 = vshll.u32 %v6370_v2, 16  ;;  %v6567_v49 = vrot.slane %v6565_v62, 4  ;;  %5845 = vst.msk [vmem:[#allocation3 + $0xf0] sm:$0xff] %vm1130_vm7, %v5808_v14  ;;  %v6376_v0 = vld [vmem:[#allocation2 + $0x7c] sm:$0xf] }
 0x313   : > { %v9740_v37 = vcombine.low %v6553_v59, %v6563_v26  ;;  %v7782_v38 = vor.u32 %v7781_v32, %v7777_v45  ;;  %v6570_v42 = vrot.slane %v6568_v35, 5  ;;  %v6578_v19 = vshrl.u32 %v6370_v2, 16  ;;  %6165 = vst.msk [vmem:[#allocation3 + $0xf0] sm:$0xff] %vm1494_vm8, %v13276_v10  ;;  %v6377_v26 = vld [vmem:[#allocation2 + $0x80] sm:$0x1] }
 0x314   : > { %v7773_v1 = vrot.slane %v7772_v40, 4  ;;  %v6576_v29 = vrot.slane %v6574_v8, 5  ;;  %v6584_v58 = vshll.u32 %v6371_v20, 16  ;;  %7323 = vrot.lane.b32.xlu0 %v10333_v36, %s10380_s19  ;;  %v6589_v30 = vshrl.u32 %v6372_v54, 16  ;;  %6342 = vst.msk [vmem:[#allocation3 + $0xf0] sm:$0xff] %vm1697_vm9, %v6305_v5 }
 0x315   : > { %6850 = vst.msk [vmem:[#allocation3 + $0x98] sm:$0xff] %vm514_vm6, %v9740_v37  ;;  %v7783_v57 = vrot.slane %v7782_v38, 4  ;;  %v6571_v51 = vor.u32 %v6570_v42, %v6567_v49  ;;  %v6592_v15 = vshll.u32 %v6372_v54, 16  ;;  %v6580_v56 = vrot.slane %v6578_v19, 4  ;;  %v6378_v38 = vld [vmem:[#allocation2 + $0x84] sm:$0xf] }
 0x316   : > { %7170 = vst.msk [vmem:[#allocation3 + $0x98] sm:$0xff] %vm1130_vm7, %v13033_v63  ;;  %v8233_v55 = vld [vmem:[#allocation3 + $0x160] sm:$0xff]  ;;  %v7778_v39 = vsel %vm10529_vm5, %v7773_v1, %v7777_v45  ;;  %v6586_v46 = vrot.slane %v6584_v58, 5  ;;  %v6598_v24 = vshll.u32 %v6373_v6, 16  ;;  %v6591_v63 = vrot.slane %v6589_v30, 4 }
 0x317   : > { %7347 = vst.msk [vmem:[#allocation3 + $0x98] sm:$0xff] %vm1494_vm8, %v13078_v23  ;;  %10162 = vmatprep.mubr.msk.bf16.mxu0 %vm514_vm6, %v8233_v55  ;;  %v7788_v44 = vsel %vm10529_vm5, %v7783_v57, %v7787_v34  ;;  %v6572_v31 = vrot.slane %v6571_v51, 4  ;;  %v6594_v2 = vrot.slane %v6592_v15, 5  ;;  %v6581_v45 = vor.u32 %v6580_v56, %v6576_v29  ;;  %v13322_v23 = vpop.permute.xlu0 %7136  ;;  %v6379_v1 = vld [vmem:[#allocation2 + $0x88] sm:$0xf] }
 0x318   : > { %v9813_v18 = vcombine.low %v7778_v39, %v7788_v44  ;;  %7891 = vst.msk [vmem:[#allocation3 + $0x98] sm:$0xff] %vm1697_vm9, %v13183_v7  ;;  %v6600_v27 = vrot.slane %v6598_v24, 5  ;;  %v6602_v59 = vshrl.u32 %v6373_v6, 16  ;;  %v6608_v20 = vshll.u32 %v6374_v22, 16  ;;  %v6380_v30 = vld [vmem:[#allocation2 + $0x8c] sm:$0x1] }
 0x319   : > { %v6577_v36 = vsel %vm10529_vm5, %v6572_v31, %v6576_v29  ;;  %v6595_v32 = vor.u32 %v6594_v2, %v6591_v63  ;;  %v6613_v62 = vshrl.u32 %v6375_v12, 16  ;;  %v6582_v10 = vrot.slane %v6581_v45, 4  ;;  %v6381_v44 = vld [vmem:[#allocation2 + $0x90] sm:$0xf]  ;;  %v8207_v63 = vld [vmem:[#allocation3 + $0x90] sm:$0xff] }
 0x31a   : > { %7867 = vrot.lane.b32.xlu0 %v9813_v18, %s10381_s22  ;;  %v6604_v35 = vrot.slane %v6602_v59, 4  ;;  %v6616_v40 = vshll.u32 %v6375_v12, 16  ;;  %v6622_v34 = vshll.u32 %v6376_v0, 16  ;;  %v6610_v8 = vrot.slane %v6608_v20, 5  ;;  %v6382_v45 = vld [vmem:[#allocation2 + $0x94] sm:$0xf] }
 0x31b   : > { %v6596_v7 = vrot.slane %v6595_v32, 4  ;;  %v6615_v54 = vrot.slane %v6613_v62, 4  ;;  %v6626_v37 = vshrl.u32 %v6376_v0, 16  ;;  %v6587_v5 = vsel %vm10529_vm5, %v6582_v10, %v6586_v46  ;;  %v13332_v55 = vpop.permute.xlu0 %7313  ;;  %v13345_v10 = vpop.permute.xlu1 %6129 }
 0x31c   : > { %v6605_v49 = vor.u32 %v6604_v35, %v6600_v27  ;;  %v6618_v42 = vrot.slane %v6616_v40, 5  ;;  %v6624_v6 = vrot.slane %v6622_v34, 5  ;;  %v9741_v29 = vcombine.low %v6577_v36, %v6587_v5  ;;  %v6383_v40 = vld [vmem:[#allocation2 + $0x98] sm:$0x1] }
 0x31d   : > { %v6601_v19 = vsel %vm10529_vm5, %v6596_v7, %v6600_v27  ;;  %v6628_v58 = vrot.slane %v6626_v37, 4  ;;  %v6632_v57 = vshll.u32 %v6377_v26, 16  ;;  %v6637_v15 = vshrl.u32 %v6378_v38, 16 }
 0x31e   : > { %v6606_v51 = vrot.slane %v6605_v49, 4  ;;  %v6619_v22 = vor.u32 %v6618_v42, %v6615_v54  ;;  %v6640_v14 = vshll.u32 %v6378_v38, 16  ;;  %6851 = vst.msk [vmem:[#allocation3 + $0xb0] sm:$0xff] %vm514_vm6, %v9741_v29  ;;  %v6646_v24 = vshll.u32 %v6379_v1, 16  ;;  %v6385_v49 = vld [vmem:[#allocation2 + $0xa0] sm:$0xf] }
 0x31f   : > { %v8208_v39 = vld [vmem:[#allocation3 + $0x98] sm:$0xff]  ;;  %v6629_v56 = vor.u32 %v6628_v58, %v6624_v6  ;;  %v6634_v46 = vrot.slane %v6632_v57, 5  ;;  %v6650_v12 = vshrl.u32 %v6379_v1, 16  ;;  %7171 = vst.msk [vmem:[#allocation3 + $0xb0] sm:$0xff] %vm1130_vm7, %v13135_v25  ;;  %v6639_v0 = vrot.slane %v6637_v15, 4 }
 0x320   : > { %v6611_v31 = vsel %vm10529_vm5, %v6606_v51, %v6610_v8  ;;  %8516 = vmatprep.mubr.bf16.mxu1 %v8208_v39  ;;  %v6620_v2 = vrot.slane %v6619_v22, 4  ;;  %v6642_v18 = vrot.slane %v6640_v14, 5  ;;  %7348 = vst.msk [vmem:[#allocation3 + $0xb0] sm:$0xff] %vm1494_vm8, %v13157_v53  ;;  %v6648_v36 = vrot.slane %v6646_v24, 5  ;;  %v6384_v8 = vld [vmem:[#allocation2 + $0x9c] sm:$0xf]  ;;  %v7856_v38 = vpop.permute.xlu0 %7855  ;;  %v13365_v39 = vpop.permute.xlu1 %6306 }
 0x321   : > { %v9742_v27 = vcombine.low %v6601_v19, %v6611_v31  ;;  %8517 = vmatmul.mubr.bf16.gmra.mrb[60].mxu1 %v8207_v63  ;;  %v6630_v59 = vrot.slane %v6629_v56, 4  ;;  %v6652_v32 = vrot.slane %v6650_v12, 4  ;;  %7892 = vst.msk [vmem:[#allocation3 + $0xb0] sm:$0xff] %vm1697_vm9, %v13244_v52  ;;  %v6656_v62 = vshll.u32 %v6380_v30, 16  ;;  %v6386_v30 = vld [vmem:[#allocation2 + $0xa4] sm:$0x1] }
 0x322   : > { %v6625_v25 = vsel %vm10529_vm5, %v6620_v2, %v6624_v6  ;;  %v6643_v20 = vor.u32 %v6642_v18, %v6639_v0  ;;  %v6661_v35 = vshrl.u32 %v6381_v44, 16  ;;  %v6664_v34 = vshll.u32 %v6381_v44, 16  ;;  %v6387_v14 = vld [vmem:[#allocation2 + $0xa8] sm:$0xf]  ;;  %v6388_v12 = vld [vmem:[#allocation2 + $0xac] sm:$0xf] }
 0x323   : > { %6852 = vst.msk [vmem:[#allocation3 + $0xc8] sm:$0xff] %vm514_vm6, %v9742_v27  ;;  %v6635_v53 = vsel %vm10529_vm5, %v6630_v59, %v6634_v46  ;;  %v6653_v26 = vor.u32 %v6652_v32, %v6648_v36  ;;  %v6670_v7 = vshll.u32 %v6382_v45, 16  ;;  %v6658_v37 = vrot.slane %v6656_v62, 5  ;;  %v13367_v44 = vpop.f32.mrb[80].mxu0 }
 0x324   : > { %7172 = vst.msk [vmem:[#allocation3 + $0xc8] sm:$0xff] %vm1130_vm7, %v13211_v21  ;;  %v9743_v52 = vcombine.low %v6625_v25, %v6635_v53  ;;  %v6644_v54 = vrot.slane %v6643_v20, 4  ;;  %v6663_v5 = vrot.slane %v6661_v35, 4  ;;  %v6666_v6 = vrot.slane %v6664_v34, 5  ;;  %v7139_v2 = vpop.permute.xlu0 %7138  ;;  %v6389_v53 = vld [vmem:[#allocation2 + $0xb0] sm:$0x1] }
 0x325   : > { %7349 = vst.msk [vmem:[#allocation3 + $0xc8] sm:$0xff] %vm1494_vm8, %v13225_v17  ;;  %v6654_v42 = vrot.slane %v6653_v26, 4  ;;  %v6672_v1 = vrot.slane %v6670_v7, 5  ;;  %v6674_v29 = vshrl.u32 %v6382_v45, 16  ;;  %v6680_v19 = vshll.u32 %v6383_v40, 16  ;;  %v13370_v45 = vpop.f32.mrb[81].mxu0 }
 0x326   : > { %6853 = vst.msk [vmem:[#allocation3 + $0xe0] sm:$0xff] %vm514_vm6, %v9743_v52  ;;  %v6649_v21 = vsel %vm10529_vm5, %v6644_v54, %v6648_v36  ;;  %v6685_v58 = vshrl.u32 %v6384_v8, 16  ;;  %v6688_v57 = vshll.u32 %v6384_v8, 16  ;;  %v6667_v51 = vor.u32 %v6666_v6, %v6663_v5  ;;  %v13373_v25 = vpop.f32.mrb[82].mxu0  ;;  %v6390_v54 = vld [vmem:[#allocation2 + $0xb4] sm:$0xf] }
 0x327   : > { %7893 = vst.msk [vmem:[#allocation3 + $0xc8] sm:$0xff] %vm1697_vm9, %v13304_v4  ;;  %v6659_v17 = vsel %vm10529_vm5, %v6654_v42, %v6658_v37  ;;  %v6676_v22 = vrot.slane %v6674_v29, 4  ;;  %v6694_v15 = vshll.u32 %v6385_v49, 16  ;;  %v6682_v56 = vrot.slane %v6680_v19, 5  ;;  %v13379_v40 = vpop.f32.mrb[83].mxu0 }
 0x328   : > { %7173 = vst.msk [vmem:[#allocation3 + $0xe0] sm:$0xff] %vm1130_vm7, %v13270_v9  ;;  %v9744_v4 = vcombine.low %v6649_v21, %v6659_v17  ;;  %v6687_v46 = vrot.slane %v6685_v58, 4  ;;  %v6690_v24 = vrot.slane %v6688_v57, 5  ;;  %v8211_v9 = vld [vmem:[#allocation3 + $0xb0] sm:$0xff]  ;;  %v6668_v31 = vrot.slane %v6667_v51, 4  ;;  %v7316_v19 = vpop.permute.xlu0 %7315 }
 0x329   : > { %7350 = vst.msk [vmem:[#allocation3 + $0xe0] sm:$0xff] %vm1494_vm8, %v13291_v28  ;;  %v6677_v63 = vor.u32 %v6676_v22, %v6672_v1  ;;  %v6696_v0 = vrot.slane %v6694_v15, 5  ;;  %v6698_v18 = vshrl.u32 %v6385_v49, 16  ;;  %8524 = vmatprep.mubr.bf16.mxu1 %v8211_v9  ;;  %v8210_v28 = vld [vmem:[#allocation3 + $0xa8] sm:$0xff]  ;;  %v6704_v59 = vshll.u32 %v6386_v30, 16 }
 0x32a   : > { %7894 = vst.msk [vmem:[#allocation3 + $0xe0] sm:$0xff] %vm1697_vm9, %v7856_v38  ;;  %v6691_v27 = vor.u32 %v6690_v24, %v6687_v46  ;;  %v6709_v36 = vshrl.u32 %v6387_v14, 16  ;;  %v6712_v32 = vshll.u32 %v6387_v14, 16  ;;  %8525 = vmatmul.mubr.bf16.gmra.mrb[64].mxu1 %v8210_v28  ;;  %v6673_v20 = vsel %vm10529_vm5, %v6668_v31, %v6672_v1  ;;  %v6391_v42 = vld [vmem:[#allocation2 + $0xb8] sm:$0xf] }
 0x32b   : > { %6854 = vst.msk [vmem:[#allocation3 + $0xf8] sm:$0xff] %vm514_vm6, %v9744_v4  ;;  %v6678_v62 = vrot.slane %v6677_v63, 4  ;;  %v6700_v35 = vrot.slane %v6698_v18, 4  ;;  %v6718_v26 = vshll.u32 %v6388_v12, 16  ;;  %v6706_v7 = vrot.slane %v6704_v59, 5  ;;  %v5810_v1 = vpop.permute.xlu1 %5809 }
 0x32c   : > { %7174 = vst.msk [vmem:[#allocation3 + $0xf8] sm:$0xff] %vm1130_vm7, %v13322_v23  ;;  %v6692_v34 = vrot.slane %v6691_v27, 4  ;;  %v6711_v8 = vrot.slane %v6709_v36, 4  ;;  %v6714_v52 = vrot.slane %v6712_v32, 5  ;;  %v6722_v49 = vshrl.u32 %v6388_v12, 16  ;;  %5846 = vst.msk [vmem:[#allocation3 + $0x108] sm:$0xff] %vm1130_vm7, %v5810_v1 }
 0x32d   : > { %7351 = vst.msk [vmem:[#allocation3 + $0xf8] sm:$0xff] %vm1494_vm8, %v13332_v55  ;;  %v6683_v23 = vsel %vm10529_vm5, %v6678_v62, %v6682_v56  ;;  %v6701_v38 = vor.u32 %v6700_v35, %v6696_v0  ;;  %v6720_v5 = vrot.slane %v6718_v26, 5  ;;  %v6728_v21 = vshll.u32 %v6389_v53, 16  ;;  %v6392_v17 = vld [vmem:[#allocation2 + $0xbc] sm:$0x1]  ;;  %6166 = vst.msk [vmem:[#allocation3 + $0x108] sm:$0xff] %vm1494_vm8, %v13345_v10 }
 0x32e   : > { %v8214_v37 = vld [vmem:[#allocation3 + $0xc8] sm:$0xff]  ;;  %v9745_v6 = vcombine.low %v6673_v20, %v6683_v23  ;;  %v6697_v29 = vsel %vm10529_vm5, %v6692_v34, %v6696_v0  ;;  %v6715_v55 = vor.u32 %v6714_v52, %v6711_v8  ;;  %v6724_v57 = vrot.slane %v6722_v49, 4  ;;  %6343 = vst.msk [vmem:[#allocation3 + $0x108] sm:$0xff] %vm1697_vm9, %v13365_v39  ;;  %v8213_v0 = vld [vmem:[#allocation3 + $0xc0] sm:$0xff]  ;;  %v6395_v36 = vld [vmem:[#allocation2 + $0xc8] sm:$0x1] }
 0x32f   : > { %8532 = vmatprep.mubr.bf16.mxu1 %v8214_v37  ;;  %v6702_v58 = vrot.slane %v6701_v38, 4  ;;  %v6733_v51 = vshrl.u32 %v6390_v54, 16  ;;  %v6736_v22 = vshll.u32 %v6390_v54, 16  ;;  %v6730_v15 = vrot.slane %v6728_v21, 5  ;;  %v6393_v56 = vld [vmem:[#allocation2 + $0xc0] sm:$0xf] }
 0x330   : > { %6855 = vst.msk [vmem:[#allocation3 + $0x110] sm:$0xff] %vm514_vm6, %v9745_v6  ;;  %v6716_v30 = vrot.slane %v6715_v55, 4  ;;  %v6742_v14 = vshll.u32 %v6391_v42, 16  ;;  %v6746_v4 = vshrl.u32 %v6391_v42, 16  ;;  %v6725_v12 = vor.u32 %v6724_v57, %v6720_v5  ;;  %v6394_v63 = vld [vmem:[#allocation2 + $0xc4] sm:$0xf] }
 0x331   : > { %7175 = vst.msk [vmem:[#allocation3 + $0x110] sm:$0xff] %vm1130_vm7, %v7139_v2  ;;  %v8217_v46 = vld [vmem:[#allocation3 + $0xe0] sm:$0xff]  ;;  %v6707_v24 = vsel %vm10529_vm5, %v6702_v58, %v6706_v7  ;;  %v6735_v9 = vrot.slane %v6733_v51, 4  ;;  %v6738_v31 = vrot.slane %v6736_v22, 5  ;;  %v6752_v59 = vshll.u32 %v6392_v17, 16 }
 0x332   : > { %7352 = vst.msk [vmem:[#allocation3 + $0x110] sm:$0xff] %vm1494_vm8, %v7316_v19  ;;  %v9746_v10 = vcombine.low %v6697_v29, %v6707_v24  ;;  %v6721_v18 = vsel %vm10529_vm5, %v6716_v30, %v6720_v5  ;;  %v6744_v28 = vrot.slane %v6742_v14, 5  ;;  %v6748_v2 = vrot.slane %v6746_v4, 4  ;;  %8533 = vmatmul.mubr.bf16.gmra.mrb[68].mxu1 %v8213_v0  ;;  %v7946_v26 = vld [vmem:[#allocation2 + $0xcc] sm:$0xe]  ;;  %v6132_v29 = vpop.permute.xlu1 %6131  ;;  %v8216_v30 = vld [vmem:[#allocation3 + $0xd8] sm:$0xff] }
 0x333   : > { %v6726_v27 = vrot.slane %v6725_v12, 4  ;;  %v6739_v39 = vor.u32 %v6738_v31, %v6735_v9  ;;  %v6757_v32 = vshrl.u32 %v6393_v56, 16  ;;  %8540 = vmatprep.mubr.bf16.mxu1 %v8217_v46  ;;  %v6760_v62 = vshll.u32 %v6393_v56, 16  ;;  %v7948_v54 = vld [vmem:[#allocation2 + $0xd4] sm:$0x1] }
 0x334   : > { %6856 = vst.msk [vmem:[#allocation3 + $0x128] sm:$0xff] %vm514_vm6, %v9746_v10  ;;  %v6749_v20 = vor.u32 %v6748_v2, %v6744_v28  ;;  %v6766_v35 = vshll.u32 %v6394_v63, 16  ;;  %v6770_v53 = vshrl.u32 %v6394_v63, 16  ;;  %v6754_v8 = vrot.slane %v6752_v59, 5  ;;  %v8219_v63 = vld [vmem:[#allocation3 + $0xf0] sm:$0xff] }
 0x335   : > { %v6731_v34 = vsel %vm10529_vm5, %v6726_v27, %v6730_v15  ;;  %v6740_v7 = vrot.slane %v6739_v39, 4  ;;  %v6759_v52 = vrot.slane %v6757_v32, 4  ;;  %v6762_v38 = vrot.slane %v6760_v62, 5 }
 0x336   : > { %v9747_v37 = vcombine.low %v6721_v18, %v6731_v34  ;;  %v6750_v23 = vrot.slane %v6749_v20, 4  ;;  %v6768_v5 = vrot.slane %v6766_v35, 5  ;;  %v6772_v42 = vrot.slane %v6770_v53, 4  ;;  %v8222_v35 = vld [vmem:[#allocation3 + $0x108] sm:$0xff] }
 0x337   : > { %v6745_v49 = vsel %vm10529_vm5, %v6740_v7, %v6744_v28  ;;  %v6776_v6 = vshll.u32 %v6395_v36, 16  ;;  %v9829_v1 = vrot.slane %v7946_v26, 9  ;;  %v6763_v21 = vor.u32 %v6762_v38, %v6759_v52  ;;  %v7858_v15 = vpop.permute.xlu0 %7857 }
 0x338   : > { %6857 = vst.msk [vmem:[#allocation3 + $0x140] sm:$0xff] %vm514_vm6, %v9747_v37  ;;  %v6755_v55 = vsel %vm10529_vm5, %v6750_v23, %v6754_v8  ;;  %v8106_v19 = vrot.slane %v8104_v43, 4  ;;  %v8107_v58 = vrot.slane %v7948_v54, 5  ;;  %v6773_v17 = vor.u32 %v6772_v42, %v6768_v5 }
 0x339   : > { %v9748_v57 = vcombine.low %v6745_v49, %v6755_v55  ;;  %v6778_v51 = vrot.slane %v6776_v6, 5  ;;  %v8105_v22 = vsel %vm10459_vm2, %v9829_v1, %v8104_v43  ;;  %v6764_v14 = vrot.slane %v6763_v21, 4  ;;  %7895 = vst.msk [vmem:[#allocation3 + $0xf8] sm:$0xff] %vm1697_vm9, %v7858_v15  ;;  %v6309_v43 = vpop.permute.xlu1 %6308 }
 0x33a   : > { %v8108_v4 = vsel %vm10459_vm2, %v8106_v19, %v8107_v58  ;;  %8541 = vmatmul.mubr.bf16.gmra.mrb[72].mxu1 %v8216_v30  ;;  %v6774_v56 = vrot.slane %v6773_v17, 4 }
 0x33b   : > { %6858 = vst.msk [vmem:[#allocation3 + $0x158] sm:$0xff] %vm514_vm6, %v9748_v57  ;;  %v9845_v46 = vcombine.low %v8105_v22, %v8108_v4  ;;  %v6769_v24 = vsel %vm10529_vm5, %v6764_v14, %v6768_v5  ;;  %v7141_v12 = vpop.permute.xlu0 %7140  ;;  %v13452_v5 = vld [vmem:[%s13643_s5] ss:$0 sm:$0xff] }
 0x33c   : > { %v6779_v11 = vsel %vm10529_vm5, %v6774_v56, %v6778_v51  ;;  %7176 = vst.msk [vmem:[#allocation3 + $0x128] sm:$0xff] %vm1130_vm7, %v7141_v12 }
 0x33d   : > { %8188 = vst.msk [vmem:[#allocation3 + $0x178] sm:$0xff] %vm514_vm6, %v9845_v46  ;;  %v9749_v9 = vcombine.low %v6769_v24, %v6779_v11 }
 0x33f   : > { %6859 = vst.msk [vmem:[#allocation3 + $0x170] sm:$0xff] %vm514_vm6, %v9749_v9  ;;  %v7318_v3 = vpop.permute.xlu0 %7317 }
 0x340   : > { %v8220_v31 = vld [vmem:[#allocation3 + $0xf8] sm:$0xff]  ;;  %7353 = vst.msk [vmem:[#allocation3 + $0x128] sm:$0xff] %vm1494_vm8, %v7318_v3 }
 0x341   : > { %8548 = vmatprep.mubr.bf16.mxu1 %v8220_v31 }
 0x342   : > { %v5812_v0 = vpop.permute.xlu1 %5811  ;;  %8549 = vmatmul.mubr.bf16.gmra.mrb[76].mxu1 %v8219_v63 }
 0x343   : > { %5847 = vst.msk [vmem:[#allocation3 + $0x120] sm:$0xff] %vm1130_vm7, %v5812_v0 }
 0x344   : > { %v8236_v10 = vld [vmem:[#allocation3 + $0x178] sm:$0xff]  ;;  %6167 = vst.msk [vmem:[#allocation3 + $0x120] sm:$0xff] %vm1494_vm8, %v6132_v29 }
 0x345   : > { %10163 = vmatmul.mubr.msk.bf16.gmra.mrb[100].mxu0 %vm514_vm6, %v8236_v10  ;;  %6344 = vst.msk [vmem:[#allocation3 + $0x120] sm:$0xff] %vm1697_vm9, %v6309_v43 }
 0x348   : > { %v6134_v13 = vpop.permute.xlu1 %6133  ;;  %v13429_v18 = vpop.f32.mrb[84].mxu0 }
 0x349   : > { %v13431_v28 = vpop.f32.mrb[85].mxu0 }
 0x34a   : > { %v13433_v2 = vpop.f32.mrb[86].mxu0 }
 0x34b   : > { %v13435_v27 = vpop.f32.mrb[87].mxu0 }
 0x34c   : > { %v6311_v59 = vpop.permute.xlu1 %6310  ;;  %v8225_v37 = vld [vmem:[#allocation3 + $0x120] sm:$0xff] }
 0x353   : > { %v7860_v39 = vpop.permute.xlu0 %7859 }
 0x354   : > { %7896 = vst.msk [vmem:[#allocation3 + $0x110] sm:$0xff] %vm1697_vm9, %v7860_v39 }
 0x357   : > { %v7143_v36 = vpop.permute.xlu0 %7142 }
 0x358   : > { %7177 = vst.msk [vmem:[#allocation3 + $0x140] sm:$0xff] %vm1130_vm7, %v7143_v36 }
 0x35a   : > { %v5814_v32 = vpop.permute.xlu1 %5813 }
 0x35b   : > { %5848 = vst.msk [vmem:[#allocation3 + $0x138] sm:$0xff] %vm1130_vm7, %v5814_v32  ;;  %v7320_v20 = vpop.permute.xlu0 %7319  ;;  %v8223_v62 = vld [vmem:[#allocation3 + $0x110] sm:$0xff] }
 0x35c   : > { %6168 = vst.msk [vmem:[#allocation3 + $0x138] sm:$0xff] %vm1494_vm8, %v6134_v13  ;;  %7354 = vst.msk [vmem:[#allocation3 + $0x140] sm:$0xff] %vm1494_vm8, %v7320_v20  ;;  %8556 = vmatprep.mubr.bf16.mxu1 %v8223_v62 }
 0x35d   : > { %6345 = vst.msk [vmem:[#allocation3 + $0x138] sm:$0xff] %vm1697_vm9, %v6311_v59  ;;  %8557 = vmatmul.mubr.bf16.gmra.mrb[80].mxu1 %v8222_v35 }
 0x35f   : > { %v6136_v53 = vpop.permute.xlu1 %6135 }
 0x363   : > { %v6313_v34 = vpop.permute.xlu1 %6312 }
 0x364   : > { %v8228_v4 = vld [vmem:[#allocation3 + $0x138] sm:$0xff] }
 0x367   : > { %v7862_v26 = vpop.permute.xlu0 %7861 }
 0x368   : > { %7897 = vst.msk [vmem:[#allocation3 + $0x128] sm:$0xff] %vm1697_vm9, %v7862_v26 }
 0x36b   : > { %v7145_v7 = vpop.permute.xlu0 %7144 }
 0x36c   : > { %7178 = vst.msk [vmem:[#allocation3 + $0x158] sm:$0xff] %vm1130_vm7, %v7145_v7 }
 0x36d   : > { %v5816_v8 = vpop.permute.xlu1 %5815 }
 0x36e   : > { %5849 = vst.msk [vmem:[#allocation3 + $0x150] sm:$0xff] %vm1130_vm7, %v5816_v8 }
 0x36f   : > { %6169 = vst.msk [vmem:[#allocation3 + $0x150] sm:$0xff] %vm1494_vm8, %v6136_v53  ;;  %v7322_v52 = vpop.permute.xlu0 %7321  ;;  %v8226_v54 = vld [vmem:[#allocation3 + $0x128] sm:$0xff] }
 0x370   : > { %6346 = vst.msk [vmem:[#allocation3 + $0x150] sm:$0xff] %vm1697_vm9, %v6313_v34  ;;  %8564 = vmatprep.mubr.bf16.mxu1 %v8226_v54 }
 0x371   : > { %7355 = vst.msk [vmem:[#allocation3 + $0x158] sm:$0xff] %vm1494_vm8, %v7322_v52  ;;  %8565 = vmatmul.mubr.bf16.gmra.mrb[84].mxu1 %v8225_v37 }
 0x372   : > { %v9958_v23 = vpop.f32.mrb[36].mxu1  ;;  %v6138_v38 = vpop.permute.xlu1 %6137 }
 0x373   : > { %v9959_v49 = vpop.f32.mrb[37].mxu1 }
 0x374   : > { %v9960_v6 = vadd.f32 %v9959_v49, %v9958_v23  ;;  %v9961_v1 = vpop.f32.mrb[38].mxu1 }
 0x375   : > { %v9962_v29 = vpop.f32.mrb[39].mxu1 }
 0x376   : > { %v8471_v55 = vadd.f32 %v9960_v6, %v13452_v5  ;;  %v9963_v21 = vadd.f32 %v9962_v29, %v9961_v1 }
 0x377   : > { %v8231_v10 = vld [vmem:[#allocation3 + $0x150] sm:$0xff] }
 0x378   : > { %v7864_v42 = vpop.permute.xlu0 %7863  ;;  %v8632_v58 = vadd.f32 %v13043_v48, %v8471_v55  ;;  %v8474_v57 = vadd.f32 %v9963_v21, %v13452_v5 }
 0x379   : > { %7898 = vst.msk [vmem:[#allocation3 + $0x140] sm:$0xff] %vm1697_vm9, %v7864_v42 }
 0x37a   : > { %v8635_v51 = vadd.f32 %v13053_v33, %v8474_v57  ;;  %v8758_v62 = vmax.f32 %v8632_v58, 0.0 }
 0x37b   : > { %v13462_v22 = vpop.f32.mrb[88].mxu0 }
 0x37c   : > { %v7147_v19 = vpop.permute.xlu0 %7146  ;;  %v13464_v15 = vpop.f32.mrb[89].mxu0  ;;  %v8759_v20 = vmax.f32 %v8635_v51, 0.0 }
 0x37d   : > { %v5818_v17 = vpop.permute.xlu1 %5817  ;;  %7179 = vst.msk [vmem:[#allocation3 + $0x170] sm:$0xff] %vm1130_vm7, %v7147_v19  ;;  %v13466_v48 = vpop.f32.mrb[90].mxu0 }
 0x37e   : > { %5850 = vst.msk [vmem:[#allocation3 + $0x168] sm:$0xff] %vm1130_vm7, %v5818_v17  ;;  %v13469_v56 = vpop.f32.mrb[91].mxu0  ;;  %v13478_v35 = vpack.c.bf16 %v8759_v20, %v8758_v62 }
 0x37f   : > { %6170 = vst.msk [vmem:[#allocation3 + $0x168] sm:$0xff] %vm1494_vm8, %v6138_v38 }
 0x380   : > { %v8229_v30 = vld [vmem:[#allocation3 + $0x140] sm:$0xff] }
 0x381   : > { %v6315_v14 = vpop.permute.xlu1 %6314  ;;  %8572 = vmatprep.mubr.bf16.mxu1 %v8229_v30 }
 0x382   : > { %6347 = vst.msk [vmem:[#allocation3 + $0x168] sm:$0xff] %vm1697_vm9, %v6315_v14  ;;  %8573 = vmatmul.mubr.bf16.gmra.mrb[88].mxu1 %v8228_v4  ;;  %v7866_v46 = vpop.permute.xlu0 %7865  ;;  %v9964_v33 = vpop.f32.mrb[40].mxu1 }
 0x383   : > { %7899 = vst.msk [vmem:[#allocation3 + $0x158] sm:$0xff] %vm1697_vm9, %v7866_v46  ;;  %v9965_v11 = vpop.f32.mrb[41].mxu1 }
 0x384   : > { %v9966_v43 = vadd.f32 %v9965_v11, %v9964_v33  ;;  %v9967_v12 = vpop.f32.mrb[42].mxu1 }
 0x385   : > { %v9968_v9 = vpop.f32.mrb[43].mxu1 }
 0x386   : > { %v7324_v24 = vpop.permute.xlu0 %7323  ;;  %v8479_v3 = vadd.f32 %v9966_v43, %v13452_v5  ;;  %v9969_v31 = vadd.f32 %v9968_v9, %v9967_v12 }
 0x387   : > { %7356 = vst.msk [vmem:[#allocation3 + $0x170] sm:$0xff] %vm1494_vm8, %v7324_v24 }
 0x388   : > { %v8640_v13 = vadd.f32 %v13035_v47, %v8479_v3  ;;  %v8482_v39 = vadd.f32 %v9969_v31, %v13452_v5 }
 0x389   : > { %v8234_v32 = vld [vmem:[#allocation3 + $0x168] sm:$0xff] }
 0x38a   : > { %v8232_v63 = vld [vmem:[#allocation3 + $0x158] sm:$0xff]  ;;  %v8643_v59 = vadd.f32 %v13048_v50, %v8482_v39  ;;  %v8760_v7 = vmax.f32 %v8640_v13, 0.0 }
 0x38b   : > { %8580 = vmatprep.mubr.bf16.mxu1 %v8232_v63 }
 0x38c   : > { %v7868_v0 = vpop.permute.xlu0 %7867  ;;  %8581 = vmatmul.mubr.bf16.gmra.mrb[92].mxu1 %v8231_v10  ;;  %v8761_v53 = vmax.f32 %v8643_v59, 0.0 }
 0x38d   : > { %7900 = vst.msk [vmem:[#allocation3 + $0x170] sm:$0xff] %vm1697_vm9, %v7868_v0 }
 0x38e   : > { %v13481_v23 = vpack.c.bf16 %v8761_v53, %v8760_v7 }
 0x394   : > { %v8235_v36 = vld [vmem:[#allocation3 + $0x170] sm:$0xff] }
 0x395   : > { %8588 = vmatprep.mubr.bf16.mxu1 %v8235_v36 }
 0x396   : > { %8589 = vmatmul.mubr.bf16.gmra.mrb[96].mxu1 %v8234_v32 }
 0x39d   : > { %v9970_v26 = vpop.f32.mrb[44].mxu1 }
 0x39e   : > { %v9971_v34 = vpop.f32.mrb[45].mxu1 }
 0x39f   : > { %v9972_v47 = vadd.f32 %v9971_v34, %v9970_v26  ;;  %v9973_v8 = vpop.f32.mrb[46].mxu1 }
 0x3a0   : > { %v9974_v52 = vpop.f32.mrb[47].mxu1 }
 0x3a1   : > { %v8487_v54 = vadd.f32 %v9972_v47, %v13452_v5  ;;  %v9975_v37 = vadd.f32 %v9974_v52, %v9973_v8 }
 0x3a3   : > { %v8648_v50 = vadd.f32 %v13248_v41, %v8487_v54  ;;  %v8490_v38 = vadd.f32 %v9975_v37, %v13452_v5 }
 0x3a5   : > { %v8651_v49 = vadd.f32 %v13259_v60, %v8490_v38  ;;  %v8762_v58 = vmax.f32 %v8648_v50, 0.0 }
 0x3a7   : > { %v8763_v55 = vmax.f32 %v8651_v49, 0.0 }
 0x3a8   : > { %v13486_v42 = vpop.f32.mrb[92].mxu0 }
 0x3a9   : > { %v13488_v6 = vpop.f32.mrb[93].mxu0  ;;  %v13495_v14 = vpack.c.bf16 %v8763_v55, %v8762_v58 }
 0x3aa   : > { %v13490_v1 = vpop.f32.mrb[94].mxu0 }
 0x3ab   : > { %v13492_v29 = vpop.f32.mrb[95].mxu0 }
 0x3b9   : > { %v9976_v21 = vpop.f32.mrb[48].mxu1 }
 0x3ba   : > { %v9977_v19 = vpop.f32.mrb[49].mxu1 }
 0x3bb   : > { %v9978_v57 = vadd.f32 %v9977_v19, %v9976_v21  ;;  %v9979_v17 = vpop.f32.mrb[50].mxu1 }
 0x3bc   : > { %v9980_v51 = vpop.f32.mrb[51].mxu1 }
 0x3bd   : > { %v8495_v41 = vadd.f32 %v9978_v57, %v13452_v5  ;;  %v9981_v30 = vadd.f32 %v9980_v51, %v9979_v17 }
 0x3bf   : > { %v8656_v60 = vadd.f32 %v13240_v16, %v8495_v41  ;;  %v8498_v4 = vadd.f32 %v9981_v30, %v13452_v5 }
 0x3c1   : > { %v8659_v46 = vadd.f32 %v13253_v61, %v8498_v4  ;;  %v8764_v24 = vmax.f32 %v8656_v60, 0.0 }
 0x3c3   : > { %v8765_v33 = vmax.f32 %v8659_v46, 0.0 }
 0x3c5   : > { %v13500_v12 = vpack.c.bf16 %v8765_v33, %v8764_v24  ;;  %v8807_v33 = vld [vmem:[%s13645_s7] sm:$0xf] }
 0x3c6   : > { %8810 = vperm.xlu0 %10204, %v8807_v33  }
 0x3d0   : > { %v9982_v11 = vpop.f32.mrb[52].mxu1 }
 0x3d1   : > { %v9983_v43 = vpop.f32.mrb[53].mxu1 }
 0x3d2   : > { %v9984_v9 = vadd.f32 %v9983_v43, %v9982_v11  ;;  %v9985_v3 = vpop.f32.mrb[54].mxu1 }
 0x3d3   : > { %v9986_v31 = vpop.f32.mrb[55].mxu1  ;;  %v13503_v10 = vpop.f32.mrb[96].mxu0 }
 0x3d4   : > { %v8503_v63 = vadd.f32 %v9984_v9, %v13452_v5  ;;  %v9987_v0 = vadd.f32 %v9986_v31, %v9985_v3  ;;  %v13505_v13 = vpop.f32.mrb[97].mxu0 }
 0x3d5   : > { %v13509_v39 = vpop.f32.mrb[98].mxu0 }
 0x3d6   : > { %v8664_v16 = vadd.f32 %v13370_v45, %v8503_v63  ;;  %v8506_v61 = vadd.f32 %v9987_v0, %v13452_v5  ;;  %v13511_v59 = vpop.f32.mrb[99].mxu0 }
 0x3d8   : > { %v8667_v36 = vadd.f32 %v13379_v40, %v8506_v61  ;;  %v8766_v20 = vmax.f32 %v8664_v16, 0.0 }
 0x3da   : > { %v8767_v32 = vmax.f32 %v8667_v36, 0.0 }
 0x3dc   : > { %v13514_v7 = vpack.c.bf16 %v8767_v32, %v8766_v20 }
 0x3df   : > { %v9988_v62 = vpop.f32.mrb[56].mxu1 }
 0x3e0   : > { %v9989_v53 = vpop.f32.mrb[57].mxu1 }
 0x3e1   : > { %v9990_v26 = vadd.f32 %v9989_v53, %v9988_v62  ;;  %v9991_v34 = vpop.f32.mrb[58].mxu1 }
 0x3e2   : > { %v9992_v47 = vpop.f32.mrb[59].mxu1 }
 0x3e3   : > { %v8511_v8 = vadd.f32 %v9990_v26, %v13452_v5  ;;  %v9993_v45 = vadd.f32 %v9992_v47, %v9991_v34 }
 0x3e5   : > { %v8672_v52 = vadd.f32 %v13367_v44, %v8511_v8  ;;  %v8514_v54 = vadd.f32 %v9993_v45, %v13452_v5  ;;  %v13526_v44 = vld [vmem:[%s13644_s6] sm:$0x3] }
 0x3e6   : > { %10088 = vmatprep.mubr.msk.bf16.mxu1 %vm514_vm6, %v13526_v44 }
 0x3e7   : > { %v8675_v37 = vadd.f32 %v13373_v25, %v8514_v54  ;;  %v8768_v40 = vmax.f32 %v8672_v52, 0.0 }
 0x3e9   : > { %v8769_v50 = vmax.f32 %v8675_v37, 0.0 }
 0x3eb   : > { %v13520_v38 = vpack.c.bf16 %v8769_v50, %v8768_v40 }
 0x3f4   : > { %v9994_v49 = vpop.f32.mrb[60].mxu1 }
 0x3f5   : > { %v9995_v55 = vpop.f32.mrb[61].mxu1 }
 0x3f6   : > { %v9996_v21 = vadd.f32 %v9995_v55, %v9994_v49  ;;  %v9997_v19 = vpop.f32.mrb[62].mxu1 }
 0x3f7   : > { %v9998_v58 = vpop.f32.mrb[63].mxu1 }
 0x3f8   : > { %v8519_v57 = vadd.f32 %v9996_v21, %v13452_v5  ;;  %v9999_v17 = vadd.f32 %v9998_v58, %v9997_v19 }
 0x3fa   : > { %v8680_v25 = vadd.f32 %v13431_v28, %v8519_v57  ;;  %v8522_v51 = vadd.f32 %v9999_v17, %v13452_v5 }
 0x3fc   : > { %v8683_v41 = vadd.f32 %v13435_v27, %v8522_v51  ;;  %v8770_v30 = vmax.f32 %v8680_v25, 0.0 }
 0x3fd   : > { %v10000_v4 = vpop.f32.mrb[64].mxu1 }
 0x3fe   : > { %v8771_v60 = vmax.f32 %v8683_v41, 0.0  ;;  %v10001_v46 = vpop.f32.mrb[65].mxu1 }
 0x3ff   : > { %v10002_v24 = vadd.f32 %v10001_v46, %v10000_v4  ;;  %v10003_v11 = vpop.f32.mrb[66].mxu1 }
 0x400   : > { %v13536_v43 = vpack.c.bf16 %v8771_v60, %v8770_v30  ;;  %v10004_v9 = vpop.f32.mrb[67].mxu1 }
 0x401   : > { %v8527_v28 = vadd.f32 %v10002_v24, %v13452_v5  ;;  %v10005_v3 = vadd.f32 %v10004_v9, %v10003_v11 }
 0x403   : > { %v8688_v31 = vadd.f32 %v13429_v18, %v8527_v28  ;;  %v8530_v27 = vadd.f32 %v10005_v3, %v13452_v5 }
 0x405   : > { %v8691_v63 = vadd.f32 %v13433_v2, %v8530_v27  ;;  %v10006_v0 = vpop.f32.mrb[68].mxu1  ;;  %v8772_v61 = vmax.f32 %v8688_v31, 0.0 }
 0x406   : > { %v10007_v16 = vpop.f32.mrb[69].mxu1 }
 0x407   : > { %v8773_v36 = vmax.f32 %v8691_v63, 0.0  ;;  %v10008_v32 = vadd.f32 %v10007_v16, %v10006_v0  ;;  %v10009_v20 = vpop.f32.mrb[70].mxu1  ;;  %v8823_v0 = vsel %vm514_vm6, %v13495_v14, 0  ;;  %v8826_v14 = vsel %vm514_vm6, %v13500_v12, 0 }
 0x408   : > { %v10010_v62 = vpop.f32.mrb[71].mxu1  ;;  %v8829_v12 = vsel %vm514_vm6, %v13514_v7, 0 }
 0x409   : > { %v8535_v53 = vadd.f32 %v10008_v32, %v13452_v5  ;;  %v10011_v26 = vadd.f32 %v10010_v62, %v10009_v20  ;;  %v13543_v34 = vpack.c.bf16 %v8773_v36, %v8772_v61 }
 0x40b   : > { %v8696_v47 = vadd.f32 %v13464_v15, %v8535_v53  ;;  %v8538_v18 = vadd.f32 %v10011_v26, %v13452_v5 }
 0x40d   : > { %v8699_v8 = vadd.f32 %v13469_v56, %v8538_v18  ;;  %v10012_v45 = vpop.f32.mrb[72].mxu1  ;;  %v8774_v52 = vmax.f32 %v8696_v47, 0.0  ;;  %v8817_v56 = vsel %vm514_vm6, %v13478_v35, 0 }
 0x40e   : > { %v10013_v2 = vpop.f32.mrb[73].mxu1 }
 0x40f   : > { %v8775_v54 = vmax.f32 %v8699_v8, 0.0  ;;  %v10014_v37 = vadd.f32 %v10013_v2, %v10012_v45  ;;  %v10015_v50 = vpop.f32.mrb[74].mxu1 }
 0x410   : > { %v10016_v40 = vpop.f32.mrb[75].mxu1 }
 0x411   : > { %v8798_v49 = vpack.c.bf16 %v8775_v54, %v8774_v52  ;;  %v8543_v55 = vadd.f32 %v10014_v37, %v13452_v5  ;;  %v10017_v21 = vadd.f32 %v10016_v40, %v10015_v50 }
 0x413   : > { %v8704_v19 = vadd.f32 %v13462_v22, %v8543_v55  ;;  %10166 = vmatprep.subr.msk.bf16.mxu1 %vm514_vm6, %v8798_v49  ;;  %v8546_v15 = vadd.f32 %v10017_v21, %v13452_v5 }
 0x414   : > { %10073 = vmatpush3.bf16.xpose.msra.mxu1 %v8817_v56 }
 0x415   : > { %v8707_v58 = vadd.f32 %v13466_v48, %v8546_v15  ;;  %v10018_v57 = vpop.f32.mrb[76].mxu1  ;;  %v8776_v17 = vmax.f32 %v8704_v19, 0.0  ;;  %v8820_v48 = vsel %vm514_vm6, %v13481_v23, 0 }
 0x416   : > { %v10019_v51 = vpop.f32.mrb[77].mxu1 }
 0x417   : > { %v8777_v25 = vmax.f32 %v8707_v58, 0.0  ;;  %v10020_v30 = vadd.f32 %v10019_v51, %v10018_v57  ;;  %v10021_v60 = vpop.f32.mrb[78].mxu1 }
 0x418   : > { %v13555_v41 = vpop.f32.mrb[100].mxu0  ;;  %v10022_v46 = vpop.f32.mrb[79].mxu1 }
 0x419   : > { %v13557_v4 = vpop.f32.mrb[101].mxu0  ;;  %v8799_v22 = vpack.c.bf16 %v8777_v25, %v8776_v17  ;;  %v8551_v24 = vadd.f32 %v10020_v30, %v13452_v5  ;;  %v10023_v35 = vadd.f32 %v10022_v46, %v10021_v60 }
 0x41a   : > { %v13559_v33 = vpop.f32.mrb[102].mxu0 }
 0x41b   : > { %v13562_v11 = vpop.f32.mrb[103].mxu0  ;;  %10167 = vmatprep.subr.msk.bf16.mxu1 %vm514_vm6, %v8799_v22  ;;  %v8712_v9 = vadd.f32 %v13488_v6, %v8551_v24  ;;  %v8554_v28 = vadd.f32 %v10023_v35, %v13452_v5 }
 0x41c   : > { %10075 = vmatpush3.bf16.xpose.msra.mxu1 %v8820_v48 }
 0x41d   : > { %v8715_v3 = vadd.f32 %v13492_v29, %v8554_v28  ;;  %v8778_v31 = vmax.f32 %v8712_v9, 0.0  ;;  %v8832_v9 = vsel %vm514_vm6, %v13520_v38, 0 }
 0x41f   : > { %v8779_v27 = vmax.f32 %v8715_v3, 0.0 }
 0x421   : > { %v8800_v63 = vpack.c.bf16 %v8779_v27, %v8778_v31 }
 0x423   : > { %10168 = vmatprep.subr.msk.bf16.mxu1 %vm514_vm6, %v8800_v63 }
 0x424   : > { %10077 = vmatpush3.bf16.xpose.msra.mxu1 %v8823_v0 }
 0x430   : > { %v10024_v16 = vpop.f32.mrb[80].mxu1 }
 0x431   : > { %v10025_v61 = vpop.f32.mrb[81].mxu1 }
 0x432   : > { %v10026_v36 = vadd.f32 %v10025_v61, %v10024_v16  ;;  %v10027_v23 = vpop.f32.mrb[82].mxu1 }
 0x433   : > { %v10028_v32 = vpop.f32.mrb[83].mxu1 }
 0x434   : > { %v8559_v6 = vadd.f32 %v10026_v36, %v13452_v5  ;;  %v10029_v20 = vadd.f32 %v10028_v32, %v10027_v23 }
 0x436   : > { %v8720_v62 = vadd.f32 %v13486_v42, %v8559_v6  ;;  %v8562_v29 = vadd.f32 %v10029_v20, %v13452_v5 }
 0x438   : > { %v8723_v53 = vadd.f32 %v13490_v1, %v8562_v29  ;;  %v8780_v26 = vmax.f32 %v8720_v62, 0.0 }
 0x43a   : > { %v8781_v47 = vmax.f32 %v8723_v53, 0.0 }
 0x43c   : > { %v8801_v18 = vpack.c.bf16 %v8781_v47, %v8780_v26  ;;  %v8838_v47 = vsel %vm514_vm6, %v13543_v34, 0 }
 0x43e   : > { %10169 = vmatprep.subr.msk.bf16.mxu1 %vm514_vm6, %v8801_v18 }
 0x43f   : > { %10079 = vmatpush3.bf16.xpose.msra.mxu1 %v8826_v14 }
 0x444   : > { %v10030_v8 = vpop.f32.mrb[84].mxu1 }
 0x445   : > { %v10031_v45 = vpop.f32.mrb[85].mxu1 }
 0x446   : > { %v10032_v2 = vadd.f32 %v10031_v45, %v10030_v8  ;;  %v10033_v52 = vpop.f32.mrb[86].mxu1 }
 0x447   : > { %v10034_v54 = vpop.f32.mrb[87].mxu1 }
 0x448   : > { %v8567_v42 = vadd.f32 %v10032_v2, %v13452_v5  ;;  %v10035_v37 = vadd.f32 %v10034_v54, %v10033_v52 }
 0x44a   : > { %v8728_v50 = vadd.f32 %v13505_v13, %v8567_v42  ;;  %v8570_v1 = vadd.f32 %v10035_v37, %v13452_v5  ;;  %v10383_v42 = vmov 1983009808  }
 0x44b   : > { %v8931_v37 = vunpack.c.l.s4 %v10383_v42 }
 0x44c   : > { %v8731_v40 = vadd.f32 %v13511_v59, %v8570_v1  ;;  %v8782_v49 = vmax.f32 %v8728_v50, 0.0  ;;  %v8933_v50 = vlaneseq }
 0x44e   : > { %v8783_v55 = vmax.f32 %v8731_v40, 0.0 }
 0x450   : > { %v8802_v21 = vpack.c.bf16 %v8783_v55, %v8782_v49 }
 0x452   : > { %10170 = vmatprep.subr.msk.bf16.mxu1 %vm514_vm6, %v8802_v21  ;;  %v8932_v21 = vunpack.c.0.s8 %v8931_v37 }
 0x453   : > { %10081 = vmatpush3.bf16.xpose.msra.mxu1 %v8829_v12  ;;  %v8934_v12 = vshrl.u32 %v8933_v50, 7 }
 0x455   : > { %v10036_v19 = vpop.f32.mrb[88].mxu1 }
 0x456   : > { %v10037_v15 = vpop.f32.mrb[89].mxu1 }
 0x457   : > { %v10038_v56 = vadd.f32 %v10037_v15, %v10036_v19  ;;  %v10039_v58 = vpop.f32.mrb[90].mxu1  ;;  %v10343_v19 = vld [vmem:[%s13614_s10] ss:$0 sps:$4 sm:$0xff]   ;;  %v8935_v15 = vsub.s32 %v8932_v21, %v8934_v12 }
 0x458   : > { %v10040_v57 = vpop.f32.mrb[91].mxu1 }
 0x459   : > { %v8575_v13 = vadd.f32 %v10038_v56, %v13452_v5  ;;  %v10041_v17 = vadd.f32 %v10040_v57, %v10039_v58  ;;  %v8936_v56 = vrot.slane %v10343_v19, %v8935_v15 }
 0x45b   : > { %v8736_v25 = vadd.f32 %v13503_v10, %v8575_v13  ;;  %v8578_v59 = vadd.f32 %v10041_v17, %v13452_v5 }
 0x45d   : > { %v8739_v51 = vadd.f32 %v13509_v39, %v8578_v59  ;;  %v8784_v30 = vmax.f32 %v8736_v25, 0.0 }
 0x45f   : > { %v8785_v60 = vmax.f32 %v8739_v51, 0.0  ;;  %v10042_v22 = vpop.f32.mrb[92].mxu1  ;;  %v8937_v51 = vcombine.high %v8936_v56, %v8936_v56 }
 0x460   : > { %v10043_v7 = vpop.f32.mrb[93].mxu1 }
 0x461   : > { %v8803_v46 = vpack.c.bf16 %v8785_v60, %v8784_v30  ;;  %v10044_v24 = vadd.f32 %v10043_v7, %v10042_v22  ;;  %v10045_v35 = vpop.f32.mrb[94].mxu1 }
 0x462   : > { %v10046_v48 = vpop.f32.mrb[95].mxu1 }
 0x463   : > { %10171 = vmatprep.subr.msk.bf16.mxu1 %vm514_vm6, %v8803_v46  ;;  %v10047_v28 = vadd.f32 %v10046_v48, %v10045_v35  ;;  %v8583_v10 = vadd.f32 %v10044_v24, %v13452_v5 }
 0x464   : > { %10083 = vmatpush3.bf16.xpose.msra.mxu1 %v8832_v9 }
 0x465   : > { %v8744_v3 = vadd.f32 %v13557_v4, %v8583_v10  ;;  %v8586_v39 = vadd.f32 %v10047_v28, %v13452_v5  ;;  %v8835_v4 = vsel %vm514_vm6, %v13536_v43, 0 }
 0x467   : > { %v8747_v31 = vadd.f32 %v13562_v11, %v8586_v39  ;;  %v8786_v63 = vmax.f32 %v8744_v3, 0.0 }
 0x469   : > { %v10048_v27 = vpop.f32.mrb[96].mxu1  ;;  %v8787_v0 = vmax.f32 %v8747_v31, 0.0 }
 0x46a   : > { %v10049_v16 = vpop.f32.mrb[97].mxu1 }
 0x46b   : > { %v10050_v61 = vadd.f32 %v10049_v16, %v10048_v27  ;;  %v10051_v36 = vpop.f32.mrb[98].mxu1  ;;  %v8804_v23 = vpack.c.bf16 %v8787_v0, %v8786_v63 }
 0x46c   : > { %v10052_v32 = vpop.f32.mrb[99].mxu1 }
 0x46d   : > { %v8591_v38 = vadd.f32 %v10050_v61, %v13452_v5  ;;  %v10053_v6 = vadd.f32 %v10052_v32, %v10051_v36  ;;  %10172 = vmatprep.subr.msk.bf16.mxu1 %vm514_vm6, %v8804_v23 }
 0x46e   : > { %10085 = vmatpush3.bf16.xpose.msra.mxu1 %v8835_v4 }
 0x46f   : > { %v8752_v11 = vadd.f32 %v13555_v41, %v8591_v38  ;;  %v8594_v20 = vadd.f32 %v10053_v6, %v13452_v5  ;;  %v8811_v5 = vpop.permute.xlu0 %8810 }
 0x471   : > { %v8755_v62 = vadd.f32 %v13559_v33, %v8594_v20  ;;  %v8788_v29 = vmax.f32 %v8752_v11, 0.0 }
 0x473   : > { %v8789_v53 = vmax.f32 %v8755_v62, 0.0 }
 0x475   : > { %v8805_v26 = vpack.c.bf16 %v8789_v53, %v8788_v29 }
 0x477   : > { %10173 = vmatprep.subr.msk.bf16.mxu1 %vm514_vm6, %v8805_v26 }
 0x478   : > { %10087 = vmatpush3.bf16.xpose.msra.mxu1 %v8838_v47 }
 0x47f   : > { %10089 = vmatmul.mubr.msk.bf16.vlgmr.msra.gmra.mrb[100].mxu1 %vm514_vm6, %v13526_v44 }
 0x552   : > { %v8898_v43 = vpop.f32.mrb[100].mxu1 }
 0x553   : > { %v8899_v34 = vadd.f32 %v8898_v43, %v8811_v5  ;;  %v8900_v41 = vpop.f32.mrb[101].mxu1 }
 0x554   : > { %v8901_v33 = vadd.f32 %v8900_v41, %v8811_v5  ;;  %v8902_v44 = vpop.f32.mrb[102].mxu1 }
 0x555   : > { %v8907_v18 = vand.u32 2147483647, %v8899_v34  ;;  %8923 = vst [vmem:[%s13620_s14] sm:$0x3] %v8899_v34  ;;  %v8903_v14 = vpop.f32.mrb[103].mxu1  ;;  %v8905_v13 = vmax.f32 %v8899_v34, 0.0 }
 0x556   : > { %v8908_v8 = vand.u32 2147483647, %v8901_v33  ;;  %8924 = vst [vmem:[%s13620_s14 + $0x8] sm:$0x3] %v8901_v33  ;;  %v8906_v25 = vmax.f32 %v8901_v33, 0.0 }
 0x557   : > { %v8909_v45 = vsub.f32 0.0, %v8907_v18 }
 0x558   : > { %v8910_v2 = vsub.f32 0.0, %v8908_v8 }
 0x559   : > { %v8911_v52 = vmul.f32 1.442695, %v8909_v45 }
 0x55a   : > { %v8913_v54 = vmul.f32 1.442695, %v8910_v2 }
 0x55b   : > { %10344 = vpow2.f32 %v8911_v52 }
 0x55c   : > { %10346 = vpow2.f32 %v8913_v54 }
 0x565   : > { %v10345_v1 = vpop.eup %10344 }
 0x566   : > { %v10347_v40 = vpop.eup %10346  ;;  %v8915_v49 = vadd.f32 1.0, %v10345_v1 }
 0x567   : > { %v8916_v55 = vadd.f32 1.0, %v10347_v40 }
 0x568   : > { %10348 = vlog2.f32 %v8915_v49 }
 0x569   : > { %10350 = vlog2.f32 %v8916_v55 }
 0x572   : > { %v10349_v58 = vpop.eup %10348 }
 0x573   : > { %v10351_v57 = vpop.eup %10350  ;;  %v8918_v17 = vmul.f32 0.6931472, %v10349_v58 }
 0x574   : > { %v8920_v59 = vmul.f32 0.6931472, %v10351_v57 }
 0x575   : > { %v8921_v30 = vadd.f32 %v8918_v17, %v8905_v13 }
 0x576   : > { %v8922_v60 = vadd.f32 %v8920_v59, %v8906_v25 }
 0x577   : > { %8925 = vst [vmem:[%s13620_s14] sm:$0xc] %v8921_v30  ;;  %v8940_v22 = vmul.f32 %v8936_v56, %v8921_v30 }
 0x578   : > { %8926 = vst [vmem:[%s13620_s14 + $0x8] sm:$0xc] %v8922_v60  ;;  %v8941_v46 = vmul.f32 %v8937_v51, %v8922_v60 }
 0x579   : > { %v8944_v7 = vrot.slane %v8940_v22, 2 }
 0x57a   : > { %v8945_v24 = vrot.slane %v8941_v46, 2 }
 0x57b   : > { %v8948_v35 = vadd.f32 %v8944_v7, %v8899_v34 }
 0x57c   : > { %v8949_v48 = vadd.f32 %v8945_v24, %v8901_v33 }
 0x57d   : > { %v8952_v9 = vrot.slane %v8948_v35, 4 }
 0x57e   : > { %v8953_v28 = vrot.slane %v8949_v48, 4 }
 0x57f   : > { %8956 = vst [vmem:[%s13620_s14] sm:$0x30] %v8952_v9 }
 0x580   : > { %8957 = vst [vmem:[%s13620_s14 + $0x8] sm:$0x30] %v8953_v28 }
 0x581 PF: > { %s18_s29 = sadd.s32 1, %s10377_s29   ;;  %s13684_s27 = smov %s10373_s28 }
 0x582   : > { %p15_p5 = scmp.ge.s32.totalorder %s18_s29, 4   ;;  %s13685_s28 = smov %s13687_s30 }
 0x584   :  { %17 = sbr.rel (!%p15_p5) target bundleno = 2 (0x2), region = 95 }

</bundles_post_ra>
